<compile_context>
chip_gen: v7x
topology: tpu7x:2x2x1
jax: 0.10.0
libtpu: 0.0.40
codegen_flags: <defaults>
</compile_context>

<pallas_src>
import functools

import jax
import jax.numpy as jnp
from jax.experimental import pallas as pl
from jax.experimental.pallas import tpu as pltpu

CPAD = 256    # conv channel width kept zero-padded (160 -> 256) through the stack
K1PAD = 32    # conv1 im2col K padded (27 -> 32)
HPAD = 384    # hidden width padded (320 -> 384)


def _round_up(x, m):
    return pl.cdiv(x, m) * m


# ----------------------------------------------------------------------------
# Pallas kernel 1: single-shot matmul + bias + ReLU (full K and N in one block)
# ----------------------------------------------------------------------------
def _conv_mm_kernel(x_ref, w_ref, b_ref, o_ref):
    acc = jnp.dot(x_ref[...], w_ref[...], preferred_element_type=jnp.float32)
    o_ref[...] = jnp.maximum(acc + b_ref[...], 0.0).astype(o_ref.dtype)


def conv_matmul_bias_relu(x, w, b):
    """relu(x @ w + b). x:(M,K) bf16, w:(K,N) bf16, b:(1,N) f32, N % 128 == 0."""
    M, K = x.shape
    Kw, N = w.shape
    assert K == Kw and N % 128 == 0 and b.shape == (1, N)
    tm = min(256, _round_up(M, 16))
    Mp = _round_up(M, tm)
    if Mp != M:
        x = jnp.pad(x, ((0, Mp - M), (0, 0)))
    out = pl.pallas_call(
        _conv_mm_kernel,
        out_shape=jax.ShapeDtypeStruct((Mp, N), jnp.bfloat16),
        grid_spec=pltpu.PrefetchScalarGridSpec(
            num_scalar_prefetch=0,
            grid=(Mp // tm,),
            in_specs=[
                pl.BlockSpec((tm, K), lambda i: (i, 0)),   # activations tile
                pl.BlockSpec((K, N), lambda i: (0, 0)),    # whole weight, resident
                pl.BlockSpec((1, N), lambda i: (0, 0)),    # bias row
            ],
            out_specs=pl.BlockSpec((tm, N), lambda i: (i, 0)),
        ),
        compiler_params=pltpu.CompilerParams(
            dimension_semantics=("parallel",)
        ),
    )(x, w, b)
    return out if Mp == M else out[:M]


# ----------------------------------------------------------------------------
# Pallas kernel 2: fused MLP  (linear1 + ReLU -> linear2 + ReLU -> all heads)
# ----------------------------------------------------------------------------
def _fused_mlp_kernel(x_ref, w1_ref, b1_ref, w2_ref, b2_ref, wc_ref, bc_ref, o_ref):
    h = jnp.dot(x_ref[...], w1_ref[...], preferred_element_type=jnp.float32)
    h = jnp.maximum(h + b1_ref[...], 0.0).astype(w2_ref.dtype)
    h = jnp.dot(h, w2_ref[...], preferred_element_type=jnp.float32)
    h = jnp.maximum(h + b2_ref[...], 0.0).astype(wc_ref.dtype)
    o = jnp.dot(h, wc_ref[...], preferred_element_type=jnp.float32)
    o_ref[...] = o + bc_ref[...]


def fused_mlp(feat, w1, b1, w2, b2, wc, bc):
    Bp, F = feat.shape
    H = w1.shape[1]
    NC = wc.shape[1]
    assert F == w1.shape[0] and w2.shape == (H, H) and wc.shape[0] == H
    return pl.pallas_call(
        _fused_mlp_kernel,
        out_shape=jax.ShapeDtypeStruct((Bp, NC), jnp.float32),
        grid_spec=pltpu.PrefetchScalarGridSpec(
            num_scalar_prefetch=0,
            grid=(1,),
            in_specs=[
                pl.BlockSpec((Bp, F), lambda i: (0, 0)),
                pl.BlockSpec((F, H), lambda i: (0, 0)),
                pl.BlockSpec((1, H), lambda i: (0, 0)),
                pl.BlockSpec((H, H), lambda i: (0, 0)),
                pl.BlockSpec((1, H), lambda i: (0, 0)),
                pl.BlockSpec((H, NC), lambda i: (0, 0)),
                pl.BlockSpec((1, NC), lambda i: (0, 0)),
            ],
            out_specs=pl.BlockSpec((Bp, NC), lambda i: (0, 0)),
        ),
        compiler_params=pltpu.CompilerParams(
            dimension_semantics=("arbitrary",)
        ),
    )(feat, w1, b1, w2, b2, wc, bc)


# ----------------------------------------------------------------------------
# im2col for Conv2d(k=3, stride=2, pad=1), NHWC, channel-padded activations.
# ----------------------------------------------------------------------------
def _im2col_3x3_s2_p1(x_nhwc):
    # TODO(synk): patch extraction stays as plain-XLA glue (one small fusion per
    # layer); the stride-2 gather cannot be expressed by a BlockSpec index_map.
    B, H, W, C = x_nhwc.shape
    Ho = (H + 2 - 3) // 2 + 1
    Wo = (W + 2 - 3) // 2 + 1
    xp = jnp.pad(x_nhwc, ((0, 0), (1, 1), (1, 1), (0, 0)))
    cols = [xp[:, kh:kh + 2 * Ho:2, kw:kw + 2 * Wo:2, :]
            for kh in range(3) for kw in range(3)]
    patches = jnp.concatenate(cols, axis=-1)          # (B,Ho,Wo,9C), (kh,kw,c)
    return patches.reshape(B * Ho * Wo, 9 * C), (B, Ho, Wo)


# ----------------------------------------------------------------------------
# Parameters: PyTorch-layout init + one-time packing into matmul-ready layout.
# ----------------------------------------------------------------------------
def init_raw_params(key, num_classes=10, num_tasks=2):
    def dense(k, shape, fan_in):
        return jax.random.normal(k, shape, jnp.float32) * (2.0 / fan_in) ** 0.5

    keys = jax.random.split(key, 10 + 2 * num_tasks)
    it = iter(keys)
    raw = {"convs": [], "heads": []}
    for cin, cout in [(3, 160), (160, 160), (160, 160)]:
        w = dense(next(it), (cout, cin, 3, 3), cin * 9)
        b = jax.random.normal(next(it), (cout,), jnp.float32) * 0.01
        raw["convs"].append((w, b))
    raw["linear1"] = (dense(next(it), (320, 2560), 2560),
                      jax.random.normal(next(it), (320,), jnp.float32) * 0.01)
    raw["linear2"] = (dense(next(it), (320, 320), 320),
                      jax.random.normal(next(it), (320,), jnp.float32) * 0.01)
    for _ in range(num_tasks):
        w = dense(next(it), (num_classes, 320), 320)
        b = jax.random.normal(next(it), (num_classes,), jnp.float32) * 0.01
        raw["heads"].append((w, b))
    return raw


def pack_params(raw, num_classes, num_tasks):
    """One-time (outside jit) transpose / permute / zero-pad / bf16-cast."""
    packed = {}

    convs = []
    for li, (w, b) in enumerate(raw["convs"]):
        cout, cin, _, _ = w.shape
        w_t = jnp.transpose(w, (2, 3, 1, 0))               # (3,3,cin,cout) = (kh,kw,ci,co)
        if li == 0:
            w2d = w_t.reshape(9 * cin, cout)               # (27,160)
            w2d = jnp.pad(w2d, ((0, K1PAD - 9 * cin), (0, CPAD - cout)))
        else:
            w_t = jnp.pad(w_t, ((0, 0), (0, 0), (0, CPAD - cin), (0, CPAD - cout)))
            w2d = w_t.reshape(9 * CPAD, CPAD)              # (2304,256)
        bb = jnp.pad(b, (0, CPAD - cout)).reshape(1, CPAD).astype(jnp.float32)
        convs.append((w2d.astype(jnp.bfloat16), bb))
    packed["convs"] = convs

    # linear1: rows permuted from PyTorch's NCHW-flatten order (c,h,w) to the
    # NHWC-with-padded-channels order (h,w,c_pad) used by the conv stack.
    w1, b1 = raw["linear1"]
    w1_chw = w1.T.reshape(160, 4, 4, 320)                  # (c,h,w,out)
    w1_hwc = jnp.transpose(w1_chw, (1, 2, 0, 3))           # (h,w,c,out)
    w1_hwc = jnp.pad(w1_hwc, ((0, 0), (0, 0), (0, CPAD - 160), (0, HPAD - 320)))
    packed["linear1"] = (
        w1_hwc.reshape(4 * 4 * CPAD, HPAD).astype(jnp.bfloat16),
        jnp.pad(b1, (0, HPAD - 320)).reshape(1, HPAD).astype(jnp.float32),
    )

    w2, b2 = raw["linear2"]
    packed["linear2"] = (
        jnp.pad(w2.T, ((0, HPAD - 320), (0, HPAD - 320))).astype(jnp.bfloat16),
        jnp.pad(b2, (0, HPAD - 320)).reshape(1, HPAD).astype(jnp.float32),
    )

    # Multi-head classifier: all task heads packed side by side.
    wc = jnp.concatenate([w.T for (w, _) in raw["heads"]], axis=1)  # (320, nt*nc)
    bc = jnp.concatenate([b for (_, b) in raw["heads"]], axis=0)
    ncols = num_tasks * num_classes
    headpad = max(128, _round_up(ncols, 128))
    packed["heads"] = (
        jnp.pad(wc, ((0, HPAD - 320), (0, headpad - ncols))).astype(jnp.bfloat16),
        jnp.pad(bc, (0, headpad - ncols)).reshape(1, headpad).astype(jnp.float32),
    )
    return packed


# ----------------------------------------------------------------------------
# Forward pass (MTConvCIFAR.forward(x, task_labels))
# ----------------------------------------------------------------------------
def mt_conv_cifar_forward(x_nchw, task_labels, packed, *, num_tasks, num_classes):
    # NCHW -> NHWC bf16 for the MXU path; channels stay zero-padded to CPAD
    # between layers (zero weight cols + zero bias + ReLU keep them exactly 0).
    x = jnp.transpose(x_nchw, (0, 2, 3, 1)).astype(jnp.bfloat16)

    for (w, b) in packed["convs"]:
        cols, (B, Ho, Wo) = _im2col_3x3_s2_p1(x)
        if cols.shape[1] != w.shape[0]:          # conv1 only: pad K 27 -> 32
            cols = jnp.pad(cols, ((0, 0), (0, w.shape[0] - cols.shape[1])))
        x = conv_matmul_bias_relu(cols, w, b).reshape(B, Ho, Wo, CPAD)

    # Flatten in NHWC order (== PyTorch x.view(-1, 2560) because linear1's rows
    # were permuted / zero-padded to this ordering at pack time).
    w1, b1 = packed["linear1"]
    w2, b2 = packed["linear2"]
    wc, bc = packed["heads"]
    feat = x.reshape(B, Ho * Wo * CPAD)
    assert feat.shape[1] == w1.shape[0], (feat.shape, w1.shape)

    Bp = _round_up(max(B, 8), 8)
    if Bp != B:
        feat = jnp.pad(feat, ((0, Bp - B), (0, 0)))

    logits_all = fused_mlp(feat, w1, b1, w2, b2, wc, bc)   # (Bp, headpad) f32
    logits_all = logits_all[:B, : num_tasks * num_classes]
    logits_all = logits_all.reshape(B, num_tasks, num_classes)

    # Multi-head routing: each sample uses its task's linear head.
    # TODO(synk): Avalanche's MultiHeadClassifier dynamic head growth /
    # active-unit masking is not modeled (fixed per-task Linear(320, ncls)).
    idx = task_labels[:, None, None].astype(jnp.int32)
    return jnp.take_along_axis(logits_all, idx, axis=1)[:, 0]


# Plain-JAX reference on the same packed params (same math, no Pallas).
def reference_forward(x_nchw, task_labels, packed, num_tasks, num_classes):
    x = jnp.transpose(x_nchw, (0, 2, 3, 1)).astype(jnp.bfloat16)
    for (w, b) in packed["convs"]:
        cols, (B, Ho, Wo) = _im2col_3x3_s2_p1(x)
        if cols.shape[1] != w.shape[0]:
            cols = jnp.pad(cols, ((0, 0), (0, w.shape[0] - cols.shape[1])))
        y = jnp.maximum(jnp.dot(cols, w, preferred_element_type=jnp.float32) + b, 0.0)
        x = y.astype(jnp.bfloat16).reshape(B, Ho, Wo, CPAD)
    feat = x.reshape(B, -1)
    w1, b1 = packed["linear1"]
    w2, b2 = packed["linear2"]
    wc, bc = packed["heads"]
    h = jnp.maximum(jnp.dot(feat, w1, preferred_element_type=jnp.float32) + b1, 0.0)
    h = jnp.maximum(jnp.dot(h.astype(jnp.bfloat16), w2,
                            preferred_element_type=jnp.float32) + b2, 0.0)
    o = jnp.dot(h.astype(jnp.bfloat16), wc, preferred_element_type=jnp.float32) + bc
    o = o[:, : num_tasks * num_classes].reshape(B, num_tasks, num_classes)
    idx = task_labels[:, None, None].astype(jnp.int32)
    return jnp.take_along_axis(o, idx, axis=1)[:, 0]


if __name__ == "__main__":
    key = jax.random.PRNGKey(0)
    k_params, k_x = jax.random.split(key)

    num_classes = 10
    num_tasks = 2
    raw = init_raw_params(k_params, num_classes=num_classes, num_tasks=num_tasks)
    packed = pack_params(raw, num_classes=num_classes, num_tasks=num_tasks)

    # CIFAR-sized input: three stride-2 convs take 32x32 -> 4x4 => 16*160 = 2560.
    x = jax.random.normal(k_x, (2, 3, 32, 32), jnp.float32)
    task_labels = jnp.array([0, 1], dtype=jnp.int32)

    fwd = jax.jit(functools.partial(
        mt_conv_cifar_forward, num_tasks=num_tasks, num_classes=num_classes))
    out = jax.block_until_ready(fwd(x, task_labels, packed))

    assert out.shape == (2, num_classes), out.shape
    assert out.dtype == jnp.float32
    assert bool(jnp.all(jnp.isfinite(out)))

    ref = reference_forward(x, task_labels, packed, num_tasks, num_classes)
    assert bool(jnp.allclose(out, ref, atol=5e-2, rtol=5e-2)), (out, ref)

    print("KERNEL_OK")
</pallas_src>

<mosaic_0001>
module attributes {stable_mosaic.version = 11 : i64} {
  func.func @_conv_mm_kernel(%arg0: i32, %arg1: memref<256x32xbf16, #tpu.memory_space<vmem>>, %arg2: memref<32x256xbf16, #tpu.memory_space<vmem>>, %arg3: memref<1x256xf32, #tpu.memory_space<vmem>>, %arg4: memref<256x256xbf16, #tpu.memory_space<vmem>>) attributes {dimension_semantics = [#tpu.dimension_semantics<parallel>], iteration_bounds = array<i64: 2>, scalar_prefetch = 0 : i64, scratch_operands = 0 : i64, tpu.core_type = #tpu.core_type<tc>, window_params = [{transform_indices = @transform_0, window_bounds = array<i64: 256, 32>}, {pipeline_mode = #tpu.pipeline_mode<synchronous>, transform_indices = @transform_1, window_bounds = array<i64: 32, 256>}, {pipeline_mode = #tpu.pipeline_mode<synchronous>, transform_indices = @transform_2, window_bounds = array<i64: 1, 256>}, {transform_indices = @transform_3, window_bounds = array<i64: 256, 256>}]} {
    %c0 = arith.constant 0 : index
    %c0_0 = arith.constant 0 : index
    %0 = vector.load %arg1[%c0, %c0_0] : memref<256x32xbf16, #tpu.memory_space<vmem>>, vector<256x32xbf16>
    %c0_1 = arith.constant 0 : index
    %c0_2 = arith.constant 0 : index
    %1 = vector.load %arg2[%c0_1, %c0_2] : memref<32x256xbf16, #tpu.memory_space<vmem>>, vector<32x256xbf16>
    %cst = arith.constant dense<0.000000e+00> : vector<256x256xf32>
    %2 = tpu.matmul %0, %1, %cst {dimension_numbers = #tpu.dot_dimension_numbers<[1], [0], [0], [1], [0, 0, 1, 1], [], []>} : vector<256x32xbf16>, vector<32x256xbf16>, vector<256x256xf32> -> vector<256x256xf32>
    %c0_3 = arith.constant 0 : index
    %c0_4 = arith.constant 0 : index
    %3 = vector.load %arg3[%c0_3, %c0_4] : memref<1x256xf32, #tpu.memory_space<vmem>>, vector<1x256xf32>
    %4 = vector.broadcast %3 : vector<1x256xf32> to vector<256x256xf32>
    %5 = arith.addf %2, %4 : vector<256x256xf32>
    %cst_5 = arith.constant 0.000000e+00 : f32
    %6 = vector.broadcast %cst_5 : f32 to vector<256x256xf32>
    %7 = arith.maximumf %5, %6 : vector<256x256xf32>
    %8 = arith.truncf %7 : vector<256x256xf32> to vector<256x256xbf16>
    %c0_6 = arith.constant 0 : index
    %c0_7 = arith.constant 0 : index
    %9 = vector.load %arg4[%c0_6, %c0_7] : memref<256x256xbf16, #tpu.memory_space<vmem>>, vector<256x256xbf16>
    tpu.vector_store %arg4[%c0_6, %c0_7], %8 {strides = array<i32>} : memref<256x256xbf16, #tpu.memory_space<vmem>>, vector<256x256xbf16>,
    return
  }
  func.func @transform_0(%arg0: i32) -> (i32, i32) {
    %c0_i32 = arith.constant 0 : i32
    %c0_i32_0 = arith.constant 0 : i32
    return %arg0, %c0_i32 : i32, i32
  }
  func.func @transform_1(%arg0: i32) -> (i32, i32) {
    %c0_i32 = arith.constant 0 : i32
    %c0_i32_0 = arith.constant 0 : i32
    %c0_i32_1 = arith.constant 0 : i32
    return %c0_i32, %c0_i32_0 : i32, i32
  }
  func.func @transform_2(%arg0: i32) -> (i32, i32) {
    %c0_i32 = arith.constant 0 : i32
    %c0_i32_0 = arith.constant 0 : i32
    %c0_i32_1 = arith.constant 0 : i32
    return %c0_i32, %c0_i32_0 : i32, i32
  }
  func.func @transform_3(%arg0: i32) -> (i32, i32) {
    %c0_i32 = arith.constant 0 : i32
    %c0_i32_0 = arith.constant 0 : i32
    return %arg0, %c0_i32 : i32, i32
  }
}

module attributes {stable_mosaic.version = 11 : i64} {
  func.func @_conv_mm_kernel(%arg0: i32, %arg1: memref<128x2304xbf16, #tpu.memory_space<vmem>>, %arg2: memref<2304x256xbf16, #tpu.memory_space<vmem>>, %arg3: memref<1x256xf32, #tpu.memory_space<vmem>>, %arg4: memref<128x256xbf16, #tpu.memory_space<vmem>>) attributes {dimension_semantics = [#tpu.dimension_semantics<parallel>], iteration_bounds = array<i64: 1>, scalar_prefetch = 0 : i64, scratch_operands = 0 : i64, tpu.core_type = #tpu.core_type<tc>, window_params = [{transform_indices = @transform_0, window_bounds = array<i64: 128, 2304>}, {pipeline_mode = #tpu.pipeline_mode<synchronous>, transform_indices = @transform_1, window_bounds = array<i64: 2304, 256>}, {pipeline_mode = #tpu.pipeline_mode<synchronous>, transform_indices = @transform_2, window_bounds = array<i64: 1, 256>}, {transform_indices = @transform_3, window_bounds = array<i64: 128, 256>}]} {
    %c0 = arith.constant 0 : index
    %c0_0 = arith.constant 0 : index
    %0 = vector.load %arg1[%c0, %c0_0] : memref<128x2304xbf16, #tpu.memory_space<vmem>>, vector<128x2304xbf16>
    %c0_1 = arith.constant 0 : index
    %c0_2 = arith.constant 0 : index
    %1 = vector.load %arg2[%c0_1, %c0_2] : memref<2304x256xbf16, #tpu.memory_space<vmem>>, vector<2304x256xbf16>
    %cst = arith.constant dense<0.000000e+00> : vector<128x256xf32>
    %2 = tpu.matmul %0, %1, %cst {dimension_numbers = #tpu.dot_dimension_numbers<[1], [0], [0], [1], [0, 0, 1, 1], [], []>} : vector<128x2304xbf16>, vector<2304x256xbf16>, vector<128x256xf32> -> vector<128x256xf32>
    %c0_3 = arith.constant 0 : index
    %c0_4 = arith.constant 0 : index
    %3 = vector.load %arg3[%c0_3, %c0_4] : memref<1x256xf32, #tpu.memory_space<vmem>>, vector<1x256xf32>
    %4 = vector.broadcast %3 : vector<1x256xf32> to vector<128x256xf32>
    %5 = arith.addf %2, %4 : vector<128x256xf32>
    %cst_5 = arith.constant 0.000000e+00 : f32
    %6 = vector.broadcast %cst_5 : f32 to vector<128x256xf32>
    %7 = arith.maximumf %5, %6 : vector<128x256xf32>
    %8 = arith.truncf %7 : vector<128x256xf32> to vector<128x256xbf16>
    %c0_6 = arith.constant 0 : index
    %c0_7 = arith.constant 0 : index
    %9 = vector.load %arg4[%c0_6, %c0_7] : memref<128x256xbf16, #tpu.memory_space<vmem>>, vector<128x256xbf16>
    tpu.vector_store %arg4[%c0_6, %c0_7], %8 {strides = array<i32>} : memref<128x256xbf16, #tpu.memory_space<vmem>>, vector<128x256xbf16>,
    return
  }
  func.func @transform_0(%arg0: i32) -> (i32, i32) {
    %c0_i32 = arith.constant 0 : i32
    %c0_i32_0 = arith.constant 0 : i32
    return %arg0, %c0_i32 : i32, i32
  }
  func.func @transform_1(%arg0: i32) -> (i32, i32) {
    %c0_i32 = arith.constant 0 : i32
    %c0_i32_0 = arith.constant 0 : i32
    %c0_i32_1 = arith.constant 0 : i32
    return %c0_i32, %c0_i32_0 : i32, i32
  }
  func.func @transform_2(%arg0: i32) -> (i32, i32) {
    %c0_i32 = arith.constant 0 : i32
    %c0_i32_0 = arith.constant 0 : i32
    %c0_i32_1 = arith.constant 0 : i32
    return %c0_i32, %c0_i32_0 : i32, i32
  }
  func.func @transform_3(%arg0: i32) -> (i32, i32) {
    %c0_i32 = arith.constant 0 : i32
    %c0_i32_0 = arith.constant 0 : i32
    return %arg0, %c0_i32 : i32, i32
  }
}

module attributes {stable_mosaic.version = 11 : i64} {
  func.func @_conv_mm_kernel(%arg0: i32, %arg1: memref<32x2304xbf16, #tpu.memory_space<vmem>>, %arg2: memref<2304x256xbf16, #tpu.memory_space<vmem>>, %arg3: memref<1x256xf32, #tpu.memory_space<vmem>>, %arg4: memref<32x256xbf16, #tpu.memory_space<vmem>>) attributes {dimension_semantics = [#tpu.dimension_semantics<parallel>], iteration_bounds = array<i64: 1>, scalar_prefetch = 0 : i64, scratch_operands = 0 : i64, tpu.core_type = #tpu.core_type<tc>, window_params = [{transform_indices = @transform_0, window_bounds = array<i64: 32, 2304>}, {pipeline_mode = #tpu.pipeline_mode<synchronous>, transform_indices = @transform_1, window_bounds = array<i64: 2304, 256>}, {pipeline_mode = #tpu.pipeline_mode<synchronous>, transform_indices = @transform_2, window_bounds = array<i64: 1, 256>}, {transform_indices = @transform_3, window_bounds = array<i64: 32, 256>}]} {
    %c0 = arith.constant 0 : index
    %c0_0 = arith.constant 0 : index
    %0 = vector.load %arg1[%c0, %c0_0] : memref<32x2304xbf16, #tpu.memory_space<vmem>>, vector<32x2304xbf16>
    %c0_1 = arith.constant 0 : index
    %c0_2 = arith.constant 0 : index
    %1 = vector.load %arg2[%c0_1, %c0_2] : memref<2304x256xbf16, #tpu.memory_space<vmem>>, vector<2304x256xbf16>
    %cst = arith.constant dense<0.000000e+00> : vector<32x256xf32>
    %2 = tpu.matmul %0, %1, %cst {dimension_numbers = #tpu.dot_dimension_numbers<[1], [0], [0], [1], [0, 0, 1, 1], [], []>} : vector<32x2304xbf16>, vector<2304x256xbf16>, vector<32x256xf32> -> vector<32x256xf32>
    %c0_3 = arith.constant 0 : index
    %c0_4 = arith.constant 0 : index
    %3 = vector.load %arg3[%c0_3, %c0_4] : memref<1x256xf32, #tpu.memory_space<vmem>>, vector<1x256xf32>
    %4 = vector.broadcast %3 : vector<1x256xf32> to vector<32x256xf32>
    %5 = arith.addf %2, %4 : vector<32x256xf32>
    %cst_5 = arith.constant 0.000000e+00 : f32
    %6 = vector.broadcast %cst_5 : f32 to vector<32x256xf32>
    %7 = arith.maximumf %5, %6 : vector<32x256xf32>
    %8 = arith.truncf %7 : vector<32x256xf32> to vector<32x256xbf16>
    %c0_6 = arith.constant 0 : index
    %c0_7 = arith.constant 0 : index
    %9 = vector.load %arg4[%c0_6, %c0_7] : memref<32x256xbf16, #tpu.memory_space<vmem>>, vector<32x256xbf16>
    tpu.vector_store %arg4[%c0_6, %c0_7], %8 {strides = array<i32>} : memref<32x256xbf16, #tpu.memory_space<vmem>>, vector<32x256xbf16>,
    return
  }
  func.func @transform_0(%arg0: i32) -> (i32, i32) {
    %c0_i32 = arith.constant 0 : i32
    %c0_i32_0 = arith.constant 0 : i32
    return %arg0, %c0_i32 : i32, i32
  }
  func.func @transform_1(%arg0: i32) -> (i32, i32) {
    %c0_i32 = arith.constant 0 : i32
    %c0_i32_0 = arith.constant 0 : i32
    %c0_i32_1 = arith.constant 0 : i32
    return %c0_i32, %c0_i32_0 : i32, i32
  }
  func.func @transform_2(%arg0: i32) -> (i32, i32) {
    %c0_i32 = arith.constant 0 : i32
    %c0_i32_0 = arith.constant 0 : i32
    %c0_i32_1 = arith.constant 0 : i32
    return %c0_i32, %c0_i32_0 : i32, i32
  }
  func.func @transform_3(%arg0: i32) -> (i32, i32) {
    %c0_i32 = arith.constant 0 : i32
    %c0_i32_0 = arith.constant 0 : i32
    return %arg0, %c0_i32 : i32, i32
  }
}

module attributes {stable_mosaic.version = 11 : i64} {
  func.func @_fused_mlp_kernel(%arg0: i32, %arg1: memref<8x4096xbf16, #tpu.memory_space<vmem>>, %arg2: memref<4096x384xbf16, #tpu.memory_space<vmem>>, %arg3: memref<1x384xf32, #tpu.memory_space<vmem>>, %arg4: memref<384x384xbf16, #tpu.memory_space<vmem>>, %arg5: memref<1x384xf32, #tpu.memory_space<vmem>>, %arg6: memref<384x128xbf16, #tpu.memory_space<vmem>>, %arg7: memref<1x128xf32, #tpu.memory_space<vmem>>, %arg8: memref<8x128xf32, #tpu.memory_space<vmem>>) attributes {dimension_semantics = [#tpu.dimension_semantics<arbitrary>], iteration_bounds = array<i64: 1>, scalar_prefetch = 0 : i64, scratch_operands = 0 : i64, tpu.core_type = #tpu.core_type<tc>, window_params = [{pipeline_mode = #tpu.pipeline_mode<synchronous>, transform_indices = @transform_0, window_bounds = array<i64: 8, 4096>}, {pipeline_mode = #tpu.pipeline_mode<synchronous>, transform_indices = @transform_1, window_bounds = array<i64: 4096, 384>}, {pipeline_mode = #tpu.pipeline_mode<synchronous>, transform_indices = @transform_2, window_bounds = array<i64: 1, 384>}, {pipeline_mode = #tpu.pipeline_mode<synchronous>, transform_indices = @transform_3, window_bounds = array<i64: 384, 384>}, {pipeline_mode = #tpu.pipeline_mode<synchronous>, transform_indices = @transform_4, window_bounds = array<i64: 1, 384>}, {pipeline_mode = #tpu.pipeline_mode<synchronous>, transform_indices = @transform_5, window_bounds = array<i64: 384, 128>}, {pipeline_mode = #tpu.pipeline_mode<synchronous>, transform_indices = @transform_6, window_bounds = array<i64: 1, 128>}, {pipeline_mode = #tpu.pipeline_mode<synchronous>, transform_indices = @transform_7, window_bounds = array<i64: 8, 128>}]} {
    %c0 = arith.constant 0 : index
    %c0_0 = arith.constant 0 : index
    %0 = vector.load %arg1[%c0, %c0_0] : memref<8x4096xbf16, #tpu.memory_space<vmem>>, vector<8x4096xbf16>
    %c0_1 = arith.constant 0 : index
    %c0_2 = arith.constant 0 : index
    %1 = vector.load %arg2[%c0_1, %c0_2] : memref<4096x384xbf16, #tpu.memory_space<vmem>>, vector<4096x384xbf16>
    %cst = arith.constant dense<0.000000e+00> : vector<8x384xf32>
    %2 = tpu.matmul %0, %1, %cst {dimension_numbers = #tpu.dot_dimension_numbers<[1], [0], [0], [1], [0, 0, 1, 1], [], []>} : vector<8x4096xbf16>, vector<4096x384xbf16>, vector<8x384xf32> -> vector<8x384xf32>
    %c0_3 = arith.constant 0 : index
    %c0_4 = arith.constant 0 : index
    %3 = vector.load %arg3[%c0_3, %c0_4] : memref<1x384xf32, #tpu.memory_space<vmem>>, vector<1x384xf32>
    %4 = vector.broadcast %3 : vector<1x384xf32> to vector<8x384xf32>
    %5 = arith.addf %2, %4 : vector<8x384xf32>
    %cst_5 = arith.constant 0.000000e+00 : f32
    %6 = vector.broadcast %cst_5 : f32 to vector<8x384xf32>
    %7 = arith.maximumf %5, %6 : vector<8x384xf32>
    %8 = arith.truncf %7 : vector<8x384xf32> to vector<8x384xbf16>
    %c0_6 = arith.constant 0 : index
    %c0_7 = arith.constant 0 : index
    %9 = vector.load %arg4[%c0_6, %c0_7] : memref<384x384xbf16, #tpu.memory_space<vmem>>, vector<384x384xbf16>
    %cst_8 = arith.constant dense<0.000000e+00> : vector<8x384xf32>
    %10 = tpu.matmul %8, %9, %cst_8 {dimension_numbers = #tpu.dot_dimension_numbers<[1], [0], [0], [1], [0, 0, 1, 1], [], []>} : vector<8x384xbf16>, vector<384x384xbf16>, vector<8x384xf32> -> vector<8x384xf32>
    %c0_9 = arith.constant 0 : index
    %c0_10 = arith.constant 0 : index
    %11 = vector.load %arg5[%c0_9, %c0_10] : memref<1x384xf32, #tpu.memory_space<vmem>>, vector<1x384xf32>
    %12 = vector.broadcast %11 : vector<1x384xf32> to vector<8x384xf32>
    %13 = arith.addf %10, %12 : vector<8x384xf32>
    %cst_11 = arith.constant 0.000000e+00 : f32
    %14 = vector.broadcast %cst_11 : f32 to vector<8x384xf32>
    %15 = arith.maximumf %13, %14 : vector<8x384xf32>
    %16 = arith.truncf %15 : vector<8x384xf32> to vector<8x384xbf16>
    %c0_12 = arith.constant 0 : index
    %c0_13 = arith.constant 0 : index
    %17 = vector.load %arg6[%c0_12, %c0_13] : memref<384x128xbf16, #tpu.memory_space<vmem>>, vector<384x128xbf16>
    %cst_14 = arith.constant dense<0.000000e+00> : vector<8x128xf32>
    %18 = tpu.matmul %16, %17, %cst_14 {dimension_numbers = #tpu.dot_dimension_numbers<[1], [0], [0], [1], [0, 0, 1, 1], [], []>} : vector<8x384xbf16>, vector<384x128xbf16>, vector<8x128xf32> -> vector<8x128xf32>
    %c0_15 = arith.constant 0 : index
    %c0_16 = arith.constant 0 : index
    %19 = vector.load %arg7[%c0_15, %c0_16] : memref<1x128xf32, #tpu.memory_space<vmem>>, vector<1x128xf32>
    %20 = vector.broadcast %19 : vector<1x128xf32> to vector<8x128xf32>
    %21 = arith.addf %18, %20 : vector<8x128xf32>
    %c0_17 = arith.constant 0 : index
    %c0_18 = arith.constant 0 : index
    %22 = vector.load %arg8[%c0_17, %c0_18] : memref<8x128xf32, #tpu.memory_space<vmem>>, vector<8x128xf32>
    tpu.vector_store %arg8[%c0_17, %c0_18], %21 {strides = array<i32>} : memref<8x128xf32, #tpu.memory_space<vmem>>, vector<8x128xf32>,
    return
  }
  func.func @transform_0(%arg0: i32) -> (i32, i32) {
    %c0_i32 = arith.constant 0 : i32
    %c0_i32_0 = arith.constant 0 : i32
    %c0_i32_1 = arith.constant 0 : i32
    return %c0_i32, %c0_i32_0 : i32, i32
  }
  func.func @transform_1(%arg0: i32) -> (i32, i32) {
    %c0_i32 = arith.constant 0 : i32
    %c0_i32_0 = arith.constant 0 : i32
    %c0_i32_1 = arith.constant 0 : i32
    return %c0_i32, %c0_i32_0 : i32, i32
  }
  func.func @transform_2(%arg0: i32) -> (i32, i32) {
    %c0_i32 = arith.constant 0 : i32
    %c0_i32_0 = arith.constant 0 : i32
    %c0_i32_1 = arith.constant 0 : i32
    return %c0_i32, %c0_i32_0 : i32, i32
  }
  func.func @transform_3(%arg0: i32) -> (i32, i32) {
    %c0_i32 = arith.constant 0 : i32
    %c0_i32_0 = arith.constant 0 : i32
    %c0_i32_1 = arith.constant 0 : i32
    return %c0_i32, %c0_i32_0 : i32, i32
  }
  func.func @transform_4(%arg0: i32) -> (i32, i32) {
    %c0_i32 = arith.constant 0 : i32
    %c0_i32_0 = arith.constant 0 : i32
    %c0_i32_1 = arith.constant 0 : i32
    return %c0_i32, %c0_i32_0 : i32, i32
  }
  func.func @transform_5(%arg0: i32) -> (i32, i32) {
    %c0_i32 = arith.constant 0 : i32
    %c0_i32_0 = arith.constant 0 : i32
    %c0_i32_1 = arith.constant 0 : i32
    return %c0_i32, %c0_i32_0 : i32, i32
  }
  func.func @transform_6(%arg0: i32) -> (i32, i32) {
    %c0_i32 = arith.constant 0 : i32
    %c0_i32_0 = arith.constant 0 : i32
    %c0_i32_1 = arith.constant 0 : i32
    return %c0_i32, %c0_i32_0 : i32, i32
  }
  func.func @transform_7(%arg0: i32) -> (i32, i32) {
    %c0_i32 = arith.constant 0 : i32
    %c0_i32_0 = arith.constant 0 : i32
    %c0_i32_1 = arith.constant 0 : i32
    return %c0_i32, %c0_i32_0 : i32, i32
  }
}

</mosaic_0001>

<bundles_post_ra>
// kernel: mt_conv_cifar_forward.4
= control target key start
LH: loop header
LB: loop body
LE: loop exit
PB: predicated region body
PF: predicated region fallthrough
CT: control target
= control target key end

     0   :  { %s1090_s12 = smov 0   ;;  %s1262_s0 = inlined_call_operand.vmem [shape: bf16[512,32], index: 0, kind: input, shape index: {}]   ;;  %s1263_s1 = inlined_call_operand.vmem [shape: bf16[32,256], index: 1, kind: input, shape index: {}]   ;;  %s1264_s2 = inlined_call_operand.vmem [shape: f32[1,256], index: 2, kind: input, shape index: {}]   ;;  %s1265_s3 = inlined_call_operand.vmem [shape: bf16[512,256], index: 3, kind: output, shape index: {}]  }
   0x1 LB: > { %s913_s13 = sadd.s32 4294967295, %s1067_s12   ;;  %p917_p0 = scmp.ge.s32.totalorder %s1067_s12, 1  ;;  %s1067_s12 = sphi %s1090_s12, %s13_s12  }
   0x2   : > { %p138_p1 = scmp.lt.s32.totalorder %s1067_s12, 3 }
   0x4   : > { %p139_p2 = pnand %p917_p0, %p138_p1 }
   0x5   : > { %v1039_v0 = vld [vmem:[%s1263_s1 + $0x4] ss:$8 sps:$4 sm:$0xff] (!%p139_p2)   ;;  %s918_s16 = sshll.u32 (!%p139_p2), %s913_s13, 5  ;;  %v1041_v1 = vld [vmem:[%s1263_s1] ss:$8 sps:$4 sm:$0xff] (!%p139_p2)   ;;  %v1069_v2 = vmov (!%p139_p2), 0   ;;  %v215_v21 = vlaneseq (!%p139_p2) }
   0x6   : > { %142 = sbr.rel (%p139_p2) target bundleno = 296 (0x128), region = 32  ;;  %406 = vmatprep.mubr.bf16.mxu0 (!%p139_p2), %v1069_v2  ;;  %486 = vmatprep.mubr.bf16.mxu1 (!%p139_p2), %v1069_v2  ;;  %p164_p3 = scmp.lt.s32.totalorder (!%p139_p2), %s918_s16, 63  ;;  %v1042_v3 = vld [vmem:[%s1263_s1 + $0x14] ss:$8 sps:$4 sm:$0xff] (!%p139_p2)   ;;  %v1044_v4 = vld [vmem:[%s1263_s1 + $0x10] ss:$8 sps:$4 sm:$0xff] (!%p139_p2)  }
   0x7   : > { %374 = vmatprep.subr.bf16.mxu0 (!%p139_p2), %v1039_v0  ;;  %1026 = vmatprep.subr.bf16.mxu1 (!%p139_p2), %v1039_v0  ;;  %vm325_vm0 = vcmask (!%p139_p2), 261120   ;;  %v216_v22 = vshrl.u32 (!%p139_p2), %v215_v21, 7  ;;  %v213_v24 = vld [vmem:[%s1264_s2] sm:$0x3] (!%p139_p2) }
   0x8   : > { %375 = vmatpush1.bf16.msra.mxu0 (!%p139_p2), %v1041_v1  ;;  %1028 = vmatpush1.bf16.msra.mxu1 (!%p139_p2), %v1041_v1 }
   0x9   : > { %376 = vmatprep.subr.bf16.mxu0 (!%p139_p2), %v1042_v3  ;;  %1027 = vmatprep.subr.bf16.mxu1 (!%p139_p2), %v1042_v3  ;;  %v217_v23 = vsub.s32 (!%p139_p2), 0, %v216_v22  ;;  %v221_v25 = vsub.s32 (!%p139_p2), 1, %v216_v22 }
   0xb   : > { %v1153_v26 = vrot.slane (!%p139_p2), %v213_v24, %v217_v23  ;;  %v1155_v27 = vrot.slane (!%p139_p2), %v213_v24, %v221_v25 }
   0xc   : > { %377 = vmatpush1.bf16.msra.mxu0 (!%p139_p2), %v1044_v4  ;;  %1029 = vmatpush1.bf16.msra.mxu1 (!%p139_p2), %v1044_v4 }
   0xd   : > { %s1267_s16 = smov (!%p164_p3, %s918_s16), 63 }
   0xe   : > { %s919_s23 = sshll.u32 %s1267_s16, 2  ;;  %s993_s29 = sshll.u32 %s1267_s16, 3 }
   0xf   : > { %s1116_s26 = scalar_lea.vmem %s1262_s0, %s919_s23  ;;  %s1169_s5 = scalar_lea.vmem %s1265_s3, %s993_s29 }
  0x10   : > { %v1045_v5 = vld [vmem:[%s1116_s26] sm:$0xff]   ;;  %v1047_v7 = vld [vmem:[%s1116_s26 + $0x8] sm:$0xff]   ;;  %v1049_v9 = vld [vmem:[%s1116_s26 + $0x10] sm:$0xff]  }
  0x11   : > { %v1046_v6 = vld [vmem:[%s1116_s26 + $0x40] sm:$0xff]   ;;  %943 = vmatmul.mubr.msk.bf16.vlgmr.msra.gmra.mrb[0].mxu0 %vm325_vm0, %v1045_v5  ;;  %v1048_v8 = vld [vmem:[%s1116_s26 + $0x48] sm:$0xff]   ;;  %v1050_v10 = vld [vmem:[%s1116_s26 + $0x50] sm:$0xff]  }
  0x12   : > { %951 = vmatmul.mubr.msk.bf16.vlgmr.msra.gmra.mrb[0].mxu1 %vm325_vm0, %v1046_v6  ;;  %416 = vmatprep.mubr.bf16.mxu0 %v1069_v2  ;;  %v1051_v11 = vld [vmem:[%s1116_s26 + $0x18] sm:$0xff]   ;;  %v1053_v13 = vld [vmem:[%s1116_s26 + $0x20] sm:$0xff]   ;;  %v1055_v15 = vld [vmem:[%s1116_s26 + $0x28] sm:$0xff]  }
  0x13   : > { %496 = vmatprep.mubr.bf16.mxu1 %v1069_v2  ;;  %v1052_v12 = vld [vmem:[%s1116_s26 + $0x58] sm:$0xff]   ;;  %v1054_v14 = vld [vmem:[%s1116_s26 + $0x60] sm:$0xff]   ;;  %v1056_v16 = vld [vmem:[%s1116_s26 + $0x68] sm:$0xff]  }
  0x14   : > { %v1057_v17 = vld [vmem:[%s1116_s26 + $0x30] sm:$0xff]   ;;  %v1059_v19 = vld [vmem:[%s1116_s26 + $0x38] sm:$0xff]  }
  0x15   : > { %v1058_v18 = vld [vmem:[%s1116_s26 + $0x70] sm:$0xff]   ;;  %v1060_v20 = vld [vmem:[%s1116_s26 + $0x78] sm:$0xff]  }
  0x19   : > { %944 = vmatmul.mubr.msk.bf16.gmra.mrb[4].mxu0 %vm325_vm0, %v1047_v7 }
  0x1a   : > { %952 = vmatmul.mubr.msk.bf16.gmra.mrb[4].mxu1 %vm325_vm0, %v1048_v8  ;;  %426 = vmatprep.mubr.bf16.mxu0 %v1069_v2 }
  0x1b   : > { %506 = vmatprep.mubr.bf16.mxu1 %v1069_v2 }
  0x21   : > { %945 = vmatmul.mubr.msk.bf16.gmra.mrb[8].mxu0 %vm325_vm0, %v1049_v9 }
  0x22   : > { %953 = vmatmul.mubr.msk.bf16.gmra.mrb[8].mxu1 %vm325_vm0, %v1050_v10  ;;  %436 = vmatprep.mubr.bf16.mxu0 %v1069_v2 }
  0x23   : > { %516 = vmatprep.mubr.bf16.mxu1 %v1069_v2 }
  0x29   : > { %946 = vmatmul.mubr.msk.bf16.gmra.mrb[12].mxu0 %vm325_vm0, %v1051_v11 }
  0x2a   : > { %954 = vmatmul.mubr.msk.bf16.gmra.mrb[12].mxu1 %vm325_vm0, %v1052_v12  ;;  %446 = vmatprep.mubr.bf16.mxu0 %v1069_v2 }
  0x2b   : > { %526 = vmatprep.mubr.bf16.mxu1 %v1069_v2 }
  0x31   : > { %947 = vmatmul.mubr.msk.bf16.gmra.mrb[16].mxu0 %vm325_vm0, %v1053_v13 }
  0x32   : > { %955 = vmatmul.mubr.msk.bf16.gmra.mrb[16].mxu1 %vm325_vm0, %v1054_v14  ;;  %456 = vmatprep.mubr.bf16.mxu0 %v1069_v2 }
  0x33   : > { %536 = vmatprep.mubr.bf16.mxu1 %v1069_v2 }
  0x39   : > { %948 = vmatmul.mubr.msk.bf16.gmra.mrb[20].mxu0 %vm325_vm0, %v1055_v15 }
  0x3a   : > { %956 = vmatmul.mubr.msk.bf16.gmra.mrb[20].mxu1 %vm325_vm0, %v1056_v16  ;;  %466 = vmatprep.mubr.bf16.mxu0 %v1069_v2 }
  0x3b   : > { %546 = vmatprep.mubr.bf16.mxu1 %v1069_v2 }
  0x41   : > { %949 = vmatmul.mubr.msk.bf16.gmra.mrb[24].mxu0 %vm325_vm0, %v1057_v17 }
  0x42   : > { %957 = vmatmul.mubr.msk.bf16.gmra.mrb[24].mxu1 %vm325_vm0, %v1058_v18  ;;  %476 = vmatprep.mubr.bf16.mxu0 %v1069_v2 }
  0x43   : > { %556 = vmatprep.mubr.bf16.mxu1 %v1069_v2 }
  0x49   : > { %950 = vmatmul.mubr.msk.bf16.gmra.mrb[28].mxu0 %vm325_vm0, %v1059_v19 }
  0x4a   : > { %958 = vmatmul.mubr.msk.bf16.gmra.mrb[28].mxu1 %vm325_vm0, %v1060_v20 }
  0xe4   : > { %v408_v28 = vpop.f32.mrb[0].mxu0 }
  0xe5   : > { %v488_v29 = vpop.f32.mrb[0].mxu1  ;;  %v409_v30 = vadd.f32 %v408_v28, %v1153_v26  ;;  %v410_v32 = vpop.f32.mrb[1].mxu0 }
  0xe6   : > { %v489_v31 = vadd.f32 %v488_v29, %v1153_v26  ;;  %v490_v33 = vpop.f32.mrb[1].mxu1  ;;  %v411_v34 = vadd.f32 %v410_v32, %v1155_v27  ;;  %v412_v36 = vpop.f32.mrb[2].mxu0 }
  0xe7   : > { %v491_v35 = vadd.f32 %v490_v33, %v1155_v27  ;;  %v492_v37 = vpop.f32.mrb[2].mxu1  ;;  %v567_v38 = vmax.f32 %v409_v30, 0.0  ;;  %v413_v40 = vadd.f32 %v412_v36, %v1153_v26  ;;  %v414_v42 = vpop.f32.mrb[3].mxu0 }
  0xe8   : > { %v599_v39 = vmax.f32 %v489_v31, 0.0  ;;  %v493_v41 = vadd.f32 %v492_v37, %v1153_v26  ;;  %v494_v43 = vpop.f32.mrb[3].mxu1  ;;  %v568_v44 = vmax.f32 %v411_v34, 0.0  ;;  %v415_v46 = vadd.f32 %v414_v42, %v1155_v27 }
  0xe9   : > { %v600_v45 = vmax.f32 %v491_v35, 0.0  ;;  %v495_v47 = vadd.f32 %v494_v43, %v1155_v27  ;;  %v569_v48 = vmax.f32 %v413_v40, 0.0 }
  0xea   : > { %v601_v49 = vmax.f32 %v493_v41, 0.0  ;;  %v994_v50 = vpack.c.bf16 %v568_v44, %v567_v38  ;;  %v570_v52 = vmax.f32 %v415_v46, 0.0 }
  0xeb   : > { %v1010_v51 = vpack.c.bf16 %v600_v45, %v599_v39  ;;  %v602_v53 = vmax.f32 %v495_v47, 0.0 }
  0xec   : > { %823 = vst [vmem:[%s1169_s5] sm:$0xff] %v994_v50  ;;  %v995_v54 = vpack.c.bf16 %v570_v52, %v569_v48  ;;  %v418_v56 = vpop.f32.mrb[4].mxu0 }
  0xed   : > { %839 = vst [vmem:[%s1169_s5 + $0x80] sm:$0xff] %v1010_v51  ;;  %v1011_v55 = vpack.c.bf16 %v602_v53, %v601_v49  ;;  %v498_v57 = vpop.f32.mrb[4].mxu1  ;;  %v419_v58 = vadd.f32 %v418_v56, %v1153_v26  ;;  %v420_v60 = vpop.f32.mrb[5].mxu0 }
  0xee   : > { %v499_v59 = vadd.f32 %v498_v57, %v1153_v26  ;;  %v500_v61 = vpop.f32.mrb[5].mxu1  ;;  %824 = vst [vmem:[%s1169_s5 + $0x8] sm:$0xff] %v995_v54  ;;  %v421_v62 = vadd.f32 %v420_v60, %v1155_v27  ;;  %v422_v0 = vpop.f32.mrb[6].mxu0 }
  0xef   : > { %840 = vst [vmem:[%s1169_s5 + $0x88] sm:$0xff] %v1011_v55  ;;  %v501_v63 = vadd.f32 %v500_v61, %v1155_v27  ;;  %v502_v1 = vpop.f32.mrb[6].mxu1  ;;  %v571_v2 = vmax.f32 %v419_v58, 0.0  ;;  %v423_v4 = vadd.f32 %v422_v0, %v1153_v26  ;;  %v424_v6 = vpop.f32.mrb[7].mxu0 }
  0xf0   : > { %v603_v3 = vmax.f32 %v499_v59, 0.0  ;;  %v503_v5 = vadd.f32 %v502_v1, %v1153_v26  ;;  %v504_v7 = vpop.f32.mrb[7].mxu1  ;;  %v572_v8 = vmax.f32 %v421_v62, 0.0  ;;  %v425_v10 = vadd.f32 %v424_v6, %v1155_v27 }
  0xf1   : > { %v604_v9 = vmax.f32 %v501_v63, 0.0  ;;  %v505_v11 = vadd.f32 %v504_v7, %v1155_v27  ;;  %v573_v12 = vmax.f32 %v423_v4, 0.0 }
  0xf2   : > { %v605_v13 = vmax.f32 %v503_v5, 0.0  ;;  %v996_v14 = vpack.c.bf16 %v572_v8, %v571_v2  ;;  %v574_v16 = vmax.f32 %v425_v10, 0.0 }
  0xf3   : > { %v1012_v15 = vpack.c.bf16 %v604_v9, %v603_v3  ;;  %v606_v17 = vmax.f32 %v505_v11, 0.0 }
  0xf4   : > { %825 = vst [vmem:[%s1169_s5 + $0x10] sm:$0xff] %v996_v14  ;;  %v997_v18 = vpack.c.bf16 %v574_v16, %v573_v12  ;;  %v428_v20 = vpop.f32.mrb[8].mxu0 }
  0xf5   : > { %841 = vst [vmem:[%s1169_s5 + $0x90] sm:$0xff] %v1012_v15  ;;  %v1013_v19 = vpack.c.bf16 %v606_v17, %v605_v13  ;;  %v508_v21 = vpop.f32.mrb[8].mxu1  ;;  %v429_v22 = vadd.f32 %v428_v20, %v1153_v26  ;;  %v430_v24 = vpop.f32.mrb[9].mxu0 }
  0xf6   : > { %v509_v23 = vadd.f32 %v508_v21, %v1153_v26  ;;  %v510_v25 = vpop.f32.mrb[9].mxu1  ;;  %826 = vst [vmem:[%s1169_s5 + $0x18] sm:$0xff] %v997_v18  ;;  %v431_v28 = vadd.f32 %v430_v24, %v1155_v27  ;;  %v432_v30 = vpop.f32.mrb[10].mxu0 }
  0xf7   : > { %842 = vst [vmem:[%s1169_s5 + $0x98] sm:$0xff] %v1013_v19  ;;  %v511_v29 = vadd.f32 %v510_v25, %v1155_v27  ;;  %v512_v31 = vpop.f32.mrb[10].mxu1  ;;  %v575_v32 = vmax.f32 %v429_v22, 0.0  ;;  %v433_v34 = vadd.f32 %v432_v30, %v1153_v26  ;;  %v434_v36 = vpop.f32.mrb[11].mxu0 }
  0xf8   : > { %v607_v33 = vmax.f32 %v509_v23, 0.0  ;;  %v513_v35 = vadd.f32 %v512_v31, %v1153_v26  ;;  %v514_v37 = vpop.f32.mrb[11].mxu1  ;;  %v576_v38 = vmax.f32 %v431_v28, 0.0  ;;  %v435_v40 = vadd.f32 %v434_v36, %v1155_v27 }
  0xf9   : > { %v608_v39 = vmax.f32 %v511_v29, 0.0  ;;  %v515_v41 = vadd.f32 %v514_v37, %v1155_v27  ;;  %v577_v42 = vmax.f32 %v433_v34, 0.0 }
  0xfa   : > { %v609_v43 = vmax.f32 %v513_v35, 0.0  ;;  %v998_v44 = vpack.c.bf16 %v576_v38, %v575_v32  ;;  %v578_v46 = vmax.f32 %v435_v40, 0.0 }
  0xfb   : > { %v1014_v45 = vpack.c.bf16 %v608_v39, %v607_v33  ;;  %v610_v47 = vmax.f32 %v515_v41, 0.0 }
  0xfc   : > { %827 = vst [vmem:[%s1169_s5 + $0x20] sm:$0xff] %v998_v44  ;;  %v999_v48 = vpack.c.bf16 %v578_v46, %v577_v42  ;;  %v438_v50 = vpop.f32.mrb[12].mxu0 }
  0xfd   : > { %843 = vst [vmem:[%s1169_s5 + $0xa0] sm:$0xff] %v1014_v45  ;;  %v1015_v49 = vpack.c.bf16 %v610_v47, %v609_v43  ;;  %v518_v51 = vpop.f32.mrb[12].mxu1  ;;  %v439_v52 = vadd.f32 %v438_v50, %v1153_v26  ;;  %v440_v54 = vpop.f32.mrb[13].mxu0 }
  0xfe   : > { %v519_v53 = vadd.f32 %v518_v51, %v1153_v26  ;;  %v520_v55 = vpop.f32.mrb[13].mxu1  ;;  %828 = vst [vmem:[%s1169_s5 + $0x28] sm:$0xff] %v999_v48  ;;  %v441_v56 = vadd.f32 %v440_v54, %v1155_v27  ;;  %v442_v58 = vpop.f32.mrb[14].mxu0 }
  0xff   : > { %844 = vst [vmem:[%s1169_s5 + $0xa8] sm:$0xff] %v1015_v49  ;;  %v521_v57 = vadd.f32 %v520_v55, %v1155_v27  ;;  %v522_v59 = vpop.f32.mrb[14].mxu1  ;;  %v579_v60 = vmax.f32 %v439_v52, 0.0  ;;  %v443_v62 = vadd.f32 %v442_v58, %v1153_v26  ;;  %v444_v0 = vpop.f32.mrb[15].mxu0 }
 0x100   : > { %v611_v61 = vmax.f32 %v519_v53, 0.0  ;;  %v523_v63 = vadd.f32 %v522_v59, %v1153_v26  ;;  %v524_v1 = vpop.f32.mrb[15].mxu1  ;;  %v580_v2 = vmax.f32 %v441_v56, 0.0  ;;  %v445_v4 = vadd.f32 %v444_v0, %v1155_v27 }
 0x101   : > { %v612_v3 = vmax.f32 %v521_v57, 0.0  ;;  %v525_v5 = vadd.f32 %v524_v1, %v1155_v27  ;;  %v581_v6 = vmax.f32 %v443_v62, 0.0 }
 0x102   : > { %v613_v7 = vmax.f32 %v523_v63, 0.0  ;;  %v1000_v8 = vpack.c.bf16 %v580_v2, %v579_v60  ;;  %v582_v10 = vmax.f32 %v445_v4, 0.0 }
 0x103   : > { %v1016_v9 = vpack.c.bf16 %v612_v3, %v611_v61  ;;  %v614_v11 = vmax.f32 %v525_v5, 0.0 }
 0x104   : > { %829 = vst [vmem:[%s1169_s5 + $0x30] sm:$0xff] %v1000_v8  ;;  %v1001_v12 = vpack.c.bf16 %v582_v10, %v581_v6  ;;  %v448_v14 = vpop.f32.mrb[16].mxu0 }
 0x105   : > { %845 = vst [vmem:[%s1169_s5 + $0xb0] sm:$0xff] %v1016_v9  ;;  %v1017_v13 = vpack.c.bf16 %v614_v11, %v613_v7  ;;  %v528_v15 = vpop.f32.mrb[16].mxu1  ;;  %v449_v16 = vadd.f32 %v448_v14, %v1153_v26  ;;  %v450_v18 = vpop.f32.mrb[17].mxu0 }
 0x106   : > { %v529_v17 = vadd.f32 %v528_v15, %v1153_v26  ;;  %v530_v19 = vpop.f32.mrb[17].mxu1  ;;  %830 = vst [vmem:[%s1169_s5 + $0x38] sm:$0xff] %v1001_v12  ;;  %v451_v20 = vadd.f32 %v450_v18, %v1155_v27  ;;  %v452_v22 = vpop.f32.mrb[18].mxu0 }
 0x107   : > { %846 = vst [vmem:[%s1169_s5 + $0xb8] sm:$0xff] %v1017_v13  ;;  %v531_v21 = vadd.f32 %v530_v19, %v1155_v27  ;;  %v532_v23 = vpop.f32.mrb[18].mxu1  ;;  %v583_v24 = vmax.f32 %v449_v16, 0.0  ;;  %v453_v28 = vadd.f32 %v452_v22, %v1153_v26  ;;  %v454_v30 = vpop.f32.mrb[19].mxu0 }
 0x108   : > { %v615_v25 = vmax.f32 %v529_v17, 0.0  ;;  %v533_v29 = vadd.f32 %v532_v23, %v1153_v26  ;;  %v534_v31 = vpop.f32.mrb[19].mxu1  ;;  %v584_v32 = vmax.f32 %v451_v20, 0.0  ;;  %v455_v34 = vadd.f32 %v454_v30, %v1155_v27 }
 0x109   : > { %v616_v33 = vmax.f32 %v531_v21, 0.0  ;;  %v535_v35 = vadd.f32 %v534_v31, %v1155_v27  ;;  %v585_v36 = vmax.f32 %v453_v28, 0.0 }
 0x10a   : > { %v617_v37 = vmax.f32 %v533_v29, 0.0  ;;  %v1002_v38 = vpack.c.bf16 %v584_v32, %v583_v24  ;;  %v586_v40 = vmax.f32 %v455_v34, 0.0 }
 0x10b   : > { %v1018_v39 = vpack.c.bf16 %v616_v33, %v615_v25  ;;  %v618_v41 = vmax.f32 %v535_v35, 0.0 }
 0x10c   : > { %831 = vst [vmem:[%s1169_s5 + $0x40] sm:$0xff] %v1002_v38  ;;  %v1003_v42 = vpack.c.bf16 %v586_v40, %v585_v36  ;;  %v458_v44 = vpop.f32.mrb[20].mxu0 }
 0x10d   : > { %847 = vst [vmem:[%s1169_s5 + $0xc0] sm:$0xff] %v1018_v39  ;;  %v1019_v43 = vpack.c.bf16 %v618_v41, %v617_v37  ;;  %v538_v45 = vpop.f32.mrb[20].mxu1  ;;  %v459_v46 = vadd.f32 %v458_v44, %v1153_v26  ;;  %v460_v48 = vpop.f32.mrb[21].mxu0 }
 0x10e   : > { %v539_v47 = vadd.f32 %v538_v45, %v1153_v26  ;;  %v540_v49 = vpop.f32.mrb[21].mxu1  ;;  %832 = vst [vmem:[%s1169_s5 + $0x48] sm:$0xff] %v1003_v42  ;;  %v461_v50 = vadd.f32 %v460_v48, %v1155_v27  ;;  %v462_v52 = vpop.f32.mrb[22].mxu0 }
 0x10f   : > { %848 = vst [vmem:[%s1169_s5 + $0xc8] sm:$0xff] %v1019_v43  ;;  %v541_v51 = vadd.f32 %v540_v49, %v1155_v27  ;;  %v542_v53 = vpop.f32.mrb[22].mxu1  ;;  %v587_v54 = vmax.f32 %v459_v46, 0.0  ;;  %v463_v56 = vadd.f32 %v462_v52, %v1153_v26  ;;  %v464_v58 = vpop.f32.mrb[23].mxu0 }
 0x110   : > { %v619_v55 = vmax.f32 %v539_v47, 0.0  ;;  %v543_v57 = vadd.f32 %v542_v53, %v1153_v26  ;;  %v544_v59 = vpop.f32.mrb[23].mxu1  ;;  %v588_v60 = vmax.f32 %v461_v50, 0.0  ;;  %v465_v62 = vadd.f32 %v464_v58, %v1155_v27 }
 0x111   : > { %v620_v61 = vmax.f32 %v541_v51, 0.0  ;;  %v545_v63 = vadd.f32 %v544_v59, %v1155_v27  ;;  %v589_v0 = vmax.f32 %v463_v56, 0.0 }
 0x112   : > { %v621_v1 = vmax.f32 %v543_v57, 0.0  ;;  %v1004_v2 = vpack.c.bf16 %v588_v60, %v587_v54  ;;  %v590_v4 = vmax.f32 %v465_v62, 0.0 }
 0x113   : > { %v1020_v3 = vpack.c.bf16 %v620_v61, %v619_v55  ;;  %v622_v5 = vmax.f32 %v545_v63, 0.0 }
 0x114   : > { %833 = vst [vmem:[%s1169_s5 + $0x50] sm:$0xff] %v1004_v2  ;;  %v1005_v6 = vpack.c.bf16 %v590_v4, %v589_v0  ;;  %v468_v8 = vpop.f32.mrb[24].mxu0 }
 0x115   : > { %849 = vst [vmem:[%s1169_s5 + $0xd0] sm:$0xff] %v1020_v3  ;;  %v1021_v7 = vpack.c.bf16 %v622_v5, %v621_v1  ;;  %v548_v9 = vpop.f32.mrb[24].mxu1  ;;  %v469_v10 = vadd.f32 %v468_v8, %v1153_v26  ;;  %v470_v12 = vpop.f32.mrb[25].mxu0 }
 0x116   : > { %v549_v11 = vadd.f32 %v548_v9, %v1153_v26  ;;  %v550_v13 = vpop.f32.mrb[25].mxu1  ;;  %834 = vst [vmem:[%s1169_s5 + $0x58] sm:$0xff] %v1005_v6  ;;  %v471_v14 = vadd.f32 %v470_v12, %v1155_v27  ;;  %v472_v16 = vpop.f32.mrb[26].mxu0 }
 0x117   : > { %850 = vst [vmem:[%s1169_s5 + $0xd8] sm:$0xff] %v1021_v7  ;;  %v551_v15 = vadd.f32 %v550_v13, %v1155_v27  ;;  %v552_v17 = vpop.f32.mrb[26].mxu1  ;;  %v591_v18 = vmax.f32 %v469_v10, 0.0  ;;  %v473_v20 = vadd.f32 %v472_v16, %v1153_v26  ;;  %v474_v22 = vpop.f32.mrb[27].mxu0 }
 0x118   : > { %v623_v19 = vmax.f32 %v549_v11, 0.0  ;;  %v553_v21 = vadd.f32 %v552_v17, %v1153_v26  ;;  %v554_v23 = vpop.f32.mrb[27].mxu1  ;;  %v592_v24 = vmax.f32 %v471_v14, 0.0  ;;  %v475_v28 = vadd.f32 %v474_v22, %v1155_v27 }
 0x119   : > { %v624_v25 = vmax.f32 %v551_v15, 0.0  ;;  %v555_v29 = vadd.f32 %v554_v23, %v1155_v27  ;;  %v593_v30 = vmax.f32 %v473_v20, 0.0 }
 0x11a   : > { %v625_v31 = vmax.f32 %v553_v21, 0.0  ;;  %v1006_v32 = vpack.c.bf16 %v592_v24, %v591_v18  ;;  %v594_v34 = vmax.f32 %v475_v28, 0.0 }
 0x11b   : > { %v1022_v33 = vpack.c.bf16 %v624_v25, %v623_v19  ;;  %v626_v35 = vmax.f32 %v555_v29, 0.0 }
 0x11c   : > { %835 = vst [vmem:[%s1169_s5 + $0x60] sm:$0xff] %v1006_v32  ;;  %v1007_v36 = vpack.c.bf16 %v594_v34, %v593_v30  ;;  %v478_v38 = vpop.f32.mrb[28].mxu0 }
 0x11d   : > { %851 = vst [vmem:[%s1169_s5 + $0xe0] sm:$0xff] %v1022_v33  ;;  %v1023_v37 = vpack.c.bf16 %v626_v35, %v625_v31  ;;  %v558_v39 = vpop.f32.mrb[28].mxu1  ;;  %v479_v40 = vadd.f32 %v478_v38, %v1153_v26  ;;  %v480_v42 = vpop.f32.mrb[29].mxu0 }
 0x11e   : > { %v559_v41 = vadd.f32 %v558_v39, %v1153_v26  ;;  %v560_v43 = vpop.f32.mrb[29].mxu1  ;;  %836 = vst [vmem:[%s1169_s5 + $0x68] sm:$0xff] %v1007_v36  ;;  %v481_v44 = vadd.f32 %v480_v42, %v1155_v27  ;;  %v482_v46 = vpop.f32.mrb[30].mxu0 }
 0x11f   : > { %852 = vst [vmem:[%s1169_s5 + $0xe8] sm:$0xff] %v1023_v37  ;;  %v561_v45 = vadd.f32 %v560_v43, %v1155_v27  ;;  %v562_v47 = vpop.f32.mrb[30].mxu1  ;;  %v595_v48 = vmax.f32 %v479_v40, 0.0  ;;  %v483_v50 = vadd.f32 %v482_v46, %v1153_v26  ;;  %v484_v52 = vpop.f32.mrb[31].mxu0 }
 0x120   : > { %v627_v49 = vmax.f32 %v559_v41, 0.0  ;;  %v563_v51 = vadd.f32 %v562_v47, %v1153_v26  ;;  %v564_v53 = vpop.f32.mrb[31].mxu1  ;;  %v596_v54 = vmax.f32 %v481_v44, 0.0  ;;  %v485_v56 = vadd.f32 %v484_v52, %v1155_v27 }
 0x121   : > { %v628_v55 = vmax.f32 %v561_v45, 0.0  ;;  %v565_v57 = vadd.f32 %v564_v53, %v1155_v27  ;;  %v597_v58 = vmax.f32 %v483_v50, 0.0 }
 0x122   : > { %v629_v59 = vmax.f32 %v563_v51, 0.0  ;;  %v1008_v60 = vpack.c.bf16 %v596_v54, %v595_v48  ;;  %v598_v62 = vmax.f32 %v485_v56, 0.0 }
 0x123   : > { %v1024_v61 = vpack.c.bf16 %v628_v55, %v627_v49  ;;  %v630_v63 = vmax.f32 %v565_v57, 0.0 }
 0x124   : > { %837 = vst [vmem:[%s1169_s5 + $0x70] sm:$0xff] %v1008_v60  ;;  %v1009_v0 = vpack.c.bf16 %v598_v62, %v597_v58 }
 0x125   : > { %853 = vst [vmem:[%s1169_s5 + $0xf0] sm:$0xff] %v1024_v61  ;;  %v1025_v26 = vpack.c.bf16 %v630_v63, %v629_v59 }
 0x126   : > { %838 = vst [vmem:[%s1169_s5 + $0x78] sm:$0xff] %v1009_v0 }
 0x127   : > { %854 = vst [vmem:[%s1169_s5 + $0xf8] sm:$0xff] %v1025_v26 }
 0x128 PF: > { %s13_s12 = sadd.s32 1, %s1067_s12  }
 0x129   : > { %p10_p4 = scmp.ge.s32.totalorder %s13_s12, 4  }
 0x12b   :  { %12 = sbr.rel (!%p10_p4) target bundleno = 1 (0x1), region = 62 }

// kernel: mt_conv_cifar_forward.5
= control target key start
LH: loop header
LB: loop body
LE: loop exit
PB: predicated region body
PF: predicated region fallthrough
CT: control target
= control target key end

     0   :  { %s6711_s1 = inlined_call_operand.vmem [shape: bf16[2304,256], index: 1, kind: input, shape index: {}]   ;;  %s6712_s0 = inlined_call_operand.vmem [shape: bf16[128,2304], index: 0, kind: input, shape index: {}]   ;;  %s6713_s2 = inlined_call_operand.vmem [shape: f32[1,256], index: 2, kind: input, shape index: {}]   ;;  %s6714_s3 = inlined_call_operand.vmem [shape: bf16[128,256], index: 3, kind: output, shape index: {}]  }
   0x1   :  { %v4567_v0 = vld [vmem:[%s6711_s1 + $0x4] ss:$8 sps:$4 sm:$0xff]   ;;  %v4571_v2 = vld [vmem:[%s6711_s1] ss:$8 sps:$4 sm:$0xff]   ;;  %v4573_v4 = vld [vmem:[%s6711_s1 + $0x14] ss:$8 sps:$4 sm:$0xff]  }
   0x2   :  { %v4569_v1 = vld [vmem:[%s6711_s1 + $0x404] ss:$8 sps:$4 sm:$0xff]   ;;  %2618 = vmatprep.subr.bf16.mxu1 %v4567_v0  ;;  %v4572_v3 = vld [vmem:[%s6711_s1 + $0x400] ss:$8 sps:$4 sm:$0xff]   ;;  %v4575_v5 = vld [vmem:[%s6711_s1 + $0x414] ss:$8 sps:$4 sm:$0xff]  }
   0x3   :  { %3070 = vmatprep.subr.bf16.mxu0 %v4569_v1  ;;  %2619 = vmatpush1.bf16.msra.mxu1 %v4571_v2  ;;  %v4577_v6 = vld [vmem:[%s6711_s1 + $0x10] ss:$8 sps:$4 sm:$0xff]   ;;  %v4579_v8 = vld [vmem:[%s6711_s1 + $0x24] ss:$8 sps:$4 sm:$0xff]   ;;  %v4583_v10 = vld [vmem:[%s6711_s1 + $0x20] ss:$8 sps:$4 sm:$0xff]  }
   0x4   :  { %3071 = vmatpush1.bf16.msra.mxu0 %v4572_v3  ;;  %2620 = vmatprep.subr.bf16.mxu1 %v4573_v4  ;;  %v4578_v7 = vld [vmem:[%s6711_s1 + $0x410] ss:$8 sps:$4 sm:$0xff]   ;;  %v4581_v9 = vld [vmem:[%s6711_s1 + $0x424] ss:$8 sps:$4 sm:$0xff]   ;;  %v4584_v11 = vld [vmem:[%s6711_s1 + $0x420] ss:$8 sps:$4 sm:$0xff]  }
   0x5   :  { %3072 = vmatprep.subr.bf16.mxu0 %v4575_v5  ;;  %v4585_v12 = vld [vmem:[%s6711_s1 + $0x34] ss:$8 sps:$4 sm:$0xff]   ;;  %v4589_v14 = vld [vmem:[%s6711_s1 + $0x30] ss:$8 sps:$4 sm:$0xff]   ;;  %v4591_v16 = vld [vmem:[%s6711_s1 + $0x44] ss:$8 sps:$4 sm:$0xff]  }
   0x6   :  { %v4587_v13 = vld [vmem:[%s6711_s1 + $0x434] ss:$8 sps:$4 sm:$0xff]   ;;  %v4590_v15 = vld [vmem:[%s6711_s1 + $0x430] ss:$8 sps:$4 sm:$0xff]   ;;  %v4593_v17 = vld [vmem:[%s6711_s1 + $0x444] ss:$8 sps:$4 sm:$0xff]  }
   0x7   :  { %2621 = vmatpush1.bf16.msra.mxu1 %v4577_v6  ;;  %v4595_v18 = vld [vmem:[%s6711_s1 + $0x40] ss:$8 sps:$4 sm:$0xff]   ;;  %v4597_v20 = vld [vmem:[%s6711_s1 + $0x54] ss:$8 sps:$4 sm:$0xff]   ;;  %v4601_v22 = vld [vmem:[%s6711_s1 + $0x50] ss:$8 sps:$4 sm:$0xff]  }
   0x8   :  { %3073 = vmatpush1.bf16.msra.mxu0 %v4578_v7  ;;  %2622 = vmatprep.subr.bf16.mxu1 %v4579_v8  ;;  %v4596_v19 = vld [vmem:[%s6711_s1 + $0x440] ss:$8 sps:$4 sm:$0xff]   ;;  %v4599_v21 = vld [vmem:[%s6711_s1 + $0x454] ss:$8 sps:$4 sm:$0xff]   ;;  %v4602_v23 = vld [vmem:[%s6711_s1 + $0x450] ss:$8 sps:$4 sm:$0xff]  }
   0x9   :  { %3074 = vmatprep.subr.bf16.mxu0 %v4581_v9  ;;  %v4603_v24 = vld [vmem:[%s6711_s1 + $0x64] ss:$8 sps:$4 sm:$0xff]   ;;  %v4607_v26 = vld [vmem:[%s6711_s1 + $0x60] ss:$8 sps:$4 sm:$0xff]   ;;  %v4609_v28 = vld [vmem:[%s6711_s1 + $0x74] ss:$8 sps:$4 sm:$0xff]  }
   0xa   :  { %v4605_v25 = vld [vmem:[%s6711_s1 + $0x464] ss:$8 sps:$4 sm:$0xff]   ;;  %v4608_v27 = vld [vmem:[%s6711_s1 + $0x460] ss:$8 sps:$4 sm:$0xff]   ;;  %v4611_v29 = vld [vmem:[%s6711_s1 + $0x474] ss:$8 sps:$4 sm:$0xff]  }
   0xb   :  { %2623 = vmatpush1.bf16.msra.mxu1 %v4583_v10  ;;  %v4613_v30 = vld [vmem:[%s6711_s1 + $0x70] ss:$8 sps:$4 sm:$0xff]   ;;  %v4615_v32 = vld [vmem:[%s6711_s1 + $0x84] ss:$8 sps:$4 sm:$0xff]   ;;  %v4619_v34 = vld [vmem:[%s6711_s1 + $0x80] ss:$8 sps:$4 sm:$0xff]  }
   0xc   :  { %3075 = vmatpush1.bf16.msra.mxu0 %v4584_v11  ;;  %2624 = vmatprep.subr.bf16.mxu1 %v4585_v12  ;;  %v4614_v31 = vld [vmem:[%s6711_s1 + $0x470] ss:$8 sps:$4 sm:$0xff]   ;;  %v4617_v33 = vld [vmem:[%s6711_s1 + $0x484] ss:$8 sps:$4 sm:$0xff]   ;;  %v4620_v35 = vld [vmem:[%s6711_s1 + $0x480] ss:$8 sps:$4 sm:$0xff]  }
   0xd   :  { %3076 = vmatprep.subr.bf16.mxu0 %v4587_v13  ;;  %v4621_v36 = vld [vmem:[%s6711_s1 + $0x94] ss:$8 sps:$4 sm:$0xff]   ;;  %v4625_v38 = vld [vmem:[%s6711_s1 + $0x90] ss:$8 sps:$4 sm:$0xff]   ;;  %v4627_v40 = vld [vmem:[%s6711_s1 + $0xa4] ss:$8 sps:$4 sm:$0xff]  }
   0xe   :  { %v4623_v37 = vld [vmem:[%s6711_s1 + $0x494] ss:$8 sps:$4 sm:$0xff]   ;;  %v4626_v39 = vld [vmem:[%s6711_s1 + $0x490] ss:$8 sps:$4 sm:$0xff]   ;;  %v4629_v41 = vld [vmem:[%s6711_s1 + $0x4a4] ss:$8 sps:$4 sm:$0xff]  }
   0xf   :  { %2625 = vmatpush1.bf16.msra.mxu1 %v4589_v14  ;;  %v4631_v42 = vld [vmem:[%s6711_s1 + $0xa0] ss:$8 sps:$4 sm:$0xff]   ;;  %v4633_v44 = vld [vmem:[%s6711_s1 + $0xb4] ss:$8 sps:$4 sm:$0xff]   ;;  %v4637_v46 = vld [vmem:[%s6711_s1 + $0xb0] ss:$8 sps:$4 sm:$0xff]  }
  0x10   :  { %3077 = vmatpush1.bf16.msra.mxu0 %v4590_v15  ;;  %2626 = vmatprep.subr.bf16.mxu1 %v4591_v16  ;;  %v4632_v43 = vld [vmem:[%s6711_s1 + $0x4a0] ss:$8 sps:$4 sm:$0xff]   ;;  %v4635_v45 = vld [vmem:[%s6711_s1 + $0x4b4] ss:$8 sps:$4 sm:$0xff]   ;;  %v4638_v47 = vld [vmem:[%s6711_s1 + $0x4b0] ss:$8 sps:$4 sm:$0xff]  }
  0x11   :  { %3078 = vmatprep.subr.bf16.mxu0 %v4593_v17  ;;  %v4639_v48 = vld [vmem:[%s6711_s1 + $0xc4] ss:$8 sps:$4 sm:$0xff]   ;;  %v4643_v52 = vld [vmem:[%s6711_s1 + $0xc0] ss:$8 sps:$4 sm:$0xff]   ;;  %v4645_v54 = vld [vmem:[%s6711_s1 + $0xd4] ss:$8 sps:$4 sm:$0xff]  }
  0x12   :  { %v4665_v49 = vld [vmem:[%s6712_s0 + $0x4] ss:$72 sps:$4 sm:$0xff]   ;;  %v4644_v53 = vld [vmem:[%s6711_s1 + $0x4c0] ss:$8 sps:$4 sm:$0xff]   ;;  %v4647_v55 = vld [vmem:[%s6711_s1 + $0x4d4] ss:$8 sps:$4 sm:$0xff]  }
  0x13   :  { %2627 = vmatpush1.bf16.msra.mxu1 %v4595_v18  ;;  %v4641_v50 = vld [vmem:[%s6711_s1 + $0x4c4] ss:$8 sps:$4 sm:$0xff]   ;;  %2650 = vmatprep.mubr.bf16.mxu1 %v4665_v49  ;;  %v4649_v56 = vld [vmem:[%s6711_s1 + $0xd0] ss:$8 sps:$4 sm:$0xff]   ;;  %v4655_v60 = vld [vmem:[%s6711_s1 + $0xe0] ss:$8 sps:$4 sm:$0xff]  }
  0x14   :  { %3079 = vmatpush1.bf16.msra.mxu0 %v4596_v19  ;;  %2628 = vmatprep.subr.bf16.mxu1 %v4597_v20  ;;  %v4668_v51 = vld [vmem:[%s6712_s0 + $0x24] ss:$72 sps:$4 sm:$0xff]   ;;  %v4650_v57 = vld [vmem:[%s6711_s1 + $0x4d0] ss:$8 sps:$4 sm:$0xff]   ;;  %v4656_v61 = vld [vmem:[%s6711_s1 + $0x4e0] ss:$8 sps:$4 sm:$0xff]  }
  0x15   :  { %3080 = vmatprep.subr.bf16.mxu0 %v4599_v21  ;;  %3102 = vmatprep.mubr.bf16.mxu0 %v4668_v51  ;;  %v4651_v58 = vld [vmem:[%s6711_s1 + $0xe4] ss:$8 sps:$4 sm:$0xff]   ;;  %v4657_v62 = vld [vmem:[%s6711_s1 + $0xf4] ss:$8 sps:$4 sm:$0xff]   ;;  %v4661_v0 = vld [vmem:[%s6711_s1 + $0xf0] ss:$8 sps:$4 sm:$0xff]  }
  0x16   :  { %v4653_v59 = vld [vmem:[%s6711_s1 + $0x4e4] ss:$8 sps:$4 sm:$0xff]   ;;  %v4659_v63 = vld [vmem:[%s6711_s1 + $0x4f4] ss:$8 sps:$4 sm:$0xff]   ;;  %v4662_v1 = vld [vmem:[%s6711_s1 + $0x4f0] ss:$8 sps:$4 sm:$0xff]  }
  0x17   :  { %2629 = vmatpush1.bf16.msra.mxu1 %v4601_v22  ;;  %v4671_v2 = vld [vmem:[%s6711_s1 + $0x104] ss:$8 sps:$4 sm:$0xff]   ;;  %v4663_v4 = vld [vmem:[%s6712_s0] ss:$72 sps:$4 sm:$0xff]   ;;  %v4677_v8 = vld [vmem:[%s6711_s1 + $0x114] ss:$8 sps:$4 sm:$0xff]  }
  0x18   :  { %3081 = vmatpush1.bf16.msra.mxu0 %v4602_v23  ;;  %2630 = vmatprep.subr.bf16.mxu1 %v4603_v24  ;;  %v4674_v3 = vld [vmem:[%s6711_s1 + $0x504] ss:$8 sps:$4 sm:$0xff]   ;;  %v4666_v5 = vld [vmem:[%s6712_s0 + $0x20] ss:$72 sps:$4 sm:$0xff]   ;;  %v4680_v9 = vld [vmem:[%s6711_s1 + $0x514] ss:$8 sps:$4 sm:$0xff]  }
  0x19   :  { %3082 = vmatprep.subr.bf16.mxu0 %v4605_v25  ;;  %v4669_v6 = vld [vmem:[%s6711_s1 + $0x100] ss:$8 sps:$4 sm:$0xff]   ;;  %v4681_v10 = vld [vmem:[%s6712_s0 + $0x94] ss:$72 sps:$4 sm:$0xff]   ;;  %v4675_v12 = vld [vmem:[%s6711_s1 + $0x110] ss:$8 sps:$4 sm:$0xff]  }
  0x1a   :  { %v4672_v7 = vld [vmem:[%s6711_s1 + $0x500] ss:$8 sps:$4 sm:$0xff]   ;;  %v4683_v11 = vld [vmem:[%s6712_s0 + $0xb4] ss:$72 sps:$4 sm:$0xff]   ;;  %v4678_v13 = vld [vmem:[%s6711_s1 + $0x510] ss:$8 sps:$4 sm:$0xff]  }
  0x1b   :  { %2631 = vmatpush1.bf16.msra.mxu1 %v4607_v26  ;;  %v4688_v14 = vld [vmem:[%s6711_s1 + $0x124] ss:$8 sps:$4 sm:$0xff]   ;;  %v4685_v16 = vld [vmem:[%s6712_s0 + $0x90] ss:$72 sps:$4 sm:$0xff]   ;;  %v4686_v17 = vld [vmem:[%s6711_s1 + $0x120] ss:$8 sps:$4 sm:$0xff]  }
  0x1c   :  { %3083 = vmatpush1.bf16.msra.mxu0 %v4608_v27  ;;  %2632 = vmatprep.subr.bf16.mxu1 %v4609_v28  ;;  %v4692_v15 = vld [vmem:[%s6711_s1 + $0x524] ss:$8 sps:$4 sm:$0xff]   ;;  %v4689_v18 = vld [vmem:[%s6712_s0 + $0xb0] ss:$72 sps:$4 sm:$0xff]   ;;  %v4690_v19 = vld [vmem:[%s6711_s1 + $0x520] ss:$8 sps:$4 sm:$0xff]  }
  0x1d   :  { %3084 = vmatprep.subr.bf16.mxu0 %v4611_v29  ;;  %v4695_v20 = vld [vmem:[%s6711_s1 + $0x134] ss:$8 sps:$4 sm:$0xff]   ;;  %v4699_v22 = vld [vmem:[%s6712_s0 + $0x124] ss:$72 sps:$4 sm:$0xff]   ;;  %v4693_v24 = vld [vmem:[%s6711_s1 + $0x130] ss:$8 sps:$4 sm:$0xff]  }
  0x1e   :  { %v4698_v21 = vld [vmem:[%s6711_s1 + $0x534] ss:$8 sps:$4 sm:$0xff]   ;;  %v4701_v23 = vld [vmem:[%s6712_s0 + $0x144] ss:$72 sps:$4 sm:$0xff]   ;;  %v4696_v25 = vld [vmem:[%s6711_s1 + $0x530] ss:$8 sps:$4 sm:$0xff]  }
  0x1f   :  { %2633 = vmatpush1.bf16.msra.mxu1 %v4613_v30  ;;  %v4706_v26 = vld [vmem:[%s6711_s1 + $0x144] ss:$8 sps:$4 sm:$0xff]   ;;  %v4703_v28 = vld [vmem:[%s6712_s0 + $0x120] ss:$72 sps:$4 sm:$0xff]   ;;  %v4732_v49 = vld [vmem:[%s6711_s1 + $0x570] ss:$8 sps:$4 sm:$0xff]  }
  0x20   :  { %3085 = vmatpush1.bf16.msra.mxu0 %v4614_v31  ;;  %2634 = vmatprep.subr.bf16.mxu1 %v4615_v32  ;;  %v4710_v27 = vld [vmem:[%s6711_s1 + $0x544] ss:$8 sps:$4 sm:$0xff]   ;;  %v4704_v29 = vld [vmem:[%s6711_s1 + $0x140] ss:$8 sps:$4 sm:$0xff]   ;;  %v4713_v32 = vld [vmem:[%s6711_s1 + $0x154] ss:$8 sps:$4 sm:$0xff]  }
  0x21   :  { %3086 = vmatprep.subr.bf16.mxu0 %v4617_v33  ;;  %v4707_v30 = vld [vmem:[%s6712_s0 + $0x140] ss:$72 sps:$4 sm:$0xff]   ;;  %v4716_v33 = vld [vmem:[%s6711_s1 + $0x554] ss:$8 sps:$4 sm:$0xff]   ;;  %v4746_v51 = vld [vmem:[%s6711_s1 + $0x584] ss:$8 sps:$4 sm:$0xff]  }
  0x22   :  { %v4708_v31 = vld [vmem:[%s6711_s1 + $0x540] ss:$8 sps:$4 sm:$0xff]  }
  0x23   :  { %2635 = vmatpush1.bf16.msra.mxu1 %v4619_v34  ;;  %v4717_v34 = vld [vmem:[%s6712_s0 + $0x1b4] ss:$72 sps:$4 sm:$0xff]  }
  0x24   :  { %3087 = vmatpush1.bf16.msra.mxu0 %v4620_v35  ;;  %2636 = vmatprep.subr.bf16.mxu1 %v4621_v36  ;;  %v4719_v35 = vld [vmem:[%s6712_s0 + $0x1d4] ss:$72 sps:$4 sm:$0xff]   ;;  %v4711_v36 = vld [vmem:[%s6711_s1 + $0x150] ss:$8 sps:$4 sm:$0xff]  }
  0x25   :  { %3088 = vmatprep.subr.bf16.mxu0 %v4623_v37  ;;  %v4714_v37 = vld [vmem:[%s6711_s1 + $0x550] ss:$8 sps:$4 sm:$0xff]  }
  0x27   :  { %2637 = vmatpush1.bf16.msra.mxu1 %v4625_v38  ;;  %v4724_v38 = vld [vmem:[%s6711_s1 + $0x164] ss:$8 sps:$4 sm:$0xff]  }
  0x28   :  { %3089 = vmatpush1.bf16.msra.mxu0 %v4626_v39  ;;  %2638 = vmatprep.subr.bf16.mxu1 %v4627_v40  ;;  %v4728_v39 = vld [vmem:[%s6711_s1 + $0x564] ss:$8 sps:$4 sm:$0xff]   ;;  %v4721_v40 = vld [vmem:[%s6712_s0 + $0x1b0] ss:$72 sps:$4 sm:$0xff]  }
  0x29   :  { %3090 = vmatprep.subr.bf16.mxu0 %v4629_v41  ;;  %v4722_v41 = vld [vmem:[%s6711_s1 + $0x160] ss:$8 sps:$4 sm:$0xff]  }
  0x2b   :  { %2639 = vmatpush1.bf16.msra.mxu1 %v4631_v42  ;;  %v4725_v42 = vld [vmem:[%s6712_s0 + $0x1d0] ss:$72 sps:$4 sm:$0xff]  }
  0x2c   :  { %3091 = vmatpush1.bf16.msra.mxu0 %v4632_v43  ;;  %2640 = vmatprep.subr.bf16.mxu1 %v4633_v44  ;;  %v4726_v43 = vld [vmem:[%s6711_s1 + $0x560] ss:$8 sps:$4 sm:$0xff]   ;;  %v4731_v44 = vld [vmem:[%s6711_s1 + $0x174] ss:$8 sps:$4 sm:$0xff]  }
  0x2d   :  { %3092 = vmatprep.subr.bf16.mxu0 %v4635_v45  ;;  %v4734_v45 = vld [vmem:[%s6711_s1 + $0x574] ss:$8 sps:$4 sm:$0xff]  }
  0x2f   :  { %2641 = vmatpush1.bf16.msra.mxu1 %v4637_v46  ;;  %v4735_v46 = vld [vmem:[%s6712_s0 + $0x244] ss:$72 sps:$4 sm:$0xff]  }
  0x30   :  { %3093 = vmatpush1.bf16.msra.mxu0 %v4638_v47  ;;  %2642 = vmatprep.subr.bf16.mxu1 %v4639_v48  ;;  %v4737_v47 = vld [vmem:[%s6712_s0 + $0x264] ss:$72 sps:$4 sm:$0xff]   ;;  %v4729_v48 = vld [vmem:[%s6711_s1 + $0x170] ss:$8 sps:$4 sm:$0xff]  }
  0x31   :  { %3094 = vmatprep.subr.bf16.mxu0 %v4641_v50  ;;  %v4742_v50 = vld [vmem:[%s6711_s1 + $0x184] ss:$8 sps:$4 sm:$0xff]  }
  0x33   :  { %2643 = vmatpush1.bf16.msra.mxu1 %v4643_v52  ;;  %v4739_v52 = vld [vmem:[%s6712_s0 + $0x240] ss:$72 sps:$4 sm:$0xff]  }
  0x34   :  { %3095 = vmatpush1.bf16.msra.mxu0 %v4644_v53  ;;  %2644 = vmatprep.subr.bf16.mxu1 %v4645_v54  ;;  %v4740_v53 = vld [vmem:[%s6711_s1 + $0x180] ss:$8 sps:$4 sm:$0xff]  }
  0x35   :  { %3096 = vmatprep.subr.bf16.mxu0 %v4647_v55  ;;  %v4743_v54 = vld [vmem:[%s6712_s0 + $0x260] ss:$72 sps:$4 sm:$0xff]  }
  0x36   :  { %v4744_v55 = vld [vmem:[%s6711_s1 + $0x580] ss:$8 sps:$4 sm:$0xff]  }
  0x37   :  { %2645 = vmatpush1.bf16.msra.mxu1 %v4649_v56  ;;  %v4749_v56 = vld [vmem:[%s6711_s1 + $0x194] ss:$8 sps:$4 sm:$0xff]  }
  0x38   :  { %3097 = vmatpush1.bf16.msra.mxu0 %v4650_v57  ;;  %2646 = vmatprep.subr.bf16.mxu1 %v4651_v58  ;;  %v4752_v57 = vld [vmem:[%s6711_s1 + $0x594] ss:$8 sps:$4 sm:$0xff]  }
  0x39   :  { %3098 = vmatprep.subr.bf16.mxu0 %v4653_v59  ;;  %v4753_v58 = vld [vmem:[%s6712_s0 + $0x2d4] ss:$72 sps:$4 sm:$0xff]  }
  0x3a   :  { %v4755_v59 = vld [vmem:[%s6712_s0 + $0x2f4] ss:$72 sps:$4 sm:$0xff]  }
  0x3b   :  { %2647 = vmatpush1.bf16.msra.mxu1 %v4655_v60  ;;  %v4747_v60 = vld [vmem:[%s6711_s1 + $0x190] ss:$8 sps:$4 sm:$0xff]  }
  0x3c   :  { %3099 = vmatpush1.bf16.msra.mxu0 %v4656_v61  ;;  %2648 = vmatprep.subr.bf16.mxu1 %v4657_v62  ;;  %v4750_v61 = vld [vmem:[%s6711_s1 + $0x590] ss:$8 sps:$4 sm:$0xff]   ;;  %v4760_v62 = vld [vmem:[%s6711_s1 + $0x1a4] ss:$8 sps:$4 sm:$0xff]  }
  0x3d   :  { %3100 = vmatprep.subr.bf16.mxu0 %v4659_v63  ;;  %v4764_v63 = vld [vmem:[%s6711_s1 + $0x5a4] ss:$8 sps:$4 sm:$0xff]  }
  0x3f   :  { %2649 = vmatpush1.bf16.msra.mxu1 %v4661_v0  ;;  %v4757_v0 = vld [vmem:[%s6712_s0 + $0x2d0] ss:$72 sps:$4 sm:$0xff]  }
  0x40   :  { %3101 = vmatpush1.bf16.msra.mxu0 %v4662_v1  ;;  %2731 = vmatprep.subr.bf16.mxu1 %v4671_v2  ;;  %v4758_v1 = vld [vmem:[%s6711_s1 + $0x1a0] ss:$8 sps:$4 sm:$0xff]   ;;  %v4761_v2 = vld [vmem:[%s6712_s0 + $0x2f0] ss:$72 sps:$4 sm:$0xff]  }
  0x41   :  { %3183 = vmatprep.subr.bf16.mxu0 %v4674_v3  ;;  %v4762_v3 = vld [vmem:[%s6711_s1 + $0x5a0] ss:$8 sps:$4 sm:$0xff]  }
  0x42   :  { %2651 = vmatmul.mubr.bf16.vlgmr.msra.gmra.mrb[0].mxu1 %v4663_v4  ;;  %v4767_v4 = vld [vmem:[%s6711_s1 + $0x1b4] ss:$8 sps:$4 sm:$0xff]  }
  0x43   :  { %3103 = vmatmul.mubr.bf16.vlgmr.msra.gmra.mrb[0].mxu0 %v4666_v5  ;;  %2732 = vmatpush1.bf16.msra.mxu1 %v4669_v6  ;;  %v4770_v5 = vld [vmem:[%s6711_s1 + $0x5b4] ss:$8 sps:$4 sm:$0xff]   ;;  %v4771_v6 = vld [vmem:[%s6712_s0 + $0x364] ss:$72 sps:$4 sm:$0xff]  }
  0x44   :  { %3184 = vmatpush1.bf16.msra.mxu0 %v4672_v7  ;;  %2733 = vmatprep.subr.bf16.mxu1 %v4677_v8  ;;  %v4773_v7 = vld [vmem:[%s6712_s0 + $0x384] ss:$72 sps:$4 sm:$0xff]   ;;  %v4765_v8 = vld [vmem:[%s6711_s1 + $0x1b0] ss:$8 sps:$4 sm:$0xff]  }
  0x45   :  { %3185 = vmatprep.subr.bf16.mxu0 %v4680_v9  ;;  %2660 = vmatprep.mubr.bf16.mxu1 %v4681_v10  ;;  %v4768_v9 = vld [vmem:[%s6711_s1 + $0x5b0] ss:$8 sps:$4 sm:$0xff]   ;;  %v4778_v10 = vld [vmem:[%s6711_s1 + $0x1c4] ss:$8 sps:$4 sm:$0xff]  }
  0x46   :  { %3112 = vmatprep.mubr.bf16.mxu0 %v4683_v11  ;;  %v4782_v11 = vld [vmem:[%s6711_s1 + $0x5c4] ss:$8 sps:$4 sm:$0xff]  }
  0x47   :  { %2734 = vmatpush1.bf16.msra.mxu1 %v4675_v12  ;;  %v4775_v12 = vld [vmem:[%s6712_s0 + $0x360] ss:$72 sps:$4 sm:$0xff]  }
  0x48   :  { %3186 = vmatpush1.bf16.msra.mxu0 %v4678_v13  ;;  %2735 = vmatprep.subr.bf16.mxu1 %v4688_v14  ;;  %v4776_v13 = vld [vmem:[%s6711_s1 + $0x1c0] ss:$8 sps:$4 sm:$0xff]  }
  0x49   :  { %3187 = vmatprep.subr.bf16.mxu0 %v4692_v15  ;;  %v4779_v14 = vld [vmem:[%s6712_s0 + $0x380] ss:$72 sps:$4 sm:$0xff]  }
  0x4a   :  { %2661 = vmatmul.mubr.bf16.gmra.mrb[4].mxu1 %v4685_v16  ;;  %v4780_v15 = vld [vmem:[%s6711_s1 + $0x5c0] ss:$8 sps:$4 sm:$0xff]   ;;  %v4785_v16 = vld [vmem:[%s6711_s1 + $0x1d4] ss:$8 sps:$4 sm:$0xff]  }
  0x4b   :  { %3113 = vmatmul.mubr.bf16.gmra.mrb[4].mxu0 %v4689_v18  ;;  %2736 = vmatpush1.bf16.msra.mxu1 %v4686_v17  ;;  %v4788_v17 = vld [vmem:[%s6711_s1 + $0x5d4] ss:$8 sps:$4 sm:$0xff]  }
  0x4c   :  { %3188 = vmatpush1.bf16.msra.mxu0 %v4690_v19  ;;  %2737 = vmatprep.subr.bf16.mxu1 %v4695_v20  ;;  %v4789_v18 = vld [vmem:[%s6712_s0 + $0x3f4] ss:$72 sps:$4 sm:$0xff]   ;;  %v4783_v20 = vld [vmem:[%s6711_s1 + $0x1d0] ss:$8 sps:$4 sm:$0xff]  }
  0x4d   :  { %3189 = vmatprep.subr.bf16.mxu0 %v4698_v21  ;;  %2670 = vmatprep.mubr.bf16.mxu1 %v4699_v22  ;;  %v4791_v19 = vld [vmem:[%s6712_s0 + $0x414] ss:$72 sps:$4 sm:$0xff]   ;;  %v4786_v21 = vld [vmem:[%s6711_s1 + $0x5d0] ss:$8 sps:$4 sm:$0xff]   ;;  %v4796_v22 = vld [vmem:[%s6711_s1 + $0x1e4] ss:$8 sps:$4 sm:$0xff]  }
  0x4e   :  { %3122 = vmatprep.mubr.bf16.mxu0 %v4701_v23  ;;  %v4800_v23 = vld [vmem:[%s6711_s1 + $0x5e4] ss:$8 sps:$4 sm:$0xff]  }
  0x4f   :  { %2738 = vmatpush1.bf16.msra.mxu1 %v4693_v24  ;;  %v4793_v24 = vld [vmem:[%s6712_s0 + $0x3f0] ss:$72 sps:$4 sm:$0xff]  }
  0x50   :  { %3190 = vmatpush1.bf16.msra.mxu0 %v4696_v25  ;;  %2739 = vmatprep.subr.bf16.mxu1 %v4706_v26  ;;  %v4794_v25 = vld [vmem:[%s6711_s1 + $0x1e0] ss:$8 sps:$4 sm:$0xff]   ;;  %v4797_v26 = vld [vmem:[%s6712_s0 + $0x410] ss:$72 sps:$4 sm:$0xff]  }
  0x51   :  { %3191 = vmatprep.subr.bf16.mxu0 %v4710_v27  ;;  %v4798_v27 = vld [vmem:[%s6711_s1 + $0x5e0] ss:$8 sps:$4 sm:$0xff]  }
  0x52   :  { %2671 = vmatmul.mubr.bf16.gmra.mrb[8].mxu1 %v4703_v28  ;;  %v4803_v28 = vld [vmem:[%s6711_s1 + $0x1f4] ss:$8 sps:$4 sm:$0xff]  }
  0x53   :  { %3123 = vmatmul.mubr.bf16.gmra.mrb[8].mxu0 %v4707_v30  ;;  %2740 = vmatpush1.bf16.msra.mxu1 %v4704_v29  ;;  %v4806_v29 = vld [vmem:[%s6711_s1 + $0x5f4] ss:$8 sps:$4 sm:$0xff]  }
  0x54   :  { %3192 = vmatpush1.bf16.msra.mxu0 %v4708_v31  ;;  %2741 = vmatprep.subr.bf16.mxu1 %v4713_v32  ;;  %v4809_v30 = vld [vmem:[%s6712_s0 + $0xc] ss:$72 sps:$4 sm:$0xff]   ;;  %v4801_v32 = vld [vmem:[%s6711_s1 + $0x1f0] ss:$8 sps:$4 sm:$0xff]  }
  0x55   :  { %3193 = vmatprep.subr.bf16.mxu0 %v4716_v33  ;;  %2680 = vmatprep.mubr.bf16.mxu1 %v4717_v34  ;;  %v4812_v31 = vld [vmem:[%s6712_s0 + $0x2c] ss:$72 sps:$4 sm:$0xff]   ;;  %v4804_v33 = vld [vmem:[%s6711_s1 + $0x5f0] ss:$8 sps:$4 sm:$0xff]  }
  0x56   :  { %3132 = vmatprep.mubr.bf16.mxu0 %v4719_v35  ;;  %v4815_v34 = vld [vmem:[%s6711_s1 + $0x204] ss:$8 sps:$4 sm:$0xff]  }
  0x57   :  { %2742 = vmatpush1.bf16.msra.mxu1 %v4711_v36  ;;  %v4818_v35 = vld [vmem:[%s6711_s1 + $0x604] ss:$8 sps:$4 sm:$0xff]   ;;  %v4807_v36 = vld [vmem:[%s6712_s0 + $0x8] ss:$72 sps:$4 sm:$0xff]  }
  0x58   :  { %3194 = vmatpush1.bf16.msra.mxu0 %v4714_v37  ;;  %2743 = vmatprep.subr.bf16.mxu1 %v4724_v38  ;;  %v4810_v37 = vld [vmem:[%s6712_s0 + $0x28] ss:$72 sps:$4 sm:$0xff]  }
  0x59   :  { %3195 = vmatprep.subr.bf16.mxu0 %v4728_v39  ;;  %v4813_v38 = vld [vmem:[%s6711_s1 + $0x200] ss:$8 sps:$4 sm:$0xff]  }
  0x5a   :  { %2681 = vmatmul.mubr.bf16.gmra.mrb[12].mxu1 %v4721_v40  ;;  %v4816_v39 = vld [vmem:[%s6711_s1 + $0x600] ss:$8 sps:$4 sm:$0xff]   ;;  %v4821_v40 = vld [vmem:[%s6711_s1 + $0x214] ss:$8 sps:$4 sm:$0xff]  }
  0x5b   :  { %3133 = vmatmul.mubr.bf16.gmra.mrb[12].mxu0 %v4725_v42  ;;  %2744 = vmatpush1.bf16.msra.mxu1 %v4722_v41  ;;  %v4824_v41 = vld [vmem:[%s6711_s1 + $0x614] ss:$8 sps:$4 sm:$0xff]  }
  0x5c   :  { %3196 = vmatpush1.bf16.msra.mxu0 %v4726_v43  ;;  %2745 = vmatprep.subr.bf16.mxu1 %v4731_v44  ;;  %v4825_v42 = vld [vmem:[%s6712_s0 + $0x9c] ss:$72 sps:$4 sm:$0xff]   ;;  %v4819_v44 = vld [vmem:[%s6711_s1 + $0x210] ss:$8 sps:$4 sm:$0xff]  }
  0x5d   :  { %3197 = vmatprep.subr.bf16.mxu0 %v4734_v45  ;;  %2690 = vmatprep.mubr.bf16.mxu1 %v4735_v46  ;;  %v4827_v43 = vld [vmem:[%s6712_s0 + $0xbc] ss:$72 sps:$4 sm:$0xff]   ;;  %v4822_v45 = vld [vmem:[%s6711_s1 + $0x610] ss:$8 sps:$4 sm:$0xff]  }
  0x5e   :  { %3142 = vmatprep.mubr.bf16.mxu0 %v4737_v47  ;;  %v4832_v46 = vld [vmem:[%s6711_s1 + $0x224] ss:$8 sps:$4 sm:$0xff]  }
  0x5f   :  { %2746 = vmatpush1.bf16.msra.mxu1 %v4729_v48  ;;  %v4836_v47 = vld [vmem:[%s6711_s1 + $0x624] ss:$8 sps:$4 sm:$0xff]   ;;  %v4829_v48 = vld [vmem:[%s6712_s0 + $0x98] ss:$72 sps:$4 sm:$0xff]  }
  0x60   :  { %3198 = vmatpush1.bf16.msra.mxu0 %v4732_v49  ;;  %2747 = vmatprep.subr.bf16.mxu1 %v4742_v50  ;;  %v4830_v49 = vld [vmem:[%s6711_s1 + $0x220] ss:$8 sps:$4 sm:$0xff]  }
  0x61   :  { %3199 = vmatprep.subr.bf16.mxu0 %v4746_v51  ;;  %v4833_v50 = vld [vmem:[%s6712_s0 + $0xb8] ss:$72 sps:$4 sm:$0xff]  }
  0x62   :  { %2691 = vmatmul.mubr.bf16.gmra.mrb[16].mxu1 %v4739_v52  ;;  %v4834_v51 = vld [vmem:[%s6711_s1 + $0x620] ss:$8 sps:$4 sm:$0xff]   ;;  %v4839_v52 = vld [vmem:[%s6711_s1 + $0x234] ss:$8 sps:$4 sm:$0xff]  }
  0x63   :  { %3143 = vmatmul.mubr.bf16.gmra.mrb[16].mxu0 %v4743_v54  ;;  %2748 = vmatpush1.bf16.msra.mxu1 %v4740_v53  ;;  %v4842_v53 = vld [vmem:[%s6711_s1 + $0x634] ss:$8 sps:$4 sm:$0xff]  }
  0x64   :  { %3200 = vmatpush1.bf16.msra.mxu0 %v4744_v55  ;;  %2749 = vmatprep.subr.bf16.mxu1 %v4749_v56  ;;  %v4843_v54 = vld [vmem:[%s6712_s0 + $0x12c] ss:$72 sps:$4 sm:$0xff]   ;;  %v4837_v56 = vld [vmem:[%s6711_s1 + $0x230] ss:$8 sps:$4 sm:$0xff]  }
  0x65   :  { %3201 = vmatprep.subr.bf16.mxu0 %v4752_v57  ;;  %2700 = vmatprep.mubr.bf16.mxu1 %v4753_v58  ;;  %v4845_v55 = vld [vmem:[%s6712_s0 + $0x14c] ss:$72 sps:$4 sm:$0xff]   ;;  %v4840_v57 = vld [vmem:[%s6711_s1 + $0x630] ss:$8 sps:$4 sm:$0xff]  }
  0x66   :  { %3152 = vmatprep.mubr.bf16.mxu0 %v4755_v59  ;;  %v4850_v58 = vld [vmem:[%s6711_s1 + $0x244] ss:$8 sps:$4 sm:$0xff]  }
  0x67   :  { %2750 = vmatpush1.bf16.msra.mxu1 %v4747_v60  ;;  %v4854_v59 = vld [vmem:[%s6711_s1 + $0x644] ss:$8 sps:$4 sm:$0xff]   ;;  %v4847_v60 = vld [vmem:[%s6712_s0 + $0x128] ss:$72 sps:$4 sm:$0xff]  }
  0x68   :  { %3202 = vmatpush1.bf16.msra.mxu0 %v4750_v61  ;;  %2751 = vmatprep.subr.bf16.mxu1 %v4760_v62  ;;  %v4848_v61 = vld [vmem:[%s6711_s1 + $0x240] ss:$8 sps:$4 sm:$0xff]  }
  0x69   :  { %3203 = vmatprep.subr.bf16.mxu0 %v4764_v63  ;;  %v4851_v62 = vld [vmem:[%s6712_s0 + $0x148] ss:$72 sps:$4 sm:$0xff]  }
  0x6a   :  { %2701 = vmatmul.mubr.bf16.gmra.mrb[20].mxu1 %v4757_v0  ;;  %v4852_v63 = vld [vmem:[%s6711_s1 + $0x640] ss:$8 sps:$4 sm:$0xff]   ;;  %v4857_v0 = vld [vmem:[%s6711_s1 + $0x254] ss:$8 sps:$4 sm:$0xff]  }
  0x6b   :  { %3153 = vmatmul.mubr.bf16.gmra.mrb[20].mxu0 %v4761_v2  ;;  %2752 = vmatpush1.bf16.msra.mxu1 %v4758_v1  ;;  %v4860_v1 = vld [vmem:[%s6711_s1 + $0x654] ss:$8 sps:$4 sm:$0xff]  }
  0x6c   :  { %3204 = vmatpush1.bf16.msra.mxu0 %v4762_v3  ;;  %2753 = vmatprep.subr.bf16.mxu1 %v4767_v4  ;;  %v4861_v2 = vld [vmem:[%s6712_s0 + $0x1bc] ss:$72 sps:$4 sm:$0xff]   ;;  %v4855_v4 = vld [vmem:[%s6711_s1 + $0x250] ss:$8 sps:$4 sm:$0xff]  }
  0x6d   :  { %3205 = vmatprep.subr.bf16.mxu0 %v4770_v5  ;;  %2710 = vmatprep.mubr.bf16.mxu1 %v4771_v6  ;;  %v4863_v3 = vld [vmem:[%s6712_s0 + $0x1dc] ss:$72 sps:$4 sm:$0xff]   ;;  %v4858_v5 = vld [vmem:[%s6711_s1 + $0x650] ss:$8 sps:$4 sm:$0xff]  }
  0x6e   :  { %3162 = vmatprep.mubr.bf16.mxu0 %v4773_v7  ;;  %v4868_v6 = vld [vmem:[%s6711_s1 + $0x264] ss:$8 sps:$4 sm:$0xff]  }
  0x6f   :  { %2754 = vmatpush1.bf16.msra.mxu1 %v4765_v8  ;;  %v4872_v7 = vld [vmem:[%s6711_s1 + $0x664] ss:$8 sps:$4 sm:$0xff]   ;;  %v4865_v8 = vld [vmem:[%s6712_s0 + $0x1b8] ss:$72 sps:$4 sm:$0xff]  }
  0x70   :  { %3206 = vmatpush1.bf16.msra.mxu0 %v4768_v9  ;;  %2755 = vmatprep.subr.bf16.mxu1 %v4778_v10  ;;  %v4866_v9 = vld [vmem:[%s6711_s1 + $0x260] ss:$8 sps:$4 sm:$0xff]  }
  0x71   :  { %3207 = vmatprep.subr.bf16.mxu0 %v4782_v11  ;;  %v4869_v10 = vld [vmem:[%s6712_s0 + $0x1d8] ss:$72 sps:$4 sm:$0xff]  }
  0x72   :  { %2711 = vmatmul.mubr.bf16.gmra.mrb[24].mxu1 %v4775_v12  ;;  %v4870_v11 = vld [vmem:[%s6711_s1 + $0x660] ss:$8 sps:$4 sm:$0xff]   ;;  %v4875_v12 = vld [vmem:[%s6711_s1 + $0x274] ss:$8 sps:$4 sm:$0xff]  }
  0x73   :  { %3163 = vmatmul.mubr.bf16.gmra.mrb[24].mxu0 %v4779_v14  ;;  %2756 = vmatpush1.bf16.msra.mxu1 %v4776_v13  ;;  %v4878_v13 = vld [vmem:[%s6711_s1 + $0x674] ss:$8 sps:$4 sm:$0xff]  }
  0x74   :  { %3208 = vmatpush1.bf16.msra.mxu0 %v4780_v15  ;;  %2757 = vmatprep.subr.bf16.mxu1 %v4785_v16  ;;  %v4879_v14 = vld [vmem:[%s6712_s0 + $0x24c] ss:$72 sps:$4 sm:$0xff]   ;;  %v4873_v16 = vld [vmem:[%s6711_s1 + $0x270] ss:$8 sps:$4 sm:$0xff]  }
  0x75   :  { %3209 = vmatprep.subr.bf16.mxu0 %v4788_v17  ;;  %2720 = vmatprep.mubr.bf16.mxu1 %v4789_v18  ;;  %v4881_v15 = vld [vmem:[%s6712_s0 + $0x26c] ss:$72 sps:$4 sm:$0xff]   ;;  %v4876_v17 = vld [vmem:[%s6711_s1 + $0x670] ss:$8 sps:$4 sm:$0xff]  }
  0x76   :  { %3172 = vmatprep.mubr.bf16.mxu0 %v4791_v19  ;;  %v4886_v18 = vld [vmem:[%s6711_s1 + $0x284] ss:$8 sps:$4 sm:$0xff]  }
  0x77   :  { %2758 = vmatpush1.bf16.msra.mxu1 %v4783_v20  ;;  %v4890_v19 = vld [vmem:[%s6711_s1 + $0x684] ss:$8 sps:$4 sm:$0xff]   ;;  %v4883_v20 = vld [vmem:[%s6712_s0 + $0x248] ss:$72 sps:$4 sm:$0xff]  }
  0x78   :  { %3210 = vmatpush1.bf16.msra.mxu0 %v4786_v21  ;;  %2759 = vmatprep.subr.bf16.mxu1 %v4796_v22  ;;  %v4884_v21 = vld [vmem:[%s6711_s1 + $0x280] ss:$8 sps:$4 sm:$0xff]  }
  0x79   :  { %3211 = vmatprep.subr.bf16.mxu0 %v4800_v23  ;;  %v4887_v22 = vld [vmem:[%s6712_s0 + $0x268] ss:$72 sps:$4 sm:$0xff]  }
  0x7a   :  { %2721 = vmatmul.mubr.bf16.gmra.mrb[28].mxu1 %v4793_v24  ;;  %v4888_v23 = vld [vmem:[%s6711_s1 + $0x680] ss:$8 sps:$4 sm:$0xff]   ;;  %v4893_v24 = vld [vmem:[%s6711_s1 + $0x294] ss:$8 sps:$4 sm:$0xff]  }
  0x7b   :  { %3173 = vmatmul.mubr.bf16.gmra.mrb[28].mxu0 %v4797_v26  ;;  %2760 = vmatpush1.bf16.msra.mxu1 %v4794_v25  ;;  %v4896_v25 = vld [vmem:[%s6711_s1 + $0x694] ss:$8 sps:$4 sm:$0xff]  }
  0x7c   :  { %3212 = vmatpush1.bf16.msra.mxu0 %v4798_v27  ;;  %2761 = vmatprep.subr.bf16.mxu1 %v4803_v28  ;;  %v4897_v26 = vld [vmem:[%s6712_s0 + $0x2dc] ss:$72 sps:$4 sm:$0xff]   ;;  %v4891_v28 = vld [vmem:[%s6711_s1 + $0x290] ss:$8 sps:$4 sm:$0xff]  }
  0x7d   :  { %3213 = vmatprep.subr.bf16.mxu0 %v4806_v29  ;;  %2763 = vmatprep.mubr.bf16.mxu1 %v4809_v30  ;;  %v4899_v27 = vld [vmem:[%s6712_s0 + $0x2fc] ss:$72 sps:$4 sm:$0xff]   ;;  %v4894_v29 = vld [vmem:[%s6711_s1 + $0x690] ss:$8 sps:$4 sm:$0xff]  }
  0x7e   :  { %3215 = vmatprep.mubr.bf16.mxu0 %v4812_v31  ;;  %v4904_v30 = vld [vmem:[%s6711_s1 + $0x2a4] ss:$8 sps:$4 sm:$0xff]  }
  0x7f   :  { %2762 = vmatpush1.bf16.msra.mxu1 %v4801_v32  ;;  %v4908_v31 = vld [vmem:[%s6711_s1 + $0x6a4] ss:$8 sps:$4 sm:$0xff]   ;;  %v4901_v32 = vld [vmem:[%s6712_s0 + $0x2d8] ss:$72 sps:$4 sm:$0xff]  }
  0x80   :  { %3214 = vmatpush1.bf16.msra.mxu0 %v4804_v33  ;;  %2844 = vmatprep.subr.bf16.mxu1 %v4815_v34  ;;  %v4902_v33 = vld [vmem:[%s6711_s1 + $0x2a0] ss:$8 sps:$4 sm:$0xff]  }
  0x81   :  { %3296 = vmatprep.subr.bf16.mxu0 %v4818_v35  ;;  %v4905_v34 = vld [vmem:[%s6712_s0 + $0x2f8] ss:$72 sps:$4 sm:$0xff]  }
  0x82   :  { %2764 = vmatmul.mubr.bf16.vlgmr.msra.gmra.mrb[0].mxu1 %v4807_v36  ;;  %v4906_v35 = vld [vmem:[%s6711_s1 + $0x6a0] ss:$8 sps:$4 sm:$0xff]   ;;  %v4911_v36 = vld [vmem:[%s6711_s1 + $0x2b4] ss:$8 sps:$4 sm:$0xff]  }
  0x83   :  { %3216 = vmatmul.mubr.bf16.vlgmr.msra.gmra.mrb[0].mxu0 %v4810_v37  ;;  %2845 = vmatpush1.bf16.msra.mxu1 %v4813_v38  ;;  %v4914_v37 = vld [vmem:[%s6711_s1 + $0x6b4] ss:$8 sps:$4 sm:$0xff]  }
  0x84   :  { %3297 = vmatpush1.bf16.msra.mxu0 %v4816_v39  ;;  %2846 = vmatprep.subr.bf16.mxu1 %v4821_v40  ;;  %v4915_v38 = vld [vmem:[%s6712_s0 + $0x36c] ss:$72 sps:$4 sm:$0xff]   ;;  %v4909_v40 = vld [vmem:[%s6711_s1 + $0x2b0] ss:$8 sps:$4 sm:$0xff]  }
  0x85   :  { %3298 = vmatprep.subr.bf16.mxu0 %v4824_v41  ;;  %2773 = vmatprep.mubr.bf16.mxu1 %v4825_v42  ;;  %v4917_v39 = vld [vmem:[%s6712_s0 + $0x38c] ss:$72 sps:$4 sm:$0xff]   ;;  %v4912_v41 = vld [vmem:[%s6711_s1 + $0x6b0] ss:$8 sps:$4 sm:$0xff]  }
  0x86   :  { %3225 = vmatprep.mubr.bf16.mxu0 %v4827_v43  ;;  %v4922_v42 = vld [vmem:[%s6711_s1 + $0x2c4] ss:$8 sps:$4 sm:$0xff]  }
  0x87   :  { %2847 = vmatpush1.bf16.msra.mxu1 %v4819_v44  ;;  %v4926_v43 = vld [vmem:[%s6711_s1 + $0x6c4] ss:$8 sps:$4 sm:$0xff]   ;;  %v4919_v44 = vld [vmem:[%s6712_s0 + $0x368] ss:$72 sps:$4 sm:$0xff]  }
  0x88   :  { %3299 = vmatpush1.bf16.msra.mxu0 %v4822_v45  ;;  %2848 = vmatprep.subr.bf16.mxu1 %v4832_v46  ;;  %v4920_v45 = vld [vmem:[%s6711_s1 + $0x2c0] ss:$8 sps:$4 sm:$0xff]  }
  0x89   :  { %3300 = vmatprep.subr.bf16.mxu0 %v4836_v47  ;;  %v4923_v46 = vld [vmem:[%s6712_s0 + $0x388] ss:$72 sps:$4 sm:$0xff]  }
  0x8a   :  { %2774 = vmatmul.mubr.bf16.gmra.mrb[4].mxu1 %v4829_v48  ;;  %v4924_v47 = vld [vmem:[%s6711_s1 + $0x6c0] ss:$8 sps:$4 sm:$0xff]   ;;  %v4929_v48 = vld [vmem:[%s6711_s1 + $0x2d4] ss:$8 sps:$4 sm:$0xff]  }
  0x8b   :  { %3226 = vmatmul.mubr.bf16.gmra.mrb[4].mxu0 %v4833_v50  ;;  %2849 = vmatpush1.bf16.msra.mxu1 %v4830_v49  ;;  %v4932_v49 = vld [vmem:[%s6711_s1 + $0x6d4] ss:$8 sps:$4 sm:$0xff]  }
  0x8c   :  { %3301 = vmatpush1.bf16.msra.mxu0 %v4834_v51  ;;  %2850 = vmatprep.subr.bf16.mxu1 %v4839_v52  ;;  %v4933_v50 = vld [vmem:[%s6712_s0 + $0x3fc] ss:$72 sps:$4 sm:$0xff]   ;;  %v4927_v52 = vld [vmem:[%s6711_s1 + $0x2d0] ss:$8 sps:$4 sm:$0xff]  }
  0x8d   :  { %3302 = vmatprep.subr.bf16.mxu0 %v4842_v53  ;;  %2783 = vmatprep.mubr.bf16.mxu1 %v4843_v54  ;;  %v4935_v51 = vld [vmem:[%s6712_s0 + $0x41c] ss:$72 sps:$4 sm:$0xff]   ;;  %v4930_v53 = vld [vmem:[%s6711_s1 + $0x6d0] ss:$8 sps:$4 sm:$0xff]  }
  0x8e   :  { %3235 = vmatprep.mubr.bf16.mxu0 %v4845_v55  ;;  %v4940_v54 = vld [vmem:[%s6711_s1 + $0x2e4] ss:$8 sps:$4 sm:$0xff]  }
  0x8f   :  { %2851 = vmatpush1.bf16.msra.mxu1 %v4837_v56  ;;  %v4944_v55 = vld [vmem:[%s6711_s1 + $0x6e4] ss:$8 sps:$4 sm:$0xff]   ;;  %v4937_v56 = vld [vmem:[%s6712_s0 + $0x3f8] ss:$72 sps:$4 sm:$0xff]  }
  0x90   :  { %3303 = vmatpush1.bf16.msra.mxu0 %v4840_v57  ;;  %2852 = vmatprep.subr.bf16.mxu1 %v4850_v58  ;;  %v4938_v57 = vld [vmem:[%s6711_s1 + $0x2e0] ss:$8 sps:$4 sm:$0xff]  }
  0x91   :  { %3304 = vmatprep.subr.bf16.mxu0 %v4854_v59  ;;  %v4941_v58 = vld [vmem:[%s6712_s0 + $0x418] ss:$72 sps:$4 sm:$0xff]  }
  0x92   :  { %2784 = vmatmul.mubr.bf16.gmra.mrb[8].mxu1 %v4847_v60  ;;  %v4942_v59 = vld [vmem:[%s6711_s1 + $0x6e0] ss:$8 sps:$4 sm:$0xff]   ;;  %v4947_v60 = vld [vmem:[%s6711_s1 + $0x2f4] ss:$8 sps:$4 sm:$0xff]  }
  0x93   :  { %3236 = vmatmul.mubr.bf16.gmra.mrb[8].mxu0 %v4851_v62  ;;  %2853 = vmatpush1.bf16.msra.mxu1 %v4848_v61  ;;  %v4950_v61 = vld [vmem:[%s6711_s1 + $0x6f4] ss:$8 sps:$4 sm:$0xff]  }
  0x94   :  { %3305 = vmatpush1.bf16.msra.mxu0 %v4852_v63  ;;  %2854 = vmatprep.subr.bf16.mxu1 %v4857_v0  ;;  %v4953_v62 = vld [vmem:[%s6712_s0 + $0x14] ss:$72 sps:$4 sm:$0xff]   ;;  %v4945_v0 = vld [vmem:[%s6711_s1 + $0x2f0] ss:$8 sps:$4 sm:$0xff]  }
  0x95   :  { %3306 = vmatprep.subr.bf16.mxu0 %v4860_v1  ;;  %2793 = vmatprep.mubr.bf16.mxu1 %v4861_v2  ;;  %v4956_v63 = vld [vmem:[%s6712_s0 + $0x34] ss:$72 sps:$4 sm:$0xff]   ;;  %v4948_v1 = vld [vmem:[%s6711_s1 + $0x6f0] ss:$8 sps:$4 sm:$0xff]   ;;  %v4959_v2 = vld [vmem:[%s6711_s1 + $0x304] ss:$8 sps:$4 sm:$0xff]  }
  0x96   :  { %3245 = vmatprep.mubr.bf16.mxu0 %v4863_v3  ;;  %v4962_v3 = vld [vmem:[%s6711_s1 + $0x704] ss:$8 sps:$4 sm:$0xff]  }
  0x97   :  { %2855 = vmatpush1.bf16.msra.mxu1 %v4855_v4  ;;  %v4951_v4 = vld [vmem:[%s6712_s0 + $0x10] ss:$72 sps:$4 sm:$0xff]  }
  0x98   :  { %3307 = vmatpush1.bf16.msra.mxu0 %v4858_v5  ;;  %2856 = vmatprep.subr.bf16.mxu1 %v4868_v6  ;;  %v4954_v5 = vld [vmem:[%s6712_s0 + $0x30] ss:$72 sps:$4 sm:$0xff]   ;;  %v4957_v6 = vld [vmem:[%s6711_s1 + $0x300] ss:$8 sps:$4 sm:$0xff]  }
  0x99   :  { %3308 = vmatprep.subr.bf16.mxu0 %v4872_v7  ;;  %v4960_v7 = vld [vmem:[%s6711_s1 + $0x700] ss:$8 sps:$4 sm:$0xff]  }
  0x9a   :  { %2794 = vmatmul.mubr.bf16.gmra.mrb[12].mxu1 %v4865_v8  ;;  %v4965_v8 = vld [vmem:[%s6711_s1 + $0x314] ss:$8 sps:$4 sm:$0xff]  }
  0x9b   :  { %3246 = vmatmul.mubr.bf16.gmra.mrb[12].mxu0 %v4869_v10  ;;  %2857 = vmatpush1.bf16.msra.mxu1 %v4866_v9  ;;  %v4968_v9 = vld [vmem:[%s6711_s1 + $0x714] ss:$8 sps:$4 sm:$0xff]   ;;  %v4969_v10 = vld [vmem:[%s6712_s0 + $0xa4] ss:$72 sps:$4 sm:$0xff]  }
  0x9c   :  { %3309 = vmatpush1.bf16.msra.mxu0 %v4870_v11  ;;  %2858 = vmatprep.subr.bf16.mxu1 %v4875_v12  ;;  %v4971_v11 = vld [vmem:[%s6712_s0 + $0xc4] ss:$72 sps:$4 sm:$0xff]   ;;  %v4963_v12 = vld [vmem:[%s6711_s1 + $0x310] ss:$8 sps:$4 sm:$0xff]  }
  0x9d   :  { %3310 = vmatprep.subr.bf16.mxu0 %v4878_v13  ;;  %2803 = vmatprep.mubr.bf16.mxu1 %v4879_v14  ;;  %v4966_v13 = vld [vmem:[%s6711_s1 + $0x710] ss:$8 sps:$4 sm:$0xff]   ;;  %v4976_v14 = vld [vmem:[%s6711_s1 + $0x324] ss:$8 sps:$4 sm:$0xff]  }
  0x9e   :  { %3255 = vmatprep.mubr.bf16.mxu0 %v4881_v15  ;;  %v4980_v15 = vld [vmem:[%s6711_s1 + $0x724] ss:$8 sps:$4 sm:$0xff]  }
  0x9f   :  { %2859 = vmatpush1.bf16.msra.mxu1 %v4873_v16  ;;  %v4973_v16 = vld [vmem:[%s6712_s0 + $0xa0] ss:$72 sps:$4 sm:$0xff]  }
  0xa0   :  { %3311 = vmatpush1.bf16.msra.mxu0 %v4876_v17  ;;  %2860 = vmatprep.subr.bf16.mxu1 %v4886_v18  ;;  %v4974_v17 = vld [vmem:[%s6711_s1 + $0x320] ss:$8 sps:$4 sm:$0xff]  }
  0xa1   :  { %3312 = vmatprep.subr.bf16.mxu0 %v4890_v19  ;;  %v4977_v18 = vld [vmem:[%s6712_s0 + $0xc0] ss:$72 sps:$4 sm:$0xff]  }
  0xa2   :  { %2804 = vmatmul.mubr.bf16.gmra.mrb[16].mxu1 %v4883_v20  ;;  %v4978_v19 = vld [vmem:[%s6711_s1 + $0x720] ss:$8 sps:$4 sm:$0xff]   ;;  %v4983_v20 = vld [vmem:[%s6711_s1 + $0x334] ss:$8 sps:$4 sm:$0xff]  }
  0xa3   :  { %3256 = vmatmul.mubr.bf16.gmra.mrb[16].mxu0 %v4887_v22  ;;  %2861 = vmatpush1.bf16.msra.mxu1 %v4884_v21  ;;  %v4986_v21 = vld [vmem:[%s6711_s1 + $0x734] ss:$8 sps:$4 sm:$0xff]  }
  0xa4   :  { %3313 = vmatpush1.bf16.msra.mxu0 %v4888_v23  ;;  %2862 = vmatprep.subr.bf16.mxu1 %v4893_v24  ;;  %v4987_v22 = vld [vmem:[%s6712_s0 + $0x134] ss:$72 sps:$4 sm:$0xff]   ;;  %v4981_v24 = vld [vmem:[%s6711_s1 + $0x330] ss:$8 sps:$4 sm:$0xff]  }
  0xa5   :  { %3314 = vmatprep.subr.bf16.mxu0 %v4896_v25  ;;  %2813 = vmatprep.mubr.bf16.mxu1 %v4897_v26  ;;  %v4989_v23 = vld [vmem:[%s6712_s0 + $0x154] ss:$72 sps:$4 sm:$0xff]   ;;  %v4984_v25 = vld [vmem:[%s6711_s1 + $0x730] ss:$8 sps:$4 sm:$0xff]   ;;  %v4994_v26 = vld [vmem:[%s6711_s1 + $0x344] ss:$8 sps:$4 sm:$0xff]  }
  0xa6   :  { %3265 = vmatprep.mubr.bf16.mxu0 %v4899_v27  ;;  %v4998_v27 = vld [vmem:[%s6711_s1 + $0x744] ss:$8 sps:$4 sm:$0xff]  }
  0xa7   :  { %2863 = vmatpush1.bf16.msra.mxu1 %v4891_v28  ;;  %v4991_v28 = vld [vmem:[%s6712_s0 + $0x130] ss:$72 sps:$4 sm:$0xff]  }
  0xa8   :  { %3315 = vmatpush1.bf16.msra.mxu0 %v4894_v29  ;;  %2864 = vmatprep.subr.bf16.mxu1 %v4904_v30  ;;  %v4992_v29 = vld [vmem:[%s6711_s1 + $0x340] ss:$8 sps:$4 sm:$0xff]   ;;  %v4995_v30 = vld [vmem:[%s6712_s0 + $0x150] ss:$72 sps:$4 sm:$0xff]  }
  0xa9   :  { %3316 = vmatprep.subr.bf16.mxu0 %v4908_v31  ;;  %v4996_v31 = vld [vmem:[%s6711_s1 + $0x740] ss:$8 sps:$4 sm:$0xff]  }
  0xaa   :  { %2814 = vmatmul.mubr.bf16.gmra.mrb[20].mxu1 %v4901_v32  ;;  %v5001_v32 = vld [vmem:[%s6711_s1 + $0x354] ss:$8 sps:$4 sm:$0xff]  }
  0xab   :  { %3266 = vmatmul.mubr.bf16.gmra.mrb[20].mxu0 %v4905_v34  ;;  %2865 = vmatpush1.bf16.msra.mxu1 %v4902_v33  ;;  %v5004_v33 = vld [vmem:[%s6711_s1 + $0x754] ss:$8 sps:$4 sm:$0xff]   ;;  %v5005_v34 = vld [vmem:[%s6712_s0 + $0x1c4] ss:$72 sps:$4 sm:$0xff]  }
  0xac   :  { %3317 = vmatpush1.bf16.msra.mxu0 %v4906_v35  ;;  %2866 = vmatprep.subr.bf16.mxu1 %v4911_v36  ;;  %v5007_v35 = vld [vmem:[%s6712_s0 + $0x1e4] ss:$72 sps:$4 sm:$0xff]   ;;  %v4999_v36 = vld [vmem:[%s6711_s1 + $0x350] ss:$8 sps:$4 sm:$0xff]  }
  0xad   :  { %3318 = vmatprep.subr.bf16.mxu0 %v4914_v37  ;;  %2823 = vmatprep.mubr.bf16.mxu1 %v4915_v38  ;;  %v5002_v37 = vld [vmem:[%s6711_s1 + $0x750] ss:$8 sps:$4 sm:$0xff]   ;;  %v5012_v38 = vld [vmem:[%s6711_s1 + $0x364] ss:$8 sps:$4 sm:$0xff]  }
  0xae   :  { %3275 = vmatprep.mubr.bf16.mxu0 %v4917_v39  ;;  %v5016_v39 = vld [vmem:[%s6711_s1 + $0x764] ss:$8 sps:$4 sm:$0xff]  }
  0xaf   :  { %2867 = vmatpush1.bf16.msra.mxu1 %v4909_v40  ;;  %v5009_v40 = vld [vmem:[%s6712_s0 + $0x1c0] ss:$72 sps:$4 sm:$0xff]  }
  0xb0   :  { %3319 = vmatpush1.bf16.msra.mxu0 %v4912_v41  ;;  %2868 = vmatprep.subr.bf16.mxu1 %v4922_v42  ;;  %v5010_v41 = vld [vmem:[%s6711_s1 + $0x360] ss:$8 sps:$4 sm:$0xff]  }
  0xb1   :  { %3320 = vmatprep.subr.bf16.mxu0 %v4926_v43  ;;  %v5013_v42 = vld [vmem:[%s6712_s0 + $0x1e0] ss:$72 sps:$4 sm:$0xff]  }
  0xb2   :  { %2824 = vmatmul.mubr.bf16.gmra.mrb[24].mxu1 %v4919_v44  ;;  %v5014_v43 = vld [vmem:[%s6711_s1 + $0x760] ss:$8 sps:$4 sm:$0xff]   ;;  %v5019_v44 = vld [vmem:[%s6711_s1 + $0x374] ss:$8 sps:$4 sm:$0xff]  }
  0xb3   :  { %3276 = vmatmul.mubr.bf16.gmra.mrb[24].mxu0 %v4923_v46  ;;  %2869 = vmatpush1.bf16.msra.mxu1 %v4920_v45  ;;  %v5022_v45 = vld [vmem:[%s6711_s1 + $0x774] ss:$8 sps:$4 sm:$0xff]  }
  0xb4   :  { %3321 = vmatpush1.bf16.msra.mxu0 %v4924_v47  ;;  %2870 = vmatprep.subr.bf16.mxu1 %v4929_v48  ;;  %v5023_v46 = vld [vmem:[%s6712_s0 + $0x254] ss:$72 sps:$4 sm:$0xff]   ;;  %v5017_v48 = vld [vmem:[%s6711_s1 + $0x370] ss:$8 sps:$4 sm:$0xff]  }
  0xb5   :  { %3322 = vmatprep.subr.bf16.mxu0 %v4932_v49  ;;  %2833 = vmatprep.mubr.bf16.mxu1 %v4933_v50  ;;  %v5025_v47 = vld [vmem:[%s6712_s0 + $0x274] ss:$72 sps:$4 sm:$0xff]   ;;  %v5020_v49 = vld [vmem:[%s6711_s1 + $0x770] ss:$8 sps:$4 sm:$0xff]   ;;  %v5030_v50 = vld [vmem:[%s6711_s1 + $0x384] ss:$8 sps:$4 sm:$0xff]  }
  0xb6   :  { %3285 = vmatprep.mubr.bf16.mxu0 %v4935_v51  ;;  %v5034_v51 = vld [vmem:[%s6711_s1 + $0x784] ss:$8 sps:$4 sm:$0xff]  }
  0xb7   :  { %2871 = vmatpush1.bf16.msra.mxu1 %v4927_v52  ;;  %v5027_v52 = vld [vmem:[%s6712_s0 + $0x250] ss:$72 sps:$4 sm:$0xff]  }
  0xb8   :  { %3323 = vmatpush1.bf16.msra.mxu0 %v4930_v53  ;;  %2872 = vmatprep.subr.bf16.mxu1 %v4940_v54  ;;  %v5028_v53 = vld [vmem:[%s6711_s1 + $0x380] ss:$8 sps:$4 sm:$0xff]   ;;  %v5031_v54 = vld [vmem:[%s6712_s0 + $0x270] ss:$72 sps:$4 sm:$0xff]  }
  0xb9   :  { %3324 = vmatprep.subr.bf16.mxu0 %v4944_v55  ;;  %v5032_v55 = vld [vmem:[%s6711_s1 + $0x780] ss:$8 sps:$4 sm:$0xff]  }
  0xba   :  { %2834 = vmatmul.mubr.bf16.gmra.mrb[28].mxu1 %v4937_v56  ;;  %v5037_v56 = vld [vmem:[%s6711_s1 + $0x394] ss:$8 sps:$4 sm:$0xff]  }
  0xbb   :  { %3286 = vmatmul.mubr.bf16.gmra.mrb[28].mxu0 %v4941_v58  ;;  %2873 = vmatpush1.bf16.msra.mxu1 %v4938_v57  ;;  %v5040_v57 = vld [vmem:[%s6711_s1 + $0x794] ss:$8 sps:$4 sm:$0xff]   ;;  %v5041_v58 = vld [vmem:[%s6712_s0 + $0x2e4] ss:$72 sps:$4 sm:$0xff]  }
  0xbc   :  { %3325 = vmatpush1.bf16.msra.mxu0 %v4942_v59  ;;  %2874 = vmatprep.subr.bf16.mxu1 %v4947_v60  ;;  %v5043_v59 = vld [vmem:[%s6712_s0 + $0x304] ss:$72 sps:$4 sm:$0xff]   ;;  %v5035_v60 = vld [vmem:[%s6711_s1 + $0x390] ss:$8 sps:$4 sm:$0xff]  }
  0xbd   :  { %3326 = vmatprep.subr.bf16.mxu0 %v4950_v61  ;;  %2876 = vmatprep.mubr.bf16.mxu1 %v4953_v62  ;;  %v5038_v61 = vld [vmem:[%s6711_s1 + $0x790] ss:$8 sps:$4 sm:$0xff]   ;;  %v5048_v62 = vld [vmem:[%s6711_s1 + $0x3a4] ss:$8 sps:$4 sm:$0xff]  }
  0xbe   :  { %3328 = vmatprep.mubr.bf16.mxu0 %v4956_v63  ;;  %v5052_v63 = vld [vmem:[%s6711_s1 + $0x7a4] ss:$8 sps:$4 sm:$0xff]  }
  0xbf   :  { %2875 = vmatpush1.bf16.msra.mxu1 %v4945_v0  ;;  %v5045_v0 = vld [vmem:[%s6712_s0 + $0x2e0] ss:$72 sps:$4 sm:$0xff]  }
  0xc0   :  { %3327 = vmatpush1.bf16.msra.mxu0 %v4948_v1  ;;  %2957 = vmatprep.subr.bf16.mxu1 %v4959_v2  ;;  %v5046_v1 = vld [vmem:[%s6711_s1 + $0x3a0] ss:$8 sps:$4 sm:$0xff]  }
  0xc1   :  { %3409 = vmatprep.subr.bf16.mxu0 %v4962_v3  ;;  %v5049_v2 = vld [vmem:[%s6712_s0 + $0x300] ss:$72 sps:$4 sm:$0xff]  }
  0xc2   :  { %2877 = vmatmul.mubr.bf16.vlgmr.msra.gmra.mrb[0].mxu1 %v4951_v4  ;;  %v5050_v3 = vld [vmem:[%s6711_s1 + $0x7a0] ss:$8 sps:$4 sm:$0xff]   ;;  %v5055_v4 = vld [vmem:[%s6711_s1 + $0x3b4] ss:$8 sps:$4 sm:$0xff]  }
  0xc3   :  { %3329 = vmatmul.mubr.bf16.vlgmr.msra.gmra.mrb[0].mxu0 %v4954_v5  ;;  %2958 = vmatpush1.bf16.msra.mxu1 %v4957_v6  ;;  %v5058_v5 = vld [vmem:[%s6711_s1 + $0x7b4] ss:$8 sps:$4 sm:$0xff]  }
  0xc4   :  { %3410 = vmatpush1.bf16.msra.mxu0 %v4960_v7  ;;  %2959 = vmatprep.subr.bf16.mxu1 %v4965_v8  ;;  %v5059_v6 = vld [vmem:[%s6712_s0 + $0x374] ss:$72 sps:$4 sm:$0xff]   ;;  %v5053_v8 = vld [vmem:[%s6711_s1 + $0x3b0] ss:$8 sps:$4 sm:$0xff]  }
  0xc5   :  { %3411 = vmatprep.subr.bf16.mxu0 %v4968_v9  ;;  %2886 = vmatprep.mubr.bf16.mxu1 %v4969_v10  ;;  %v5061_v7 = vld [vmem:[%s6712_s0 + $0x394] ss:$72 sps:$4 sm:$0xff]   ;;  %v5056_v9 = vld [vmem:[%s6711_s1 + $0x7b0] ss:$8 sps:$4 sm:$0xff]   ;;  %v5066_v10 = vld [vmem:[%s6711_s1 + $0x3c4] ss:$8 sps:$4 sm:$0xff]  }
  0xc6   :  { %3338 = vmatprep.mubr.bf16.mxu0 %v4971_v11  ;;  %v5070_v11 = vld [vmem:[%s6711_s1 + $0x7c4] ss:$8 sps:$4 sm:$0xff]  }
  0xc7   :  { %2960 = vmatpush1.bf16.msra.mxu1 %v4963_v12  ;;  %v5063_v12 = vld [vmem:[%s6712_s0 + $0x370] ss:$72 sps:$4 sm:$0xff]  }
  0xc8   :  { %3412 = vmatpush1.bf16.msra.mxu0 %v4966_v13  ;;  %2961 = vmatprep.subr.bf16.mxu1 %v4976_v14  ;;  %v5064_v13 = vld [vmem:[%s6711_s1 + $0x3c0] ss:$8 sps:$4 sm:$0xff]   ;;  %v5067_v14 = vld [vmem:[%s6712_s0 + $0x390] ss:$72 sps:$4 sm:$0xff]  }
  0xc9   :  { %3413 = vmatprep.subr.bf16.mxu0 %v4980_v15  ;;  %v5068_v15 = vld [vmem:[%s6711_s1 + $0x7c0] ss:$8 sps:$4 sm:$0xff]  }
  0xca   :  { %2887 = vmatmul.mubr.bf16.gmra.mrb[4].mxu1 %v4973_v16  ;;  %v5073_v16 = vld [vmem:[%s6711_s1 + $0x3d4] ss:$8 sps:$4 sm:$0xff]  }
  0xcb   :  { %3339 = vmatmul.mubr.bf16.gmra.mrb[4].mxu0 %v4977_v18  ;;  %2962 = vmatpush1.bf16.msra.mxu1 %v4974_v17  ;;  %v5076_v17 = vld [vmem:[%s6711_s1 + $0x7d4] ss:$8 sps:$4 sm:$0xff]   ;;  %v5077_v18 = vld [vmem:[%s6712_s0 + $0x404] ss:$72 sps:$4 sm:$0xff]  }
  0xcc   :  { %3414 = vmatpush1.bf16.msra.mxu0 %v4978_v19  ;;  %2963 = vmatprep.subr.bf16.mxu1 %v4983_v20  ;;  %v5079_v19 = vld [vmem:[%s6712_s0 + $0x424] ss:$72 sps:$4 sm:$0xff]   ;;  %v5071_v20 = vld [vmem:[%s6711_s1 + $0x3d0] ss:$8 sps:$4 sm:$0xff]  }
  0xcd   :  { %3415 = vmatprep.subr.bf16.mxu0 %v4986_v21  ;;  %2896 = vmatprep.mubr.bf16.mxu1 %v4987_v22  ;;  %v5074_v21 = vld [vmem:[%s6711_s1 + $0x7d0] ss:$8 sps:$4 sm:$0xff]   ;;  %v5084_v22 = vld [vmem:[%s6711_s1 + $0x3e4] ss:$8 sps:$4 sm:$0xff]  }
  0xce   :  { %3348 = vmatprep.mubr.bf16.mxu0 %v4989_v23  ;;  %v5088_v23 = vld [vmem:[%s6711_s1 + $0x7e4] ss:$8 sps:$4 sm:$0xff]  }
  0xcf   :  { %2964 = vmatpush1.bf16.msra.mxu1 %v4981_v24  ;;  %v5081_v24 = vld [vmem:[%s6712_s0 + $0x400] ss:$72 sps:$4 sm:$0xff]  }
  0xd0   :  { %3416 = vmatpush1.bf16.msra.mxu0 %v4984_v25  ;;  %2965 = vmatprep.subr.bf16.mxu1 %v4994_v26  ;;  %v5082_v25 = vld [vmem:[%s6711_s1 + $0x3e0] ss:$8 sps:$4 sm:$0xff]  }
  0xd1   :  { %3417 = vmatprep.subr.bf16.mxu0 %v4998_v27  ;;  %v5085_v26 = vld [vmem:[%s6712_s0 + $0x420] ss:$72 sps:$4 sm:$0xff]  }
  0xd2   :  { %2897 = vmatmul.mubr.bf16.gmra.mrb[8].mxu1 %v4991_v28  ;;  %v5086_v27 = vld [vmem:[%s6711_s1 + $0x7e0] ss:$8 sps:$4 sm:$0xff]   ;;  %v5091_v28 = vld [vmem:[%s6711_s1 + $0x3f4] ss:$8 sps:$4 sm:$0xff]  }
  0xd3   :  { %3349 = vmatmul.mubr.bf16.gmra.mrb[8].mxu0 %v4995_v30  ;;  %2966 = vmatpush1.bf16.msra.mxu1 %v4992_v29  ;;  %v5094_v29 = vld [vmem:[%s6711_s1 + $0x7f4] ss:$8 sps:$4 sm:$0xff]  }
  0xd4   :  { %3418 = vmatpush1.bf16.msra.mxu0 %v4996_v31  ;;  %2967 = vmatprep.subr.bf16.mxu1 %v5001_v32  ;;  %v5097_v30 = vld [vmem:[%s6712_s0 + $0x1c] ss:$72 sps:$4 sm:$0xff]   ;;  %v5089_v32 = vld [vmem:[%s6711_s1 + $0x3f0] ss:$8 sps:$4 sm:$0xff]  }
  0xd5   :  { %3419 = vmatprep.subr.bf16.mxu0 %v5004_v33  ;;  %2906 = vmatprep.mubr.bf16.mxu1 %v5005_v34  ;;  %v5100_v31 = vld [vmem:[%s6712_s0 + $0x3c] ss:$72 sps:$4 sm:$0xff]   ;;  %v5092_v33 = vld [vmem:[%s6711_s1 + $0x7f0] ss:$8 sps:$4 sm:$0xff]  }
  0xd6   :  { %3358 = vmatprep.mubr.bf16.mxu0 %v5007_v35  ;;  %v5103_v34 = vld [vmem:[%s6711_s1 + $0x804] ss:$8 sps:$4 sm:$0xff]   ;;  %v5095_v35 = vld [vmem:[%s6712_s0 + $0x18] ss:$72 sps:$4 sm:$0xff]  }
  0xd7   :  { %2968 = vmatpush1.bf16.msra.mxu1 %v4999_v36  ;;  %v5098_v36 = vld [vmem:[%s6712_s0 + $0x38] ss:$72 sps:$4 sm:$0xff]  }
  0xd8   :  { %3420 = vmatpush1.bf16.msra.mxu0 %v5002_v37  ;;  %2969 = vmatprep.subr.bf16.mxu1 %v5012_v38  ;;  %v5101_v37 = vld [vmem:[%s6711_s1 + $0x800] ss:$8 sps:$4 sm:$0xff]   ;;  %v5106_v38 = vld [vmem:[%s6711_s1 + $0x814] ss:$8 sps:$4 sm:$0xff]  }
  0xd9   :  { %3421 = vmatprep.subr.bf16.mxu0 %v5016_v39  ;;  %v5107_v39 = vld [vmem:[%s6712_s0 + $0xac] ss:$72 sps:$4 sm:$0xff]  }
  0xda   :  { %2907 = vmatmul.mubr.bf16.gmra.mrb[12].mxu1 %v5009_v40  ;;  %v5109_v40 = vld [vmem:[%s6712_s0 + $0xcc] ss:$72 sps:$4 sm:$0xff]  }
  0xdb   :  { %3359 = vmatmul.mubr.bf16.gmra.mrb[12].mxu0 %v5013_v42  ;;  %2970 = vmatpush1.bf16.msra.mxu1 %v5010_v41  ;;  %v5104_v41 = vld [vmem:[%s6711_s1 + $0x810] ss:$8 sps:$4 sm:$0xff]   ;;  %v5115_v42 = vld [vmem:[%s6711_s1 + $0x824] ss:$8 sps:$4 sm:$0xff]  }
  0xdc   :  { %3422 = vmatpush1.bf16.msra.mxu0 %v5014_v43  ;;  %2971 = vmatprep.subr.bf16.mxu1 %v5019_v44  ;;  %v5111_v43 = vld [vmem:[%s6712_s0 + $0xa8] ss:$72 sps:$4 sm:$0xff]  }
  0xdd   :  { %3423 = vmatprep.subr.bf16.mxu0 %v5022_v45  ;;  %2916 = vmatprep.mubr.bf16.mxu1 %v5023_v46  ;;  %v5112_v44 = vld [vmem:[%s6712_s0 + $0xc8] ss:$72 sps:$4 sm:$0xff]   ;;  %v5118_v46 = vld [vmem:[%s6711_s1 + $0x834] ss:$8 sps:$4 sm:$0xff]  }
  0xde   :  { %3368 = vmatprep.mubr.bf16.mxu0 %v5025_v47  ;;  %v5113_v45 = vld [vmem:[%s6711_s1 + $0x820] ss:$8 sps:$4 sm:$0xff]   ;;  %v5119_v47 = vld [vmem:[%s6712_s0 + $0x13c] ss:$72 sps:$4 sm:$0xff]  }
  0xdf   :  { %2972 = vmatpush1.bf16.msra.mxu1 %v5017_v48  ;;  %v5121_v48 = vld [vmem:[%s6712_s0 + $0x15c] ss:$72 sps:$4 sm:$0xff]  }
  0xe0   :  { %3424 = vmatpush1.bf16.msra.mxu0 %v5020_v49  ;;  %2973 = vmatprep.subr.bf16.mxu1 %v5030_v50  ;;  %v5116_v49 = vld [vmem:[%s6711_s1 + $0x830] ss:$8 sps:$4 sm:$0xff]   ;;  %v5127_v50 = vld [vmem:[%s6711_s1 + $0x844] ss:$8 sps:$4 sm:$0xff]  }
  0xe1   :  { %3425 = vmatprep.subr.bf16.mxu0 %v5034_v51  ;;  %v5123_v51 = vld [vmem:[%s6712_s0 + $0x138] ss:$72 sps:$4 sm:$0xff]  }
  0xe2   :  { %2917 = vmatmul.mubr.bf16.gmra.mrb[16].mxu1 %v5027_v52  ;;  %v5124_v52 = vld [vmem:[%s6712_s0 + $0x158] ss:$72 sps:$4 sm:$0xff]  }
  0xe3   :  { %3369 = vmatmul.mubr.bf16.gmra.mrb[16].mxu0 %v5031_v54  ;;  %2974 = vmatpush1.bf16.msra.mxu1 %v5028_v53  ;;  %v5125_v53 = vld [vmem:[%s6711_s1 + $0x840] ss:$8 sps:$4 sm:$0xff]   ;;  %v5130_v54 = vld [vmem:[%s6711_s1 + $0x854] ss:$8 sps:$4 sm:$0xff]  }
  0xe4   :  { %3426 = vmatpush1.bf16.msra.mxu0 %v5032_v55  ;;  %2975 = vmatprep.subr.bf16.mxu1 %v5037_v56  ;;  %v5131_v55 = vld [vmem:[%s6712_s0 + $0x1cc] ss:$72 sps:$4 sm:$0xff]  }
  0xe5   :  { %3427 = vmatprep.subr.bf16.mxu0 %v5040_v57  ;;  %2926 = vmatprep.mubr.bf16.mxu1 %v5041_v58  ;;  %v5133_v56 = vld [vmem:[%s6712_s0 + $0x1ec] ss:$72 sps:$4 sm:$0xff]   ;;  %v5128_v57 = vld [vmem:[%s6711_s1 + $0x850] ss:$8 sps:$4 sm:$0xff]  }
  0xe6   :  { %3378 = vmatprep.mubr.bf16.mxu0 %v5043_v59  ;;  %v5139_v58 = vld [vmem:[%s6711_s1 + $0x864] ss:$8 sps:$4 sm:$0xff]   ;;  %v5135_v59 = vld [vmem:[%s6712_s0 + $0x1c8] ss:$72 sps:$4 sm:$0xff]  }
  0xe7   :  { %2976 = vmatpush1.bf16.msra.mxu1 %v5035_v60  ;;  %v5136_v60 = vld [vmem:[%s6712_s0 + $0x1e8] ss:$72 sps:$4 sm:$0xff]  }
  0xe8   :  { %3428 = vmatpush1.bf16.msra.mxu0 %v5038_v61  ;;  %2977 = vmatprep.subr.bf16.mxu1 %v5048_v62  ;;  %v5137_v61 = vld [vmem:[%s6711_s1 + $0x860] ss:$8 sps:$4 sm:$0xff]   ;;  %v5142_v62 = vld [vmem:[%s6711_s1 + $0x874] ss:$8 sps:$4 sm:$0xff]  }
  0xe9   :  { %3429 = vmatprep.subr.bf16.mxu0 %v5052_v63  ;;  %v5143_v63 = vld [vmem:[%s6712_s0 + $0x25c] ss:$72 sps:$4 sm:$0xff]  }
  0xea   :  { %2927 = vmatmul.mubr.bf16.gmra.mrb[20].mxu1 %v5045_v0  ;;  %v5145_v0 = vld [vmem:[%s6712_s0 + $0x27c] ss:$72 sps:$4 sm:$0xff]  }
  0xeb   :  { %3379 = vmatmul.mubr.bf16.gmra.mrb[20].mxu0 %v5049_v2  ;;  %2978 = vmatpush1.bf16.msra.mxu1 %v5046_v1  ;;  %v5140_v1 = vld [vmem:[%s6711_s1 + $0x870] ss:$8 sps:$4 sm:$0xff]   ;;  %v5151_v2 = vld [vmem:[%s6711_s1 + $0x884] ss:$8 sps:$4 sm:$0xff]  }
  0xec   :  { %3430 = vmatpush1.bf16.msra.mxu0 %v5050_v3  ;;  %2979 = vmatprep.subr.bf16.mxu1 %v5055_v4  ;;  %v5147_v3 = vld [vmem:[%s6712_s0 + $0x258] ss:$72 sps:$4 sm:$0xff]  }
  0xed   :  { %3431 = vmatprep.subr.bf16.mxu0 %v5058_v5  ;;  %2936 = vmatprep.mubr.bf16.mxu1 %v5059_v6  ;;  %v5148_v4 = vld [vmem:[%s6712_s0 + $0x278] ss:$72 sps:$4 sm:$0xff]   ;;  %v5154_v6 = vld [vmem:[%s6711_s1 + $0x894] ss:$8 sps:$4 sm:$0xff]  }
  0xee   :  { %3388 = vmatprep.mubr.bf16.mxu0 %v5061_v7  ;;  %v5149_v5 = vld [vmem:[%s6711_s1 + $0x880] ss:$8 sps:$4 sm:$0xff]   ;;  %v5155_v7 = vld [vmem:[%s6712_s0 + $0x2ec] ss:$72 sps:$4 sm:$0xff]  }
  0xef   :  { %2980 = vmatpush1.bf16.msra.mxu1 %v5053_v8  ;;  %v5157_v8 = vld [vmem:[%s6712_s0 + $0x30c] ss:$72 sps:$4 sm:$0xff]  }
  0xf0   :  { %3432 = vmatpush1.bf16.msra.mxu0 %v5056_v9  ;;  %2981 = vmatprep.subr.bf16.mxu1 %v5066_v10  ;;  %v5152_v9 = vld [vmem:[%s6711_s1 + $0x890] ss:$8 sps:$4 sm:$0xff]   ;;  %v5163_v10 = vld [vmem:[%s6711_s1 + $0x8a4] ss:$8 sps:$4 sm:$0xff]  }
  0xf1   :  { %3433 = vmatprep.subr.bf16.mxu0 %v5070_v11  ;;  %v5159_v11 = vld [vmem:[%s6712_s0 + $0x2e8] ss:$72 sps:$4 sm:$0xff]  }
  0xf2   :  { %2937 = vmatmul.mubr.bf16.gmra.mrb[24].mxu1 %v5063_v12  ;;  %v5160_v12 = vld [vmem:[%s6712_s0 + $0x308] ss:$72 sps:$4 sm:$0xff]  }
  0xf3   :  { %3389 = vmatmul.mubr.bf16.gmra.mrb[24].mxu0 %v5067_v14  ;;  %2982 = vmatpush1.bf16.msra.mxu1 %v5064_v13  ;;  %v5161_v13 = vld [vmem:[%s6711_s1 + $0x8a0] ss:$8 sps:$4 sm:$0xff]   ;;  %v5166_v14 = vld [vmem:[%s6711_s1 + $0x8b4] ss:$8 sps:$4 sm:$0xff]  }
  0xf4   :  { %3434 = vmatpush1.bf16.msra.mxu0 %v5068_v15  ;;  %2983 = vmatprep.subr.bf16.mxu1 %v5073_v16  ;;  %v5167_v15 = vld [vmem:[%s6712_s0 + $0x37c] ss:$72 sps:$4 sm:$0xff]  }
  0xf5   :  { %3435 = vmatprep.subr.bf16.mxu0 %v5076_v17  ;;  %2946 = vmatprep.mubr.bf16.mxu1 %v5077_v18  ;;  %v5169_v16 = vld [vmem:[%s6712_s0 + $0x39c] ss:$72 sps:$4 sm:$0xff]   ;;  %v5164_v17 = vld [vmem:[%s6711_s1 + $0x8b0] ss:$8 sps:$4 sm:$0xff]  }
  0xf6   :  { %3398 = vmatprep.mubr.bf16.mxu0 %v5079_v19  ;;  %v5175_v18 = vld [vmem:[%s6711_s1 + $0x8c4] ss:$8 sps:$4 sm:$0xff]   ;;  %v5171_v19 = vld [vmem:[%s6712_s0 + $0x378] ss:$72 sps:$4 sm:$0xff]  }
  0xf7   :  { %2984 = vmatpush1.bf16.msra.mxu1 %v5071_v20  ;;  %v5172_v20 = vld [vmem:[%s6712_s0 + $0x398] ss:$72 sps:$4 sm:$0xff]  }
  0xf8   :  { %3436 = vmatpush1.bf16.msra.mxu0 %v5074_v21  ;;  %2985 = vmatprep.subr.bf16.mxu1 %v5084_v22  ;;  %v5173_v21 = vld [vmem:[%s6711_s1 + $0x8c0] ss:$8 sps:$4 sm:$0xff]   ;;  %v5178_v22 = vld [vmem:[%s6711_s1 + $0x8d4] ss:$8 sps:$4 sm:$0xff]  }
  0xf9   :  { %3437 = vmatprep.subr.bf16.mxu0 %v5088_v23  ;;  %v5179_v23 = vld [vmem:[%s6712_s0 + $0x40c] ss:$72 sps:$4 sm:$0xff]  }
  0xfa   :  { %2947 = vmatmul.mubr.bf16.gmra.mrb[28].mxu1 %v5081_v24  ;;  %v5181_v24 = vld [vmem:[%s6712_s0 + $0x42c] ss:$72 sps:$4 sm:$0xff]  }
  0xfb   :  { %3399 = vmatmul.mubr.bf16.gmra.mrb[28].mxu0 %v5085_v26  ;;  %2986 = vmatpush1.bf16.msra.mxu1 %v5082_v25  ;;  %v5176_v25 = vld [vmem:[%s6711_s1 + $0x8d0] ss:$8 sps:$4 sm:$0xff]   ;;  %v5187_v26 = vld [vmem:[%s6711_s1 + $0x8e4] ss:$8 sps:$4 sm:$0xff]  }
  0xfc   :  { %3438 = vmatpush1.bf16.msra.mxu0 %v5086_v27  ;;  %2987 = vmatprep.subr.bf16.mxu1 %v5091_v28  ;;  %v5183_v27 = vld [vmem:[%s6712_s0 + $0x408] ss:$72 sps:$4 sm:$0xff]  }
  0xfd   :  { %3439 = vmatprep.subr.bf16.mxu0 %v5094_v29  ;;  %2989 = vmatprep.mubr.bf16.mxu1 %v5097_v30  ;;  %v5184_v28 = vld [vmem:[%s6712_s0 + $0x428] ss:$72 sps:$4 sm:$0xff]   ;;  %v5190_v30 = vld [vmem:[%s6711_s1 + $0x8f4] ss:$8 sps:$4 sm:$0xff]  }
  0xfe   :  { %3441 = vmatprep.mubr.bf16.mxu0 %v5100_v31  ;;  %v5185_v29 = vld [vmem:[%s6711_s1 + $0x8e0] ss:$8 sps:$4 sm:$0xff]   ;;  %v5193_v31 = vld [vmem:[%s6712_s0 + $0x44] ss:$72 sps:$4 sm:$0xff]  }
  0xff   :  { %2988 = vmatpush1.bf16.msra.mxu1 %v5089_v32  ;;  %v5196_v32 = vld [vmem:[%s6712_s0 + $0x284] ss:$72 sps:$4 sm:$0xff]  }
 0x100   :  { %3440 = vmatpush1.bf16.msra.mxu0 %v5092_v33  ;;  %4247 = vmatprep.subr.bf16.mxu1 %v5103_v34  ;;  %v5188_v33 = vld [vmem:[%s6711_s1 + $0x8f0] ss:$8 sps:$4 sm:$0xff]  }
 0x101   :  { %3522 = vmatprep.subr.bf16.mxu0 %v5103_v34  ;;  %v5191_v34 = vld [vmem:[%s6712_s0 + $0x40] ss:$72 sps:$4 sm:$0xff]  }
 0x102   :  { %2990 = vmatmul.mubr.bf16.vlgmr.msra.gmra.mrb[0].mxu1 %v5095_v35  ;;  %v5194_v35 = vld [vmem:[%s6712_s0 + $0x280] ss:$72 sps:$4 sm:$0xff]  }
 0x103   :  { %3442 = vmatmul.mubr.bf16.vlgmr.msra.gmra.mrb[0].mxu0 %v5098_v36  ;;  %4263 = vmatpush1.bf16.msra.mxu1 %v5101_v37  ;;  %v5197_v36 = vld [vmem:[%s6712_s0 + $0xd4] ss:$72 sps:$4 sm:$0xff]  }
 0x104   :  { %3523 = vmatpush1.bf16.msra.mxu0 %v5101_v37  ;;  %4248 = vmatprep.subr.bf16.mxu1 %v5106_v38  ;;  %v5199_v37 = vld [vmem:[%s6712_s0 + $0x314] ss:$72 sps:$4 sm:$0xff]  }
 0x105   :  { %3524 = vmatprep.subr.bf16.mxu0 %v5106_v38  ;;  %2999 = vmatprep.mubr.bf16.mxu1 %v5107_v39  ;;  %v5201_v38 = vld [vmem:[%s6712_s0 + $0xd0] ss:$72 sps:$4 sm:$0xff]  }
 0x106   :  { %3451 = vmatprep.mubr.bf16.mxu0 %v5109_v40  ;;  %v5202_v39 = vld [vmem:[%s6712_s0 + $0x310] ss:$72 sps:$4 sm:$0xff]   ;;  %v5203_v40 = vld [vmem:[%s6712_s0 + $0x164] ss:$72 sps:$4 sm:$0xff]  }
 0x107   :  { %4264 = vmatpush1.bf16.msra.mxu1 %v5104_v41 }
 0x108   :  { %3525 = vmatpush1.bf16.msra.mxu0 %v5104_v41  ;;  %4249 = vmatprep.subr.bf16.mxu1 %v5115_v42  ;;  %v5205_v41 = vld [vmem:[%s6712_s0 + $0x3a4] ss:$72 sps:$4 sm:$0xff]  }
 0x109   :  { %3526 = vmatprep.subr.bf16.mxu0 %v5115_v42  ;;  %v5207_v42 = vld [vmem:[%s6712_s0 + $0x160] ss:$72 sps:$4 sm:$0xff]  }
 0x10a   :  { %3000 = vmatmul.mubr.bf16.gmra.mrb[4].mxu1 %v5111_v43  ;;  %v5208_v43 = vld [vmem:[%s6712_s0 + $0x3a0] ss:$72 sps:$4 sm:$0xff]  }
 0x10b   :  { %3452 = vmatmul.mubr.bf16.gmra.mrb[4].mxu0 %v5112_v44  ;;  %4265 = vmatpush1.bf16.msra.mxu1 %v5113_v45  ;;  %v5209_v44 = vld [vmem:[%s6712_s0 + $0x1f4] ss:$72 sps:$4 sm:$0xff]  }
 0x10c   :  { %3527 = vmatpush1.bf16.msra.mxu0 %v5113_v45  ;;  %4250 = vmatprep.subr.bf16.mxu1 %v5118_v46  ;;  %v5211_v45 = vld [vmem:[%s6712_s0 + $0x434] ss:$72 sps:$4 sm:$0xff]  }
 0x10d   :  { %3528 = vmatprep.subr.bf16.mxu0 %v5118_v46  ;;  %3009 = vmatprep.mubr.bf16.mxu1 %v5119_v47  ;;  %v5213_v46 = vld [vmem:[%s6712_s0 + $0x1f0] ss:$72 sps:$4 sm:$0xff]  }
 0x10e   :  { %3461 = vmatprep.mubr.bf16.mxu0 %v5121_v48  ;;  %v5214_v47 = vld [vmem:[%s6712_s0 + $0x430] ss:$72 sps:$4 sm:$0xff]  }
 0x10f   :  { %4266 = vmatpush1.bf16.msra.mxu1 %v5116_v49 }
 0x110   :  { %3529 = vmatpush1.bf16.msra.mxu0 %v5116_v49  ;;  %4251 = vmatprep.subr.bf16.mxu1 %v5127_v50 }
 0x111   :  { %3530 = vmatprep.subr.bf16.mxu0 %v5127_v50 }
 0x112   :  { %3010 = vmatmul.mubr.bf16.gmra.mrb[8].mxu1 %v5123_v51 }
 0x113   :  { %3462 = vmatmul.mubr.bf16.gmra.mrb[8].mxu0 %v5124_v52  ;;  %4267 = vmatpush1.bf16.msra.mxu1 %v5125_v53 }
 0x114   :  { %3531 = vmatpush1.bf16.msra.mxu0 %v5125_v53  ;;  %4252 = vmatprep.subr.bf16.mxu1 %v5130_v54 }
 0x115   :  { %3532 = vmatprep.subr.bf16.mxu0 %v5130_v54  ;;  %3019 = vmatprep.mubr.bf16.mxu1 %v5131_v55 }
 0x116   :  { %3471 = vmatprep.mubr.bf16.mxu0 %v5133_v56 }
 0x117   :  { %4268 = vmatpush1.bf16.msra.mxu1 %v5128_v57 }
 0x118   :  { %3533 = vmatpush1.bf16.msra.mxu0 %v5128_v57  ;;  %4253 = vmatprep.subr.bf16.mxu1 %v5139_v58 }
 0x119   :  { %3534 = vmatprep.subr.bf16.mxu0 %v5139_v58 }
 0x11a   :  { %3020 = vmatmul.mubr.bf16.gmra.mrb[12].mxu1 %v5135_v59  ;;  %v448_v59 = vlaneseq }
 0x11b   :  { %3472 = vmatmul.mubr.bf16.gmra.mrb[12].mxu0 %v5136_v60  ;;  %4269 = vmatpush1.bf16.msra.mxu1 %v5137_v61 }
 0x11c   :  { %3535 = vmatpush1.bf16.msra.mxu0 %v5137_v61  ;;  %4254 = vmatprep.subr.bf16.mxu1 %v5142_v62  ;;  %v449_v61 = vshrl.u32 %v448_v59, 7 }
 0x11d   :  { %3536 = vmatprep.subr.bf16.mxu0 %v5142_v62  ;;  %3029 = vmatprep.mubr.bf16.mxu1 %v5143_v63 }
 0x11e   :  { %3481 = vmatprep.mubr.bf16.mxu0 %v5145_v0 }
 0x11f   :  { %4270 = vmatpush1.bf16.msra.mxu1 %v5140_v1 }
 0x120   :  { %3537 = vmatpush1.bf16.msra.mxu0 %v5140_v1  ;;  %4255 = vmatprep.subr.bf16.mxu1 %v5151_v2  ;;  %v450_v1 = vsub.s32 0, %v449_v61 }
 0x121   :  { %3538 = vmatprep.subr.bf16.mxu0 %v5151_v2 }
 0x122   :  { %3030 = vmatmul.mubr.bf16.gmra.mrb[16].mxu1 %v5147_v3  ;;  %v446_v3 = vld [vmem:[%s6713_s2] sm:$0x3] }
 0x123   :  { %3482 = vmatmul.mubr.bf16.gmra.mrb[16].mxu0 %v5148_v4  ;;  %4271 = vmatpush1.bf16.msra.mxu1 %v5149_v5  ;;  %v454_v4 = vsub.s32 1, %v449_v61 }
 0x124   :  { %3539 = vmatpush1.bf16.msra.mxu0 %v5149_v5  ;;  %4256 = vmatprep.subr.bf16.mxu1 %v5154_v6  ;;  %v6566_v5 = vrot.slane %v446_v3, %v450_v1 }
 0x125   :  { %3540 = vmatprep.subr.bf16.mxu0 %v5154_v6  ;;  %3039 = vmatprep.mubr.bf16.mxu1 %v5155_v7  ;;  %v6568_v6 = vrot.slane %v446_v3, %v454_v4 }
 0x126   :  { %3491 = vmatprep.mubr.bf16.mxu0 %v5157_v8 }
 0x127   :  { %4272 = vmatpush1.bf16.msra.mxu1 %v5152_v9 }
 0x128   :  { %3541 = vmatpush1.bf16.msra.mxu0 %v5152_v9  ;;  %4257 = vmatprep.subr.bf16.mxu1 %v5163_v10 }
 0x129   :  { %3542 = vmatprep.subr.bf16.mxu0 %v5163_v10 }
 0x12a   :  { %3040 = vmatmul.mubr.bf16.gmra.mrb[20].mxu1 %v5159_v11 }
 0x12b   :  { %3492 = vmatmul.mubr.bf16.gmra.mrb[20].mxu0 %v5160_v12  ;;  %4273 = vmatpush1.bf16.msra.mxu1 %v5161_v13 }
 0x12c   :  { %3543 = vmatpush1.bf16.msra.mxu0 %v5161_v13  ;;  %4258 = vmatprep.subr.bf16.mxu1 %v5166_v14 }
 0x12d   :  { %3544 = vmatprep.subr.bf16.mxu0 %v5166_v14  ;;  %3049 = vmatprep.mubr.bf16.mxu1 %v5167_v15 }
 0x12e   :  { %3501 = vmatprep.mubr.bf16.mxu0 %v5169_v16 }
 0x12f   :  { %4274 = vmatpush1.bf16.msra.mxu1 %v5164_v17 }
 0x130   :  { %3545 = vmatpush1.bf16.msra.mxu0 %v5164_v17  ;;  %4259 = vmatprep.subr.bf16.mxu1 %v5175_v18 }
 0x131   :  { %3546 = vmatprep.subr.bf16.mxu0 %v5175_v18 }
 0x132   :  { %3050 = vmatmul.mubr.bf16.gmra.mrb[24].mxu1 %v5171_v19 }
 0x133   :  { %3502 = vmatmul.mubr.bf16.gmra.mrb[24].mxu0 %v5172_v20  ;;  %4275 = vmatpush1.bf16.msra.mxu1 %v5173_v21 }
 0x134   :  { %3547 = vmatpush1.bf16.msra.mxu0 %v5173_v21  ;;  %4260 = vmatprep.subr.bf16.mxu1 %v5178_v22 }
 0x135   :  { %3548 = vmatprep.subr.bf16.mxu0 %v5178_v22  ;;  %3059 = vmatprep.mubr.bf16.mxu1 %v5179_v23 }
 0x136   :  { %3511 = vmatprep.mubr.bf16.mxu0 %v5181_v24 }
 0x137   :  { %4276 = vmatpush1.bf16.msra.mxu1 %v5176_v25 }
 0x138   :  { %3549 = vmatpush1.bf16.msra.mxu0 %v5176_v25  ;;  %4261 = vmatprep.subr.bf16.mxu1 %v5187_v26 }
 0x139   :  { %3550 = vmatprep.subr.bf16.mxu0 %v5187_v26 }
 0x13a   :  { %3060 = vmatmul.mubr.bf16.gmra.mrb[28].mxu1 %v5183_v27 }
 0x13b   :  { %3512 = vmatmul.mubr.bf16.gmra.mrb[28].mxu0 %v5184_v28  ;;  %4277 = vmatpush1.bf16.msra.mxu1 %v5185_v29 }
 0x13c   :  { %3551 = vmatpush1.bf16.msra.mxu0 %v5185_v29  ;;  %4262 = vmatprep.subr.bf16.mxu1 %v5190_v30 }
 0x13d   :  { %3552 = vmatprep.subr.bf16.mxu0 %v5190_v30  ;;  %3554 = vmatprep.mubr.bf16.mxu0 %v5193_v31 }
 0x13e   :  { %3594 = vmatprep.mubr.bf16.mxu1 %v5196_v32 }
 0x13f   :  { %4278 = vmatpush1.bf16.msra.mxu1 %v5188_v33 }
 0x140   :  { %3553 = vmatpush1.bf16.msra.mxu0 %v5188_v33 }
 0x142   :  { %3595 = vmatmul.mubr.bf16.vlgmr.msra.gmra.mrb[32].mxu1 %v5194_v35 }
 0x143   :  { %3555 = vmatmul.mubr.bf16.vlgmr.msra.gmra.mrb[0].mxu0 %v5191_v34  ;;  %3604 = vmatprep.mubr.bf16.mxu1 %v5199_v37 }
 0x144   :  { %3564 = vmatprep.mubr.bf16.mxu0 %v5197_v36 }
 0x14a   :  { %3605 = vmatmul.mubr.bf16.gmra.mrb[36].mxu1 %v5202_v39 }
 0x14b   :  { %3565 = vmatmul.mubr.bf16.gmra.mrb[4].mxu0 %v5201_v38  ;;  %3614 = vmatprep.mubr.bf16.mxu1 %v5205_v41 }
 0x14c   :  { %3574 = vmatprep.mubr.bf16.mxu0 %v5203_v40 }
 0x152   :  { %3615 = vmatmul.mubr.bf16.gmra.mrb[40].mxu1 %v5208_v43 }
 0x153   :  { %3575 = vmatmul.mubr.bf16.gmra.mrb[8].mxu0 %v5207_v42  ;;  %3624 = vmatprep.mubr.bf16.mxu1 %v5211_v45 }
 0x154   :  { %3584 = vmatprep.mubr.bf16.mxu0 %v5209_v44 }
 0x15a   :  { %3625 = vmatmul.mubr.bf16.gmra.mrb[44].mxu1 %v5214_v47 }
 0x15b   :  { %3585 = vmatmul.mubr.bf16.gmra.mrb[12].mxu0 %v5213_v46 }
 0x1d5   :  { %v6531_v48 = vpop.f32.mrb[0].mxu1 }
 0x1d6   :  { %v6533_v49 = vpop.f32.mrb[1].mxu1 }
 0x1d7   :  { %v6535_v50 = vpop.f32.mrb[2].mxu1 }
 0x1d8   :  { %v6537_v51 = vpop.f32.mrb[3].mxu1 }
 0x1dd   :  { %v6539_v52 = vpop.f32.mrb[4].mxu1 }
 0x1de   :  { %v6541_v53 = vpop.f32.mrb[5].mxu1 }
 0x1df   :  { %v6543_v54 = vpop.f32.mrb[6].mxu1 }
 0x1e0   :  { %v6545_v55 = vpop.f32.mrb[7].mxu1 }
 0x1e5   :  { %v6547_v56 = vpop.f32.mrb[8].mxu1 }
 0x1e6   :  { %v6549_v57 = vpop.f32.mrb[9].mxu1 }
 0x1e7   :  { %v6551_v58 = vpop.f32.mrb[10].mxu1 }
 0x1e8   :  { %v6553_v60 = vpop.f32.mrb[11].mxu1 }
 0x1ed   :  { %v6555_v62 = vpop.f32.mrb[12].mxu1 }
 0x1ee   :  { %v6557_v63 = vpop.f32.mrb[13].mxu1 }
 0x1ef   :  { %v6559_v0 = vpop.f32.mrb[14].mxu1 }
 0x1f0   :  { %v6561_v2 = vpop.f32.mrb[15].mxu1 }
 0x1f5   :  { %v3031_v7 = vpop.f32.mrb[16].mxu1 }
 0x1f6   :  { %v3483_v8 = vpop.f32.mrb[16].mxu0  ;;  %v4311_v9 = vadd.f32 %v3031_v7, %v6566_v5  ;;  %v3033_v10 = vpop.f32.mrb[17].mxu1 }
 0x1f7   :  { %v3485_v11 = vpop.f32.mrb[17].mxu0  ;;  %v4314_v12 = vadd.f32 %v3033_v10, %v6568_v6  ;;  %v3035_v13 = vpop.f32.mrb[18].mxu1 }
 0x1f8   :  { %v3487_v14 = vpop.f32.mrb[18].mxu0  ;;  %v4312_v15 = vadd.f32 %v4311_v9, %v3483_v8  ;;  %v4317_v16 = vadd.f32 %v3035_v13, %v6566_v5  ;;  %v3037_v17 = vpop.f32.mrb[19].mxu1 }
 0x1f9   :  { %v3489_v18 = vpop.f32.mrb[19].mxu0  ;;  %v6573_v19 = vadd.f32 %v4314_v12, %v3485_v11  ;;  %v4320_v20 = vadd.f32 %v3037_v17, %v6568_v6 }
 0x1fa   :  { %v6576_v21 = vadd.f32 %v4317_v16, %v3487_v14 }
 0x1fb   :  { %v6578_v22 = vadd.f32 %v4320_v20, %v3489_v18 }
 0x1fd   :  { %v3041_v23 = vpop.f32.mrb[20].mxu1 }
 0x1fe   :  { %v3493_v24 = vpop.f32.mrb[20].mxu0  ;;  %v4323_v25 = vadd.f32 %v3041_v23, %v6566_v5  ;;  %v3043_v26 = vpop.f32.mrb[21].mxu1 }
 0x1ff   :  { %v3495_v27 = vpop.f32.mrb[21].mxu0  ;;  %v4326_v28 = vadd.f32 %v3043_v26, %v6568_v6  ;;  %v3045_v29 = vpop.f32.mrb[22].mxu1 }
 0x200   :  { %v3497_v30 = vpop.f32.mrb[22].mxu0  ;;  %v6582_v31 = vadd.f32 %v4323_v25, %v3493_v24  ;;  %v4329_v32 = vadd.f32 %v3045_v29, %v6566_v5  ;;  %v3047_v33 = vpop.f32.mrb[23].mxu1  ;;  %v4279_v29 = vadd.f32 %v6531_v48, %v6566_v5 }
 0x201   :  { %v3499_v34 = vpop.f32.mrb[23].mxu0  ;;  %v6585_v35 = vadd.f32 %v4326_v28, %v3495_v27  ;;  %v4332_v36 = vadd.f32 %v3047_v33, %v6568_v6 }
 0x202   :  { %v6588_v37 = vadd.f32 %v4329_v32, %v3497_v30  ;;  %v4281_v30 = vadd.f32 %v6533_v49, %v6568_v6 }
 0x203   :  { %v6590_v38 = vadd.f32 %v4332_v36, %v3499_v34  ;;  %v4283_v34 = vadd.f32 %v6535_v50, %v6566_v5 }
 0x205   :  { %v3051_v39 = vpop.f32.mrb[24].mxu1 }
 0x206   :  { %v3503_v40 = vpop.f32.mrb[24].mxu0  ;;  %v4335_v41 = vadd.f32 %v3051_v39, %v6566_v5  ;;  %v3053_v42 = vpop.f32.mrb[25].mxu1 }
 0x207   :  { %v3505_v43 = vpop.f32.mrb[25].mxu0  ;;  %v4338_v44 = vadd.f32 %v3053_v42, %v6568_v6  ;;  %v3055_v45 = vpop.f32.mrb[26].mxu1  ;;  %v4285_v42 = vadd.f32 %v6537_v51, %v6568_v6 }
 0x208   :  { %v3507_v46 = vpop.f32.mrb[26].mxu0  ;;  %v6594_v47 = vadd.f32 %v4335_v41, %v3503_v40  ;;  %v4341_v59 = vadd.f32 %v3055_v45, %v6566_v5  ;;  %v3057_v61 = vpop.f32.mrb[27].mxu1 }
 0x209   :  { %v3509_v1 = vpop.f32.mrb[27].mxu0  ;;  %v6597_v3 = vadd.f32 %v4338_v44, %v3505_v43  ;;  %v4344_v4 = vadd.f32 %v3057_v61, %v6568_v6 }
 0x20a   :  { %v6600_v7 = vadd.f32 %v4341_v59, %v3507_v46 }
 0x20b   :  { %v6602_v8 = vadd.f32 %v4344_v4, %v3509_v1 }
 0x20d   :  { %v3061_v9 = vpop.f32.mrb[28].mxu1 }
 0x20e   :  { %v3513_v10 = vpop.f32.mrb[28].mxu0  ;;  %v4347_v11 = vadd.f32 %v3061_v9, %v6566_v5  ;;  %v3063_v12 = vpop.f32.mrb[29].mxu1 }
 0x20f   :  { %v3515_v13 = vpop.f32.mrb[29].mxu0  ;;  %v4350_v14 = vadd.f32 %v3063_v12, %v6568_v6  ;;  %v3065_v16 = vpop.f32.mrb[30].mxu1 }
 0x210   :  { %v3517_v17 = vpop.f32.mrb[30].mxu0  ;;  %v6606_v18 = vadd.f32 %v4347_v11, %v3513_v10  ;;  %v4353_v20 = vadd.f32 %v3065_v16, %v6566_v5  ;;  %v3067_v23 = vpop.f32.mrb[31].mxu1  ;;  %v4287_v16 = vadd.f32 %v6539_v52, %v6566_v5 }
 0x211   :  { %v3519_v24 = vpop.f32.mrb[31].mxu0  ;;  %v6609_v25 = vadd.f32 %v4350_v14, %v3515_v13  ;;  %v4356_v26 = vadd.f32 %v3067_v23, %v6568_v6 }
 0x212   :  { %v6612_v27 = vadd.f32 %v4353_v20, %v3517_v17  ;;  %v4289_v17 = vadd.f32 %v6541_v53, %v6568_v6 }
 0x213   :  { %v6614_v28 = vadd.f32 %v4356_v26, %v3519_v24  ;;  %v4291_v24 = vadd.f32 %v6543_v54, %v6566_v5 }
 0x215   :  { %v3596_v33 = vpop.f32.mrb[32].mxu1 }
 0x216   :  { %v3556_v32 = vpop.f32.mrb[0].mxu0  ;;  %v4313_v39 = vadd.f32 %v4312_v15, %v3596_v33  ;;  %v3598_v41 = vpop.f32.mrb[33].mxu1 }
 0x217   :  { %v4280_v36 = vadd.f32 %v4279_v29, %v3556_v32  ;;  %v3558_v40 = vpop.f32.mrb[1].mxu0  ;;  %v4316_v44 = vadd.f32 %v6573_v19, %v3598_v41  ;;  %v3600_v48 = vpop.f32.mrb[34].mxu1 }
 0x218   :  { %v4282_v43 = vadd.f32 %v4281_v30, %v3558_v40  ;;  %v3560_v45 = vpop.f32.mrb[2].mxu0  ;;  %v3651_v59 = vmax.f32 %v4313_v39, 0.0  ;;  %v4319_v61 = vadd.f32 %v6576_v21, %v3600_v48  ;;  %v3602_v4 = vpop.f32.mrb[35].mxu1  ;;  %v4293_v30 = vadd.f32 %v6545_v55, %v6568_v6 }
 0x219   :  { %v3635_v46 = vmax.f32 %v4280_v36, 0.0  ;;  %v4284_v49 = vadd.f32 %v4283_v34, %v3560_v45  ;;  %v3562_v1 = vpop.f32.mrb[3].mxu0  ;;  %v3652_v9 = vmax.f32 %v4316_v44, 0.0  ;;  %v4322_v10 = vadd.f32 %v6578_v22, %v3602_v4 }
 0x21a   :  { %v3636_v50 = vmax.f32 %v4282_v43, 0.0  ;;  %v4286_v15 = vadd.f32 %v4285_v42, %v3562_v1  ;;  %v3653_v12 = vmax.f32 %v4319_v61, 0.0  ;;  %v4295_v1 = vadd.f32 %v6547_v56, %v6566_v5 }
 0x21b   :  { %v3637_v11 = vmax.f32 %v4284_v49, 0.0  ;;  %v4239_v13 = vpack.c.bf16 %v3652_v9, %v3651_v59  ;;  %v3654_v19 = vmax.f32 %v4322_v10, 0.0  ;;  %v4297_v4 = vadd.f32 %v6549_v57, %v6568_v6 }
 0x21c   :  { %v4231_v51 = vpack.c.bf16 %v3636_v50, %v3635_v46  ;;  %v3638_v14 = vmax.f32 %v4286_v15, 0.0  ;;  %v4299_v15 = vadd.f32 %v6551_v58, %v6566_v5 }
 0x21d   :  { %3771 = vst [vmem:[%s6714_s3 + $0x40] sm:$0xff] %v4239_v13  ;;  %v4240_v22 = vpack.c.bf16 %v3654_v19, %v3653_v12  ;;  %v3606_v23 = vpop.f32.mrb[36].mxu1  ;;  %v4301_v12 = vadd.f32 %v6553_v60, %v6568_v6 }
 0x21e   :  { %3763 = vst [vmem:[%s6714_s3] sm:$0xff] %v4231_v51  ;;  %v4232_v21 = vpack.c.bf16 %v3638_v14, %v3637_v11  ;;  %v3566_v20 = vpop.f32.mrb[4].mxu0  ;;  %v4325_v52 = vadd.f32 %v6582_v31, %v3606_v23  ;;  %v3608_v53 = vpop.f32.mrb[37].mxu1 }
 0x21f   :  { %v4288_v26 = vadd.f32 %v4287_v16, %v3566_v20  ;;  %v3568_v29 = vpop.f32.mrb[5].mxu0  ;;  %3772 = vst [vmem:[%s6714_s3 + $0x48] sm:$0xff] %v4240_v22  ;;  %v4328_v33 = vadd.f32 %v6585_v35, %v3608_v53  ;;  %v3610_v34 = vpop.f32.mrb[38].mxu1 }
 0x220   :  { %3764 = vst [vmem:[%s6714_s3 + $0x8] sm:$0xff] %v4232_v21  ;;  %v4290_v32 = vadd.f32 %v4289_v17, %v3568_v29  ;;  %v3570_v54 = vpop.f32.mrb[6].mxu0  ;;  %v3655_v31 = vmax.f32 %v4325_v52, 0.0  ;;  %v4331_v40 = vadd.f32 %v6588_v37, %v3610_v34  ;;  %v3612_v55 = vpop.f32.mrb[39].mxu1 }
 0x221   :  { %v3639_v36 = vmax.f32 %v4288_v26, 0.0  ;;  %v4292_v39 = vadd.f32 %v4291_v24, %v3570_v54  ;;  %v3572_v41 = vpop.f32.mrb[7].mxu0  ;;  %v3656_v43 = vmax.f32 %v4328_v33, 0.0  ;;  %v4334_v45 = vadd.f32 %v6590_v38, %v3612_v55 }
 0x222   :  { %v3640_v42 = vmax.f32 %v4290_v32, 0.0  ;;  %v4294_v44 = vadd.f32 %v4293_v30, %v3572_v41  ;;  %v3657_v46 = vmax.f32 %v4331_v40, 0.0  ;;  %v4303_v32 = vadd.f32 %v6555_v62, %v6566_v5 }
 0x223   :  { %v3641_v48 = vmax.f32 %v4292_v39, 0.0  ;;  %v4241_v49 = vpack.c.bf16 %v3656_v43, %v3655_v31  ;;  %v3658_v35 = vmax.f32 %v4334_v45, 0.0  ;;  %v4305_v33 = vadd.f32 %v6557_v63, %v6568_v6 }
 0x224   :  { %v4233_v59 = vpack.c.bf16 %v3640_v42, %v3639_v36  ;;  %v3642_v61 = vmax.f32 %v4294_v44, 0.0  ;;  %v4307_v36 = vadd.f32 %v6559_v0, %v6566_v5  ;;  %v4309_v40 = vadd.f32 %v6561_v2, %v6568_v6 }
 0x225   :  { %3773 = vst [vmem:[%s6714_s3 + $0x50] sm:$0xff] %v4241_v49  ;;  %v4242_v38 = vpack.c.bf16 %v3658_v35, %v3657_v46  ;;  %v3616_v9 = vpop.f32.mrb[40].mxu1 }
 0x226   :  { %3765 = vst [vmem:[%s6714_s3 + $0x10] sm:$0xff] %v4233_v59  ;;  %v4234_v37 = vpack.c.bf16 %v3642_v61, %v3641_v48  ;;  %v3576_v50 = vpop.f32.mrb[8].mxu0  ;;  %v4337_v56 = vadd.f32 %v6594_v47, %v3616_v9  ;;  %v3618_v57 = vpop.f32.mrb[41].mxu1 }
 0x227   :  { %v4296_v10 = vadd.f32 %v4295_v1, %v3576_v50  ;;  %v3578_v11 = vpop.f32.mrb[9].mxu0  ;;  %3774 = vst [vmem:[%s6714_s3 + $0x58] sm:$0xff] %v4242_v38  ;;  %v4340_v13 = vadd.f32 %v6597_v3, %v3618_v57  ;;  %v3620_v14 = vpop.f32.mrb[42].mxu1 }
 0x228   :  { %3766 = vst [vmem:[%s6714_s3 + $0x18] sm:$0xff] %v4234_v37  ;;  %v4298_v51 = vadd.f32 %v4297_v4, %v3578_v11  ;;  %v3580_v58 = vpop.f32.mrb[10].mxu0  ;;  %v3659_v47 = vmax.f32 %v4337_v56, 0.0  ;;  %v4343_v17 = vadd.f32 %v6600_v7, %v3620_v14  ;;  %v3622_v60 = vpop.f32.mrb[43].mxu1 }
 0x229   :  { %v3643_v19 = vmax.f32 %v4296_v10, 0.0  ;;  %v4300_v16 = vadd.f32 %v4299_v15, %v3580_v58  ;;  %v3582_v21 = vpop.f32.mrb[11].mxu0  ;;  %v3660_v20 = vmax.f32 %v4340_v13, 0.0  ;;  %v4346_v24 = vadd.f32 %v6602_v8, %v3622_v60 }
 0x22a   :  { %v3644_v22 = vmax.f32 %v4298_v51, 0.0  ;;  %v4302_v23 = vadd.f32 %v4301_v12, %v3582_v21  ;;  %v3661_v52 = vmax.f32 %v4343_v17, 0.0 }
 0x22b   :  { %v3645_v26 = vmax.f32 %v4300_v16, 0.0  ;;  %v4243_v53 = vpack.c.bf16 %v3660_v20, %v3659_v47  ;;  %v3662_v3 = vmax.f32 %v4346_v24, 0.0 }
 0x22c   :  { %v4235_v29 = vpack.c.bf16 %v3644_v22, %v3643_v19  ;;  %v3646_v30 = vmax.f32 %v4302_v23, 0.0 }
 0x22d   :  { %3775 = vst [vmem:[%s6714_s3 + $0x60] sm:$0xff] %v4243_v53  ;;  %v4244_v8 = vpack.c.bf16 %v3662_v3, %v3661_v52  ;;  %v3626_v34 = vpop.f32.mrb[44].mxu1 }
 0x22e   :  { %3767 = vst [vmem:[%s6714_s3 + $0x20] sm:$0xff] %v4235_v29  ;;  %v4236_v7 = vpack.c.bf16 %v3646_v30, %v3645_v26  ;;  %v3586_v54 = vpop.f32.mrb[12].mxu0  ;;  %v4349_v62 = vadd.f32 %v6606_v18, %v3626_v34  ;;  %v3628_v63 = vpop.f32.mrb[45].mxu1 }
 0x22f   :  { %v4304_v31 = vadd.f32 %v4303_v32, %v3586_v54  ;;  %v3588_v39 = vpop.f32.mrb[13].mxu0  ;;  %3776 = vst [vmem:[%s6714_s3 + $0x68] sm:$0xff] %v4244_v8  ;;  %v4352_v55 = vadd.f32 %v6609_v25, %v3628_v63  ;;  %v3630_v5 = vpop.f32.mrb[46].mxu1 }
 0x230   :  { %3768 = vst [vmem:[%s6714_s3 + $0x28] sm:$0xff] %v4236_v7  ;;  %v4306_v41 = vadd.f32 %v4305_v33, %v3588_v39  ;;  %v3590_v0 = vpop.f32.mrb[14].mxu0  ;;  %v3663_v18 = vmax.f32 %v4349_v62, 0.0  ;;  %v4355_v44 = vadd.f32 %v6612_v27, %v3630_v5  ;;  %v3632_v2 = vpop.f32.mrb[47].mxu1 }
 0x231   :  { %v3647_v42 = vmax.f32 %v4304_v31, 0.0  ;;  %v4308_v43 = vadd.f32 %v4307_v36, %v3590_v0  ;;  %v3592_v45 = vpop.f32.mrb[15].mxu0  ;;  %v3664_v48 = vmax.f32 %v4352_v55, 0.0  ;;  %v4358_v59 = vadd.f32 %v6614_v28, %v3632_v2 }
 0x232   :  { %v3648_v6 = vmax.f32 %v4306_v41, 0.0  ;;  %v4310_v46 = vadd.f32 %v4309_v40, %v3592_v45  ;;  %v3665_v61 = vmax.f32 %v4355_v44, 0.0 }
 0x233   :  { %v3649_v49 = vmax.f32 %v4308_v43, 0.0  ;;  %v4245_v1 = vpack.c.bf16 %v3664_v48, %v3663_v18  ;;  %v3666_v25 = vmax.f32 %v4358_v59, 0.0 }
 0x234   :  { %v4237_v35 = vpack.c.bf16 %v3648_v6, %v3647_v42  ;;  %v3650_v4 = vmax.f32 %v4310_v46, 0.0 }
 0x235   :  { %3777 = vst [vmem:[%s6714_s3 + $0x70] sm:$0xff] %v4245_v1  ;;  %v4246_v37 = vpack.c.bf16 %v3666_v25, %v3665_v61 }
 0x236   :  { %3769 = vst [vmem:[%s6714_s3 + $0x30] sm:$0xff] %v4237_v35  ;;  %v4238_v27 = vpack.c.bf16 %v3650_v4, %v3649_v49 }
 0x237   :  { %3778 = vst [vmem:[%s6714_s3 + $0x78] sm:$0xff] %v4246_v37 }
 0x238   :  { %3770 = vst [vmem:[%s6714_s3 + $0x38] sm:$0xff] %v4238_v27 }

// kernel: mt_conv_cifar_forward.6
= control target key start
LH: loop header
LB: loop body
LE: loop exit
PB: predicated region body
PF: predicated region fallthrough
CT: control target
= control target key end

     0   :  { %s4416_s1 = inlined_call_operand.vmem [shape: bf16[2304,256], index: 1, kind: input, shape index: {}]   ;;  %s4417_s0 = inlined_call_operand.vmem [shape: bf16[32,2304], index: 0, kind: input, shape index: {}]   ;;  %s4418_s2 = inlined_call_operand.vmem [shape: f32[1,256], index: 2, kind: input, shape index: {}]   ;;  %s4419_s3 = inlined_call_operand.vmem [shape: bf16[32,256], index: 3, kind: output, shape index: {}]  }
   0x1   :  { %v2923_v0 = vld [vmem:[%s4416_s1 + $0x4] ss:$8 sps:$4 sm:$0xff]   ;;  %v2927_v2 = vld [vmem:[%s4416_s1] ss:$8 sps:$4 sm:$0xff]   ;;  %v2929_v4 = vld [vmem:[%s4416_s1 + $0x14] ss:$8 sps:$4 sm:$0xff]  }
   0x2   :  { %v2925_v1 = vld [vmem:[%s4416_s1 + $0x404] ss:$8 sps:$4 sm:$0xff]   ;;  %1970 = vmatprep.subr.bf16.mxu1 %v2923_v0  ;;  %v2928_v3 = vld [vmem:[%s4416_s1 + $0x400] ss:$8 sps:$4 sm:$0xff]   ;;  %v2931_v5 = vld [vmem:[%s4416_s1 + $0x414] ss:$8 sps:$4 sm:$0xff]  }
   0x3   :  { %2182 = vmatprep.subr.bf16.mxu0 %v2925_v1  ;;  %1971 = vmatpush1.bf16.msra.mxu1 %v2927_v2  ;;  %v2933_v6 = vld [vmem:[%s4416_s1 + $0x10] ss:$8 sps:$4 sm:$0xff]   ;;  %v2935_v8 = vld [vmem:[%s4416_s1 + $0x24] ss:$8 sps:$4 sm:$0xff]   ;;  %v2939_v10 = vld [vmem:[%s4416_s1 + $0x20] ss:$8 sps:$4 sm:$0xff]  }
   0x4   :  { %2183 = vmatpush1.bf16.msra.mxu0 %v2928_v3  ;;  %1972 = vmatprep.subr.bf16.mxu1 %v2929_v4  ;;  %v2934_v7 = vld [vmem:[%s4416_s1 + $0x410] ss:$8 sps:$4 sm:$0xff]   ;;  %v2937_v9 = vld [vmem:[%s4416_s1 + $0x424] ss:$8 sps:$4 sm:$0xff]   ;;  %v2940_v11 = vld [vmem:[%s4416_s1 + $0x420] ss:$8 sps:$4 sm:$0xff]  }
   0x5   :  { %2184 = vmatprep.subr.bf16.mxu0 %v2931_v5  ;;  %v2941_v12 = vld [vmem:[%s4416_s1 + $0x34] ss:$8 sps:$4 sm:$0xff]   ;;  %v2945_v14 = vld [vmem:[%s4416_s1 + $0x30] ss:$8 sps:$4 sm:$0xff]   ;;  %v2947_v16 = vld [vmem:[%s4416_s1 + $0x44] ss:$8 sps:$4 sm:$0xff]  }
   0x6   :  { %v2943_v13 = vld [vmem:[%s4416_s1 + $0x434] ss:$8 sps:$4 sm:$0xff]   ;;  %v2946_v15 = vld [vmem:[%s4416_s1 + $0x430] ss:$8 sps:$4 sm:$0xff]   ;;  %v2949_v17 = vld [vmem:[%s4416_s1 + $0x444] ss:$8 sps:$4 sm:$0xff]  }
   0x7   :  { %1973 = vmatpush1.bf16.msra.mxu1 %v2933_v6  ;;  %v2951_v18 = vld [vmem:[%s4416_s1 + $0x40] ss:$8 sps:$4 sm:$0xff]   ;;  %v2953_v20 = vld [vmem:[%s4416_s1 + $0x54] ss:$8 sps:$4 sm:$0xff]   ;;  %v2957_v22 = vld [vmem:[%s4416_s1 + $0x50] ss:$8 sps:$4 sm:$0xff]  }
   0x8   :  { %2185 = vmatpush1.bf16.msra.mxu0 %v2934_v7  ;;  %1974 = vmatprep.subr.bf16.mxu1 %v2935_v8  ;;  %v2952_v19 = vld [vmem:[%s4416_s1 + $0x440] ss:$8 sps:$4 sm:$0xff]   ;;  %v2955_v21 = vld [vmem:[%s4416_s1 + $0x454] ss:$8 sps:$4 sm:$0xff]   ;;  %v2958_v23 = vld [vmem:[%s4416_s1 + $0x450] ss:$8 sps:$4 sm:$0xff]  }
   0x9   :  { %2186 = vmatprep.subr.bf16.mxu0 %v2937_v9  ;;  %v2959_v24 = vld [vmem:[%s4416_s1 + $0x64] ss:$8 sps:$4 sm:$0xff]   ;;  %v2963_v26 = vld [vmem:[%s4416_s1 + $0x60] ss:$8 sps:$4 sm:$0xff]   ;;  %v2965_v28 = vld [vmem:[%s4416_s1 + $0x74] ss:$8 sps:$4 sm:$0xff]  }
   0xa   :  { %v2961_v25 = vld [vmem:[%s4416_s1 + $0x464] ss:$8 sps:$4 sm:$0xff]   ;;  %v2964_v27 = vld [vmem:[%s4416_s1 + $0x460] ss:$8 sps:$4 sm:$0xff]   ;;  %v2967_v29 = vld [vmem:[%s4416_s1 + $0x474] ss:$8 sps:$4 sm:$0xff]  }
   0xb   :  { %1975 = vmatpush1.bf16.msra.mxu1 %v2939_v10  ;;  %v2969_v30 = vld [vmem:[%s4416_s1 + $0x70] ss:$8 sps:$4 sm:$0xff]   ;;  %v2971_v32 = vld [vmem:[%s4416_s1 + $0x84] ss:$8 sps:$4 sm:$0xff]   ;;  %v2975_v34 = vld [vmem:[%s4416_s1 + $0x80] ss:$8 sps:$4 sm:$0xff]  }
   0xc   :  { %2187 = vmatpush1.bf16.msra.mxu0 %v2940_v11  ;;  %1976 = vmatprep.subr.bf16.mxu1 %v2941_v12  ;;  %v2970_v31 = vld [vmem:[%s4416_s1 + $0x470] ss:$8 sps:$4 sm:$0xff]   ;;  %v2973_v33 = vld [vmem:[%s4416_s1 + $0x484] ss:$8 sps:$4 sm:$0xff]   ;;  %v2976_v35 = vld [vmem:[%s4416_s1 + $0x480] ss:$8 sps:$4 sm:$0xff]  }
   0xd   :  { %2188 = vmatprep.subr.bf16.mxu0 %v2943_v13  ;;  %v2977_v36 = vld [vmem:[%s4416_s1 + $0x94] ss:$8 sps:$4 sm:$0xff]   ;;  %v2981_v38 = vld [vmem:[%s4416_s1 + $0x90] ss:$8 sps:$4 sm:$0xff]   ;;  %v2983_v40 = vld [vmem:[%s4416_s1 + $0xa4] ss:$8 sps:$4 sm:$0xff]  }
   0xe   :  { %v2979_v37 = vld [vmem:[%s4416_s1 + $0x494] ss:$8 sps:$4 sm:$0xff]   ;;  %v2982_v39 = vld [vmem:[%s4416_s1 + $0x490] ss:$8 sps:$4 sm:$0xff]   ;;  %v2985_v41 = vld [vmem:[%s4416_s1 + $0x4a4] ss:$8 sps:$4 sm:$0xff]  }
   0xf   :  { %1977 = vmatpush1.bf16.msra.mxu1 %v2945_v14  ;;  %v2987_v42 = vld [vmem:[%s4416_s1 + $0xa0] ss:$8 sps:$4 sm:$0xff]   ;;  %v2989_v44 = vld [vmem:[%s4416_s1 + $0xb4] ss:$8 sps:$4 sm:$0xff]   ;;  %v2993_v46 = vld [vmem:[%s4416_s1 + $0xb0] ss:$8 sps:$4 sm:$0xff]  }
  0x10   :  { %2189 = vmatpush1.bf16.msra.mxu0 %v2946_v15  ;;  %1978 = vmatprep.subr.bf16.mxu1 %v2947_v16  ;;  %v2988_v43 = vld [vmem:[%s4416_s1 + $0x4a0] ss:$8 sps:$4 sm:$0xff]   ;;  %v2991_v45 = vld [vmem:[%s4416_s1 + $0x4b4] ss:$8 sps:$4 sm:$0xff]   ;;  %v2994_v47 = vld [vmem:[%s4416_s1 + $0x4b0] ss:$8 sps:$4 sm:$0xff]  }
  0x11   :  { %2190 = vmatprep.subr.bf16.mxu0 %v2949_v17  ;;  %v3021_v48 = vld [vmem:[%s4417_s0 + $0x4] ss:$72 sps:$4 sm:$0xff]   ;;  %v2999_v52 = vld [vmem:[%s4416_s1 + $0xc0] ss:$8 sps:$4 sm:$0xff]   ;;  %v3001_v54 = vld [vmem:[%s4416_s1 + $0xd4] ss:$8 sps:$4 sm:$0xff]  }
  0x12   :  { %v2995_v49 = vld [vmem:[%s4416_s1 + $0xc4] ss:$8 sps:$4 sm:$0xff]   ;;  %2002 = vmatprep.mubr.bf16.mxu1 %v3021_v48  ;;  %v3000_v53 = vld [vmem:[%s4416_s1 + $0x4c0] ss:$8 sps:$4 sm:$0xff]   ;;  %v3003_v55 = vld [vmem:[%s4416_s1 + $0x4d4] ss:$8 sps:$4 sm:$0xff]  }
  0x13   :  { %1979 = vmatpush1.bf16.msra.mxu1 %v2951_v18  ;;  %v2997_v50 = vld [vmem:[%s4416_s1 + $0x4c4] ss:$8 sps:$4 sm:$0xff]   ;;  %v3005_v56 = vld [vmem:[%s4416_s1 + $0xd0] ss:$8 sps:$4 sm:$0xff]   ;;  %v3011_v60 = vld [vmem:[%s4416_s1 + $0xe0] ss:$8 sps:$4 sm:$0xff]  }
  0x14   :  { %2191 = vmatpush1.bf16.msra.mxu0 %v2952_v19  ;;  %1980 = vmatprep.subr.bf16.mxu1 %v2953_v20  ;;  %v3027_v51 = vld [vmem:[%s4417_s0 + $0x24] ss:$72 sps:$4 sm:$0xff]   ;;  %v3006_v57 = vld [vmem:[%s4416_s1 + $0x4d0] ss:$8 sps:$4 sm:$0xff]   ;;  %v3012_v61 = vld [vmem:[%s4416_s1 + $0x4e0] ss:$8 sps:$4 sm:$0xff]  }
  0x15   :  { %2192 = vmatprep.subr.bf16.mxu0 %v2955_v21  ;;  %2214 = vmatprep.mubr.bf16.mxu0 %v3027_v51  ;;  %v3007_v58 = vld [vmem:[%s4416_s1 + $0xe4] ss:$8 sps:$4 sm:$0xff]   ;;  %v3013_v62 = vld [vmem:[%s4416_s1 + $0xf4] ss:$8 sps:$4 sm:$0xff]   ;;  %v3017_v0 = vld [vmem:[%s4416_s1 + $0xf0] ss:$8 sps:$4 sm:$0xff]  }
  0x16   :  { %v3009_v59 = vld [vmem:[%s4416_s1 + $0x4e4] ss:$8 sps:$4 sm:$0xff]   ;;  %v3015_v63 = vld [vmem:[%s4416_s1 + $0x4f4] ss:$8 sps:$4 sm:$0xff]   ;;  %v3018_v1 = vld [vmem:[%s4416_s1 + $0x4f0] ss:$8 sps:$4 sm:$0xff]  }
  0x17   :  { %1981 = vmatpush1.bf16.msra.mxu1 %v2957_v22  ;;  %v3024_v2 = vld [vmem:[%s4416_s1 + $0x104] ss:$8 sps:$4 sm:$0xff]   ;;  %v3019_v4 = vld [vmem:[%s4417_s0] ss:$72 sps:$4 sm:$0xff]   ;;  %v3033_v8 = vld [vmem:[%s4416_s1 + $0x114] ss:$8 sps:$4 sm:$0xff]  }
  0x18   :  { %2193 = vmatpush1.bf16.msra.mxu0 %v2958_v23  ;;  %1982 = vmatprep.subr.bf16.mxu1 %v2959_v24  ;;  %v3030_v3 = vld [vmem:[%s4416_s1 + $0x504] ss:$8 sps:$4 sm:$0xff]   ;;  %v3022_v5 = vld [vmem:[%s4416_s1 + $0x100] ss:$8 sps:$4 sm:$0xff]   ;;  %v3036_v9 = vld [vmem:[%s4416_s1 + $0x514] ss:$8 sps:$4 sm:$0xff]  }
  0x19   :  { %2194 = vmatprep.subr.bf16.mxu0 %v2961_v25  ;;  %v3025_v6 = vld [vmem:[%s4417_s0 + $0x20] ss:$72 sps:$4 sm:$0xff]   ;;  %v3031_v10 = vld [vmem:[%s4416_s1 + $0x110] ss:$8 sps:$4 sm:$0xff]   ;;  %v3039_v12 = vld [vmem:[%s4416_s1 + $0x124] ss:$8 sps:$4 sm:$0xff]  }
  0x1a   :  { %v3028_v7 = vld [vmem:[%s4416_s1 + $0x500] ss:$8 sps:$4 sm:$0xff]   ;;  %v3034_v11 = vld [vmem:[%s4416_s1 + $0x510] ss:$8 sps:$4 sm:$0xff]   ;;  %v3042_v13 = vld [vmem:[%s4416_s1 + $0x524] ss:$8 sps:$4 sm:$0xff]  }
  0x1b   :  { %1983 = vmatpush1.bf16.msra.mxu1 %v2963_v26  ;;  %v3037_v14 = vld [vmem:[%s4416_s1 + $0x120] ss:$8 sps:$4 sm:$0xff]   ;;  %v3045_v16 = vld [vmem:[%s4416_s1 + $0x134] ss:$8 sps:$4 sm:$0xff]   ;;  %v3043_v18 = vld [vmem:[%s4416_s1 + $0x130] ss:$8 sps:$4 sm:$0xff]  }
  0x1c   :  { %2195 = vmatpush1.bf16.msra.mxu0 %v2964_v27  ;;  %1984 = vmatprep.subr.bf16.mxu1 %v2965_v28  ;;  %v3040_v15 = vld [vmem:[%s4416_s1 + $0x520] ss:$8 sps:$4 sm:$0xff]   ;;  %v3048_v17 = vld [vmem:[%s4416_s1 + $0x534] ss:$8 sps:$4 sm:$0xff]   ;;  %v3046_v19 = vld [vmem:[%s4416_s1 + $0x530] ss:$8 sps:$4 sm:$0xff]  }
  0x1d   :  { %2196 = vmatprep.subr.bf16.mxu0 %v2967_v29  ;;  %v3051_v20 = vld [vmem:[%s4416_s1 + $0x144] ss:$8 sps:$4 sm:$0xff]   ;;  %v3049_v22 = vld [vmem:[%s4416_s1 + $0x140] ss:$8 sps:$4 sm:$0xff]   ;;  %v3057_v24 = vld [vmem:[%s4416_s1 + $0x154] ss:$8 sps:$4 sm:$0xff]  }
  0x1e   :  { %v3054_v21 = vld [vmem:[%s4416_s1 + $0x544] ss:$8 sps:$4 sm:$0xff]   ;;  %v3052_v23 = vld [vmem:[%s4416_s1 + $0x540] ss:$8 sps:$4 sm:$0xff]   ;;  %v3060_v25 = vld [vmem:[%s4416_s1 + $0x554] ss:$8 sps:$4 sm:$0xff]  }
  0x1f   :  { %1985 = vmatpush1.bf16.msra.mxu1 %v2969_v30  ;;  %v3055_v26 = vld [vmem:[%s4416_s1 + $0x150] ss:$8 sps:$4 sm:$0xff]   ;;  %v3109_v28 = vld [vmem:[%s4417_s0 + $0x94] ss:$72 sps:$4 sm:$0xff]   ;;  %v3063_v29 = vld [vmem:[%s4416_s1 + $0x164] ss:$8 sps:$4 sm:$0xff]  }
  0x20   :  { %2197 = vmatpush1.bf16.msra.mxu0 %v2970_v31  ;;  %1986 = vmatprep.subr.bf16.mxu1 %v2971_v32  ;;  %v3058_v27 = vld [vmem:[%s4416_s1 + $0x550] ss:$8 sps:$4 sm:$0xff]   ;;  %v3066_v30 = vld [vmem:[%s4416_s1 + $0x564] ss:$8 sps:$4 sm:$0xff]   ;;  %v3114_v31 = vld [vmem:[%s4417_s0 + $0xb4] ss:$72 sps:$4 sm:$0xff]  }
  0x21   :  { %2198 = vmatprep.subr.bf16.mxu0 %v2973_v33  ;;  %v3061_v32 = vld [vmem:[%s4416_s1 + $0x160] ss:$8 sps:$4 sm:$0xff]   ;;  %v3079_v48 = vld [vmem:[%s4416_s1 + $0x190] ss:$8 sps:$4 sm:$0xff]   ;;  %v3090_v51 = vld [vmem:[%s4416_s1 + $0x5a4] ss:$8 sps:$4 sm:$0xff]  }
  0x22   :  { %v3064_v33 = vld [vmem:[%s4416_s1 + $0x560] ss:$8 sps:$4 sm:$0xff]  }
  0x23   :  { %1987 = vmatpush1.bf16.msra.mxu1 %v2975_v34  ;;  %v3119_v34 = vld [vmem:[%s4417_s0 + $0x90] ss:$72 sps:$4 sm:$0xff]  }
  0x24   :  { %2199 = vmatpush1.bf16.msra.mxu0 %v2976_v35  ;;  %1988 = vmatprep.subr.bf16.mxu1 %v2977_v36  ;;  %v3120_v35 = vld [vmem:[%s4417_s0 + $0xb0] ss:$72 sps:$4 sm:$0xff]   ;;  %v3069_v36 = vld [vmem:[%s4416_s1 + $0x174] ss:$8 sps:$4 sm:$0xff]  }
  0x25   :  { %2200 = vmatprep.subr.bf16.mxu0 %v2979_v37  ;;  %v3072_v37 = vld [vmem:[%s4416_s1 + $0x574] ss:$8 sps:$4 sm:$0xff]  }
  0x27   :  { %1989 = vmatpush1.bf16.msra.mxu1 %v2981_v38  ;;  %v3067_v38 = vld [vmem:[%s4416_s1 + $0x170] ss:$8 sps:$4 sm:$0xff]  }
  0x28   :  { %2201 = vmatpush1.bf16.msra.mxu0 %v2982_v39  ;;  %1990 = vmatprep.subr.bf16.mxu1 %v2983_v40  ;;  %v3070_v39 = vld [vmem:[%s4416_s1 + $0x570] ss:$8 sps:$4 sm:$0xff]   ;;  %v3129_v40 = vld [vmem:[%s4417_s0 + $0xc] ss:$72 sps:$4 sm:$0xff]  }
  0x29   :  { %2202 = vmatprep.subr.bf16.mxu0 %v2985_v41  ;;  %v3075_v41 = vld [vmem:[%s4416_s1 + $0x184] ss:$8 sps:$4 sm:$0xff]  }
  0x2b   :  { %1991 = vmatpush1.bf16.msra.mxu1 %v2987_v42  ;;  %v3078_v42 = vld [vmem:[%s4416_s1 + $0x584] ss:$8 sps:$4 sm:$0xff]  }
  0x2c   :  { %2203 = vmatpush1.bf16.msra.mxu0 %v2988_v43  ;;  %1992 = vmatprep.subr.bf16.mxu1 %v2989_v44  ;;  %v3135_v43 = vld [vmem:[%s4417_s0 + $0x2c] ss:$72 sps:$4 sm:$0xff]   ;;  %v3073_v44 = vld [vmem:[%s4416_s1 + $0x180] ss:$8 sps:$4 sm:$0xff]  }
  0x2d   :  { %2204 = vmatprep.subr.bf16.mxu0 %v2991_v45  ;;  %v3076_v45 = vld [vmem:[%s4416_s1 + $0x580] ss:$8 sps:$4 sm:$0xff]  }
  0x2f   :  { %1993 = vmatpush1.bf16.msra.mxu1 %v2993_v46  ;;  %v3081_v46 = vld [vmem:[%s4416_s1 + $0x194] ss:$8 sps:$4 sm:$0xff]  }
  0x30   :  { %2205 = vmatpush1.bf16.msra.mxu0 %v2994_v47  ;;  %1994 = vmatprep.subr.bf16.mxu1 %v2995_v49  ;;  %v3084_v47 = vld [vmem:[%s4416_s1 + $0x594] ss:$8 sps:$4 sm:$0xff]   ;;  %v3082_v49 = vld [vmem:[%s4416_s1 + $0x590] ss:$8 sps:$4 sm:$0xff]  }
  0x31   :  { %2206 = vmatprep.subr.bf16.mxu0 %v2997_v50  ;;  %v3087_v50 = vld [vmem:[%s4416_s1 + $0x1a4] ss:$8 sps:$4 sm:$0xff]  }
  0x33   :  { %1995 = vmatpush1.bf16.msra.mxu1 %v2999_v52  ;;  %v3085_v52 = vld [vmem:[%s4416_s1 + $0x1a0] ss:$8 sps:$4 sm:$0xff]  }
  0x34   :  { %2207 = vmatpush1.bf16.msra.mxu0 %v3000_v53  ;;  %1996 = vmatprep.subr.bf16.mxu1 %v3001_v54  ;;  %v3088_v53 = vld [vmem:[%s4416_s1 + $0x5a0] ss:$8 sps:$4 sm:$0xff]   ;;  %v3093_v54 = vld [vmem:[%s4416_s1 + $0x1b4] ss:$8 sps:$4 sm:$0xff]  }
  0x35   :  { %2208 = vmatprep.subr.bf16.mxu0 %v3003_v55  ;;  %v3096_v55 = vld [vmem:[%s4416_s1 + $0x5b4] ss:$8 sps:$4 sm:$0xff]  }
  0x37   :  { %1997 = vmatpush1.bf16.msra.mxu1 %v3005_v56  ;;  %v3091_v56 = vld [vmem:[%s4416_s1 + $0x1b0] ss:$8 sps:$4 sm:$0xff]  }
  0x38   :  { %2209 = vmatpush1.bf16.msra.mxu0 %v3006_v57  ;;  %1998 = vmatprep.subr.bf16.mxu1 %v3007_v58  ;;  %v3094_v57 = vld [vmem:[%s4416_s1 + $0x5b0] ss:$8 sps:$4 sm:$0xff]   ;;  %v3099_v58 = vld [vmem:[%s4416_s1 + $0x1c4] ss:$8 sps:$4 sm:$0xff]  }
  0x39   :  { %2210 = vmatprep.subr.bf16.mxu0 %v3009_v59  ;;  %v3102_v59 = vld [vmem:[%s4416_s1 + $0x5c4] ss:$8 sps:$4 sm:$0xff]  }
  0x3b   :  { %1999 = vmatpush1.bf16.msra.mxu1 %v3011_v60  ;;  %v3097_v60 = vld [vmem:[%s4416_s1 + $0x1c0] ss:$8 sps:$4 sm:$0xff]  }
  0x3c   :  { %2211 = vmatpush1.bf16.msra.mxu0 %v3012_v61  ;;  %2000 = vmatprep.subr.bf16.mxu1 %v3013_v62  ;;  %v3100_v61 = vld [vmem:[%s4416_s1 + $0x5c0] ss:$8 sps:$4 sm:$0xff]   ;;  %v3105_v62 = vld [vmem:[%s4416_s1 + $0x1d4] ss:$8 sps:$4 sm:$0xff]  }
  0x3d   :  { %2212 = vmatprep.subr.bf16.mxu0 %v3015_v63  ;;  %v3108_v63 = vld [vmem:[%s4416_s1 + $0x5d4] ss:$8 sps:$4 sm:$0xff]  }
  0x3f   :  { %2001 = vmatpush1.bf16.msra.mxu1 %v3017_v0  ;;  %v3103_v0 = vld [vmem:[%s4416_s1 + $0x1d0] ss:$8 sps:$4 sm:$0xff]  }
  0x40   :  { %2213 = vmatpush1.bf16.msra.mxu0 %v3018_v1  ;;  %2023 = vmatprep.subr.bf16.mxu1 %v3024_v2  ;;  %v3106_v1 = vld [vmem:[%s4416_s1 + $0x5d0] ss:$8 sps:$4 sm:$0xff]   ;;  %v3113_v2 = vld [vmem:[%s4416_s1 + $0x1e4] ss:$8 sps:$4 sm:$0xff]  }
  0x41   :  { %2235 = vmatprep.subr.bf16.mxu0 %v3030_v3  ;;  %v3118_v3 = vld [vmem:[%s4416_s1 + $0x5e4] ss:$8 sps:$4 sm:$0xff]  }
  0x42   :  { %2003 = vmatmul.mubr.bf16.vlgmr.msra.gmra.mrb[0].mxu1 %v3019_v4  ;;  %v3111_v4 = vld [vmem:[%s4416_s1 + $0x1e0] ss:$8 sps:$4 sm:$0xff]  }
  0x43   :  { %2215 = vmatmul.mubr.bf16.vlgmr.msra.gmra.mrb[0].mxu0 %v3025_v6  ;;  %2024 = vmatpush1.bf16.msra.mxu1 %v3022_v5  ;;  %v3116_v5 = vld [vmem:[%s4416_s1 + $0x5e0] ss:$8 sps:$4 sm:$0xff]   ;;  %v3123_v6 = vld [vmem:[%s4416_s1 + $0x1f4] ss:$8 sps:$4 sm:$0xff]  }
  0x44   :  { %2236 = vmatpush1.bf16.msra.mxu0 %v3028_v7  ;;  %2025 = vmatprep.subr.bf16.mxu1 %v3033_v8  ;;  %v3126_v7 = vld [vmem:[%s4416_s1 + $0x5f4] ss:$8 sps:$4 sm:$0xff]   ;;  %v3121_v8 = vld [vmem:[%s4416_s1 + $0x1f0] ss:$8 sps:$4 sm:$0xff]  }
  0x45   :  { %2237 = vmatprep.subr.bf16.mxu0 %v3036_v9  ;;  %2012 = vmatprep.mubr.bf16.mxu1 %v3109_v28  ;;  %v3124_v9 = vld [vmem:[%s4416_s1 + $0x5f0] ss:$8 sps:$4 sm:$0xff]   ;;  %v3153_v28 = vld [vmem:[%s4416_s1 + $0x234] ss:$8 sps:$4 sm:$0xff]  }
  0x46   :  { %2224 = vmatprep.mubr.bf16.mxu0 %v3114_v31  ;;  %v3154_v31 = vld [vmem:[%s4416_s1 + $0x630] ss:$8 sps:$4 sm:$0xff]  }
  0x47   :  { %2026 = vmatpush1.bf16.msra.mxu1 %v3031_v10  ;;  %v3132_v10 = vld [vmem:[%s4416_s1 + $0x204] ss:$8 sps:$4 sm:$0xff]  }
  0x48   :  { %2238 = vmatpush1.bf16.msra.mxu0 %v3034_v11  ;;  %2027 = vmatprep.subr.bf16.mxu1 %v3039_v12  ;;  %v3138_v11 = vld [vmem:[%s4416_s1 + $0x604] ss:$8 sps:$4 sm:$0xff]   ;;  %v3127_v12 = vld [vmem:[%s4417_s0 + $0x8] ss:$72 sps:$4 sm:$0xff]  }
  0x49   :  { %2239 = vmatprep.subr.bf16.mxu0 %v3042_v13  ;;  %v3130_v13 = vld [vmem:[%s4416_s1 + $0x200] ss:$8 sps:$4 sm:$0xff]  }
  0x4a   :  { %2013 = vmatmul.mubr.bf16.gmra.mrb[4].mxu1 %v3119_v34  ;;  %v3162_v34 = vld [vmem:[%s4416_s1 + $0x644] ss:$8 sps:$4 sm:$0xff]  }
  0x4b   :  { %2028 = vmatpush1.bf16.msra.mxu1 %v3037_v14  ;;  %2225 = vmatmul.mubr.bf16.gmra.mrb[4].mxu0 %v3120_v35  ;;  %v3133_v14 = vld [vmem:[%s4417_s0 + $0x28] ss:$72 sps:$4 sm:$0xff]   ;;  %v3243_v35 = vld [vmem:[%s4417_s0 + $0x34] ss:$72 sps:$4 sm:$0xff]  }
  0x4c   :  { %2240 = vmatpush1.bf16.msra.mxu0 %v3040_v15  ;;  %2029 = vmatprep.subr.bf16.mxu1 %v3045_v16  ;;  %v3136_v15 = vld [vmem:[%s4416_s1 + $0x600] ss:$8 sps:$4 sm:$0xff]   ;;  %v3141_v16 = vld [vmem:[%s4416_s1 + $0x214] ss:$8 sps:$4 sm:$0xff]  }
  0x4d   :  { %2241 = vmatprep.subr.bf16.mxu0 %v3048_v17  ;;  %2055 = vmatprep.mubr.bf16.mxu1 %v3129_v40  ;;  %v3144_v17 = vld [vmem:[%s4416_s1 + $0x614] ss:$8 sps:$4 sm:$0xff]   ;;  %v3163_v40 = vld [vmem:[%s4416_s1 + $0x250] ss:$8 sps:$4 sm:$0xff]  }
  0x4e   :  { %2267 = vmatprep.mubr.bf16.mxu0 %v3135_v43  ;;  %v3174_v43 = vld [vmem:[%s4416_s1 + $0x664] ss:$8 sps:$4 sm:$0xff]  }
  0x4f   :  { %2030 = vmatpush1.bf16.msra.mxu1 %v3043_v18  ;;  %v3139_v18 = vld [vmem:[%s4416_s1 + $0x210] ss:$8 sps:$4 sm:$0xff]  }
  0x50   :  { %2242 = vmatpush1.bf16.msra.mxu0 %v3046_v19  ;;  %2031 = vmatprep.subr.bf16.mxu1 %v3051_v20  ;;  %v3142_v19 = vld [vmem:[%s4416_s1 + $0x610] ss:$8 sps:$4 sm:$0xff]   ;;  %v3217_v20 = vld [vmem:[%s4417_s0 + $0x9c] ss:$72 sps:$4 sm:$0xff]  }
  0x51   :  { %2243 = vmatprep.subr.bf16.mxu0 %v3054_v21  ;;  %v3147_v21 = vld [vmem:[%s4416_s1 + $0x224] ss:$8 sps:$4 sm:$0xff]  }
  0x53   :  { %2032 = vmatpush1.bf16.msra.mxu1 %v3049_v22  ;;  %v3150_v22 = vld [vmem:[%s4416_s1 + $0x624] ss:$8 sps:$4 sm:$0xff]  }
  0x54   :  { %2244 = vmatpush1.bf16.msra.mxu0 %v3052_v23  ;;  %2033 = vmatprep.subr.bf16.mxu1 %v3057_v24  ;;  %v3222_v23 = vld [vmem:[%s4417_s0 + $0xbc] ss:$72 sps:$4 sm:$0xff]   ;;  %v3145_v24 = vld [vmem:[%s4416_s1 + $0x220] ss:$8 sps:$4 sm:$0xff]  }
  0x55   :  { %2245 = vmatprep.subr.bf16.mxu0 %v3060_v25  ;;  %v3148_v25 = vld [vmem:[%s4416_s1 + $0x620] ss:$8 sps:$4 sm:$0xff]  }
  0x57   :  { %2034 = vmatpush1.bf16.msra.mxu1 %v3055_v26  ;;  %v3227_v26 = vld [vmem:[%s4417_s0 + $0x98] ss:$72 sps:$4 sm:$0xff]  }
  0x58   :  { %2246 = vmatpush1.bf16.msra.mxu0 %v3058_v27  ;;  %2035 = vmatprep.subr.bf16.mxu1 %v3063_v29  ;;  %v3228_v27 = vld [vmem:[%s4417_s0 + $0xb8] ss:$72 sps:$4 sm:$0xff]   ;;  %v3156_v29 = vld [vmem:[%s4416_s1 + $0x634] ss:$8 sps:$4 sm:$0xff]  }
  0x59   :  { %2247 = vmatprep.subr.bf16.mxu0 %v3066_v30  ;;  %v3151_v30 = vld [vmem:[%s4416_s1 + $0x230] ss:$8 sps:$4 sm:$0xff]  }
  0x5b   :  { %2036 = vmatpush1.bf16.msra.mxu1 %v3061_v32  ;;  %v3237_v32 = vld [vmem:[%s4417_s0 + $0x14] ss:$72 sps:$4 sm:$0xff]  }
  0x5c   :  { %2248 = vmatpush1.bf16.msra.mxu0 %v3064_v33  ;;  %2037 = vmatprep.subr.bf16.mxu1 %v3069_v36  ;;  %v3159_v33 = vld [vmem:[%s4416_s1 + $0x244] ss:$8 sps:$4 sm:$0xff]   ;;  %v3157_v36 = vld [vmem:[%s4416_s1 + $0x240] ss:$8 sps:$4 sm:$0xff]  }
  0x5d   :  { %2249 = vmatprep.subr.bf16.mxu0 %v3072_v37  ;;  %v3160_v37 = vld [vmem:[%s4416_s1 + $0x640] ss:$8 sps:$4 sm:$0xff]  }
  0x5f   :  { %2038 = vmatpush1.bf16.msra.mxu1 %v3067_v38  ;;  %v3165_v38 = vld [vmem:[%s4416_s1 + $0x254] ss:$8 sps:$4 sm:$0xff]  }
  0x60   :  { %2250 = vmatpush1.bf16.msra.mxu0 %v3070_v39  ;;  %2039 = vmatprep.subr.bf16.mxu1 %v3075_v41  ;;  %v3168_v39 = vld [vmem:[%s4416_s1 + $0x654] ss:$8 sps:$4 sm:$0xff]   ;;  %v3166_v41 = vld [vmem:[%s4416_s1 + $0x650] ss:$8 sps:$4 sm:$0xff]  }
  0x61   :  { %2251 = vmatprep.subr.bf16.mxu0 %v3078_v42  ;;  %v3171_v42 = vld [vmem:[%s4416_s1 + $0x264] ss:$8 sps:$4 sm:$0xff]  }
  0x63   :  { %2040 = vmatpush1.bf16.msra.mxu1 %v3073_v44  ;;  %v3169_v44 = vld [vmem:[%s4416_s1 + $0x260] ss:$8 sps:$4 sm:$0xff]  }
  0x64   :  { %2252 = vmatpush1.bf16.msra.mxu0 %v3076_v45  ;;  %2041 = vmatprep.subr.bf16.mxu1 %v3081_v46  ;;  %v3172_v45 = vld [vmem:[%s4416_s1 + $0x660] ss:$8 sps:$4 sm:$0xff]   ;;  %v3177_v46 = vld [vmem:[%s4416_s1 + $0x274] ss:$8 sps:$4 sm:$0xff]  }
  0x65   :  { %2253 = vmatprep.subr.bf16.mxu0 %v3084_v47  ;;  %v3180_v47 = vld [vmem:[%s4416_s1 + $0x674] ss:$8 sps:$4 sm:$0xff]  }
  0x67   :  { %2042 = vmatpush1.bf16.msra.mxu1 %v3079_v48  ;;  %v3175_v48 = vld [vmem:[%s4416_s1 + $0x270] ss:$8 sps:$4 sm:$0xff]  }
  0x68   :  { %2254 = vmatpush1.bf16.msra.mxu0 %v3082_v49  ;;  %2043 = vmatprep.subr.bf16.mxu1 %v3087_v50  ;;  %v3178_v49 = vld [vmem:[%s4416_s1 + $0x670] ss:$8 sps:$4 sm:$0xff]   ;;  %v3183_v50 = vld [vmem:[%s4416_s1 + $0x284] ss:$8 sps:$4 sm:$0xff]  }
  0x69   :  { %2255 = vmatprep.subr.bf16.mxu0 %v3090_v51  ;;  %v3186_v51 = vld [vmem:[%s4416_s1 + $0x684] ss:$8 sps:$4 sm:$0xff]  }
  0x6b   :  { %2044 = vmatpush1.bf16.msra.mxu1 %v3085_v52  ;;  %v3181_v52 = vld [vmem:[%s4416_s1 + $0x280] ss:$8 sps:$4 sm:$0xff]  }
  0x6c   :  { %2256 = vmatpush1.bf16.msra.mxu0 %v3088_v53  ;;  %2045 = vmatprep.subr.bf16.mxu1 %v3093_v54  ;;  %v3184_v53 = vld [vmem:[%s4416_s1 + $0x680] ss:$8 sps:$4 sm:$0xff]   ;;  %v3189_v54 = vld [vmem:[%s4416_s1 + $0x294] ss:$8 sps:$4 sm:$0xff]  }
  0x6d   :  { %2257 = vmatprep.subr.bf16.mxu0 %v3096_v55  ;;  %v3192_v55 = vld [vmem:[%s4416_s1 + $0x694] ss:$8 sps:$4 sm:$0xff]  }
  0x6f   :  { %2046 = vmatpush1.bf16.msra.mxu1 %v3091_v56  ;;  %v3187_v56 = vld [vmem:[%s4416_s1 + $0x290] ss:$8 sps:$4 sm:$0xff]  }
  0x70   :  { %2258 = vmatpush1.bf16.msra.mxu0 %v3094_v57  ;;  %2047 = vmatprep.subr.bf16.mxu1 %v3099_v58  ;;  %v3190_v57 = vld [vmem:[%s4416_s1 + $0x690] ss:$8 sps:$4 sm:$0xff]   ;;  %v3195_v58 = vld [vmem:[%s4416_s1 + $0x2a4] ss:$8 sps:$4 sm:$0xff]  }
  0x71   :  { %2259 = vmatprep.subr.bf16.mxu0 %v3102_v59  ;;  %v3198_v59 = vld [vmem:[%s4416_s1 + $0x6a4] ss:$8 sps:$4 sm:$0xff]  }
  0x73   :  { %2048 = vmatpush1.bf16.msra.mxu1 %v3097_v60  ;;  %v3193_v60 = vld [vmem:[%s4416_s1 + $0x2a0] ss:$8 sps:$4 sm:$0xff]  }
  0x74   :  { %2260 = vmatpush1.bf16.msra.mxu0 %v3100_v61  ;;  %2049 = vmatprep.subr.bf16.mxu1 %v3105_v62  ;;  %v3196_v61 = vld [vmem:[%s4416_s1 + $0x6a0] ss:$8 sps:$4 sm:$0xff]   ;;  %v3201_v62 = vld [vmem:[%s4416_s1 + $0x2b4] ss:$8 sps:$4 sm:$0xff]  }
  0x75   :  { %2261 = vmatprep.subr.bf16.mxu0 %v3108_v63  ;;  %v3204_v63 = vld [vmem:[%s4416_s1 + $0x6b4] ss:$8 sps:$4 sm:$0xff]  }
  0x77   :  { %2050 = vmatpush1.bf16.msra.mxu1 %v3103_v0  ;;  %v3199_v0 = vld [vmem:[%s4416_s1 + $0x2b0] ss:$8 sps:$4 sm:$0xff]  }
  0x78   :  { %2262 = vmatpush1.bf16.msra.mxu0 %v3106_v1  ;;  %2051 = vmatprep.subr.bf16.mxu1 %v3113_v2  ;;  %v3202_v1 = vld [vmem:[%s4416_s1 + $0x6b0] ss:$8 sps:$4 sm:$0xff]   ;;  %v3207_v2 = vld [vmem:[%s4416_s1 + $0x2c4] ss:$8 sps:$4 sm:$0xff]  }
  0x79   :  { %2263 = vmatprep.subr.bf16.mxu0 %v3118_v3  ;;  %v3210_v3 = vld [vmem:[%s4416_s1 + $0x6c4] ss:$8 sps:$4 sm:$0xff]  }
  0x7b   :  { %2052 = vmatpush1.bf16.msra.mxu1 %v3111_v4  ;;  %v3205_v4 = vld [vmem:[%s4416_s1 + $0x2c0] ss:$8 sps:$4 sm:$0xff]  }
  0x7c   :  { %2264 = vmatpush1.bf16.msra.mxu0 %v3116_v5  ;;  %2053 = vmatprep.subr.bf16.mxu1 %v3123_v6  ;;  %v3208_v5 = vld [vmem:[%s4416_s1 + $0x6c0] ss:$8 sps:$4 sm:$0xff]   ;;  %v3213_v6 = vld [vmem:[%s4416_s1 + $0x2d4] ss:$8 sps:$4 sm:$0xff]  }
  0x7d   :  { %2265 = vmatprep.subr.bf16.mxu0 %v3126_v7  ;;  %v3216_v7 = vld [vmem:[%s4416_s1 + $0x6d4] ss:$8 sps:$4 sm:$0xff]  }
  0x7f   :  { %2054 = vmatpush1.bf16.msra.mxu1 %v3121_v8  ;;  %v3211_v8 = vld [vmem:[%s4416_s1 + $0x2d0] ss:$8 sps:$4 sm:$0xff]  }
  0x80   :  { %2266 = vmatpush1.bf16.msra.mxu0 %v3124_v9  ;;  %2076 = vmatprep.subr.bf16.mxu1 %v3132_v10  ;;  %v3214_v9 = vld [vmem:[%s4416_s1 + $0x6d0] ss:$8 sps:$4 sm:$0xff]   ;;  %v3221_v10 = vld [vmem:[%s4416_s1 + $0x2e4] ss:$8 sps:$4 sm:$0xff]  }
  0x81   :  { %2288 = vmatprep.subr.bf16.mxu0 %v3138_v11  ;;  %v3226_v11 = vld [vmem:[%s4416_s1 + $0x6e4] ss:$8 sps:$4 sm:$0xff]  }
  0x82   :  { %2056 = vmatmul.mubr.bf16.vlgmr.msra.gmra.mrb[0].mxu1 %v3127_v12  ;;  %v3219_v12 = vld [vmem:[%s4416_s1 + $0x2e0] ss:$8 sps:$4 sm:$0xff]  }
  0x83   :  { %2268 = vmatmul.mubr.bf16.vlgmr.msra.gmra.mrb[0].mxu0 %v3133_v14  ;;  %2077 = vmatpush1.bf16.msra.mxu1 %v3130_v13  ;;  %v3224_v13 = vld [vmem:[%s4416_s1 + $0x6e0] ss:$8 sps:$4 sm:$0xff]   ;;  %v3231_v14 = vld [vmem:[%s4416_s1 + $0x2f4] ss:$8 sps:$4 sm:$0xff]  }
  0x84   :  { %2289 = vmatpush1.bf16.msra.mxu0 %v3136_v15  ;;  %2078 = vmatprep.subr.bf16.mxu1 %v3141_v16  ;;  %v3234_v15 = vld [vmem:[%s4416_s1 + $0x6f4] ss:$8 sps:$4 sm:$0xff]   ;;  %v3229_v16 = vld [vmem:[%s4416_s1 + $0x2f0] ss:$8 sps:$4 sm:$0xff]  }
  0x85   :  { %2290 = vmatprep.subr.bf16.mxu0 %v3144_v17  ;;  %2065 = vmatprep.mubr.bf16.mxu1 %v3217_v20  ;;  %v3232_v17 = vld [vmem:[%s4416_s1 + $0x6f0] ss:$8 sps:$4 sm:$0xff]  }
  0x86   :  { %2277 = vmatprep.mubr.bf16.mxu0 %v3222_v23  ;;  %v3235_v20 = vld [vmem:[%s4417_s0 + $0x10] ss:$72 sps:$4 sm:$0xff]   ;;  %v3244_v23 = vld [vmem:[%s4416_s1 + $0x700] ss:$8 sps:$4 sm:$0xff]  }
  0x87   :  { %2079 = vmatpush1.bf16.msra.mxu1 %v3139_v18  ;;  %v3240_v18 = vld [vmem:[%s4416_s1 + $0x304] ss:$8 sps:$4 sm:$0xff]  }
  0x88   :  { %2291 = vmatpush1.bf16.msra.mxu0 %v3142_v19  ;;  %2080 = vmatprep.subr.bf16.mxu1 %v3147_v21  ;;  %v3246_v19 = vld [vmem:[%s4416_s1 + $0x704] ss:$8 sps:$4 sm:$0xff]   ;;  %v3238_v21 = vld [vmem:[%s4416_s1 + $0x300] ss:$8 sps:$4 sm:$0xff]  }
  0x89   :  { %2292 = vmatprep.subr.bf16.mxu0 %v3150_v22  ;;  %v3241_v22 = vld [vmem:[%s4417_s0 + $0x30] ss:$72 sps:$4 sm:$0xff]  }
  0x8a   :  { %2066 = vmatmul.mubr.bf16.gmra.mrb[4].mxu1 %v3227_v26  ;;  %v3325_v26 = vld [vmem:[%s4417_s0 + $0xa4] ss:$72 sps:$4 sm:$0xff]  }
  0x8b   :  { %2278 = vmatmul.mubr.bf16.gmra.mrb[4].mxu0 %v3228_v27  ;;  %2081 = vmatpush1.bf16.msra.mxu1 %v3145_v24  ;;  %v3249_v24 = vld [vmem:[%s4416_s1 + $0x314] ss:$8 sps:$4 sm:$0xff]   ;;  %v3327_v27 = vld [vmem:[%s4417_s0 + $0xc4] ss:$72 sps:$4 sm:$0xff]  }
  0x8c   :  { %2293 = vmatpush1.bf16.msra.mxu0 %v3148_v25  ;;  %2082 = vmatprep.subr.bf16.mxu1 %v3153_v28  ;;  %v3252_v25 = vld [vmem:[%s4416_s1 + $0x714] ss:$8 sps:$4 sm:$0xff]   ;;  %v3247_v28 = vld [vmem:[%s4416_s1 + $0x310] ss:$8 sps:$4 sm:$0xff]  }
  0x8d   :  { %2294 = vmatprep.subr.bf16.mxu0 %v3156_v29  ;;  %2108 = vmatprep.mubr.bf16.mxu1 %v3237_v32  ;;  %v3250_v29 = vld [vmem:[%s4416_s1 + $0x710] ss:$8 sps:$4 sm:$0xff]   ;;  %v3253_v32 = vld [vmem:[%s4416_s1 + $0x320] ss:$8 sps:$4 sm:$0xff]  }
  0x8e   :  { %2320 = vmatprep.mubr.bf16.mxu0 %v3243_v35  ;;  %v3333_v35 = vld [vmem:[%s4417_s0 + $0xc0] ss:$72 sps:$4 sm:$0xff]  }
  0x8f   :  { %2083 = vmatpush1.bf16.msra.mxu1 %v3151_v30  ;;  %v3255_v30 = vld [vmem:[%s4416_s1 + $0x324] ss:$8 sps:$4 sm:$0xff]  }
  0x90   :  { %2295 = vmatpush1.bf16.msra.mxu0 %v3154_v31  ;;  %2084 = vmatprep.subr.bf16.mxu1 %v3159_v33  ;;  %v3258_v31 = vld [vmem:[%s4416_s1 + $0x724] ss:$8 sps:$4 sm:$0xff]   ;;  %v3256_v33 = vld [vmem:[%s4416_s1 + $0x720] ss:$8 sps:$4 sm:$0xff]  }
  0x91   :  { %2296 = vmatprep.subr.bf16.mxu0 %v3162_v34  ;;  %v3329_v34 = vld [vmem:[%s4417_s0 + $0xa0] ss:$72 sps:$4 sm:$0xff]  }
  0x93   :  { %2085 = vmatpush1.bf16.msra.mxu1 %v3157_v36  ;;  %v3261_v36 = vld [vmem:[%s4416_s1 + $0x334] ss:$8 sps:$4 sm:$0xff]  }
  0x94   :  { %2297 = vmatpush1.bf16.msra.mxu0 %v3160_v37  ;;  %2086 = vmatprep.subr.bf16.mxu1 %v3165_v38  ;;  %v3264_v37 = vld [vmem:[%s4416_s1 + $0x734] ss:$8 sps:$4 sm:$0xff]  }
  0x95   :  { %2298 = vmatprep.subr.bf16.mxu0 %v3168_v39  ;;  %v3345_v38 = vld [vmem:[%s4417_s0 + $0x1c] ss:$72 sps:$4 sm:$0xff]  }
  0x96   :  { %v3348_v39 = vld [vmem:[%s4417_s0 + $0x3c] ss:$72 sps:$4 sm:$0xff]  }
  0x97   :  { %2087 = vmatpush1.bf16.msra.mxu1 %v3163_v40  ;;  %v3259_v40 = vld [vmem:[%s4416_s1 + $0x330] ss:$8 sps:$4 sm:$0xff]  }
  0x98   :  { %2299 = vmatpush1.bf16.msra.mxu0 %v3166_v41  ;;  %2088 = vmatprep.subr.bf16.mxu1 %v3171_v42  ;;  %v3262_v41 = vld [vmem:[%s4416_s1 + $0x730] ss:$8 sps:$4 sm:$0xff]   ;;  %v3267_v42 = vld [vmem:[%s4416_s1 + $0x344] ss:$8 sps:$4 sm:$0xff]  }
  0x99   :  { %2300 = vmatprep.subr.bf16.mxu0 %v3174_v43  ;;  %v3270_v43 = vld [vmem:[%s4416_s1 + $0x744] ss:$8 sps:$4 sm:$0xff]  }
  0x9b   :  { %2089 = vmatpush1.bf16.msra.mxu1 %v3169_v44  ;;  %v3265_v44 = vld [vmem:[%s4416_s1 + $0x340] ss:$8 sps:$4 sm:$0xff]  }
  0x9c   :  { %2301 = vmatpush1.bf16.msra.mxu0 %v3172_v45  ;;  %2090 = vmatprep.subr.bf16.mxu1 %v3177_v46  ;;  %v3268_v45 = vld [vmem:[%s4416_s1 + $0x740] ss:$8 sps:$4 sm:$0xff]   ;;  %v3273_v46 = vld [vmem:[%s4416_s1 + $0x354] ss:$8 sps:$4 sm:$0xff]  }
  0x9d   :  { %2302 = vmatprep.subr.bf16.mxu0 %v3180_v47  ;;  %v3276_v47 = vld [vmem:[%s4416_s1 + $0x754] ss:$8 sps:$4 sm:$0xff]  }
  0x9f   :  { %2091 = vmatpush1.bf16.msra.mxu1 %v3175_v48  ;;  %v3271_v48 = vld [vmem:[%s4416_s1 + $0x350] ss:$8 sps:$4 sm:$0xff]  }
  0xa0   :  { %2303 = vmatpush1.bf16.msra.mxu0 %v3178_v49  ;;  %2092 = vmatprep.subr.bf16.mxu1 %v3183_v50  ;;  %v3274_v49 = vld [vmem:[%s4416_s1 + $0x750] ss:$8 sps:$4 sm:$0xff]   ;;  %v3279_v50 = vld [vmem:[%s4416_s1 + $0x364] ss:$8 sps:$4 sm:$0xff]  }
  0xa1   :  { %2304 = vmatprep.subr.bf16.mxu0 %v3186_v51  ;;  %v3282_v51 = vld [vmem:[%s4416_s1 + $0x764] ss:$8 sps:$4 sm:$0xff]  }
  0xa3   :  { %2093 = vmatpush1.bf16.msra.mxu1 %v3181_v52  ;;  %v3277_v52 = vld [vmem:[%s4416_s1 + $0x360] ss:$8 sps:$4 sm:$0xff]  }
  0xa4   :  { %2305 = vmatpush1.bf16.msra.mxu0 %v3184_v53  ;;  %2094 = vmatprep.subr.bf16.mxu1 %v3189_v54  ;;  %v3280_v53 = vld [vmem:[%s4416_s1 + $0x760] ss:$8 sps:$4 sm:$0xff]   ;;  %v3285_v54 = vld [vmem:[%s4416_s1 + $0x374] ss:$8 sps:$4 sm:$0xff]  }
  0xa5   :  { %2306 = vmatprep.subr.bf16.mxu0 %v3192_v55  ;;  %v3288_v55 = vld [vmem:[%s4416_s1 + $0x774] ss:$8 sps:$4 sm:$0xff]  }
  0xa7   :  { %2095 = vmatpush1.bf16.msra.mxu1 %v3187_v56  ;;  %v3283_v56 = vld [vmem:[%s4416_s1 + $0x370] ss:$8 sps:$4 sm:$0xff]  }
  0xa8   :  { %2307 = vmatpush1.bf16.msra.mxu0 %v3190_v57  ;;  %2096 = vmatprep.subr.bf16.mxu1 %v3195_v58  ;;  %v3286_v57 = vld [vmem:[%s4416_s1 + $0x770] ss:$8 sps:$4 sm:$0xff]   ;;  %v3291_v58 = vld [vmem:[%s4416_s1 + $0x384] ss:$8 sps:$4 sm:$0xff]  }
  0xa9   :  { %2308 = vmatprep.subr.bf16.mxu0 %v3198_v59  ;;  %v3294_v59 = vld [vmem:[%s4416_s1 + $0x784] ss:$8 sps:$4 sm:$0xff]  }
  0xab   :  { %2097 = vmatpush1.bf16.msra.mxu1 %v3193_v60  ;;  %v3289_v60 = vld [vmem:[%s4416_s1 + $0x380] ss:$8 sps:$4 sm:$0xff]  }
  0xac   :  { %2309 = vmatpush1.bf16.msra.mxu0 %v3196_v61  ;;  %2098 = vmatprep.subr.bf16.mxu1 %v3201_v62  ;;  %v3292_v61 = vld [vmem:[%s4416_s1 + $0x780] ss:$8 sps:$4 sm:$0xff]   ;;  %v3297_v62 = vld [vmem:[%s4416_s1 + $0x394] ss:$8 sps:$4 sm:$0xff]  }
  0xad   :  { %2310 = vmatprep.subr.bf16.mxu0 %v3204_v63  ;;  %v3300_v63 = vld [vmem:[%s4416_s1 + $0x794] ss:$8 sps:$4 sm:$0xff]  }
  0xaf   :  { %2099 = vmatpush1.bf16.msra.mxu1 %v3199_v0  ;;  %v3295_v0 = vld [vmem:[%s4416_s1 + $0x390] ss:$8 sps:$4 sm:$0xff]  }
  0xb0   :  { %2311 = vmatpush1.bf16.msra.mxu0 %v3202_v1  ;;  %2100 = vmatprep.subr.bf16.mxu1 %v3207_v2  ;;  %v3298_v1 = vld [vmem:[%s4416_s1 + $0x790] ss:$8 sps:$4 sm:$0xff]   ;;  %v3303_v2 = vld [vmem:[%s4416_s1 + $0x3a4] ss:$8 sps:$4 sm:$0xff]  }
  0xb1   :  { %2312 = vmatprep.subr.bf16.mxu0 %v3210_v3  ;;  %v3306_v3 = vld [vmem:[%s4416_s1 + $0x7a4] ss:$8 sps:$4 sm:$0xff]  }
  0xb3   :  { %2101 = vmatpush1.bf16.msra.mxu1 %v3205_v4  ;;  %v3301_v4 = vld [vmem:[%s4416_s1 + $0x3a0] ss:$8 sps:$4 sm:$0xff]  }
  0xb4   :  { %2313 = vmatpush1.bf16.msra.mxu0 %v3208_v5  ;;  %2102 = vmatprep.subr.bf16.mxu1 %v3213_v6  ;;  %v3304_v5 = vld [vmem:[%s4416_s1 + $0x7a0] ss:$8 sps:$4 sm:$0xff]   ;;  %v3309_v6 = vld [vmem:[%s4416_s1 + $0x3b4] ss:$8 sps:$4 sm:$0xff]  }
  0xb5   :  { %2314 = vmatprep.subr.bf16.mxu0 %v3216_v7  ;;  %v3312_v7 = vld [vmem:[%s4416_s1 + $0x7b4] ss:$8 sps:$4 sm:$0xff]  }
  0xb7   :  { %2103 = vmatpush1.bf16.msra.mxu1 %v3211_v8  ;;  %v3307_v8 = vld [vmem:[%s4416_s1 + $0x3b0] ss:$8 sps:$4 sm:$0xff]  }
  0xb8   :  { %2315 = vmatpush1.bf16.msra.mxu0 %v3214_v9  ;;  %2104 = vmatprep.subr.bf16.mxu1 %v3221_v10  ;;  %v3310_v9 = vld [vmem:[%s4416_s1 + $0x7b0] ss:$8 sps:$4 sm:$0xff]   ;;  %v3315_v10 = vld [vmem:[%s4416_s1 + $0x3c4] ss:$8 sps:$4 sm:$0xff]  }
  0xb9   :  { %2316 = vmatprep.subr.bf16.mxu0 %v3226_v11  ;;  %v3318_v11 = vld [vmem:[%s4416_s1 + $0x7c4] ss:$8 sps:$4 sm:$0xff]  }
  0xbb   :  { %2105 = vmatpush1.bf16.msra.mxu1 %v3219_v12  ;;  %v3313_v12 = vld [vmem:[%s4416_s1 + $0x3c0] ss:$8 sps:$4 sm:$0xff]  }
  0xbc   :  { %2317 = vmatpush1.bf16.msra.mxu0 %v3224_v13  ;;  %2106 = vmatprep.subr.bf16.mxu1 %v3231_v14  ;;  %v3316_v13 = vld [vmem:[%s4416_s1 + $0x7c0] ss:$8 sps:$4 sm:$0xff]   ;;  %v3321_v14 = vld [vmem:[%s4416_s1 + $0x3d4] ss:$8 sps:$4 sm:$0xff]  }
  0xbd   :  { %2318 = vmatprep.subr.bf16.mxu0 %v3234_v15  ;;  %v3324_v15 = vld [vmem:[%s4416_s1 + $0x7d4] ss:$8 sps:$4 sm:$0xff]  }
  0xbf   :  { %2107 = vmatpush1.bf16.msra.mxu1 %v3229_v16  ;;  %v3319_v16 = vld [vmem:[%s4416_s1 + $0x3d0] ss:$8 sps:$4 sm:$0xff]  }
  0xc0   :  { %2319 = vmatpush1.bf16.msra.mxu0 %v3232_v17  ;;  %2129 = vmatprep.subr.bf16.mxu1 %v3240_v18  ;;  %v3322_v17 = vld [vmem:[%s4416_s1 + $0x7d0] ss:$8 sps:$4 sm:$0xff]   ;;  %v3332_v18 = vld [vmem:[%s4416_s1 + $0x3e4] ss:$8 sps:$4 sm:$0xff]  }
  0xc1   :  { %2341 = vmatprep.subr.bf16.mxu0 %v3246_v19  ;;  %v3336_v19 = vld [vmem:[%s4416_s1 + $0x7e4] ss:$8 sps:$4 sm:$0xff]  }
  0xc2   :  { %2109 = vmatmul.mubr.bf16.vlgmr.msra.gmra.mrb[0].mxu1 %v3235_v20  ;;  %v3330_v20 = vld [vmem:[%s4416_s1 + $0x3e0] ss:$8 sps:$4 sm:$0xff]  }
  0xc3   :  { %2321 = vmatmul.mubr.bf16.vlgmr.msra.gmra.mrb[0].mxu0 %v3241_v22  ;;  %2130 = vmatpush1.bf16.msra.mxu1 %v3238_v21  ;;  %v3334_v21 = vld [vmem:[%s4416_s1 + $0x7e0] ss:$8 sps:$4 sm:$0xff]   ;;  %v3339_v22 = vld [vmem:[%s4416_s1 + $0x3f4] ss:$8 sps:$4 sm:$0xff]  }
  0xc4   :  { %2342 = vmatpush1.bf16.msra.mxu0 %v3244_v23  ;;  %2131 = vmatprep.subr.bf16.mxu1 %v3249_v24  ;;  %v3342_v23 = vld [vmem:[%s4416_s1 + $0x7f4] ss:$8 sps:$4 sm:$0xff]   ;;  %v3337_v24 = vld [vmem:[%s4416_s1 + $0x3f0] ss:$8 sps:$4 sm:$0xff]  }
  0xc5   :  { %2343 = vmatprep.subr.bf16.mxu0 %v3252_v25  ;;  %2118 = vmatprep.mubr.bf16.mxu1 %v3325_v26  ;;  %v3340_v25 = vld [vmem:[%s4416_s1 + $0x7f0] ss:$8 sps:$4 sm:$0xff]   ;;  %v3351_v26 = vld [vmem:[%s4416_s1 + $0x804] ss:$8 sps:$4 sm:$0xff]  }
  0xc6   :  { %2330 = vmatprep.mubr.bf16.mxu0 %v3327_v27  ;;  %v3343_v27 = vld [vmem:[%s4417_s0 + $0x18] ss:$72 sps:$4 sm:$0xff]  }
  0xc7   :  { %2132 = vmatpush1.bf16.msra.mxu1 %v3247_v28  ;;  %v3346_v28 = vld [vmem:[%s4417_s0 + $0x38] ss:$72 sps:$4 sm:$0xff]  }
  0xc8   :  { %2344 = vmatpush1.bf16.msra.mxu0 %v3250_v29  ;;  %2133 = vmatprep.subr.bf16.mxu1 %v3255_v30  ;;  %v3349_v29 = vld [vmem:[%s4416_s1 + $0x800] ss:$8 sps:$4 sm:$0xff]   ;;  %v3354_v30 = vld [vmem:[%s4416_s1 + $0x814] ss:$8 sps:$4 sm:$0xff]  }
  0xc9   :  { %2345 = vmatprep.subr.bf16.mxu0 %v3258_v31  ;;  %v3355_v31 = vld [vmem:[%s4417_s0 + $0xac] ss:$72 sps:$4 sm:$0xff]  }
  0xca   :  { %2119 = vmatmul.mubr.bf16.gmra.mrb[4].mxu1 %v3329_v34  ;;  %v3363_v34 = vld [vmem:[%s4416_s1 + $0x824] ss:$8 sps:$4 sm:$0xff]  }
  0xcb   :  { %2331 = vmatmul.mubr.bf16.gmra.mrb[4].mxu0 %v3333_v35  ;;  %2134 = vmatpush1.bf16.msra.mxu1 %v3253_v32  ;;  %v3357_v32 = vld [vmem:[%s4417_s0 + $0xcc] ss:$72 sps:$4 sm:$0xff]   ;;  %v3359_v35 = vld [vmem:[%s4417_s0 + $0xa8] ss:$72 sps:$4 sm:$0xff]  }
  0xcc   :  { %2346 = vmatpush1.bf16.msra.mxu0 %v3256_v33  ;;  %2135 = vmatprep.subr.bf16.mxu1 %v3261_v36  ;;  %v3352_v33 = vld [vmem:[%s4416_s1 + $0x810] ss:$8 sps:$4 sm:$0xff]  }
  0xcd   :  { %2347 = vmatprep.subr.bf16.mxu0 %v3264_v37  ;;  %2161 = vmatprep.mubr.bf16.mxu1 %v3345_v38  ;;  %v3360_v36 = vld [vmem:[%s4417_s0 + $0xc8] ss:$72 sps:$4 sm:$0xff]   ;;  %v3366_v38 = vld [vmem:[%s4416_s1 + $0x834] ss:$8 sps:$4 sm:$0xff]  }
  0xce   :  { %2373 = vmatprep.mubr.bf16.mxu0 %v3348_v39  ;;  %v3361_v37 = vld [vmem:[%s4416_s1 + $0x820] ss:$8 sps:$4 sm:$0xff]   ;;  %v3405_v39 = vld [vmem:[%s4417_s0 + $0x44] ss:$72 sps:$4 sm:$0xff]  }
  0xcf   :  { %2136 = vmatpush1.bf16.msra.mxu1 %v3259_v40  ;;  %v3408_v40 = vld [vmem:[%s4417_s0 + $0xd4] ss:$72 sps:$4 sm:$0xff]  }
  0xd0   :  { %2348 = vmatpush1.bf16.msra.mxu0 %v3262_v41  ;;  %2137 = vmatprep.subr.bf16.mxu1 %v3267_v42  ;;  %v3364_v41 = vld [vmem:[%s4416_s1 + $0x830] ss:$8 sps:$4 sm:$0xff]   ;;  %v3369_v42 = vld [vmem:[%s4416_s1 + $0x844] ss:$8 sps:$4 sm:$0xff]  }
  0xd1   :  { %2349 = vmatprep.subr.bf16.mxu0 %v3270_v43  ;;  %v3367_v43 = vld [vmem:[%s4416_s1 + $0x840] ss:$8 sps:$4 sm:$0xff]  }
  0xd3   :  { %2138 = vmatpush1.bf16.msra.mxu1 %v3265_v44  ;;  %v3372_v44 = vld [vmem:[%s4416_s1 + $0x854] ss:$8 sps:$4 sm:$0xff]  }
  0xd4   :  { %2350 = vmatpush1.bf16.msra.mxu0 %v3268_v45  ;;  %2139 = vmatprep.subr.bf16.mxu1 %v3273_v46  ;;  %v3370_v45 = vld [vmem:[%s4416_s1 + $0x850] ss:$8 sps:$4 sm:$0xff]   ;;  %v3375_v46 = vld [vmem:[%s4416_s1 + $0x864] ss:$8 sps:$4 sm:$0xff]  }
  0xd5   :  { %2351 = vmatprep.subr.bf16.mxu0 %v3276_v47  ;;  %v3373_v47 = vld [vmem:[%s4416_s1 + $0x860] ss:$8 sps:$4 sm:$0xff]  }
  0xd7   :  { %2140 = vmatpush1.bf16.msra.mxu1 %v3271_v48  ;;  %v3378_v48 = vld [vmem:[%s4416_s1 + $0x874] ss:$8 sps:$4 sm:$0xff]  }
  0xd8   :  { %2352 = vmatpush1.bf16.msra.mxu0 %v3274_v49  ;;  %2141 = vmatprep.subr.bf16.mxu1 %v3279_v50  ;;  %v3376_v49 = vld [vmem:[%s4416_s1 + $0x870] ss:$8 sps:$4 sm:$0xff]   ;;  %v3381_v50 = vld [vmem:[%s4416_s1 + $0x884] ss:$8 sps:$4 sm:$0xff]  }
  0xd9   :  { %2353 = vmatprep.subr.bf16.mxu0 %v3282_v51  ;;  %v3379_v51 = vld [vmem:[%s4416_s1 + $0x880] ss:$8 sps:$4 sm:$0xff]  }
  0xdb   :  { %2142 = vmatpush1.bf16.msra.mxu1 %v3277_v52  ;;  %v3384_v52 = vld [vmem:[%s4416_s1 + $0x894] ss:$8 sps:$4 sm:$0xff]  }
  0xdc   :  { %2354 = vmatpush1.bf16.msra.mxu0 %v3280_v53  ;;  %2143 = vmatprep.subr.bf16.mxu1 %v3285_v54  ;;  %v3382_v53 = vld [vmem:[%s4416_s1 + $0x890] ss:$8 sps:$4 sm:$0xff]   ;;  %v3387_v54 = vld [vmem:[%s4416_s1 + $0x8a4] ss:$8 sps:$4 sm:$0xff]  }
  0xdd   :  { %2355 = vmatprep.subr.bf16.mxu0 %v3288_v55  ;;  %v3385_v55 = vld [vmem:[%s4416_s1 + $0x8a0] ss:$8 sps:$4 sm:$0xff]  }
  0xdf   :  { %2144 = vmatpush1.bf16.msra.mxu1 %v3283_v56  ;;  %v3390_v56 = vld [vmem:[%s4416_s1 + $0x8b4] ss:$8 sps:$4 sm:$0xff]  }
  0xe0   :  { %2356 = vmatpush1.bf16.msra.mxu0 %v3286_v57  ;;  %2145 = vmatprep.subr.bf16.mxu1 %v3291_v58  ;;  %v3388_v57 = vld [vmem:[%s4416_s1 + $0x8b0] ss:$8 sps:$4 sm:$0xff]   ;;  %v3393_v58 = vld [vmem:[%s4416_s1 + $0x8c4] ss:$8 sps:$4 sm:$0xff]  }
  0xe1   :  { %2357 = vmatprep.subr.bf16.mxu0 %v3294_v59  ;;  %v3391_v59 = vld [vmem:[%s4416_s1 + $0x8c0] ss:$8 sps:$4 sm:$0xff]  }
  0xe3   :  { %2146 = vmatpush1.bf16.msra.mxu1 %v3289_v60  ;;  %v3396_v60 = vld [vmem:[%s4416_s1 + $0x8d4] ss:$8 sps:$4 sm:$0xff]  }
  0xe4   :  { %2358 = vmatpush1.bf16.msra.mxu0 %v3292_v61  ;;  %2147 = vmatprep.subr.bf16.mxu1 %v3297_v62  ;;  %v3394_v61 = vld [vmem:[%s4416_s1 + $0x8d0] ss:$8 sps:$4 sm:$0xff]   ;;  %v3399_v62 = vld [vmem:[%s4416_s1 + $0x8e4] ss:$8 sps:$4 sm:$0xff]  }
  0xe5   :  { %2359 = vmatprep.subr.bf16.mxu0 %v3300_v63  ;;  %v3397_v63 = vld [vmem:[%s4416_s1 + $0x8e0] ss:$8 sps:$4 sm:$0xff]  }
  0xe7   :  { %2148 = vmatpush1.bf16.msra.mxu1 %v3295_v0  ;;  %v3402_v0 = vld [vmem:[%s4416_s1 + $0x8f4] ss:$8 sps:$4 sm:$0xff]  }
  0xe8   :  { %2360 = vmatpush1.bf16.msra.mxu0 %v3298_v1  ;;  %2149 = vmatprep.subr.bf16.mxu1 %v3303_v2  ;;  %v3400_v1 = vld [vmem:[%s4416_s1 + $0x8f0] ss:$8 sps:$4 sm:$0xff]   ;;  %v3403_v2 = vld [vmem:[%s4417_s0 + $0x40] ss:$72 sps:$4 sm:$0xff]  }
  0xe9   :  { %2361 = vmatprep.subr.bf16.mxu0 %v3306_v3  ;;  %v3406_v3 = vld [vmem:[%s4417_s0 + $0xd0] ss:$72 sps:$4 sm:$0xff]  }
  0xeb   :  { %2150 = vmatpush1.bf16.msra.mxu1 %v3301_v4  ;;  %v340_v4 = vlaneseq }
  0xec   :  { %2362 = vmatpush1.bf16.msra.mxu0 %v3304_v5  ;;  %2151 = vmatprep.subr.bf16.mxu1 %v3309_v6 }
  0xed   :  { %2363 = vmatprep.subr.bf16.mxu0 %v3312_v7  ;;  %v341_v5 = vshrl.u32 %v340_v4, 7 }
  0xef   :  { %2152 = vmatpush1.bf16.msra.mxu1 %v3307_v8 }
  0xf0   :  { %2364 = vmatpush1.bf16.msra.mxu0 %v3310_v9  ;;  %2153 = vmatprep.subr.bf16.mxu1 %v3315_v10  ;;  %v342_v9 = vsub.s32 0, %v341_v5 }
  0xf1   :  { %2365 = vmatprep.subr.bf16.mxu0 %v3318_v11  ;;  %v338_v11 = vld [vmem:[%s4418_s2] sm:$0x3] }
  0xf3   :  { %2154 = vmatpush1.bf16.msra.mxu1 %v3313_v12  ;;  %v346_v12 = vsub.s32 1, %v341_v5 }
  0xf4   :  { %2366 = vmatpush1.bf16.msra.mxu0 %v3316_v13  ;;  %2155 = vmatprep.subr.bf16.mxu1 %v3321_v14  ;;  %v343_v13 = vrot.slane %v338_v11, %v342_v9 }
  0xf5   :  { %2367 = vmatprep.subr.bf16.mxu0 %v3324_v15  ;;  %v347_v14 = vrot.slane %v338_v11, %v346_v12 }
  0xf7   :  { %2156 = vmatpush1.bf16.msra.mxu1 %v3319_v16 }
  0xf8   :  { %2368 = vmatpush1.bf16.msra.mxu0 %v3322_v17  ;;  %2157 = vmatprep.subr.bf16.mxu1 %v3332_v18 }
  0xf9   :  { %2369 = vmatprep.subr.bf16.mxu0 %v3336_v19 }
  0xfb   :  { %2158 = vmatpush1.bf16.msra.mxu1 %v3330_v20 }
  0xfc   :  { %2370 = vmatpush1.bf16.msra.mxu0 %v3334_v21  ;;  %2159 = vmatprep.subr.bf16.mxu1 %v3339_v22 }
  0xfd   :  { %2371 = vmatprep.subr.bf16.mxu0 %v3342_v23 }
  0xff   :  { %2160 = vmatpush1.bf16.msra.mxu1 %v3337_v24 }
 0x100   :  { %2372 = vmatpush1.bf16.msra.mxu0 %v3340_v25  ;;  %2819 = vmatprep.subr.bf16.mxu1 %v3351_v26 }
 0x101   :  { %2394 = vmatprep.subr.bf16.mxu0 %v3351_v26 }
 0x102   :  { %2162 = vmatmul.mubr.bf16.vlgmr.msra.gmra.mrb[0].mxu1 %v3343_v27 }
 0x103   :  { %2374 = vmatmul.mubr.bf16.vlgmr.msra.gmra.mrb[0].mxu0 %v3346_v28  ;;  %2835 = vmatpush1.bf16.msra.mxu1 %v3349_v29 }
 0x104   :  { %2395 = vmatpush1.bf16.msra.mxu0 %v3349_v29  ;;  %2820 = vmatprep.subr.bf16.mxu1 %v3354_v30 }
 0x105   :  { %2396 = vmatprep.subr.bf16.mxu0 %v3354_v30  ;;  %2171 = vmatprep.mubr.bf16.mxu1 %v3355_v31 }
 0x106   :  { %2383 = vmatprep.mubr.bf16.mxu0 %v3357_v32 }
 0x107   :  { %2836 = vmatpush1.bf16.msra.mxu1 %v3352_v33 }
 0x108   :  { %2397 = vmatpush1.bf16.msra.mxu0 %v3352_v33  ;;  %2821 = vmatprep.subr.bf16.mxu1 %v3363_v34 }
 0x109   :  { %2398 = vmatprep.subr.bf16.mxu0 %v3363_v34 }
 0x10a   :  { %2172 = vmatmul.mubr.bf16.gmra.mrb[4].mxu1 %v3359_v35 }
 0x10b   :  { %2384 = vmatmul.mubr.bf16.gmra.mrb[4].mxu0 %v3360_v36  ;;  %2837 = vmatpush1.bf16.msra.mxu1 %v3361_v37 }
 0x10c   :  { %2399 = vmatpush1.bf16.msra.mxu0 %v3361_v37  ;;  %2822 = vmatprep.subr.bf16.mxu1 %v3366_v38 }
 0x10d   :  { %2400 = vmatprep.subr.bf16.mxu0 %v3366_v38  ;;  %2426 = vmatprep.mubr.bf16.mxu0 %v3405_v39 }
 0x10e   :  { %2436 = vmatprep.mubr.bf16.mxu1 %v3408_v40 }
 0x10f   :  { %2838 = vmatpush1.bf16.msra.mxu1 %v3364_v41 }
 0x110   :  { %2401 = vmatpush1.bf16.msra.mxu0 %v3364_v41  ;;  %2823 = vmatprep.subr.bf16.mxu1 %v3369_v42 }
 0x111   :  { %2402 = vmatprep.subr.bf16.mxu0 %v3369_v42 }
 0x113   :  { %2839 = vmatpush1.bf16.msra.mxu1 %v3367_v43 }
 0x114   :  { %2403 = vmatpush1.bf16.msra.mxu0 %v3367_v43  ;;  %2824 = vmatprep.subr.bf16.mxu1 %v3372_v44 }
 0x115   :  { %2404 = vmatprep.subr.bf16.mxu0 %v3372_v44 }
 0x117   :  { %2840 = vmatpush1.bf16.msra.mxu1 %v3370_v45 }
 0x118   :  { %2405 = vmatpush1.bf16.msra.mxu0 %v3370_v45  ;;  %2825 = vmatprep.subr.bf16.mxu1 %v3375_v46 }
 0x119   :  { %2406 = vmatprep.subr.bf16.mxu0 %v3375_v46 }
 0x11b   :  { %2841 = vmatpush1.bf16.msra.mxu1 %v3373_v47 }
 0x11c   :  { %2407 = vmatpush1.bf16.msra.mxu0 %v3373_v47  ;;  %2826 = vmatprep.subr.bf16.mxu1 %v3378_v48 }
 0x11d   :  { %2408 = vmatprep.subr.bf16.mxu0 %v3378_v48 }
 0x11f   :  { %2842 = vmatpush1.bf16.msra.mxu1 %v3376_v49 }
 0x120   :  { %2409 = vmatpush1.bf16.msra.mxu0 %v3376_v49  ;;  %2827 = vmatprep.subr.bf16.mxu1 %v3381_v50 }
 0x121   :  { %2410 = vmatprep.subr.bf16.mxu0 %v3381_v50 }
 0x123   :  { %2843 = vmatpush1.bf16.msra.mxu1 %v3379_v51 }
 0x124   :  { %2411 = vmatpush1.bf16.msra.mxu0 %v3379_v51  ;;  %2828 = vmatprep.subr.bf16.mxu1 %v3384_v52 }
 0x125   :  { %2412 = vmatprep.subr.bf16.mxu0 %v3384_v52 }
 0x127   :  { %2844 = vmatpush1.bf16.msra.mxu1 %v3382_v53 }
 0x128   :  { %2413 = vmatpush1.bf16.msra.mxu0 %v3382_v53  ;;  %2829 = vmatprep.subr.bf16.mxu1 %v3387_v54 }
 0x129   :  { %2414 = vmatprep.subr.bf16.mxu0 %v3387_v54 }
 0x12b   :  { %2845 = vmatpush1.bf16.msra.mxu1 %v3385_v55 }
 0x12c   :  { %2415 = vmatpush1.bf16.msra.mxu0 %v3385_v55  ;;  %2830 = vmatprep.subr.bf16.mxu1 %v3390_v56 }
 0x12d   :  { %2416 = vmatprep.subr.bf16.mxu0 %v3390_v56 }
 0x12f   :  { %2846 = vmatpush1.bf16.msra.mxu1 %v3388_v57 }
 0x130   :  { %2417 = vmatpush1.bf16.msra.mxu0 %v3388_v57  ;;  %2831 = vmatprep.subr.bf16.mxu1 %v3393_v58 }
 0x131   :  { %2418 = vmatprep.subr.bf16.mxu0 %v3393_v58 }
 0x133   :  { %2847 = vmatpush1.bf16.msra.mxu1 %v3391_v59 }
 0x134   :  { %2419 = vmatpush1.bf16.msra.mxu0 %v3391_v59  ;;  %2832 = vmatprep.subr.bf16.mxu1 %v3396_v60 }
 0x135   :  { %2420 = vmatprep.subr.bf16.mxu0 %v3396_v60 }
 0x137   :  { %2848 = vmatpush1.bf16.msra.mxu1 %v3394_v61 }
 0x138   :  { %2421 = vmatpush1.bf16.msra.mxu0 %v3394_v61  ;;  %2833 = vmatprep.subr.bf16.mxu1 %v3399_v62 }
 0x139   :  { %2422 = vmatprep.subr.bf16.mxu0 %v3399_v62 }
 0x13b   :  { %2849 = vmatpush1.bf16.msra.mxu1 %v3397_v63 }
 0x13c   :  { %2423 = vmatpush1.bf16.msra.mxu0 %v3397_v63  ;;  %2834 = vmatprep.subr.bf16.mxu1 %v3402_v0 }
 0x13d   :  { %2424 = vmatprep.subr.bf16.mxu0 %v3402_v0 }
 0x13f   :  { %2850 = vmatpush1.bf16.msra.mxu1 %v3400_v1 }
 0x140   :  { %2425 = vmatpush1.bf16.msra.mxu0 %v3400_v1 }
 0x142   :  { %2437 = vmatmul.mubr.bf16.vlgmr.msra.gmra.mrb[8].mxu1 %v3406_v3 }
 0x143   :  { %2427 = vmatmul.mubr.bf16.vlgmr.msra.gmra.mrb[0].mxu0 %v3403_v2 }
 0x1d5   :  { %v2163_v6 = vpop.f32.mrb[0].mxu1 }
 0x1d6   :  { %v2165_v7 = vpop.f32.mrb[1].mxu1  ;;  %v2851_v31 = vadd.f32 %v2163_v6, %v343_v13 }
 0x1d7   :  { %v2167_v8 = vpop.f32.mrb[2].mxu1  ;;  %v2853_v32 = vadd.f32 %v2165_v7, %v347_v14 }
 0x1d8   :  { %v2169_v10 = vpop.f32.mrb[3].mxu1  ;;  %v2855_v35 = vadd.f32 %v2167_v8, %v343_v13 }
 0x1d9   :  { %v2857_v40 = vadd.f32 %v2169_v10, %v347_v14 }
 0x1dd   :  { %v2173_v15 = vpop.f32.mrb[4].mxu1 }
 0x1de   :  { %v2385_v16 = vpop.f32.mrb[4].mxu0  ;;  %v2859_v17 = vadd.f32 %v2173_v15, %v343_v13  ;;  %v2175_v18 = vpop.f32.mrb[5].mxu1 }
 0x1df   :  { %v2387_v19 = vpop.f32.mrb[5].mxu0  ;;  %v2862_v20 = vadd.f32 %v2175_v18, %v347_v14  ;;  %v2177_v21 = vpop.f32.mrb[6].mxu1 }
 0x1e0   :  { %v2389_v22 = vpop.f32.mrb[6].mxu0  ;;  %v2860_v23 = vadd.f32 %v2859_v17, %v2385_v16  ;;  %v2865_v24 = vadd.f32 %v2177_v21, %v343_v13  ;;  %v2179_v25 = vpop.f32.mrb[7].mxu1 }
 0x1e1   :  { %v2391_v26 = vpop.f32.mrb[7].mxu0  ;;  %v2863_v27 = vadd.f32 %v2862_v20, %v2387_v19  ;;  %v2868_v28 = vadd.f32 %v2179_v25, %v347_v14 }
 0x1e2   :  { %v2866_v29 = vadd.f32 %v2865_v24, %v2389_v22 }
 0x1e3   :  { %v2869_v30 = vadd.f32 %v2868_v28, %v2391_v26 }
 0x215   :  { %v2438_v34 = vpop.f32.mrb[8].mxu1 }
 0x216   :  { %v2428_v33 = vpop.f32.mrb[0].mxu0  ;;  %v2861_v37 = vadd.f32 %v2860_v23, %v2438_v34  ;;  %v2440_v39 = vpop.f32.mrb[9].mxu1 }
 0x217   :  { %v2852_v36 = vadd.f32 %v2851_v31, %v2428_v33  ;;  %v2430_v38 = vpop.f32.mrb[1].mxu0  ;;  %v2864_v42 = vadd.f32 %v2863_v27, %v2440_v39  ;;  %v2442_v44 = vpop.f32.mrb[10].mxu1 }
 0x218   :  { %v2854_v41 = vadd.f32 %v2853_v32, %v2430_v38  ;;  %v2432_v43 = vpop.f32.mrb[2].mxu0  ;;  %v2451_v46 = vmax.f32 %v2861_v37, 0.0  ;;  %v2867_v48 = vadd.f32 %v2866_v29, %v2442_v44  ;;  %v2444_v50 = vpop.f32.mrb[11].mxu1 }
 0x219   :  { %v2447_v45 = vmax.f32 %v2852_v36, 0.0  ;;  %v2856_v47 = vadd.f32 %v2855_v35, %v2432_v43  ;;  %v2434_v49 = vpop.f32.mrb[3].mxu0  ;;  %v2452_v52 = vmax.f32 %v2864_v42, 0.0  ;;  %v2870_v54 = vadd.f32 %v2869_v30, %v2444_v50 }
 0x21a   :  { %v2448_v51 = vmax.f32 %v2854_v41, 0.0  ;;  %v2858_v53 = vadd.f32 %v2857_v40, %v2434_v49  ;;  %v2453_v56 = vmax.f32 %v2867_v48, 0.0 }
 0x21b   :  { %v2449_v55 = vmax.f32 %v2856_v47, 0.0  ;;  %v2817_v58 = vpack.c.bf16 %v2452_v52, %v2451_v46  ;;  %v2454_v60 = vmax.f32 %v2870_v54, 0.0 }
 0x21c   :  { %v2815_v57 = vpack.c.bf16 %v2448_v51, %v2447_v45  ;;  %v2450_v59 = vmax.f32 %v2858_v53, 0.0 }
 0x21d   :  { %2481 = vst [vmem:[%s4419_s3 + $0x10] sm:$0xff] %v2817_v58  ;;  %v2818_v62 = vpack.c.bf16 %v2454_v60, %v2453_v56 }
 0x21e   :  { %2479 = vst [vmem:[%s4419_s3] sm:$0xff] %v2815_v57  ;;  %v2816_v61 = vpack.c.bf16 %v2450_v59, %v2449_v55 }
 0x21f   :  { %2482 = vst [vmem:[%s4419_s3 + $0x18] sm:$0xff] %v2818_v62 }
 0x220   :  { %2480 = vst [vmem:[%s4419_s3 + $0x8] sm:$0xff] %v2816_v61 }

// kernel: mt_conv_cifar_forward.7
= control target key start
LH: loop header
LB: loop body
LE: loop exit
PB: predicated region body
PF: predicated region fallthrough
CT: control target
= control target key end

     0   :  { %vm10142_vm0 = vmmov 0   ;;  %s13111_s1 = inlined_call_operand.vmem [shape: bf16[4096,384], index: 1, kind: input, shape index: {}]   ;;  %s13112_s0 = inlined_call_operand.vmem [shape: bf16[8,4096], index: 0, kind: input, shape index: {}]   ;;  %s13113_s2 = inlined_call_operand.vmem [shape: f32[1,384], index: 2, kind: input, shape index: {}]   ;;  %s13114_s3 = inlined_call_operand.vmem [shape: bf16[384,384], index: 3, kind: input, shape index: {}]   ;;  %s13115_s5 = inlined_call_operand.vmem [shape: bf16[384,128], index: 5, kind: input, shape index: {}]   ;;  %s13116_s4 = inlined_call_operand.vmem [shape: f32[1,384], index: 4, kind: input, shape index: {}]   ;;  %s13117_s6 = inlined_call_operand.vmem [shape: f32[1,128], index: 6, kind: input, shape index: {}]   ;;  %s13118_s7 = inlined_call_operand.vmem [shape: f32[8,128], index: 7, kind: output, shape index: {}]  }
   0x1   :  { %v8963_v0 = vld [vmem:[%s13111_s1 + $0x4] ss:$12 sps:$4 sm:$0xff]   ;;  %v8967_v2 = vld [vmem:[%s13111_s1] ss:$12 sps:$4 sm:$0xff]   ;;  %v8969_v4 = vld [vmem:[%s13111_s1 + $0x1c] ss:$12 sps:$4 sm:$0xff]  }
   0x2   :  { %v8965_v1 = vld [vmem:[%s13111_s1 + $0x304] ss:$12 sps:$4 sm:$0xff]   ;;  %5292 = vmatprep.subr.bf16.mxu1 %v8963_v0  ;;  %v8968_v3 = vld [vmem:[%s13111_s1 + $0x300] ss:$12 sps:$4 sm:$0xff]   ;;  %v8971_v5 = vld [vmem:[%s13111_s1 + $0x31c] ss:$12 sps:$4 sm:$0xff]  }
   0x3   :  { %5374 = vmatprep.subr.bf16.mxu0 %v8965_v1  ;;  %5293 = vmatpush1.bf16.msra.mxu1 %v8967_v2  ;;  %v8973_v6 = vld [vmem:[%s13111_s1 + $0x18] ss:$12 sps:$4 sm:$0xff]   ;;  %v8975_v8 = vld [vmem:[%s13111_s1 + $0x34] ss:$12 sps:$4 sm:$0xff]   ;;  %v8979_v10 = vld [vmem:[%s13111_s1 + $0x30] ss:$12 sps:$4 sm:$0xff]  }
   0x4   :  { %5375 = vmatpush1.bf16.msra.mxu0 %v8968_v3  ;;  %5294 = vmatprep.subr.bf16.mxu1 %v8969_v4  ;;  %v8974_v7 = vld [vmem:[%s13111_s1 + $0x318] ss:$12 sps:$4 sm:$0xff]   ;;  %v8977_v9 = vld [vmem:[%s13111_s1 + $0x334] ss:$12 sps:$4 sm:$0xff]   ;;  %v8980_v11 = vld [vmem:[%s13111_s1 + $0x330] ss:$12 sps:$4 sm:$0xff]  }
   0x5   :  { %5376 = vmatprep.subr.bf16.mxu0 %v8971_v5  ;;  %v8981_v12 = vld [vmem:[%s13111_s1 + $0x4c] ss:$12 sps:$4 sm:$0xff]   ;;  %v8985_v14 = vld [vmem:[%s13111_s1 + $0x48] ss:$12 sps:$4 sm:$0xff]   ;;  %v8987_v16 = vld [vmem:[%s13111_s1 + $0x64] ss:$12 sps:$4 sm:$0xff]  }
   0x6   :  { %v8983_v13 = vld [vmem:[%s13111_s1 + $0x34c] ss:$12 sps:$4 sm:$0xff]   ;;  %v8986_v15 = vld [vmem:[%s13111_s1 + $0x348] ss:$12 sps:$4 sm:$0xff]   ;;  %v8989_v17 = vld [vmem:[%s13111_s1 + $0x364] ss:$12 sps:$4 sm:$0xff]  }
   0x7   :  { %5295 = vmatpush1.bf16.msra.mxu1 %v8973_v6  ;;  %v8991_v18 = vld [vmem:[%s13111_s1 + $0x60] ss:$12 sps:$4 sm:$0xff]   ;;  %v8993_v20 = vld [vmem:[%s13111_s1 + $0x7c] ss:$12 sps:$4 sm:$0xff]   ;;  %v8997_v22 = vld [vmem:[%s13111_s1 + $0x78] ss:$12 sps:$4 sm:$0xff]  }
   0x8   :  { %5377 = vmatpush1.bf16.msra.mxu0 %v8974_v7  ;;  %5296 = vmatprep.subr.bf16.mxu1 %v8975_v8  ;;  %v8992_v19 = vld [vmem:[%s13111_s1 + $0x360] ss:$12 sps:$4 sm:$0xff]   ;;  %v8995_v21 = vld [vmem:[%s13111_s1 + $0x37c] ss:$12 sps:$4 sm:$0xff]   ;;  %v8998_v23 = vld [vmem:[%s13111_s1 + $0x378] ss:$12 sps:$4 sm:$0xff]  }
   0x9   :  { %5378 = vmatprep.subr.bf16.mxu0 %v8977_v9  ;;  %v8999_v24 = vld [vmem:[%s13111_s1 + $0x94] ss:$12 sps:$4 sm:$0xff]   ;;  %v9003_v26 = vld [vmem:[%s13111_s1 + $0x90] ss:$12 sps:$4 sm:$0xff]   ;;  %v9005_v28 = vld [vmem:[%s13111_s1 + $0xac] ss:$12 sps:$4 sm:$0xff]  }
   0xa   :  { %v9001_v25 = vld [vmem:[%s13111_s1 + $0x394] ss:$12 sps:$4 sm:$0xff]   ;;  %v9004_v27 = vld [vmem:[%s13111_s1 + $0x390] ss:$12 sps:$4 sm:$0xff]   ;;  %v9007_v29 = vld [vmem:[%s13111_s1 + $0x3ac] ss:$12 sps:$4 sm:$0xff]  }
   0xb   :  { %5297 = vmatpush1.bf16.msra.mxu1 %v8979_v10  ;;  %v9009_v30 = vld [vmem:[%s13111_s1 + $0xa8] ss:$12 sps:$4 sm:$0xff]   ;;  %v9011_v32 = vld [vmem:[%s13111_s1 + $0xc4] ss:$12 sps:$4 sm:$0xff]   ;;  %v9015_v34 = vld [vmem:[%s13111_s1 + $0xc0] ss:$12 sps:$4 sm:$0xff]  }
   0xc   :  { %5379 = vmatpush1.bf16.msra.mxu0 %v8980_v11  ;;  %5298 = vmatprep.subr.bf16.mxu1 %v8981_v12  ;;  %v9010_v31 = vld [vmem:[%s13111_s1 + $0x3a8] ss:$12 sps:$4 sm:$0xff]   ;;  %v9013_v33 = vld [vmem:[%s13111_s1 + $0x3c4] ss:$12 sps:$4 sm:$0xff]   ;;  %v9016_v35 = vld [vmem:[%s13111_s1 + $0x3c0] ss:$12 sps:$4 sm:$0xff]  }
   0xd   :  { %5380 = vmatprep.subr.bf16.mxu0 %v8983_v13  ;;  %v9017_v36 = vld [vmem:[%s13111_s1 + $0xdc] ss:$12 sps:$4 sm:$0xff]   ;;  %v9021_v38 = vld [vmem:[%s13111_s1 + $0xd8] ss:$12 sps:$4 sm:$0xff]   ;;  %v9023_v40 = vld [vmem:[%s13111_s1 + $0xf4] ss:$12 sps:$4 sm:$0xff]  }
   0xe   :  { %v9019_v37 = vld [vmem:[%s13111_s1 + $0x3dc] ss:$12 sps:$4 sm:$0xff]   ;;  %v9022_v39 = vld [vmem:[%s13111_s1 + $0x3d8] ss:$12 sps:$4 sm:$0xff]   ;;  %v9025_v41 = vld [vmem:[%s13111_s1 + $0x3f4] ss:$12 sps:$4 sm:$0xff]  }
   0xf   :  { %5299 = vmatpush1.bf16.msra.mxu1 %v8985_v14  ;;  %v9027_v42 = vld [vmem:[%s13111_s1 + $0xf0] ss:$12 sps:$4 sm:$0xff]   ;;  %v9029_v44 = vld [vmem:[%s13111_s1 + $0x10c] ss:$12 sps:$4 sm:$0xff]   ;;  %v27_v46 = vld [vmem:[%s13112_s0] sm:$0xff] }
  0x10   :  { %5381 = vmatpush1.bf16.msra.mxu0 %v8986_v15  ;;  %5300 = vmatprep.subr.bf16.mxu1 %v8987_v16  ;;  %v9028_v43 = vld [vmem:[%s13111_s1 + $0x3f0] ss:$12 sps:$4 sm:$0xff]   ;;  %v9031_v45 = vld [vmem:[%s13111_s1 + $0x40c] ss:$12 sps:$4 sm:$0xff]   ;;  %v9033_v47 = vld [vmem:[%s13111_s1 + $0x108] ss:$12 sps:$4 sm:$0xff]   ;;  %v10327_v48 = vcombine.high %v27_v46, %v27_v46  ;;  %v10393_v6 = vcombine.low %v27_v46, %v27_v46 }
  0x11   :  { %5382 = vmatprep.subr.bf16.mxu0 %v8989_v17  ;;  %v9034_v49 = vld [vmem:[%s13111_s1 + $0x408] ss:$12 sps:$4 sm:$0xff]   ;;  %v9035_v51 = vld [vmem:[%s13111_s1 + $0x124] ss:$12 sps:$4 sm:$0xff]   ;;  %v9039_v54 = vld [vmem:[%s13111_s1 + $0x120] ss:$12 sps:$4 sm:$0xff]  }
  0x12   :  { %v29_v50 = vld [vmem:[%s13112_s0 + $0x10] sm:$0xff]  ;;  %5324 = vmatprep.mubr.bf16.mxu1 %v10327_v48  ;;  %v9040_v55 = vld [vmem:[%s13111_s1 + $0x420] ss:$12 sps:$4 sm:$0xff]   ;;  %v9041_v56 = vld [vmem:[%s13111_s1 + $0x13c] ss:$12 sps:$4 sm:$0xff]  }
  0x13   :  { %5301 = vmatpush1.bf16.msra.mxu1 %v8991_v18  ;;  %v9037_v52 = vld [vmem:[%s13111_s1 + $0x424] ss:$12 sps:$4 sm:$0xff]   ;;  %v10341_v53 = vcombine.high %v29_v50, %v29_v50  ;;  %v9043_v57 = vld [vmem:[%s13111_s1 + $0x43c] ss:$12 sps:$4 sm:$0xff]   ;;  %v9047_v60 = vld [vmem:[%s13111_s1 + $0x154] ss:$12 sps:$4 sm:$0xff]   ;;  %v10395_v7 = vcombine.low %v29_v50, %v29_v50 }
  0x14   :  { %5383 = vmatpush1.bf16.msra.mxu0 %v8992_v19  ;;  %5302 = vmatprep.subr.bf16.mxu1 %v8993_v20  ;;  %v9045_v58 = vld [vmem:[%s13111_s1 + $0x138] ss:$12 sps:$4 sm:$0xff]   ;;  %v9049_v61 = vld [vmem:[%s13111_s1 + $0x454] ss:$12 sps:$4 sm:$0xff]   ;;  %v9051_v62 = vld [vmem:[%s13111_s1 + $0x150] ss:$12 sps:$4 sm:$0xff]  }
  0x15   :  { %5384 = vmatprep.subr.bf16.mxu0 %v8995_v21  ;;  %5406 = vmatprep.mubr.bf16.mxu0 %v10341_v53  ;;  %v9046_v59 = vld [vmem:[%s13111_s1 + $0x438] ss:$12 sps:$4 sm:$0xff]   ;;  %v9052_v63 = vld [vmem:[%s13111_s1 + $0x450] ss:$12 sps:$4 sm:$0xff]   ;;  %v9057_v2 = vld [vmem:[%s13111_s1 + $0x168] ss:$12 sps:$4 sm:$0xff]  }
  0x16   :  { %v9053_v0 = vld [vmem:[%s13111_s1 + $0x16c] ss:$12 sps:$4 sm:$0xff]   ;;  %v9058_v3 = vld [vmem:[%s13111_s1 + $0x468] ss:$12 sps:$4 sm:$0xff]   ;;  %v9063_v4 = vld [vmem:[%s13111_s1 + $0x184] ss:$12 sps:$4 sm:$0xff]  }
  0x17   :  { %5303 = vmatpush1.bf16.msra.mxu1 %v8997_v22  ;;  %v9055_v1 = vld [vmem:[%s13111_s1 + $0x46c] ss:$12 sps:$4 sm:$0xff]   ;;  %v9068_v5 = vld [vmem:[%s13111_s1 + $0x484] ss:$12 sps:$4 sm:$0xff]   ;;  %v9071_v10 = vld [vmem:[%s13111_s1 + $0x19c] ss:$12 sps:$4 sm:$0xff]  }
  0x18   :  { %5385 = vmatpush1.bf16.msra.mxu0 %v8998_v23  ;;  %5304 = vmatprep.subr.bf16.mxu1 %v8999_v24  ;;  %v9061_v8 = vld [vmem:[%s13111_s1 + $0x180] ss:$12 sps:$4 sm:$0xff]   ;;  %v9074_v11 = vld [vmem:[%s13111_s1 + $0x49c] ss:$12 sps:$4 sm:$0xff]   ;;  %v9069_v12 = vld [vmem:[%s13111_s1 + $0x198] ss:$12 sps:$4 sm:$0xff]  }
  0x19   :  { %5386 = vmatprep.subr.bf16.mxu0 %v9001_v25  ;;  %v9066_v9 = vld [vmem:[%s13111_s1 + $0x480] ss:$12 sps:$4 sm:$0xff]   ;;  %v9072_v13 = vld [vmem:[%s13111_s1 + $0x498] ss:$12 sps:$4 sm:$0xff]   ;;  %v9075_v16 = vld [vmem:[%s13111_s1 + $0x1b0] ss:$12 sps:$4 sm:$0xff]  }
  0x1a   :  { %v9077_v14 = vld [vmem:[%s13111_s1 + $0x1b4] ss:$12 sps:$4 sm:$0xff]   ;;  %v9078_v17 = vld [vmem:[%s13111_s1 + $0x4b0] ss:$12 sps:$4 sm:$0xff]   ;;  %v9083_v18 = vld [vmem:[%s13111_s1 + $0x1cc] ss:$12 sps:$4 sm:$0xff]  }
  0x1b   :  { %5305 = vmatpush1.bf16.msra.mxu1 %v9003_v26  ;;  %v9080_v15 = vld [vmem:[%s13111_s1 + $0x4b4] ss:$12 sps:$4 sm:$0xff]   ;;  %v9086_v19 = vld [vmem:[%s13111_s1 + $0x4cc] ss:$12 sps:$4 sm:$0xff]   ;;  %v9089_v22 = vld [vmem:[%s13111_s1 + $0x1e4] ss:$12 sps:$4 sm:$0xff]  }
  0x1c   :  { %5387 = vmatpush1.bf16.msra.mxu0 %v9004_v27  ;;  %5306 = vmatprep.subr.bf16.mxu1 %v9005_v28  ;;  %v9081_v20 = vld [vmem:[%s13111_s1 + $0x1c8] ss:$12 sps:$4 sm:$0xff]   ;;  %v9092_v23 = vld [vmem:[%s13111_s1 + $0x4e4] ss:$12 sps:$4 sm:$0xff]   ;;  %v9087_v24 = vld [vmem:[%s13111_s1 + $0x1e0] ss:$12 sps:$4 sm:$0xff]  }
  0x1d   :  { %5388 = vmatprep.subr.bf16.mxu0 %v9007_v29  ;;  %v9084_v21 = vld [vmem:[%s13111_s1 + $0x4c8] ss:$12 sps:$4 sm:$0xff]   ;;  %v9090_v25 = vld [vmem:[%s13111_s1 + $0x4e0] ss:$12 sps:$4 sm:$0xff]   ;;  %v9093_v28 = vld [vmem:[%s13111_s1 + $0x1f8] ss:$12 sps:$4 sm:$0xff]  }
  0x1e   :  { %v9095_v26 = vld [vmem:[%s13111_s1 + $0x1fc] ss:$12 sps:$4 sm:$0xff]   ;;  %v9096_v29 = vld [vmem:[%s13111_s1 + $0x4f8] ss:$12 sps:$4 sm:$0xff]  }
  0x1f   :  { %5307 = vmatpush1.bf16.msra.mxu1 %v9009_v30  ;;  %v9098_v27 = vld [vmem:[%s13111_s1 + $0x4fc] ss:$12 sps:$4 sm:$0xff]   ;;  %v9101_v30 = vld [vmem:[%s13111_s1 + $0x214] ss:$12 sps:$4 sm:$0xff]   ;;  %v9120_v50 = vld [vmem:[%s13111_s1 + $0x558] ss:$12 sps:$4 sm:$0xff]  }
  0x20   :  { %5389 = vmatpush1.bf16.msra.mxu0 %v9010_v31  ;;  %5308 = vmatprep.subr.bf16.mxu1 %v9011_v32  ;;  %v9104_v31 = vld [vmem:[%s13111_s1 + $0x514] ss:$12 sps:$4 sm:$0xff]   ;;  %v10474_v32 = vld [vmem:[%s13112_s0 + $0x8] sm:$0xff] }
  0x21   :  { %5390 = vmatprep.subr.bf16.mxu0 %v9013_v33  ;;  %v10479_v33 = vld [vmem:[%s13112_s0 + $0x18] sm:$0xff] }
  0x22   :  { %v9119_v46 = vld [vmem:[%s13111_s1 + $0x25c] ss:$12 sps:$4 sm:$0xff]  }
  0x23   :  { %5309 = vmatpush1.bf16.msra.mxu1 %v9015_v34  ;;  %v9099_v34 = vld [vmem:[%s13111_s1 + $0x210] ss:$12 sps:$4 sm:$0xff]  }
  0x24   :  { %5391 = vmatpush1.bf16.msra.mxu0 %v9016_v35  ;;  %5310 = vmatprep.subr.bf16.mxu1 %v9017_v36  ;;  %v9102_v35 = vld [vmem:[%s13111_s1 + $0x510] ss:$12 sps:$4 sm:$0xff]   ;;  %v10489_v36 = vcombine.high %v10474_v32, %v10474_v32 }
  0x25   :  { %5392 = vmatprep.subr.bf16.mxu0 %v9019_v37  ;;  %v10493_v37 = vcombine.high %v10479_v33, %v10479_v33 }
  0x27   :  { %5311 = vmatpush1.bf16.msra.mxu1 %v9021_v38  ;;  %v9107_v38 = vld [vmem:[%s13111_s1 + $0x22c] ss:$12 sps:$4 sm:$0xff]  }
  0x28   :  { %5393 = vmatpush1.bf16.msra.mxu0 %v9022_v39  ;;  %5312 = vmatprep.subr.bf16.mxu1 %v9023_v40  ;;  %v9110_v39 = vld [vmem:[%s13111_s1 + $0x52c] ss:$12 sps:$4 sm:$0xff]   ;;  %v9105_v40 = vld [vmem:[%s13111_s1 + $0x228] ss:$12 sps:$4 sm:$0xff]  }
  0x29   :  { %5394 = vmatprep.subr.bf16.mxu0 %v9025_v41  ;;  %v9108_v41 = vld [vmem:[%s13111_s1 + $0x528] ss:$12 sps:$4 sm:$0xff]  }
  0x2b   :  { %5313 = vmatpush1.bf16.msra.mxu1 %v9027_v42  ;;  %v9113_v42 = vld [vmem:[%s13111_s1 + $0x244] ss:$12 sps:$4 sm:$0xff]  }
  0x2c   :  { %5395 = vmatpush1.bf16.msra.mxu0 %v9028_v43  ;;  %5314 = vmatprep.subr.bf16.mxu1 %v9029_v44  ;;  %v9116_v43 = vld [vmem:[%s13111_s1 + $0x544] ss:$12 sps:$4 sm:$0xff]   ;;  %v9111_v44 = vld [vmem:[%s13111_s1 + $0x240] ss:$12 sps:$4 sm:$0xff]  }
  0x2d   :  { %5396 = vmatprep.subr.bf16.mxu0 %v9031_v45  ;;  %v9114_v45 = vld [vmem:[%s13111_s1 + $0x540] ss:$12 sps:$4 sm:$0xff]  }
  0x2f   :  { %5315 = vmatpush1.bf16.msra.mxu1 %v9033_v47  ;;  %v9122_v47 = vld [vmem:[%s13111_s1 + $0x55c] ss:$12 sps:$4 sm:$0xff]  }
  0x30   :  { %5397 = vmatpush1.bf16.msra.mxu0 %v9034_v49  ;;  %5316 = vmatprep.subr.bf16.mxu1 %v9035_v51  ;;  %v9117_v49 = vld [vmem:[%s13111_s1 + $0x258] ss:$12 sps:$4 sm:$0xff]   ;;  %v9125_v51 = vld [vmem:[%s13111_s1 + $0x274] ss:$12 sps:$4 sm:$0xff]  }
  0x31   :  { %5398 = vmatprep.subr.bf16.mxu0 %v9037_v52  ;;  %v9128_v52 = vld [vmem:[%s13111_s1 + $0x574] ss:$12 sps:$4 sm:$0xff]  }
  0x33   :  { %5317 = vmatpush1.bf16.msra.mxu1 %v9039_v54  ;;  %v9123_v54 = vld [vmem:[%s13111_s1 + $0x270] ss:$12 sps:$4 sm:$0xff]  }
  0x34   :  { %5399 = vmatpush1.bf16.msra.mxu0 %v9040_v55  ;;  %5318 = vmatprep.subr.bf16.mxu1 %v9041_v56  ;;  %v9126_v55 = vld [vmem:[%s13111_s1 + $0x570] ss:$12 sps:$4 sm:$0xff]   ;;  %v9131_v56 = vld [vmem:[%s13111_s1 + $0x28c] ss:$12 sps:$4 sm:$0xff]  }
  0x35   :  { %5400 = vmatprep.subr.bf16.mxu0 %v9043_v57  ;;  %v9134_v57 = vld [vmem:[%s13111_s1 + $0x58c] ss:$12 sps:$4 sm:$0xff]  }
  0x37   :  { %5319 = vmatpush1.bf16.msra.mxu1 %v9045_v58  ;;  %v9129_v58 = vld [vmem:[%s13111_s1 + $0x288] ss:$12 sps:$4 sm:$0xff]  }
  0x38   :  { %5401 = vmatpush1.bf16.msra.mxu0 %v9046_v59  ;;  %5320 = vmatprep.subr.bf16.mxu1 %v9047_v60  ;;  %v9132_v59 = vld [vmem:[%s13111_s1 + $0x588] ss:$12 sps:$4 sm:$0xff]   ;;  %v9137_v60 = vld [vmem:[%s13111_s1 + $0x2a4] ss:$12 sps:$4 sm:$0xff]  }
  0x39   :  { %5402 = vmatprep.subr.bf16.mxu0 %v9049_v61  ;;  %v9140_v61 = vld [vmem:[%s13111_s1 + $0x5a4] ss:$12 sps:$4 sm:$0xff]  }
  0x3b   :  { %5321 = vmatpush1.bf16.msra.mxu1 %v9051_v62  ;;  %v9135_v62 = vld [vmem:[%s13111_s1 + $0x2a0] ss:$12 sps:$4 sm:$0xff]  }
  0x3c   :  { %5403 = vmatpush1.bf16.msra.mxu0 %v9052_v63  ;;  %5322 = vmatprep.subr.bf16.mxu1 %v9053_v0  ;;  %v9138_v63 = vld [vmem:[%s13111_s1 + $0x5a0] ss:$12 sps:$4 sm:$0xff]   ;;  %v9143_v0 = vld [vmem:[%s13111_s1 + $0x2bc] ss:$12 sps:$4 sm:$0xff]  }
  0x3d   :  { %5404 = vmatprep.subr.bf16.mxu0 %v9055_v1  ;;  %v9146_v1 = vld [vmem:[%s13111_s1 + $0x5bc] ss:$12 sps:$4 sm:$0xff]  }
  0x3f   :  { %5323 = vmatpush1.bf16.msra.mxu1 %v9057_v2  ;;  %v9141_v2 = vld [vmem:[%s13111_s1 + $0x2b8] ss:$12 sps:$4 sm:$0xff]  }
  0x40   :  { %5405 = vmatpush1.bf16.msra.mxu0 %v9058_v3  ;;  %5333 = vmatprep.subr.bf16.mxu1 %v9063_v4  ;;  %v9144_v3 = vld [vmem:[%s13111_s1 + $0x5b8] ss:$12 sps:$4 sm:$0xff]   ;;  %v9149_v4 = vld [vmem:[%s13111_s1 + $0x2d4] ss:$12 sps:$4 sm:$0xff]  }
  0x41   :  { %5415 = vmatprep.subr.bf16.mxu0 %v9068_v5  ;;  %v9152_v5 = vld [vmem:[%s13111_s1 + $0x5d4] ss:$12 sps:$4 sm:$0xff]  }
  0x42   :  { %5325 = vmatmul.mubr.bf16.vlgmr.msra.gmra.mrb[0].mxu1 %v10393_v6 }
  0x43   :  { %5407 = vmatmul.mubr.bf16.vlgmr.msra.gmra.mrb[0].mxu0 %v10395_v7  ;;  %5334 = vmatpush1.bf16.msra.mxu1 %v9061_v8  ;;  %v9147_v8 = vld [vmem:[%s13111_s1 + $0x2d0] ss:$12 sps:$4 sm:$0xff]  }
  0x44   :  { %5416 = vmatpush1.bf16.msra.mxu0 %v9066_v9  ;;  %5335 = vmatprep.subr.bf16.mxu1 %v9071_v10  ;;  %v9150_v9 = vld [vmem:[%s13111_s1 + $0x5d0] ss:$12 sps:$4 sm:$0xff]   ;;  %v9155_v10 = vld [vmem:[%s13111_s1 + $0x2ec] ss:$12 sps:$4 sm:$0xff]  }
  0x45   :  { %5417 = vmatprep.subr.bf16.mxu0 %v9074_v11  ;;  %5365 = vmatprep.mubr.bf16.mxu1 %v10489_v36  ;;  %v9158_v11 = vld [vmem:[%s13111_s1 + $0x5ec] ss:$12 sps:$4 sm:$0xff]  }
  0x46   :  { %5447 = vmatprep.mubr.bf16.mxu0 %v10493_v37 }
  0x47   :  { %5336 = vmatpush1.bf16.msra.mxu1 %v9069_v12  ;;  %v9153_v12 = vld [vmem:[%s13111_s1 + $0x2e8] ss:$12 sps:$4 sm:$0xff]  }
  0x48   :  { %5418 = vmatpush1.bf16.msra.mxu0 %v9072_v13  ;;  %5337 = vmatprep.subr.bf16.mxu1 %v9077_v14  ;;  %v9156_v13 = vld [vmem:[%s13111_s1 + $0x5e8] ss:$12 sps:$4 sm:$0xff]   ;;  %v9165_v14 = vld [vmem:[%s13111_s1 + $0x604] ss:$12 sps:$4 sm:$0xff]  }
  0x49   :  { %5419 = vmatprep.subr.bf16.mxu0 %v9080_v15  ;;  %v9166_v15 = vld [vmem:[%s13111_s1 + $0xc8] ss:$12 sps:$4 sm:$0xff]  }
  0x4b   :  { %5338 = vmatpush1.bf16.msra.mxu1 %v9075_v16  ;;  %v10613_v16 = vcombine.low %v10474_v32, %v10474_v32  ;;  %v9185_v32 = vld [vmem:[%s13111_s1 + $0x664] ss:$12 sps:$4 sm:$0xff]  }
  0x4c   :  { %5420 = vmatpush1.bf16.msra.mxu0 %v9078_v17  ;;  %5339 = vmatprep.subr.bf16.mxu1 %v9083_v18  ;;  %v10617_v17 = vcombine.low %v10479_v33, %v10479_v33  ;;  %v9163_v18 = vld [vmem:[%s13111_s1 + $0x600] ss:$12 sps:$4 sm:$0xff]   ;;  %v9186_v33 = vld [vmem:[%s13111_s1 + $0x128] ss:$12 sps:$4 sm:$0xff]  }
  0x4d   :  { %5421 = vmatprep.subr.bf16.mxu0 %v9086_v19  ;;  %v9167_v19 = vld [vmem:[%s13111_s1 + $0x8] ss:$12 sps:$4 sm:$0xff]  }
  0x4f   :  { %5340 = vmatpush1.bf16.msra.mxu1 %v9081_v20  ;;  %v9170_v20 = vld [vmem:[%s13111_s1 + $0x61c] ss:$12 sps:$4 sm:$0xff]  }
  0x50   :  { %5422 = vmatpush1.bf16.msra.mxu0 %v9084_v21  ;;  %5341 = vmatprep.subr.bf16.mxu1 %v9089_v22  ;;  %v9171_v21 = vld [vmem:[%s13111_s1 + $0xe0] ss:$12 sps:$4 sm:$0xff]   ;;  %v9168_v22 = vld [vmem:[%s13111_s1 + $0x618] ss:$12 sps:$4 sm:$0xff]  }
  0x51   :  { %5423 = vmatprep.subr.bf16.mxu0 %v9092_v23  ;;  %v9172_v23 = vld [vmem:[%s13111_s1 + $0x20] ss:$12 sps:$4 sm:$0xff]  }
  0x53   :  { %5342 = vmatpush1.bf16.msra.mxu1 %v9087_v24  ;;  %v9175_v24 = vld [vmem:[%s13111_s1 + $0x634] ss:$12 sps:$4 sm:$0xff]  }
  0x54   :  { %5424 = vmatpush1.bf16.msra.mxu0 %v9090_v25  ;;  %5343 = vmatprep.subr.bf16.mxu1 %v9095_v26  ;;  %v9176_v25 = vld [vmem:[%s13111_s1 + $0xf8] ss:$12 sps:$4 sm:$0xff]   ;;  %v9173_v26 = vld [vmem:[%s13111_s1 + $0x630] ss:$12 sps:$4 sm:$0xff]  }
  0x55   :  { %5425 = vmatprep.subr.bf16.mxu0 %v9098_v27  ;;  %v9177_v27 = vld [vmem:[%s13111_s1 + $0x38] ss:$12 sps:$4 sm:$0xff]  }
  0x57   :  { %5344 = vmatpush1.bf16.msra.mxu1 %v9093_v28  ;;  %v9180_v28 = vld [vmem:[%s13111_s1 + $0x64c] ss:$12 sps:$4 sm:$0xff]  }
  0x58   :  { %5426 = vmatpush1.bf16.msra.mxu0 %v9096_v29  ;;  %5345 = vmatprep.subr.bf16.mxu1 %v9101_v30  ;;  %v9178_v29 = vld [vmem:[%s13111_s1 + $0x648] ss:$12 sps:$4 sm:$0xff]   ;;  %v9182_v30 = vld [vmem:[%s13111_s1 + $0x50] ss:$12 sps:$4 sm:$0xff]  }
  0x59   :  { %5427 = vmatprep.subr.bf16.mxu0 %v9104_v31  ;;  %v10667_v31 = vld [vmem:[%s13112_s0 + $0x20] sm:$0xff] }
  0x5b   :  { %5346 = vmatpush1.bf16.msra.mxu1 %v9099_v34  ;;  %v10677_v34 = vcombine.high %v10667_v31, %v10667_v31 }
  0x5c   :  { %5428 = vmatpush1.bf16.msra.mxu0 %v9102_v35  ;;  %5347 = vmatprep.subr.bf16.mxu1 %v9107_v38  ;;  %v9183_v35 = vld [vmem:[%s13111_s1 + $0x660] ss:$12 sps:$4 sm:$0xff]   ;;  %v9187_v38 = vld [vmem:[%s13111_s1 + $0x68] ss:$12 sps:$4 sm:$0xff]  }
  0x5d   :  { %5429 = vmatprep.subr.bf16.mxu0 %v9110_v39  ;;  %v9190_v39 = vld [vmem:[%s13111_s1 + $0x67c] ss:$12 sps:$4 sm:$0xff]  }
  0x5f   :  { %5348 = vmatpush1.bf16.msra.mxu1 %v9105_v40  ;;  %v9191_v40 = vld [vmem:[%s13111_s1 + $0x140] ss:$12 sps:$4 sm:$0xff]  }
  0x60   :  { %5430 = vmatpush1.bf16.msra.mxu0 %v9108_v41  ;;  %5349 = vmatprep.subr.bf16.mxu1 %v9113_v42  ;;  %v9188_v41 = vld [vmem:[%s13111_s1 + $0x678] ss:$12 sps:$4 sm:$0xff]   ;;  %v9192_v42 = vld [vmem:[%s13111_s1 + $0x80] ss:$12 sps:$4 sm:$0xff]  }
  0x61   :  { %5431 = vmatprep.subr.bf16.mxu0 %v9116_v43  ;;  %v9195_v43 = vld [vmem:[%s13111_s1 + $0x694] ss:$12 sps:$4 sm:$0xff]  }
  0x63   :  { %5350 = vmatpush1.bf16.msra.mxu1 %v9111_v44  ;;  %v9196_v44 = vld [vmem:[%s13111_s1 + $0x158] ss:$12 sps:$4 sm:$0xff]  }
  0x64   :  { %5432 = vmatpush1.bf16.msra.mxu0 %v9114_v45  ;;  %5351 = vmatprep.subr.bf16.mxu1 %v9119_v46  ;;  %v9193_v45 = vld [vmem:[%s13111_s1 + $0x690] ss:$12 sps:$4 sm:$0xff]   ;;  %v9197_v46 = vld [vmem:[%s13111_s1 + $0x98] ss:$12 sps:$4 sm:$0xff]  }
  0x65   :  { %5433 = vmatprep.subr.bf16.mxu0 %v9122_v47  ;;  %v9200_v47 = vld [vmem:[%s13111_s1 + $0x6ac] ss:$12 sps:$4 sm:$0xff]  }
  0x67   :  { %5352 = vmatpush1.bf16.msra.mxu1 %v9117_v49  ;;  %v9201_v49 = vld [vmem:[%s13111_s1 + $0x170] ss:$12 sps:$4 sm:$0xff]  }
  0x68   :  { %5434 = vmatpush1.bf16.msra.mxu0 %v9120_v50  ;;  %5353 = vmatprep.subr.bf16.mxu1 %v9125_v51  ;;  %v9198_v50 = vld [vmem:[%s13111_s1 + $0x6a8] ss:$12 sps:$4 sm:$0xff]   ;;  %v9202_v51 = vld [vmem:[%s13111_s1 + $0xb0] ss:$12 sps:$4 sm:$0xff]  }
  0x69   :  { %5435 = vmatprep.subr.bf16.mxu0 %v9128_v52  ;;  %v9205_v52 = vld [vmem:[%s13111_s1 + $0x6c4] ss:$12 sps:$4 sm:$0xff]  }
  0x6b   :  { %5354 = vmatpush1.bf16.msra.mxu1 %v9123_v54  ;;  %v9206_v54 = vld [vmem:[%s13111_s1 + $0x248] ss:$12 sps:$4 sm:$0xff]  }
  0x6c   :  { %5436 = vmatpush1.bf16.msra.mxu0 %v9126_v55  ;;  %5355 = vmatprep.subr.bf16.mxu1 %v9131_v56  ;;  %v9203_v55 = vld [vmem:[%s13111_s1 + $0x6c0] ss:$12 sps:$4 sm:$0xff]   ;;  %v9207_v56 = vld [vmem:[%s13111_s1 + $0x188] ss:$12 sps:$4 sm:$0xff]  }
  0x6d   :  { %5437 = vmatprep.subr.bf16.mxu0 %v9134_v57  ;;  %v9210_v57 = vld [vmem:[%s13111_s1 + $0x6dc] ss:$12 sps:$4 sm:$0xff]  }
  0x6f   :  { %5356 = vmatpush1.bf16.msra.mxu1 %v9129_v58  ;;  %v9211_v58 = vld [vmem:[%s13111_s1 + $0x260] ss:$12 sps:$4 sm:$0xff]  }
  0x70   :  { %5438 = vmatpush1.bf16.msra.mxu0 %v9132_v59  ;;  %5357 = vmatprep.subr.bf16.mxu1 %v9137_v60  ;;  %v9208_v59 = vld [vmem:[%s13111_s1 + $0x6d8] ss:$12 sps:$4 sm:$0xff]   ;;  %v9212_v60 = vld [vmem:[%s13111_s1 + $0x1a0] ss:$12 sps:$4 sm:$0xff]  }
  0x71   :  { %5439 = vmatprep.subr.bf16.mxu0 %v9140_v61  ;;  %v9215_v61 = vld [vmem:[%s13111_s1 + $0x6f4] ss:$12 sps:$4 sm:$0xff]  }
  0x73   :  { %5358 = vmatpush1.bf16.msra.mxu1 %v9135_v62  ;;  %v9213_v62 = vld [vmem:[%s13111_s1 + $0x6f0] ss:$12 sps:$4 sm:$0xff]  }
  0x74   :  { %5440 = vmatpush1.bf16.msra.mxu0 %v9138_v63  ;;  %5359 = vmatprep.subr.bf16.mxu1 %v9143_v0  ;;  %v9217_v63 = vld [vmem:[%s13111_s1 + $0x1b8] ss:$12 sps:$4 sm:$0xff]  }
  0x75   :  { %5441 = vmatprep.subr.bf16.mxu0 %v9146_v1  ;;  %v9220_v0 = vld [vmem:[%s13111_s1 + $0x70c] ss:$12 sps:$4 sm:$0xff]   ;;  %v9221_v1 = vld [vmem:[%s13111_s1 + $0x290] ss:$12 sps:$4 sm:$0xff]  }
  0x77   :  { %5360 = vmatpush1.bf16.msra.mxu1 %v9141_v2  ;;  %v9222_v2 = vld [vmem:[%s13111_s1 + $0x1d0] ss:$12 sps:$4 sm:$0xff]  }
  0x78   :  { %5442 = vmatpush1.bf16.msra.mxu0 %v9144_v3  ;;  %5361 = vmatprep.subr.bf16.mxu1 %v9149_v4  ;;  %v9225_v3 = vld [vmem:[%s13111_s1 + $0x724] ss:$12 sps:$4 sm:$0xff]   ;;  %v9226_v4 = vld [vmem:[%s13111_s1 + $0x2a8] ss:$12 sps:$4 sm:$0xff]  }
  0x79   :  { %5443 = vmatprep.subr.bf16.mxu0 %v9152_v5  ;;  %v9223_v5 = vld [vmem:[%s13111_s1 + $0x720] ss:$12 sps:$4 sm:$0xff]  }
  0x7b   :  { %5362 = vmatpush1.bf16.msra.mxu1 %v9147_v8  ;;  %v9227_v8 = vld [vmem:[%s13111_s1 + $0x1e8] ss:$12 sps:$4 sm:$0xff]  }
  0x7c   :  { %5444 = vmatpush1.bf16.msra.mxu0 %v9150_v9  ;;  %5363 = vmatprep.subr.bf16.mxu1 %v9155_v10  ;;  %v9230_v9 = vld [vmem:[%s13111_s1 + $0x73c] ss:$12 sps:$4 sm:$0xff]   ;;  %v9231_v10 = vld [vmem:[%s13111_s1 + $0x2c0] ss:$12 sps:$4 sm:$0xff]  }
  0x7d   :  { %5445 = vmatprep.subr.bf16.mxu0 %v9158_v11  ;;  %v9228_v11 = vld [vmem:[%s13111_s1 + $0x738] ss:$12 sps:$4 sm:$0xff]  }
  0x7f   :  { %5364 = vmatpush1.bf16.msra.mxu1 %v9153_v12  ;;  %v9232_v12 = vld [vmem:[%s13111_s1 + $0x200] ss:$12 sps:$4 sm:$0xff]  }
  0x80   :  { %5446 = vmatpush1.bf16.msra.mxu0 %v9156_v13  ;;  %8440 = vmatprep.subr.bf16.mxu1 %v9166_v15  ;;  %v9235_v13 = vld [vmem:[%s13111_s1 + $0x754] ss:$12 sps:$4 sm:$0xff]   ;;  %v9233_v15 = vld [vmem:[%s13111_s1 + $0x750] ss:$12 sps:$4 sm:$0xff]  }
  0x81   :  { %5456 = vmatprep.subr.bf16.mxu0 %v9165_v14  ;;  %v9236_v14 = vld [vmem:[%s13111_s1 + $0x2d8] ss:$12 sps:$4 sm:$0xff]  }
  0x82   :  { %5366 = vmatmul.mubr.bf16.vlgmr.msra.gmra.mrb[0].mxu1 %v10613_v16 }
  0x83   :  { %5448 = vmatmul.mubr.bf16.vlgmr.msra.gmra.mrb[0].mxu0 %v10617_v17  ;;  %8441 = vmatpush3.bf16.msra.mxu1 %v9167_v19  ;;  %v9240_v19 = vld [vmem:[%s13111_s1 + $0x76c] ss:$12 sps:$4 sm:$0xff]  }
  0x84   :  { %5457 = vmatpush1.bf16.msra.mxu0 %v9163_v18  ;;  %8442 = vmatprep.subr.bf16.mxu1 %v9171_v21  ;;  %v9237_v18 = vld [vmem:[%s13111_s1 + $0x218] ss:$12 sps:$4 sm:$0xff]   ;;  %v9238_v21 = vld [vmem:[%s13111_s1 + $0x768] ss:$12 sps:$4 sm:$0xff]  }
  0x85   :  { %5458 = vmatprep.subr.bf16.mxu0 %v9170_v20  ;;  %5980 = vmatprep.mubr.bf16.mxu1 %v10327_v48  ;;  %v9181_v48 = vld [vmem:[%s13111_s1 + $0x110] ss:$12 sps:$4 sm:$0xff]  }
  0x86   :  { %5488 = vmatprep.mubr.bf16.mxu0 %v10677_v34  ;;  %v9241_v20 = vld [vmem:[%s13111_s1 + $0x2f0] ss:$12 sps:$4 sm:$0xff]  }
  0x87   :  { %8443 = vmatpush3.bf16.msra.mxu1 %v9172_v23  ;;  %v9247_v23 = vld [vmem:[%s13111_s1 + $0x784] ss:$12 sps:$4 sm:$0xff]  }
  0x88   :  { %5459 = vmatpush1.bf16.msra.mxu0 %v9168_v22  ;;  %8444 = vmatprep.subr.bf16.mxu1 %v9176_v25  ;;  %v9242_v22 = vld [vmem:[%s13111_s1 + $0x230] ss:$12 sps:$4 sm:$0xff]   ;;  %v10828_v25 = vcombine.low %v10667_v31, %v10667_v31 }
  0x89   :  { %5460 = vmatprep.subr.bf16.mxu0 %v9175_v24  ;;  %v9248_v24 = vld [vmem:[%s13111_s1 + $0x3c8] ss:$12 sps:$4 sm:$0xff]  }
  0x8b   :  { %8445 = vmatpush3.bf16.msra.mxu1 %v9177_v27  ;;  %v9249_v27 = vld [vmem:[%s13111_s1 + $0x308] ss:$12 sps:$4 sm:$0xff]  }
  0x8c   :  { %5461 = vmatpush1.bf16.msra.mxu0 %v9173_v26  ;;  %8446 = vmatprep.subr.bf16.mxu1 %v9181_v48  ;;  %v9245_v26 = vld [vmem:[%s13111_s1 + $0x780] ss:$12 sps:$4 sm:$0xff]  }
  0x8d   :  { %5462 = vmatprep.subr.bf16.mxu0 %v9180_v28  ;;  %v9252_v28 = vld [vmem:[%s13111_s1 + $0x79c] ss:$12 sps:$4 sm:$0xff]   ;;  %v9253_v48 = vld [vmem:[%s13111_s1 + $0x3e0] ss:$12 sps:$4 sm:$0xff]  }
  0x8f   :  { %8447 = vmatpush3.bf16.msra.mxu1 %v9182_v30  ;;  %v9250_v30 = vld [vmem:[%s13111_s1 + $0x798] ss:$12 sps:$4 sm:$0xff]  }
  0x90   :  { %5463 = vmatpush1.bf16.msra.mxu0 %v9178_v29  ;;  %8448 = vmatprep.subr.bf16.mxu1 %v9186_v33  ;;  %v10845_v29 = vld [vmem:[%s13112_s0 + $0x28] sm:$0xff]  ;;  %v9257_v33 = vld [vmem:[%s13111_s1 + $0x7b4] ss:$12 sps:$4 sm:$0xff]  }
  0x91   :  { %5464 = vmatprep.subr.bf16.mxu0 %v9185_v32  ;;  %v10852_v31 = vcombine.high %v10845_v29, %v10845_v29  ;;  %v9254_v32 = vld [vmem:[%s13111_s1 + $0x320] ss:$12 sps:$4 sm:$0xff]  }
  0x93   :  { %8449 = vmatpush3.bf16.msra.mxu1 %v9187_v38  ;;  %v9259_v38 = vld [vmem:[%s13111_s1 + $0x338] ss:$12 sps:$4 sm:$0xff]  }
  0x94   :  { %5465 = vmatpush1.bf16.msra.mxu0 %v9183_v35  ;;  %8450 = vmatprep.subr.bf16.mxu1 %v9191_v40  ;;  %v9258_v35 = vld [vmem:[%s13111_s1 + $0x3f8] ss:$12 sps:$4 sm:$0xff]   ;;  %v9260_v40 = vld [vmem:[%s13111_s1 + $0x7c8] ss:$12 sps:$4 sm:$0xff]  }
  0x95   :  { %5466 = vmatprep.subr.bf16.mxu0 %v9190_v39  ;;  %v9262_v39 = vld [vmem:[%s13111_s1 + $0x7cc] ss:$12 sps:$4 sm:$0xff]  }
  0x97   :  { %8451 = vmatpush3.bf16.msra.mxu1 %v9192_v42  ;;  %v9267_v42 = vld [vmem:[%s13111_s1 + $0x7e4] ss:$12 sps:$4 sm:$0xff]  }
  0x98   :  { %5467 = vmatpush1.bf16.msra.mxu0 %v9188_v41  ;;  %8452 = vmatprep.subr.bf16.mxu1 %v9196_v44  ;;  %v9264_v41 = vld [vmem:[%s13111_s1 + $0x350] ss:$12 sps:$4 sm:$0xff]   ;;  %v9265_v44 = vld [vmem:[%s13111_s1 + $0x7e0] ss:$12 sps:$4 sm:$0xff]  }
  0x99   :  { %5468 = vmatprep.subr.bf16.mxu0 %v9195_v43  ;;  %v9268_v43 = vld [vmem:[%s13111_s1 + $0x428] ss:$12 sps:$4 sm:$0xff]  }
  0x9b   :  { %8453 = vmatpush3.bf16.msra.mxu1 %v9197_v46  ;;  %v9272_v46 = vld [vmem:[%s13111_s1 + $0x7fc] ss:$12 sps:$4 sm:$0xff]  }
  0x9c   :  { %5469 = vmatpush1.bf16.msra.mxu0 %v9193_v45  ;;  %8454 = vmatprep.subr.bf16.mxu1 %v9201_v49  ;;  %v9269_v45 = vld [vmem:[%s13111_s1 + $0x368] ss:$12 sps:$4 sm:$0xff]   ;;  %v9270_v49 = vld [vmem:[%s13111_s1 + $0x7f8] ss:$12 sps:$4 sm:$0xff]  }
  0x9d   :  { %5470 = vmatprep.subr.bf16.mxu0 %v9200_v47  ;;  %v9273_v47 = vld [vmem:[%s13111_s1 + $0x440] ss:$12 sps:$4 sm:$0xff]  }
  0x9f   :  { %8455 = vmatpush3.bf16.msra.mxu1 %v9202_v51  ;;  %v9277_v51 = vld [vmem:[%s13111_s1 + $0x814] ss:$12 sps:$4 sm:$0xff]  }
  0xa0   :  { %5471 = vmatpush1.bf16.msra.mxu0 %v9198_v50  ;;  %8462 = vmatprep.subr.bf16.mxu1 %v9206_v54  ;;  %v9274_v50 = vld [vmem:[%s13111_s1 + $0x380] ss:$12 sps:$4 sm:$0xff]   ;;  %v9275_v54 = vld [vmem:[%s13111_s1 + $0x810] ss:$12 sps:$4 sm:$0xff]  }
  0xa1   :  { %5472 = vmatprep.subr.bf16.mxu0 %v9205_v52  ;;  %v9278_v52 = vld [vmem:[%s13111_s1 + $0x458] ss:$12 sps:$4 sm:$0xff]  }
  0xa2   :  { %5981 = vmatmul.mubr.bf16.vlgmr.msra.gmra.mrb[4].mxu1 %v10393_v6  ;;  %v9216_v6 = vld [vmem:[%s13111_s1 + $0x278] ss:$12 sps:$4 sm:$0xff]  }
  0xa3   :  { %8463 = vmatpush3.bf16.msra.mxu1 %v9207_v56  ;;  %6020 = vmatprep.mubr.bf16.mxu1 %v10489_v36  ;;  %v9218_v36 = vld [vmem:[%s13111_s1 + $0x708] ss:$12 sps:$4 sm:$0xff]   ;;  %v9282_v56 = vld [vmem:[%s13111_s1 + $0x82c] ss:$12 sps:$4 sm:$0xff]  }
  0xa4   :  { %5473 = vmatpush1.bf16.msra.mxu0 %v9203_v55  ;;  %8464 = vmatprep.subr.bf16.mxu1 %v9211_v58  ;;  %v9279_v55 = vld [vmem:[%s13111_s1 + $0x398] ss:$12 sps:$4 sm:$0xff]   ;;  %v9280_v58 = vld [vmem:[%s13111_s1 + $0x828] ss:$12 sps:$4 sm:$0xff]  }
  0xa5   :  { %5474 = vmatprep.subr.bf16.mxu0 %v9210_v57  ;;  %v9283_v57 = vld [vmem:[%s13111_s1 + $0x470] ss:$12 sps:$4 sm:$0xff]  }
  0xa7   :  { %8465 = vmatpush3.bf16.msra.mxu1 %v9212_v60  ;;  %v9287_v60 = vld [vmem:[%s13111_s1 + $0x844] ss:$12 sps:$4 sm:$0xff]  }
  0xa8   :  { %5475 = vmatpush1.bf16.msra.mxu0 %v9208_v59  ;;  %8466 = vmatprep.subr.bf16.mxu1 %v9216_v6  ;;  %v9284_v59 = vld [vmem:[%s13111_s1 + $0x3b0] ss:$12 sps:$4 sm:$0xff]   ;;  %v9285_v6 = vld [vmem:[%s13111_s1 + $0x840] ss:$12 sps:$4 sm:$0xff]  }
  0xa9   :  { %5476 = vmatprep.subr.bf16.mxu0 %v9215_v61  ;;  %v9288_v61 = vld [vmem:[%s13111_s1 + $0x548] ss:$12 sps:$4 sm:$0xff]  }
  0xab   :  { %8467 = vmatpush3.bf16.msra.mxu1 %v9217_v63  ;;  %v9292_v63 = vld [vmem:[%s13111_s1 + $0x85c] ss:$12 sps:$4 sm:$0xff]  }
  0xac   :  { %5477 = vmatpush1.bf16.msra.mxu0 %v9213_v62  ;;  %8468 = vmatprep.subr.bf16.mxu1 %v9221_v1  ;;  %v9289_v62 = vld [vmem:[%s13111_s1 + $0x488] ss:$12 sps:$4 sm:$0xff]   ;;  %v9290_v1 = vld [vmem:[%s13111_s1 + $0x858] ss:$12 sps:$4 sm:$0xff]  }
  0xad   :  { %5478 = vmatprep.subr.bf16.mxu0 %v9220_v0  ;;  %v9293_v0 = vld [vmem:[%s13111_s1 + $0x560] ss:$12 sps:$4 sm:$0xff]  }
  0xaf   :  { %8469 = vmatpush3.bf16.msra.mxu1 %v9222_v2  ;;  %v9297_v2 = vld [vmem:[%s13111_s1 + $0x874] ss:$12 sps:$4 sm:$0xff]  }
  0xb0   :  { %5479 = vmatpush1.bf16.msra.mxu0 %v9218_v36  ;;  %8470 = vmatprep.subr.bf16.mxu1 %v9226_v4  ;;  %v9294_v36 = vld [vmem:[%s13111_s1 + $0x4a0] ss:$12 sps:$4 sm:$0xff]   ;;  %v9299_v4 = vld [vmem:[%s13111_s1 + $0x4b8] ss:$12 sps:$4 sm:$0xff]  }
  0xb1   :  { %5480 = vmatprep.subr.bf16.mxu0 %v9225_v3  ;;  %v9295_v3 = vld [vmem:[%s13111_s1 + $0x870] ss:$12 sps:$4 sm:$0xff]  }
  0xb3   :  { %8471 = vmatpush3.bf16.msra.mxu1 %v9227_v8  ;;  %v9300_v8 = vld [vmem:[%s13111_s1 + $0x888] ss:$12 sps:$4 sm:$0xff]  }
  0xb4   :  { %5481 = vmatpush1.bf16.msra.mxu0 %v9223_v5  ;;  %8472 = vmatprep.subr.bf16.mxu1 %v9231_v10  ;;  %v9302_v5 = vld [vmem:[%s13111_s1 + $0x88c] ss:$12 sps:$4 sm:$0xff]   ;;  %v9307_v10 = vld [vmem:[%s13111_s1 + $0x8a4] ss:$12 sps:$4 sm:$0xff]  }
  0xb5   :  { %5482 = vmatprep.subr.bf16.mxu0 %v9230_v9  ;;  %v9304_v9 = vld [vmem:[%s13111_s1 + $0x4d0] ss:$12 sps:$4 sm:$0xff]  }
  0xb7   :  { %8473 = vmatpush3.bf16.msra.mxu1 %v9232_v12  ;;  %v9305_v12 = vld [vmem:[%s13111_s1 + $0x8a0] ss:$12 sps:$4 sm:$0xff]  }
  0xb8   :  { %5483 = vmatpush1.bf16.msra.mxu0 %v9228_v11  ;;  %8474 = vmatprep.subr.bf16.mxu1 %v9236_v14  ;;  %v9308_v11 = vld [vmem:[%s13111_s1 + $0x5a8] ss:$12 sps:$4 sm:$0xff]  }
  0xb9   :  { %5484 = vmatprep.subr.bf16.mxu0 %v9235_v13  ;;  %v9309_v13 = vld [vmem:[%s13111_s1 + $0x4e8] ss:$12 sps:$4 sm:$0xff]  }
  0xba   :  { %v9312_v14 = vld [vmem:[%s13111_s1 + $0x8bc] ss:$12 sps:$4 sm:$0xff]  }
  0xbb   :  { %8475 = vmatpush3.bf16.msra.mxu1 %v9237_v18  ;;  %v9310_v18 = vld [vmem:[%s13111_s1 + $0x8b8] ss:$12 sps:$4 sm:$0xff]  }
  0xbc   :  { %5485 = vmatpush1.bf16.msra.mxu0 %v9233_v15  ;;  %8476 = vmatprep.subr.bf16.mxu1 %v9241_v20  ;;  %v9313_v15 = vld [vmem:[%s13111_s1 + $0x5c0] ss:$12 sps:$4 sm:$0xff]  }
  0xbd   :  { %5486 = vmatprep.subr.bf16.mxu0 %v9240_v19  ;;  %v9314_v19 = vld [vmem:[%s13111_s1 + $0x500] ss:$12 sps:$4 sm:$0xff]  }
  0xbe   :  { %v9317_v20 = vld [vmem:[%s13111_s1 + $0x8d4] ss:$12 sps:$4 sm:$0xff]  }
  0xbf   :  { %8477 = vmatpush3.bf16.msra.mxu1 %v9242_v22  ;;  %v9315_v22 = vld [vmem:[%s13111_s1 + $0x8d0] ss:$12 sps:$4 sm:$0xff]  }
  0xc0   :  { %5487 = vmatpush1.bf16.msra.mxu0 %v9238_v21  ;;  %8484 = vmatprep.subr.bf16.mxu1 %v9248_v24  ;;  %v9318_v21 = vld [vmem:[%s13111_s1 + $0x5d8] ss:$12 sps:$4 sm:$0xff]  }
  0xc1   :  { %5497 = vmatprep.subr.bf16.mxu0 %v9247_v23  ;;  %v9319_v23 = vld [vmem:[%s13111_s1 + $0x518] ss:$12 sps:$4 sm:$0xff]  }
  0xc2   :  { %6021 = vmatmul.mubr.bf16.vlgmr.msra.gmra.mrb[8].mxu1 %v10613_v16  ;;  %v9255_v16 = vld [vmem:[%s13111_s1 + $0x7b0] ss:$12 sps:$4 sm:$0xff]   ;;  %v9322_v24 = vld [vmem:[%s13111_s1 + $0x8ec] ss:$12 sps:$4 sm:$0xff]  }
  0xc3   :  { %5489 = vmatmul.mubr.bf16.vlgmr.msra.gmra.mrb[0].mxu0 %v10828_v25  ;;  %8485 = vmatpush3.bf16.msra.mxu1 %v9249_v27  ;;  %v9320_v27 = vld [vmem:[%s13111_s1 + $0x8e8] ss:$12 sps:$4 sm:$0xff]  }
  0xc4   :  { %5498 = vmatpush1.bf16.msra.mxu0 %v9245_v26  ;;  %8486 = vmatprep.subr.bf16.mxu1 %v9253_v48  ;;  %v9323_v26 = vld [vmem:[%s13111_s1 + $0x5f0] ss:$12 sps:$4 sm:$0xff]  }
  0xc5   :  { %5499 = vmatprep.subr.bf16.mxu0 %v9252_v28  ;;  %6060 = vmatprep.mubr.bf16.mxu1 %v10341_v53  ;;  %v9263_v53 = vld [vmem:[%s13111_s1 + $0x410] ss:$12 sps:$4 sm:$0xff]  }
  0xc6   :  { %5529 = vmatprep.mubr.bf16.mxu0 %v10852_v31  ;;  %v9324_v28 = vld [vmem:[%s13111_s1 + $0x530] ss:$12 sps:$4 sm:$0xff]  }
  0xc7   :  { %8487 = vmatpush3.bf16.msra.mxu1 %v9254_v32  ;;  %v9329_v48 = vld [vmem:[%s13111_s1 + $0x904] ss:$12 sps:$4 sm:$0xff]   ;;  %v9327_v32 = vld [vmem:[%s13111_s1 + $0x900] ss:$12 sps:$4 sm:$0xff]  }
  0xc8   :  { %5500 = vmatpush1.bf16.msra.mxu0 %v9250_v30  ;;  %8488 = vmatprep.subr.bf16.mxu1 %v9258_v35  ;;  %v9330_v30 = vld [vmem:[%s13111_s1 + $0x6c8] ss:$12 sps:$4 sm:$0xff]  }
  0xc9   :  { %5501 = vmatprep.subr.bf16.mxu0 %v9257_v33  ;;  %v11042_v33 = vcombine.low %v10845_v29, %v10845_v29  ;;  %v9331_v35 = vld [vmem:[%s13111_s1 + $0x608] ss:$12 sps:$4 sm:$0xff]   ;;  %v9335_v29 = vld [vmem:[%s13111_s1 + $0x6e0] ss:$12 sps:$4 sm:$0xff]  }
  0xcb   :  { %8489 = vmatpush3.bf16.msra.mxu1 %v9259_v38  ;;  %v9334_v38 = vld [vmem:[%s13111_s1 + $0x91c] ss:$12 sps:$4 sm:$0xff]  }
  0xcc   :  { %5502 = vmatpush1.bf16.msra.mxu0 %v9255_v16  ;;  %8490 = vmatprep.subr.bf16.mxu1 %v9263_v53  ;;  %v11050_v16 = vld [vmem:[%s13112_s0 + $0x30] sm:$0xff] }
  0xcd   :  { %5503 = vmatprep.subr.bf16.mxu0 %v9262_v39  ;;  %v9332_v39 = vld [vmem:[%s13111_s1 + $0x918] ss:$12 sps:$4 sm:$0xff]   ;;  %v11063_v53 = vcombine.high %v11050_v16, %v11050_v16 }
  0xcf   :  { %8491 = vmatpush3.bf16.msra.mxu1 %v9264_v41  ;;  %v9339_v41 = vld [vmem:[%s13111_s1 + $0x934] ss:$12 sps:$4 sm:$0xff]  }
  0xd0   :  { %5504 = vmatpush1.bf16.msra.mxu0 %v9260_v40  ;;  %8492 = vmatprep.subr.bf16.mxu1 %v9268_v43  ;;  %v9336_v40 = vld [vmem:[%s13111_s1 + $0x620] ss:$12 sps:$4 sm:$0xff]   ;;  %v9341_v43 = vld [vmem:[%s13111_s1 + $0x638] ss:$12 sps:$4 sm:$0xff]  }
  0xd1   :  { %5505 = vmatprep.subr.bf16.mxu0 %v9267_v42  ;;  %v9340_v42 = vld [vmem:[%s13111_s1 + $0x6f8] ss:$12 sps:$4 sm:$0xff]  }
  0xd3   :  { %8493 = vmatpush3.bf16.msra.mxu1 %v9269_v45  ;;  %v9342_v45 = vld [vmem:[%s13111_s1 + $0x948] ss:$12 sps:$4 sm:$0xff]  }
  0xd4   :  { %5506 = vmatpush1.bf16.msra.mxu0 %v9265_v44  ;;  %8494 = vmatprep.subr.bf16.mxu1 %v9273_v47  ;;  %v9344_v44 = vld [vmem:[%s13111_s1 + $0x94c] ss:$12 sps:$4 sm:$0xff]   ;;  %v9349_v47 = vld [vmem:[%s13111_s1 + $0x964] ss:$12 sps:$4 sm:$0xff]  }
  0xd5   :  { %5507 = vmatprep.subr.bf16.mxu0 %v9272_v46  ;;  %v9346_v46 = vld [vmem:[%s13111_s1 + $0x650] ss:$12 sps:$4 sm:$0xff]  }
  0xd7   :  { %8495 = vmatpush3.bf16.msra.mxu1 %v9274_v50  ;;  %v9347_v50 = vld [vmem:[%s13111_s1 + $0x960] ss:$12 sps:$4 sm:$0xff]  }
  0xd8   :  { %5508 = vmatpush1.bf16.msra.mxu0 %v9270_v49  ;;  %8496 = vmatprep.subr.bf16.mxu1 %v9278_v52  ;;  %v9350_v49 = vld [vmem:[%s13111_s1 + $0x728] ss:$12 sps:$4 sm:$0xff]  }
  0xd9   :  { %5509 = vmatprep.subr.bf16.mxu0 %v9277_v51  ;;  %v9351_v51 = vld [vmem:[%s13111_s1 + $0x668] ss:$12 sps:$4 sm:$0xff]  }
  0xda   :  { %v9354_v52 = vld [vmem:[%s13111_s1 + $0x97c] ss:$12 sps:$4 sm:$0xff]  }
  0xdb   :  { %8497 = vmatpush3.bf16.msra.mxu1 %v9279_v55  ;;  %v9352_v55 = vld [vmem:[%s13111_s1 + $0x978] ss:$12 sps:$4 sm:$0xff]  }
  0xdc   :  { %5510 = vmatpush1.bf16.msra.mxu0 %v9275_v54  ;;  %8498 = vmatprep.subr.bf16.mxu1 %v9283_v57  ;;  %v9355_v54 = vld [vmem:[%s13111_s1 + $0x740] ss:$12 sps:$4 sm:$0xff]  }
  0xdd   :  { %5511 = vmatprep.subr.bf16.mxu0 %v9282_v56  ;;  %v9356_v56 = vld [vmem:[%s13111_s1 + $0x680] ss:$12 sps:$4 sm:$0xff]  }
  0xde   :  { %v9359_v57 = vld [vmem:[%s13111_s1 + $0x994] ss:$12 sps:$4 sm:$0xff]  }
  0xdf   :  { %8499 = vmatpush3.bf16.msra.mxu1 %v9284_v59  ;;  %v9357_v59 = vld [vmem:[%s13111_s1 + $0x990] ss:$12 sps:$4 sm:$0xff]  }
  0xe0   :  { %5512 = vmatpush1.bf16.msra.mxu0 %v9280_v58  ;;  %8506 = vmatprep.subr.bf16.mxu1 %v9288_v61  ;;  %v9360_v58 = vld [vmem:[%s13111_s1 + $0x758] ss:$12 sps:$4 sm:$0xff]  }
  0xe1   :  { %5513 = vmatprep.subr.bf16.mxu0 %v9287_v60  ;;  %v9361_v60 = vld [vmem:[%s13111_s1 + $0x698] ss:$12 sps:$4 sm:$0xff]  }
  0xe2   :  { %6061 = vmatmul.mubr.bf16.vlgmr.msra.gmra.mrb[12].mxu1 %v10395_v7  ;;  %v9298_v7 = vld [vmem:[%s13111_s1 + $0x578] ss:$12 sps:$4 sm:$0xff]  }
  0xe3   :  { %8507 = vmatpush3.bf16.msra.mxu1 %v9289_v62  ;;  %6100 = vmatprep.mubr.bf16.mxu1 %v10493_v37  ;;  %v9303_v37 = vld [vmem:[%s13111_s1 + $0x590] ss:$12 sps:$4 sm:$0xff]   ;;  %v9364_v61 = vld [vmem:[%s13111_s1 + $0x9ac] ss:$12 sps:$4 sm:$0xff]   ;;  %v9362_v62 = vld [vmem:[%s13111_s1 + $0x9a8] ss:$12 sps:$4 sm:$0xff]  }
  0xe4   :  { %5514 = vmatpush1.bf16.msra.mxu0 %v9285_v6  ;;  %8508 = vmatprep.subr.bf16.mxu1 %v9293_v0  ;;  %v9365_v6 = vld [vmem:[%s13111_s1 + $0x770] ss:$12 sps:$4 sm:$0xff]  }
  0xe5   :  { %5515 = vmatprep.subr.bf16.mxu0 %v9292_v63  ;;  %v9366_v63 = vld [vmem:[%s13111_s1 + $0x6b0] ss:$12 sps:$4 sm:$0xff]  }
  0xe6   :  { %v9369_v0 = vld [vmem:[%s13111_s1 + $0x9c4] ss:$12 sps:$4 sm:$0xff]  }
  0xe7   :  { %8509 = vmatpush3.bf16.msra.mxu1 %v9294_v36  ;;  %v9367_v36 = vld [vmem:[%s13111_s1 + $0x9c0] ss:$12 sps:$4 sm:$0xff]  }
  0xe8   :  { %5516 = vmatpush1.bf16.msra.mxu0 %v9290_v1  ;;  %8510 = vmatprep.subr.bf16.mxu1 %v9298_v7  ;;  %v9370_v1 = vld [vmem:[%s13111_s1 + $0x848] ss:$12 sps:$4 sm:$0xff]  }
  0xe9   :  { %5517 = vmatprep.subr.bf16.mxu0 %v9297_v2  ;;  %v9371_v2 = vld [vmem:[%s13111_s1 + $0x788] ss:$12 sps:$4 sm:$0xff]  }
  0xea   :  { %v9374_v7 = vld [vmem:[%s13111_s1 + $0x9dc] ss:$12 sps:$4 sm:$0xff]  }
  0xeb   :  { %8511 = vmatpush3.bf16.msra.mxu1 %v9299_v4  ;;  %v9372_v4 = vld [vmem:[%s13111_s1 + $0x9d8] ss:$12 sps:$4 sm:$0xff]  }
  0xec   :  { %5518 = vmatpush1.bf16.msra.mxu0 %v9295_v3  ;;  %8512 = vmatprep.subr.bf16.mxu1 %v9303_v37  ;;  %v9375_v3 = vld [vmem:[%s13111_s1 + $0x860] ss:$12 sps:$4 sm:$0xff]  }
  0xed   :  { %5519 = vmatprep.subr.bf16.mxu0 %v9302_v5  ;;  %v9376_v5 = vld [vmem:[%s13111_s1 + $0x7a0] ss:$12 sps:$4 sm:$0xff]  }
  0xee   :  { %v9379_v37 = vld [vmem:[%s13111_s1 + $0x9f4] ss:$12 sps:$4 sm:$0xff]  }
  0xef   :  { %8513 = vmatpush3.bf16.msra.mxu1 %v9304_v9  ;;  %v9381_v9 = vld [vmem:[%s13111_s1 + $0x7b8] ss:$12 sps:$4 sm:$0xff]  }
  0xf0   :  { %5520 = vmatpush1.bf16.msra.mxu0 %v9300_v8  ;;  %8514 = vmatprep.subr.bf16.mxu1 %v9308_v11  ;;  %v9380_v8 = vld [vmem:[%s13111_s1 + $0x878] ss:$12 sps:$4 sm:$0xff]   ;;  %v9382_v11 = vld [vmem:[%s13111_s1 + $0xa08] ss:$12 sps:$4 sm:$0xff]  }
  0xf1   :  { %5521 = vmatprep.subr.bf16.mxu0 %v9307_v10  ;;  %v9384_v10 = vld [vmem:[%s13111_s1 + $0xa0c] ss:$12 sps:$4 sm:$0xff]  }
  0xf3   :  { %8515 = vmatpush3.bf16.msra.mxu1 %v9309_v13  ;;  %v9389_v13 = vld [vmem:[%s13111_s1 + $0xa24] ss:$12 sps:$4 sm:$0xff]  }
  0xf4   :  { %5522 = vmatpush1.bf16.msra.mxu0 %v9305_v12  ;;  %8516 = vmatprep.subr.bf16.mxu1 %v9313_v15  ;;  %v9386_v12 = vld [vmem:[%s13111_s1 + $0x7d0] ss:$12 sps:$4 sm:$0xff]   ;;  %v9387_v15 = vld [vmem:[%s13111_s1 + $0xa20] ss:$12 sps:$4 sm:$0xff]  }
  0xf5   :  { %5523 = vmatprep.subr.bf16.mxu0 %v9312_v14  ;;  %v9390_v14 = vld [vmem:[%s13111_s1 + $0x8a8] ss:$12 sps:$4 sm:$0xff]  }
  0xf7   :  { %8517 = vmatpush3.bf16.msra.mxu1 %v9314_v19  ;;  %v9394_v19 = vld [vmem:[%s13111_s1 + $0xa3c] ss:$12 sps:$4 sm:$0xff]  }
  0xf8   :  { %5524 = vmatpush1.bf16.msra.mxu0 %v9310_v18  ;;  %8518 = vmatprep.subr.bf16.mxu1 %v9318_v21  ;;  %v9391_v18 = vld [vmem:[%s13111_s1 + $0x7e8] ss:$12 sps:$4 sm:$0xff]   ;;  %v9392_v21 = vld [vmem:[%s13111_s1 + $0xa38] ss:$12 sps:$4 sm:$0xff]  }
  0xf9   :  { %5525 = vmatprep.subr.bf16.mxu0 %v9317_v20  ;;  %v9395_v20 = vld [vmem:[%s13111_s1 + $0x8c0] ss:$12 sps:$4 sm:$0xff]  }
  0xfb   :  { %8519 = vmatpush3.bf16.msra.mxu1 %v9319_v23  ;;  %v9399_v23 = vld [vmem:[%s13111_s1 + $0xa54] ss:$12 sps:$4 sm:$0xff]  }
  0xfc   :  { %5526 = vmatpush1.bf16.msra.mxu0 %v9315_v22  ;;  %8520 = vmatprep.subr.bf16.mxu1 %v9323_v26  ;;  %v9396_v22 = vld [vmem:[%s13111_s1 + $0x800] ss:$12 sps:$4 sm:$0xff]   ;;  %v9397_v26 = vld [vmem:[%s13111_s1 + $0xa50] ss:$12 sps:$4 sm:$0xff]  }
  0xfd   :  { %5527 = vmatprep.subr.bf16.mxu0 %v9322_v24  ;;  %v9400_v24 = vld [vmem:[%s13111_s1 + $0x8d8] ss:$12 sps:$4 sm:$0xff]  }
  0xff   :  { %8521 = vmatpush3.bf16.msra.mxu1 %v9324_v28  ;;  %v9404_v28 = vld [vmem:[%s13111_s1 + $0xa6c] ss:$12 sps:$4 sm:$0xff]  }
 0x100   :  { %5528 = vmatpush1.bf16.msra.mxu0 %v9320_v27  ;;  %8528 = vmatprep.subr.bf16.mxu1 %v9330_v30  ;;  %v9401_v27 = vld [vmem:[%s13111_s1 + $0x818] ss:$12 sps:$4 sm:$0xff]   ;;  %v9402_v30 = vld [vmem:[%s13111_s1 + $0xa68] ss:$12 sps:$4 sm:$0xff]  }
 0x101   :  { %5538 = vmatprep.subr.bf16.mxu0 %v9329_v48  ;;  %v9405_v48 = vld [vmem:[%s13111_s1 + $0x8f0] ss:$12 sps:$4 sm:$0xff]  }
 0x102   :  { %6101 = vmatmul.mubr.bf16.vlgmr.msra.gmra.mrb[16].mxu1 %v10617_v17  ;;  %v9337_v17 = vld [vmem:[%s13111_s1 + $0x930] ss:$12 sps:$4 sm:$0xff]  }
 0x103   :  { %5530 = vmatmul.mubr.bf16.vlgmr.msra.gmra.mrb[0].mxu0 %v11042_v33  ;;  %8529 = vmatpush3.bf16.msra.mxu1 %v9331_v35  ;;  %v9411_v35 = vld [vmem:[%s13111_s1 + $0xa84] ss:$12 sps:$4 sm:$0xff]  }
 0x104   :  { %5539 = vmatpush1.bf16.msra.mxu0 %v9327_v32  ;;  %8530 = vmatprep.subr.bf16.mxu1 %v9335_v29  ;;  %v9406_v32 = vld [vmem:[%s13111_s1 + $0x830] ss:$12 sps:$4 sm:$0xff]   ;;  %v9409_v29 = vld [vmem:[%s13111_s1 + $0xa80] ss:$12 sps:$4 sm:$0xff]  }
 0x105   :  { %5540 = vmatprep.subr.bf16.mxu0 %v9334_v38  ;;  %6140 = vmatprep.mubr.bf16.mxu1 %v10677_v34  ;;  %v9345_v34 = vld [vmem:[%s13111_s1 + $0x710] ss:$12 sps:$4 sm:$0xff]   ;;  %v9412_v38 = vld [vmem:[%s13111_s1 + $0x9c8] ss:$12 sps:$4 sm:$0xff]  }
 0x106   :  { %5570 = vmatprep.mubr.bf16.mxu0 %v11063_v53 }
 0x107   :  { %8531 = vmatpush3.bf16.msra.mxu1 %v9336_v40  ;;  %v11256_v40 = vcombine.low %v11050_v16, %v11050_v16 }
 0x108   :  { %5541 = vmatpush1.bf16.msra.mxu0 %v9332_v39  ;;  %8532 = vmatprep.subr.bf16.mxu1 %v9340_v42  ;;  %v9413_v39 = vld [vmem:[%s13111_s1 + $0x908] ss:$12 sps:$4 sm:$0xff]  }
 0x109   :  { %5542 = vmatprep.subr.bf16.mxu0 %v9339_v41  ;;  %v11261_v41 = vld [vmem:[%s13112_s0 + $0x38] sm:$0xff] }
 0x10a   :  { %v9416_v42 = vld [vmem:[%s13111_s1 + $0xa9c] ss:$12 sps:$4 sm:$0xff]   ;;  %v11271_v16 = vcombine.high %v11261_v41, %v11261_v41 }
 0x10b   :  { %8533 = vmatpush3.bf16.msra.mxu1 %v9341_v43  ;;  %v9414_v43 = vld [vmem:[%s13111_s1 + $0xa98] ss:$12 sps:$4 sm:$0xff]  }
 0x10c   :  { %5543 = vmatpush1.bf16.msra.mxu0 %v9337_v17  ;;  %8534 = vmatprep.subr.bf16.mxu1 %v9345_v34  ;;  %v9417_v17 = vld [vmem:[%s13111_s1 + $0x9e0] ss:$12 sps:$4 sm:$0xff]  }
 0x10d   :  { %5544 = vmatprep.subr.bf16.mxu0 %v9344_v44  ;;  %v9418_v44 = vld [vmem:[%s13111_s1 + $0x920] ss:$12 sps:$4 sm:$0xff]  }
 0x10e   :  { %v9421_v34 = vld [vmem:[%s13111_s1 + $0xab4] ss:$12 sps:$4 sm:$0xff]  }
 0x10f   :  { %8535 = vmatpush3.bf16.msra.mxu1 %v9346_v46  ;;  %v9423_v46 = vld [vmem:[%s13111_s1 + $0x938] ss:$12 sps:$4 sm:$0xff]  }
 0x110   :  { %5545 = vmatpush1.bf16.msra.mxu0 %v9342_v45  ;;  %8536 = vmatprep.subr.bf16.mxu1 %v9350_v49  ;;  %v9419_v45 = vld [vmem:[%s13111_s1 + $0xab0] ss:$12 sps:$4 sm:$0xff]   ;;  %v9424_v49 = vld [vmem:[%s13111_s1 + $0xac8] ss:$12 sps:$4 sm:$0xff]  }
 0x111   :  { %5546 = vmatprep.subr.bf16.mxu0 %v9349_v47  ;;  %v9426_v47 = vld [vmem:[%s13111_s1 + $0xacc] ss:$12 sps:$4 sm:$0xff]  }
 0x113   :  { %8537 = vmatpush3.bf16.msra.mxu1 %v9351_v51  ;;  %v9431_v51 = vld [vmem:[%s13111_s1 + $0xae4] ss:$12 sps:$4 sm:$0xff]  }
 0x114   :  { %5547 = vmatpush1.bf16.msra.mxu0 %v9347_v50  ;;  %8538 = vmatprep.subr.bf16.mxu1 %v9355_v54  ;;  %v9428_v50 = vld [vmem:[%s13111_s1 + $0x950] ss:$12 sps:$4 sm:$0xff]   ;;  %v9429_v54 = vld [vmem:[%s13111_s1 + $0xae0] ss:$12 sps:$4 sm:$0xff]  }
 0x115   :  { %5548 = vmatprep.subr.bf16.mxu0 %v9354_v52  ;;  %v9432_v52 = vld [vmem:[%s13111_s1 + $0xa28] ss:$12 sps:$4 sm:$0xff]  }
 0x117   :  { %8539 = vmatpush3.bf16.msra.mxu1 %v9356_v56  ;;  %v9436_v56 = vld [vmem:[%s13111_s1 + $0xafc] ss:$12 sps:$4 sm:$0xff]  }
 0x118   :  { %5549 = vmatpush1.bf16.msra.mxu0 %v9352_v55  ;;  %8540 = vmatprep.subr.bf16.mxu1 %v9360_v58  ;;  %v9433_v55 = vld [vmem:[%s13111_s1 + $0x968] ss:$12 sps:$4 sm:$0xff]   ;;  %v9434_v58 = vld [vmem:[%s13111_s1 + $0xaf8] ss:$12 sps:$4 sm:$0xff]  }
 0x119   :  { %5550 = vmatprep.subr.bf16.mxu0 %v9359_v57  ;;  %v9437_v57 = vld [vmem:[%s13111_s1 + $0xa40] ss:$12 sps:$4 sm:$0xff]  }
 0x11b   :  { %8541 = vmatpush3.bf16.msra.mxu1 %v9361_v60  ;;  %v9441_v60 = vld [vmem:[%s13111_s1 + $0xb14] ss:$12 sps:$4 sm:$0xff]  }
 0x11c   :  { %5551 = vmatpush1.bf16.msra.mxu0 %v9357_v59  ;;  %8542 = vmatprep.subr.bf16.mxu1 %v9365_v6  ;;  %v9438_v59 = vld [vmem:[%s13111_s1 + $0x980] ss:$12 sps:$4 sm:$0xff]   ;;  %v9439_v6 = vld [vmem:[%s13111_s1 + $0xb10] ss:$12 sps:$4 sm:$0xff]  }
 0x11d   :  { %5552 = vmatprep.subr.bf16.mxu0 %v9364_v61  ;;  %v9442_v61 = vld [vmem:[%s13111_s1 + $0xa58] ss:$12 sps:$4 sm:$0xff]  }
 0x11f   :  { %8543 = vmatpush3.bf16.msra.mxu1 %v9366_v63  ;;  %v9446_v63 = vld [vmem:[%s13111_s1 + $0xb2c] ss:$12 sps:$4 sm:$0xff]  }
 0x120   :  { %5553 = vmatpush1.bf16.msra.mxu0 %v9362_v62  ;;  %8550 = vmatprep.subr.bf16.mxu1 %v9370_v1  ;;  %v9443_v62 = vld [vmem:[%s13111_s1 + $0x998] ss:$12 sps:$4 sm:$0xff]   ;;  %v9444_v1 = vld [vmem:[%s13111_s1 + $0xb28] ss:$12 sps:$4 sm:$0xff]  }
 0x121   :  { %5554 = vmatprep.subr.bf16.mxu0 %v9369_v0  ;;  %v9447_v0 = vld [vmem:[%s13111_s1 + $0xa70] ss:$12 sps:$4 sm:$0xff]  }
 0x122   :  { %6141 = vmatmul.mubr.bf16.vlgmr.msra.gmra.mrb[20].mxu1 %v10828_v25  ;;  %v9377_v25 = vld [vmem:[%s13111_s1 + $0x9f0] ss:$12 sps:$4 sm:$0xff]  }
 0x123   :  { %8551 = vmatpush3.bf16.msra.mxu1 %v9371_v2  ;;  %6180 = vmatprep.mubr.bf16.mxu1 %v10852_v31  ;;  %v9385_v31 = vld [vmem:[%s13111_s1 + $0x890] ss:$12 sps:$4 sm:$0xff]  }
 0x124   :  { %5555 = vmatpush1.bf16.msra.mxu0 %v9367_v36  ;;  %8552 = vmatprep.subr.bf16.mxu1 %v9375_v3  ;;  %v9448_v36 = vld [vmem:[%s13111_s1 + $0x9b0] ss:$12 sps:$4 sm:$0xff]   ;;  %v9449_v3 = vld [vmem:[%s13111_s1 + $0xb40] ss:$12 sps:$4 sm:$0xff]  }
 0x125   :  { %5556 = vmatprep.subr.bf16.mxu0 %v9374_v7  ;;  %v9451_v2 = vld [vmem:[%s13111_s1 + $0xb44] ss:$12 sps:$4 sm:$0xff]   ;;  %v9452_v7 = vld [vmem:[%s13111_s1 + $0xb48] ss:$12 sps:$4 sm:$0xff]  }
 0x127   :  { %8553 = vmatpush3.bf16.msra.mxu1 %v9376_v5  ;;  %v9456_v5 = vld [vmem:[%s13111_s1 + $0xb5c] ss:$12 sps:$4 sm:$0xff]  }
 0x128   :  { %5557 = vmatpush1.bf16.msra.mxu0 %v9372_v4  ;;  %8554 = vmatprep.subr.bf16.mxu1 %v9380_v8  ;;  %v9453_v4 = vld [vmem:[%s13111_s1 + $0xa88] ss:$12 sps:$4 sm:$0xff]   ;;  %v9454_v8 = vld [vmem:[%s13111_s1 + $0xb58] ss:$12 sps:$4 sm:$0xff]  }
 0x129   :  { %5558 = vmatprep.subr.bf16.mxu0 %v9379_v37  ;;  %v9457_v37 = vld [vmem:[%s13111_s1 + $0xb60] ss:$12 sps:$4 sm:$0xff]  }
 0x12b   :  { %8555 = vmatpush3.bf16.msra.mxu1 %v9381_v9  ;;  %v9461_v9 = vld [vmem:[%s13111_s1 + $0xb74] ss:$12 sps:$4 sm:$0xff]  }
 0x12c   :  { %5559 = vmatpush1.bf16.msra.mxu0 %v9377_v25  ;;  %8556 = vmatprep.subr.bf16.mxu1 %v9385_v31  ;;  %v9458_v25 = vld [vmem:[%s13111_s1 + $0xaa0] ss:$12 sps:$4 sm:$0xff]   ;;  %v9459_v31 = vld [vmem:[%s13111_s1 + $0xb70] ss:$12 sps:$4 sm:$0xff]  }
 0x12d   :  { %5560 = vmatprep.subr.bf16.mxu0 %v9384_v10  ;;  %v9462_v10 = vld [vmem:[%s13111_s1 + $0xb78] ss:$12 sps:$4 sm:$0xff]  }
 0x12f   :  { %8557 = vmatpush3.bf16.msra.mxu1 %v9386_v12  ;;  %v9466_v12 = vld [vmem:[%s13111_s1 + $0xb8c] ss:$12 sps:$4 sm:$0xff]  }
 0x130   :  { %5561 = vmatpush1.bf16.msra.mxu0 %v9382_v11  ;;  %8558 = vmatprep.subr.bf16.mxu1 %v9390_v14  ;;  %v9463_v11 = vld [vmem:[%s13111_s1 + $0xab8] ss:$12 sps:$4 sm:$0xff]   ;;  %v9464_v14 = vld [vmem:[%s13111_s1 + $0xb88] ss:$12 sps:$4 sm:$0xff]  }
 0x131   :  { %5562 = vmatprep.subr.bf16.mxu0 %v9389_v13  ;;  %v9467_v13 = vld [vmem:[%s13111_s1 + $0xb90] ss:$12 sps:$4 sm:$0xff]  }
 0x133   :  { %8559 = vmatpush3.bf16.msra.mxu1 %v9391_v18  ;;  %v9471_v18 = vld [vmem:[%s13111_s1 + $0xba4] ss:$12 sps:$4 sm:$0xff]  }
 0x134   :  { %5563 = vmatpush1.bf16.msra.mxu0 %v9387_v15  ;;  %8560 = vmatprep.subr.bf16.mxu1 %v9395_v20  ;;  %v9468_v15 = vld [vmem:[%s13111_s1 + $0xad0] ss:$12 sps:$4 sm:$0xff]   ;;  %v9469_v20 = vld [vmem:[%s13111_s1 + $0xba0] ss:$12 sps:$4 sm:$0xff]  }
 0x135   :  { %5564 = vmatprep.subr.bf16.mxu0 %v9394_v19  ;;  %v9472_v19 = vld [vmem:[%s13111_s1 + $0xba8] ss:$12 sps:$4 sm:$0xff]  }
 0x137   :  { %8561 = vmatpush3.bf16.msra.mxu1 %v9396_v22  ;;  %v9476_v22 = vld [vmem:[%s13111_s1 + $0xbbc] ss:$12 sps:$4 sm:$0xff]  }
 0x138   :  { %5565 = vmatpush1.bf16.msra.mxu0 %v9392_v21  ;;  %8562 = vmatprep.subr.bf16.mxu1 %v9400_v24  ;;  %v9473_v21 = vld [vmem:[%s13111_s1 + $0xae8] ss:$12 sps:$4 sm:$0xff]   ;;  %v9474_v24 = vld [vmem:[%s13111_s1 + $0xbb8] ss:$12 sps:$4 sm:$0xff]  }
 0x139   :  { %5566 = vmatprep.subr.bf16.mxu0 %v9399_v23  ;;  %v9477_v23 = vld [vmem:[%s13111_s1 + $0xbc0] ss:$12 sps:$4 sm:$0xff]  }
 0x13b   :  { %8563 = vmatpush3.bf16.msra.mxu1 %v9401_v27  ;;  %v9481_v27 = vld [vmem:[%s13111_s1 + $0xbd4] ss:$12 sps:$4 sm:$0xff]  }
 0x13c   :  { %5567 = vmatpush1.bf16.msra.mxu0 %v9397_v26  ;;  %8564 = vmatprep.subr.bf16.mxu1 %v9405_v48  ;;  %v9478_v26 = vld [vmem:[%s13111_s1 + $0xb00] ss:$12 sps:$4 sm:$0xff]   ;;  %v9479_v48 = vld [vmem:[%s13111_s1 + $0xbd0] ss:$12 sps:$4 sm:$0xff]  }
 0x13d   :  { %5568 = vmatprep.subr.bf16.mxu0 %v9404_v28  ;;  %v9482_v28 = vld [vmem:[%s13111_s1 + $0xbd8] ss:$12 sps:$4 sm:$0xff]  }
 0x13f   :  { %8565 = vmatpush3.bf16.msra.mxu1 %v9406_v32  ;;  %v9486_v32 = vld [vmem:[%s13111_s1 + $0xbec] ss:$12 sps:$4 sm:$0xff]  }
 0x140   :  { %5569 = vmatpush1.bf16.msra.mxu0 %v9402_v30  ;;  %8572 = vmatprep.subr.bf16.mxu1 %v9412_v38  ;;  %v9483_v30 = vld [vmem:[%s13111_s1 + $0xb18] ss:$12 sps:$4 sm:$0xff]   ;;  %v9484_v38 = vld [vmem:[%s13111_s1 + $0xbe8] ss:$12 sps:$4 sm:$0xff]  }
 0x141   :  { %5579 = vmatprep.subr.bf16.mxu0 %v9411_v35  ;;  %v9487_v35 = vld [vmem:[%s13111_s1 + $0xbf0] ss:$12 sps:$4 sm:$0xff]  }
 0x142   :  { %6181 = vmatmul.mubr.bf16.vlgmr.msra.gmra.mrb[24].mxu1 %v11042_v33  ;;  %v9422_v33 = vld [vmem:[%s13111_s1 + $0x9f8] ss:$12 sps:$4 sm:$0xff]  }
 0x143   :  { %5571 = vmatmul.mubr.bf16.vlgmr.msra.gmra.mrb[0].mxu0 %v11256_v40  ;;  %8573 = vmatpush3.bf16.msra.mxu1 %v9413_v39  ;;  %v9493_v39 = vld [vmem:[%s13111_s1 + $0xc04] ss:$12 sps:$4 sm:$0xff]  }
 0x144   :  { %5580 = vmatpush1.bf16.msra.mxu0 %v9409_v29  ;;  %8574 = vmatprep.subr.bf16.mxu1 %v9417_v17  ;;  %v9488_v29 = vld [vmem:[%s13111_s1 + $0xb30] ss:$12 sps:$4 sm:$0xff]   ;;  %v7557_v17 = vcombine.low %v11261_v41, %v11261_v41  ;;  %v9499_v41 = vld [vmem:[%s13111_s1 + $0xce0] ss:$12 sps:$4 sm:$0xff]  }
 0x145   :  { %5581 = vmatprep.subr.bf16.mxu0 %v9416_v42  ;;  %6220 = vmatprep.mubr.bf16.mxu1 %v11063_v53  ;;  %v9427_v53 = vld [vmem:[%s13111_s1 + $0xa10] ss:$12 sps:$4 sm:$0xff]   ;;  %v9491_v42 = vld [vmem:[%s13111_s1 + $0xc00] ss:$12 sps:$4 sm:$0xff]  }
 0x146   :  { %5611 = vmatprep.mubr.bf16.mxu0 %v11271_v16 }
 0x147   :  { %8575 = vmatpush3.bf16.msra.mxu1 %v9418_v44  ;;  %v9498_v44 = vld [vmem:[%s13111_s1 + $0xc1c] ss:$12 sps:$4 sm:$0xff]  }
 0x148   :  { %5582 = vmatpush1.bf16.msra.mxu0 %v9414_v43  ;;  %8576 = vmatprep.subr.bf16.mxu1 %v9422_v33  ;;  %v11470_v43 = vld [vmem:[%s13112_s0 + $0x40] sm:$0xff] }
 0x149   :  { %5583 = vmatprep.subr.bf16.mxu0 %v9421_v34  ;;  %v9496_v34 = vld [vmem:[%s13111_s1 + $0xc18] ss:$12 sps:$4 sm:$0xff]   ;;  %v7560_v33 = vcombine.high %v11470_v43, %v11470_v43 }
 0x14b   :  { %8577 = vmatpush3.bf16.msra.mxu1 %v9423_v46  ;;  %v9503_v46 = vld [vmem:[%s13111_s1 + $0xc34] ss:$12 sps:$4 sm:$0xff]  }
 0x14c   :  { %5584 = vmatpush1.bf16.msra.mxu0 %v9419_v45  ;;  %8578 = vmatprep.subr.bf16.mxu1 %v9427_v53  ;;  %v9500_v45 = vld [vmem:[%s13111_s1 + $0xc20] ss:$12 sps:$4 sm:$0xff]   ;;  %v9501_v53 = vld [vmem:[%s13111_s1 + $0xc30] ss:$12 sps:$4 sm:$0xff]  }
 0x14d   :  { %5585 = vmatprep.subr.bf16.mxu0 %v9426_v47  ;;  %v9504_v47 = vld [vmem:[%s13111_s1 + $0xcf8] ss:$12 sps:$4 sm:$0xff]  }
 0x14f   :  { %8579 = vmatpush3.bf16.msra.mxu1 %v9428_v50  ;;  %v9508_v50 = vld [vmem:[%s13111_s1 + $0xc4c] ss:$12 sps:$4 sm:$0xff]  }
 0x150   :  { %5586 = vmatpush1.bf16.msra.mxu0 %v9424_v49  ;;  %8580 = vmatprep.subr.bf16.mxu1 %v9432_v52  ;;  %v9505_v49 = vld [vmem:[%s13111_s1 + $0xc38] ss:$12 sps:$4 sm:$0xff]   ;;  %v9506_v52 = vld [vmem:[%s13111_s1 + $0xc48] ss:$12 sps:$4 sm:$0xff]  }
 0x151   :  { %5587 = vmatprep.subr.bf16.mxu0 %v9431_v51  ;;  %v9509_v51 = vld [vmem:[%s13111_s1 + $0xd10] ss:$12 sps:$4 sm:$0xff]  }
 0x153   :  { %8581 = vmatpush3.bf16.msra.mxu1 %v9433_v55  ;;  %v9513_v55 = vld [vmem:[%s13111_s1 + $0xc64] ss:$12 sps:$4 sm:$0xff]  }
 0x154   :  { %5588 = vmatpush1.bf16.msra.mxu0 %v9429_v54  ;;  %8582 = vmatprep.subr.bf16.mxu1 %v9437_v57  ;;  %v9510_v54 = vld [vmem:[%s13111_s1 + $0xc50] ss:$12 sps:$4 sm:$0xff]   ;;  %v9511_v57 = vld [vmem:[%s13111_s1 + $0xc60] ss:$12 sps:$4 sm:$0xff]  }
 0x155   :  { %5589 = vmatprep.subr.bf16.mxu0 %v9436_v56  ;;  %v9514_v56 = vld [vmem:[%s13111_s1 + $0xd28] ss:$12 sps:$4 sm:$0xff]  }
 0x157   :  { %8583 = vmatpush3.bf16.msra.mxu1 %v9438_v59  ;;  %v9518_v59 = vld [vmem:[%s13111_s1 + $0xc7c] ss:$12 sps:$4 sm:$0xff]  }
 0x158   :  { %5590 = vmatpush1.bf16.msra.mxu0 %v9434_v58  ;;  %8584 = vmatprep.subr.bf16.mxu1 %v9442_v61  ;;  %v9515_v58 = vld [vmem:[%s13111_s1 + $0xc68] ss:$12 sps:$4 sm:$0xff]   ;;  %v9516_v61 = vld [vmem:[%s13111_s1 + $0xc78] ss:$12 sps:$4 sm:$0xff]  }
 0x159   :  { %5591 = vmatprep.subr.bf16.mxu0 %v9441_v60  ;;  %v9519_v60 = vld [vmem:[%s13111_s1 + $0xd40] ss:$12 sps:$4 sm:$0xff]  }
 0x15b   :  { %8585 = vmatpush3.bf16.msra.mxu1 %v9443_v62  ;;  %v9523_v62 = vld [vmem:[%s13111_s1 + $0xc94] ss:$12 sps:$4 sm:$0xff]  }
 0x15c   :  { %5592 = vmatpush1.bf16.msra.mxu0 %v9439_v6  ;;  %8586 = vmatprep.subr.bf16.mxu1 %v9447_v0  ;;  %v9520_v6 = vld [vmem:[%s13111_s1 + $0xc80] ss:$12 sps:$4 sm:$0xff]   ;;  %v9521_v0 = vld [vmem:[%s13111_s1 + $0xc90] ss:$12 sps:$4 sm:$0xff]  }
 0x15d   :  { %5593 = vmatprep.subr.bf16.mxu0 %v9446_v63  ;;  %v9524_v63 = vld [vmem:[%s13111_s1 + $0xd58] ss:$12 sps:$4 sm:$0xff]  }
 0x15f   :  { %8587 = vmatpush3.bf16.msra.mxu1 %v9448_v36  ;;  %v9528_v36 = vld [vmem:[%s13111_s1 + $0xcac] ss:$12 sps:$4 sm:$0xff]  }
 0x160   :  { %5594 = vmatpush1.bf16.msra.mxu0 %v9444_v1  ;;  %8594 = vmatprep.subr.bf16.mxu1 %v9452_v7  ;;  %v9525_v1 = vld [vmem:[%s13111_s1 + $0xc98] ss:$12 sps:$4 sm:$0xff]   ;;  %v9526_v7 = vld [vmem:[%s13111_s1 + $0xca8] ss:$12 sps:$4 sm:$0xff]  }
 0x161   :  { %5595 = vmatprep.subr.bf16.mxu0 %v9451_v2  ;;  %v9529_v2 = vld [vmem:[%s13111_s1 + $0xd70] ss:$12 sps:$4 sm:$0xff]  }
 0x162   :  { %6221 = vmatmul.mubr.bf16.vlgmr.msra.gmra.mrb[28].mxu1 %v11256_v40  ;;  %v9494_v40 = vld [vmem:[%s13111_s1 + $0xcc8] ss:$12 sps:$4 sm:$0xff]  }
 0x163   :  { %8595 = vmatpush3.bf16.msra.mxu1 %v9453_v4  ;;  %6260 = vmatprep.mubr.bf16.mxu1 %v11271_v16  ;;  %v9495_v16 = vld [vmem:[%s13111_s1 + $0xc08] ss:$12 sps:$4 sm:$0xff]   ;;  %v9533_v4 = vld [vmem:[%s13111_s1 + $0xcc4] ss:$12 sps:$4 sm:$0xff]  }
 0x164   :  { %5596 = vmatpush1.bf16.msra.mxu0 %v9449_v3  ;;  %8596 = vmatprep.subr.bf16.mxu1 %v9457_v37  ;;  %v9530_v3 = vld [vmem:[%s13111_s1 + $0xcb0] ss:$12 sps:$4 sm:$0xff]   ;;  %v9531_v37 = vld [vmem:[%s13111_s1 + $0xcc0] ss:$12 sps:$4 sm:$0xff]  }
 0x165   :  { %5597 = vmatprep.subr.bf16.mxu0 %v9456_v5  ;;  %v9536_v5 = vld [vmem:[%s13111_s1 + $0xe48] ss:$12 sps:$4 sm:$0xff]  }
 0x167   :  { %8597 = vmatpush3.bf16.msra.mxu1 %v9458_v25  ;;  %v11572_v25 = vcombine.low %v11470_v43, %v11470_v43  ;;  %v9570_v43 = vld [vmem:[%s13111_s1 + $0xd6c] ss:$12 sps:$4 sm:$0xff]  }
 0x168   :  { %5598 = vmatpush1.bf16.msra.mxu0 %v9454_v8  ;;  %8598 = vmatprep.subr.bf16.mxu1 %v9462_v10  ;;  %v9537_v8 = vld [vmem:[%s13111_s1 + $0xd88] ss:$12 sps:$4 sm:$0xff]  }
 0x169   :  { %5599 = vmatprep.subr.bf16.mxu0 %v9461_v9  ;;  %v11577_v9 = vld [vmem:[%s13112_s0 + $0x48] sm:$0xff] }
 0x16a   :  { %v9540_v10 = vld [vmem:[%s13111_s1 + $0xcdc] ss:$12 sps:$4 sm:$0xff]  }
 0x16b   :  { %8599 = vmatpush3.bf16.msra.mxu1 %v9463_v11  ;;  %v11587_v11 = vcombine.high %v11577_v9, %v11577_v9 }
 0x16c   :  { %5600 = vmatpush1.bf16.msra.mxu0 %v9459_v31  ;;  %8600 = vmatprep.subr.bf16.mxu1 %v9467_v13  ;;  %v9541_v31 = vld [vmem:[%s13111_s1 + $0xe60] ss:$12 sps:$4 sm:$0xff]  }
 0x16d   :  { %5601 = vmatprep.subr.bf16.mxu0 %v9466_v12  ;;  %v9538_v12 = vld [vmem:[%s13111_s1 + $0xcd8] ss:$12 sps:$4 sm:$0xff]   ;;  %v9542_v13 = vld [vmem:[%s13111_s1 + $0xda0] ss:$12 sps:$4 sm:$0xff]  }
 0x16f   :  { %8601 = vmatpush3.bf16.msra.mxu1 %v9468_v15  ;;  %v9546_v15 = vld [vmem:[%s13111_s1 + $0xe78] ss:$12 sps:$4 sm:$0xff]  }
 0x170   :  { %5602 = vmatpush1.bf16.msra.mxu0 %v9464_v14  ;;  %8602 = vmatprep.subr.bf16.mxu1 %v9472_v19  ;;  %v9545_v14 = vld [vmem:[%s13111_s1 + $0xcf4] ss:$12 sps:$4 sm:$0xff]   ;;  %v9547_v19 = vld [vmem:[%s13111_s1 + $0xdb8] ss:$12 sps:$4 sm:$0xff]  }
 0x171   :  { %5603 = vmatprep.subr.bf16.mxu0 %v9471_v18  ;;  %v9543_v18 = vld [vmem:[%s13111_s1 + $0xcf0] ss:$12 sps:$4 sm:$0xff]  }
 0x173   :  { %8603 = vmatpush3.bf16.msra.mxu1 %v9473_v21  ;;  %v9551_v21 = vld [vmem:[%s13111_s1 + $0xe90] ss:$12 sps:$4 sm:$0xff]  }
 0x174   :  { %5604 = vmatpush1.bf16.msra.mxu0 %v9469_v20  ;;  %8604 = vmatprep.subr.bf16.mxu1 %v9477_v23  ;;  %v9550_v20 = vld [vmem:[%s13111_s1 + $0xd0c] ss:$12 sps:$4 sm:$0xff]   ;;  %v9552_v23 = vld [vmem:[%s13111_s1 + $0xdd0] ss:$12 sps:$4 sm:$0xff]  }
 0x175   :  { %5605 = vmatprep.subr.bf16.mxu0 %v9476_v22  ;;  %v9548_v22 = vld [vmem:[%s13111_s1 + $0xd08] ss:$12 sps:$4 sm:$0xff]  }
 0x177   :  { %8605 = vmatpush3.bf16.msra.mxu1 %v9478_v26  ;;  %v9556_v26 = vld [vmem:[%s13111_s1 + $0xea8] ss:$12 sps:$4 sm:$0xff]  }
 0x178   :  { %5606 = vmatpush1.bf16.msra.mxu0 %v9474_v24  ;;  %8606 = vmatprep.subr.bf16.mxu1 %v9482_v28  ;;  %v9555_v24 = vld [vmem:[%s13111_s1 + $0xd24] ss:$12 sps:$4 sm:$0xff]   ;;  %v9557_v28 = vld [vmem:[%s13111_s1 + $0xde8] ss:$12 sps:$4 sm:$0xff]  }
 0x179   :  { %5607 = vmatprep.subr.bf16.mxu0 %v9481_v27  ;;  %v9553_v27 = vld [vmem:[%s13111_s1 + $0xd20] ss:$12 sps:$4 sm:$0xff]  }
 0x17b   :  { %8607 = vmatpush3.bf16.msra.mxu1 %v9483_v30  ;;  %v9560_v30 = vld [vmem:[%s13111_s1 + $0xd3c] ss:$12 sps:$4 sm:$0xff]  }
 0x17c   :  { %5608 = vmatpush1.bf16.msra.mxu0 %v9479_v48  ;;  %8608 = vmatprep.subr.bf16.mxu1 %v9487_v35  ;;  %v11633_v48 = vpop.f32.mrb[0].mxu1  ;;  %v9558_v35 = vld [vmem:[%s13111_s1 + $0xd38] ss:$12 sps:$4 sm:$0xff]  }
 0x17d   :  { %5609 = vmatprep.subr.bf16.mxu0 %v9486_v32  ;;  %v9561_v32 = vld [vmem:[%s13111_s1 + $0xec0] ss:$12 sps:$4 sm:$0xff]  }
 0x17f   :  { %8609 = vmatpush3.bf16.msra.mxu1 %v9488_v29  ;;  %v11647_v29 = vpop.f32.mrb[1].mxu1 }
 0x180   :  { %5610 = vmatpush1.bf16.msra.mxu0 %v9484_v38  ;;  %8616 = vmatprep.subr.bf16.mxu1 %v9494_v40  ;;  %v9562_v38 = vld [vmem:[%s13111_s1 + $0xe00] ss:$12 sps:$4 sm:$0xff]   ;;  %v9566_v40 = vld [vmem:[%s13111_s1 + $0xed8] ss:$12 sps:$4 sm:$0xff]  }
 0x181   :  { %5620 = vmatprep.subr.bf16.mxu0 %v9493_v39  ;;  %v9565_v39 = vld [vmem:[%s13111_s1 + $0xd54] ss:$12 sps:$4 sm:$0xff]  }
 0x182   :  { %6261 = vmatmul.mubr.bf16.vlgmr.msra.gmra.mrb[32].mxu1 %v7557_v17 }
 0x183   :  { %5612 = vmatmul.mubr.bf16.vlgmr.msra.gmra.mrb[0].mxu0 %v7557_v17  ;;  %8617 = vmatpush3.bf16.msra.mxu1 %v9495_v16  ;;  %v5371_v17 = vpop.f32.mrb[2].mxu1  ;;  %v9567_v16 = vld [vmem:[%s13111_s1 + $0xe18] ss:$12 sps:$4 sm:$0xff]  }
 0x184   :  { %5621 = vmatpush1.bf16.msra.mxu0 %v9491_v42  ;;  %8618 = vmatprep.subr.bf16.mxu1 %v9499_v41  ;;  %v9563_v42 = vld [vmem:[%s13111_s1 + $0xd50] ss:$12 sps:$4 sm:$0xff]   ;;  %v9640_v17 = vld [vmem:[%s13111_s1 + $0x11a8] ss:$12 sps:$4 sm:$0xff]  }
 0x185   :  { %5622 = vmatprep.subr.bf16.mxu0 %v9498_v44  ;;  %6300 = vmatprep.mubr.bf16.mxu1 %v7560_v33  ;;  %v5372_v44 = vpop.f32.mrb[3].mxu1  ;;  %v9571_v41 = vld [vmem:[%s13111_s1 + $0xef0] ss:$12 sps:$4 sm:$0xff]  }
 0x186   :  { %5652 = vmatprep.mubr.bf16.mxu0 %v7560_v33  ;;  %v9572_v33 = vld [vmem:[%s13111_s1 + $0xe30] ss:$12 sps:$4 sm:$0xff]  }
 0x187   :  { %8619 = vmatpush3.bf16.msra.mxu1 %v9500_v45  ;;  %v9575_v45 = vld [vmem:[%s13111_s1 + $0xd84] ss:$12 sps:$4 sm:$0xff]   ;;  %v9644_v44 = vld [vmem:[%s13111_s1 + $0xebc] ss:$12 sps:$4 sm:$0xff]  }
 0x188   :  { %5623 = vmatpush1.bf16.msra.mxu0 %v9496_v34  ;;  %8620 = vmatprep.subr.bf16.mxu1 %v9504_v47  ;;  %v9568_v34 = vld [vmem:[%s13111_s1 + $0xd68] ss:$12 sps:$4 sm:$0xff]   ;;  %v9573_v47 = vld [vmem:[%s13111_s1 + $0xd80] ss:$12 sps:$4 sm:$0xff]  }
 0x189   :  { %5624 = vmatprep.subr.bf16.mxu0 %v9503_v46  ;;  %v9578_v46 = vld [vmem:[%s13111_s1 + $0xfc8] ss:$12 sps:$4 sm:$0xff]  }
 0x18b   :  { %8621 = vmatpush3.bf16.msra.mxu1 %v9505_v49  ;;  %v11689_v49 = vld [vmem:[%s13112_s0 + $0x50] sm:$0xff] }
 0x18c   :  { %5625 = vmatpush1.bf16.msra.mxu0 %v9501_v53  ;;  %8622 = vmatprep.subr.bf16.mxu1 %v9509_v51  ;;  %v11684_v53 = vcombine.low %v11577_v9, %v11577_v9  ;;  %v9582_v51 = vld [vmem:[%s13111_s1 + $0xd9c] ss:$12 sps:$4 sm:$0xff]   ;;  %v9609_v9 = vld [vmem:[%s13111_s1 + $0xf98] ss:$12 sps:$4 sm:$0xff]  }
 0x18d   :  { %5626 = vmatprep.subr.bf16.mxu0 %v9508_v50  ;;  %v9579_v50 = vld [vmem:[%s13111_s1 + $0xf08] ss:$12 sps:$4 sm:$0xff]  }
 0x18f   :  { %8623 = vmatpush3.bf16.msra.mxu1 %v9510_v54  ;;  %v9580_v54 = vld [vmem:[%s13111_s1 + $0xd98] ss:$12 sps:$4 sm:$0xff]  }
 0x190   :  { %5627 = vmatpush1.bf16.msra.mxu0 %v9506_v52  ;;  %8624 = vmatprep.subr.bf16.mxu1 %v9514_v56  ;;  %v9583_v52 = vld [vmem:[%s13111_s1 + $0xfe0] ss:$12 sps:$4 sm:$0xff]  }
 0x191   :  { %5628 = vmatprep.subr.bf16.mxu0 %v9513_v55  ;;  %v11705_v55 = vcombine.high %v11689_v49, %v11689_v49  ;;  %v9584_v56 = vld [vmem:[%s13111_s1 + $0xf20] ss:$12 sps:$4 sm:$0xff]  }
 0x193   :  { %8625 = vmatpush3.bf16.msra.mxu1 %v9515_v58  ;;  %v9588_v58 = vld [vmem:[%s13111_s1 + $0xff8] ss:$12 sps:$4 sm:$0xff]  }
 0x194   :  { %5629 = vmatpush1.bf16.msra.mxu0 %v9511_v57  ;;  %8626 = vmatprep.subr.bf16.mxu1 %v9519_v60  ;;  %v9587_v57 = vld [vmem:[%s13111_s1 + $0xdb4] ss:$12 sps:$4 sm:$0xff]   ;;  %v9589_v60 = vld [vmem:[%s13111_s1 + $0xf38] ss:$12 sps:$4 sm:$0xff]  }
 0x195   :  { %5630 = vmatprep.subr.bf16.mxu0 %v9518_v59  ;;  %v9585_v59 = vld [vmem:[%s13111_s1 + $0xdb0] ss:$12 sps:$4 sm:$0xff]  }
 0x197   :  { %8627 = vmatpush3.bf16.msra.mxu1 %v9520_v6  ;;  %v9593_v6 = vld [vmem:[%s13111_s1 + $0x1010] ss:$12 sps:$4 sm:$0xff]  }
 0x198   :  { %5631 = vmatpush1.bf16.msra.mxu0 %v9516_v61  ;;  %8628 = vmatprep.subr.bf16.mxu1 %v9524_v63  ;;  %v9592_v61 = vld [vmem:[%s13111_s1 + $0xdcc] ss:$12 sps:$4 sm:$0xff]   ;;  %v9594_v63 = vld [vmem:[%s13111_s1 + $0xf50] ss:$12 sps:$4 sm:$0xff]  }
 0x199   :  { %5632 = vmatprep.subr.bf16.mxu0 %v9523_v62  ;;  %v9590_v62 = vld [vmem:[%s13111_s1 + $0xdc8] ss:$12 sps:$4 sm:$0xff]  }
 0x19b   :  { %8629 = vmatpush3.bf16.msra.mxu1 %v9525_v1  ;;  %v9598_v1 = vld [vmem:[%s13111_s1 + $0x1028] ss:$12 sps:$4 sm:$0xff]  }
 0x19c   :  { %5633 = vmatpush1.bf16.msra.mxu0 %v9521_v0  ;;  %8630 = vmatprep.subr.bf16.mxu1 %v9529_v2  ;;  %v9597_v0 = vld [vmem:[%s13111_s1 + $0xde4] ss:$12 sps:$4 sm:$0xff]   ;;  %v9599_v2 = vld [vmem:[%s13111_s1 + $0xf68] ss:$12 sps:$4 sm:$0xff]  }
 0x19d   :  { %5634 = vmatprep.subr.bf16.mxu0 %v9528_v36  ;;  %v9595_v36 = vld [vmem:[%s13111_s1 + $0xde0] ss:$12 sps:$4 sm:$0xff]  }
 0x19f   :  { %8631 = vmatpush3.bf16.msra.mxu1 %v9530_v3  ;;  %v9603_v3 = vld [vmem:[%s13111_s1 + $0x1040] ss:$12 sps:$4 sm:$0xff]  }
 0x1a0   :  { %5635 = vmatpush1.bf16.msra.mxu0 %v9526_v7  ;;  %8638 = vmatprep.subr.bf16.mxu1 %v9536_v5  ;;  %v9602_v7 = vld [vmem:[%s13111_s1 + $0xdfc] ss:$12 sps:$4 sm:$0xff]   ;;  %v9604_v5 = vld [vmem:[%s13111_s1 + $0xf80] ss:$12 sps:$4 sm:$0xff]  }
 0x1a1   :  { %5636 = vmatprep.subr.bf16.mxu0 %v9533_v4  ;;  %v9600_v4 = vld [vmem:[%s13111_s1 + $0xdf8] ss:$12 sps:$4 sm:$0xff]  }
 0x1a2   :  { %6301 = vmatmul.mubr.bf16.vlgmr.msra.gmra.mrb[36].mxu1 %v11572_v25 }
 0x1a3   :  { %8639 = vmatpush3.bf16.msra.mxu1 %v9537_v8  ;;  %6340 = vmatprep.mubr.bf16.mxu1 %v11587_v11  ;;  %v9608_v8 = vld [vmem:[%s13111_s1 + $0x1058] ss:$12 sps:$4 sm:$0xff]  }
 0x1a4   :  { %5637 = vmatpush1.bf16.msra.mxu0 %v9531_v37  ;;  %8640 = vmatprep.subr.bf16.mxu1 %v9541_v31  ;;  %v9607_v37 = vld [vmem:[%s13111_s1 + $0xe14] ss:$12 sps:$4 sm:$0xff]   ;;  %v9613_v31 = vld [vmem:[%s13111_s1 + $0x1070] ss:$12 sps:$4 sm:$0xff]  }
 0x1a5   :  { %5638 = vmatprep.subr.bf16.mxu0 %v9540_v10  ;;  %v9612_v10 = vld [vmem:[%s13111_s1 + $0xe2c] ss:$12 sps:$4 sm:$0xff]  }
 0x1a7   :  { %8641 = vmatpush3.bf16.msra.mxu1 %v9542_v13  ;;  %v9619_v13 = vld [vmem:[%s13111_s1 + $0xe44] ss:$12 sps:$4 sm:$0xff]  }
 0x1a8   :  { %5639 = vmatpush1.bf16.msra.mxu0 %v9538_v12  ;;  %8642 = vmatprep.subr.bf16.mxu1 %v9546_v15  ;;  %v9614_v12 = vld [vmem:[%s13111_s1 + $0xfb0] ss:$12 sps:$4 sm:$0xff]   ;;  %v9617_v15 = vld [vmem:[%s13111_s1 + $0xe40] ss:$12 sps:$4 sm:$0xff]  }
 0x1a9   :  { %5640 = vmatprep.subr.bf16.mxu0 %v9545_v14  ;;  %v9620_v14 = vld [vmem:[%s13111_s1 + $0x1148] ss:$12 sps:$4 sm:$0xff]  }
 0x1ab   :  { %8643 = vmatpush3.bf16.msra.mxu1 %v9547_v19  ;;  %v11802_v19 = vld [vmem:[%s13112_s0 + $0x58] sm:$0xff] }
 0x1ac   :  { %5641 = vmatpush1.bf16.msra.mxu0 %v9543_v18  ;;  %8644 = vmatprep.subr.bf16.mxu1 %v9551_v21  ;;  %v11797_v18 = vcombine.low %v11689_v49, %v11689_v49  ;;  %v9624_v21 = vld [vmem:[%s13111_s1 + $0xe5c] ss:$12 sps:$4 sm:$0xff]   ;;  %v9651_v49 = vld [vmem:[%s13111_s1 + $0x1118] ss:$12 sps:$4 sm:$0xff]  }
 0x1ad   :  { %5642 = vmatprep.subr.bf16.mxu0 %v9550_v20  ;;  %v9621_v20 = vld [vmem:[%s13111_s1 + $0x1088] ss:$12 sps:$4 sm:$0xff]  }
 0x1af   :  { %8645 = vmatpush3.bf16.msra.mxu1 %v9552_v23  ;;  %v11815_v23 = vcombine.high %v11802_v19, %v11802_v19 }
 0x1b0   :  { %5643 = vmatpush1.bf16.msra.mxu0 %v9548_v22  ;;  %8646 = vmatprep.subr.bf16.mxu1 %v9556_v26  ;;  %v9625_v22 = vld [vmem:[%s13111_s1 + $0x1160] ss:$12 sps:$4 sm:$0xff]  }
 0x1b1   :  { %5644 = vmatprep.subr.bf16.mxu0 %v9555_v24  ;;  %v9622_v24 = vld [vmem:[%s13111_s1 + $0xe58] ss:$12 sps:$4 sm:$0xff]   ;;  %v9626_v26 = vld [vmem:[%s13111_s1 + $0x10a0] ss:$12 sps:$4 sm:$0xff]  }
 0x1b3   :  { %8647 = vmatpush3.bf16.msra.mxu1 %v9557_v28  ;;  %v9630_v28 = vld [vmem:[%s13111_s1 + $0x1178] ss:$12 sps:$4 sm:$0xff]  }
 0x1b4   :  { %5645 = vmatpush1.bf16.msra.mxu0 %v9553_v27  ;;  %8648 = vmatprep.subr.bf16.mxu1 %v9561_v32  ;;  %v9629_v27 = vld [vmem:[%s13111_s1 + $0xe74] ss:$12 sps:$4 sm:$0xff]   ;;  %v9631_v32 = vld [vmem:[%s13111_s1 + $0x10b8] ss:$12 sps:$4 sm:$0xff]  }
 0x1b5   :  { %5646 = vmatprep.subr.bf16.mxu0 %v9560_v30  ;;  %v9627_v30 = vld [vmem:[%s13111_s1 + $0xe70] ss:$12 sps:$4 sm:$0xff]  }
 0x1b7   :  { %8649 = vmatpush3.bf16.msra.mxu1 %v9562_v38  ;;  %v9635_v38 = vld [vmem:[%s13111_s1 + $0x1190] ss:$12 sps:$4 sm:$0xff]  }
 0x1b8   :  { %5647 = vmatpush1.bf16.msra.mxu0 %v9558_v35  ;;  %8650 = vmatprep.subr.bf16.mxu1 %v9566_v40  ;;  %v9634_v35 = vld [vmem:[%s13111_s1 + $0xe8c] ss:$12 sps:$4 sm:$0xff]   ;;  %v9636_v40 = vld [vmem:[%s13111_s1 + $0x10d0] ss:$12 sps:$4 sm:$0xff]  }
 0x1b9   :  { %5648 = vmatprep.subr.bf16.mxu0 %v9565_v39  ;;  %v9632_v39 = vld [vmem:[%s13111_s1 + $0xe88] ss:$12 sps:$4 sm:$0xff]  }
 0x1bb   :  { %8651 = vmatpush3.bf16.msra.mxu1 %v9567_v16  ;;  %v9637_v16 = vld [vmem:[%s13111_s1 + $0xea0] ss:$12 sps:$4 sm:$0xff]  }
 0x1bc   :  { %5649 = vmatpush1.bf16.msra.mxu0 %v9563_v42  ;;  %8652 = vmatprep.subr.bf16.mxu1 %v9571_v41  ;;  %v9639_v42 = vld [vmem:[%s13111_s1 + $0xea4] ss:$12 sps:$4 sm:$0xff]   ;;  %v9645_v41 = vld [vmem:[%s13111_s1 + $0x11c0] ss:$12 sps:$4 sm:$0xff]  }
 0x1bd   :  { %5650 = vmatprep.subr.bf16.mxu0 %v9570_v43  ;;  %v9641_v43 = vld [vmem:[%s13111_s1 + $0x10e8] ss:$12 sps:$4 sm:$0xff]  }
 0x1bf   :  { %8653 = vmatpush3.bf16.msra.mxu1 %v9572_v33  ;;  %v9646_v33 = vld [vmem:[%s13111_s1 + $0x1100] ss:$12 sps:$4 sm:$0xff]  }
 0x1c0   :  { %5651 = vmatpush1.bf16.msra.mxu0 %v9568_v34  ;;  %8660 = vmatprep.subr.bf16.mxu1 %v9578_v46  ;;  %v9642_v34 = vld [vmem:[%s13111_s1 + $0xeb8] ss:$12 sps:$4 sm:$0xff]  }
 0x1c1   :  { %5661 = vmatprep.subr.bf16.mxu0 %v9575_v45  ;;  %v9649_v45 = vld [vmem:[%s13111_s1 + $0xed4] ss:$12 sps:$4 sm:$0xff]   ;;  %v9650_v46 = vld [vmem:[%s13111_s1 + $0x11d8] ss:$12 sps:$4 sm:$0xff]  }
 0x1c2   :  { %6341 = vmatmul.mubr.bf16.vlgmr.msra.gmra.mrb[40].mxu1 %v11684_v53 }
 0x1c3   :  { %5653 = vmatmul.mubr.bf16.vlgmr.msra.gmra.mrb[0].mxu0 %v11572_v25  ;;  %8661 = vmatpush3.bf16.msra.mxu1 %v9579_v50  ;;  %v9605_v25 = vld [vmem:[%s13111_s1 + $0xe10] ss:$12 sps:$4 sm:$0xff]   ;;  %v9654_v50 = vld [vmem:[%s13111_s1 + $0xeec] ss:$12 sps:$4 sm:$0xff]  }
 0x1c4   :  { %5662 = vmatpush1.bf16.msra.mxu0 %v9573_v47  ;;  %8662 = vmatprep.subr.bf16.mxu1 %v9583_v52  ;;  %v9647_v47 = vld [vmem:[%s13111_s1 + $0xed0] ss:$12 sps:$4 sm:$0xff]   ;;  %v9652_v52 = vld [vmem:[%s13111_s1 + $0xee8] ss:$12 sps:$4 sm:$0xff]  }
 0x1c5   :  { %5663 = vmatprep.subr.bf16.mxu0 %v9582_v51  ;;  %6380 = vmatprep.mubr.bf16.mxu1 %v11705_v55  ;;  %v9655_v51 = vld [vmem:[%s13111_s1 + $0x11f0] ss:$12 sps:$4 sm:$0xff]  }
 0x1c6   :  { %5693 = vmatprep.mubr.bf16.mxu0 %v11587_v11  ;;  %v9610_v11 = vld [vmem:[%s13111_s1 + $0xe28] ss:$12 sps:$4 sm:$0xff]  }
 0x1c7   :  { %8663 = vmatpush3.bf16.msra.mxu1 %v9584_v56  ;;  %v9661_v56 = vld [vmem:[%s13111_s1 + $0xf04] ss:$12 sps:$4 sm:$0xff]  }
 0x1c8   :  { %5664 = vmatpush1.bf16.msra.mxu0 %v9580_v54  ;;  %8664 = vmatprep.subr.bf16.mxu1 %v9588_v58  ;;  %v9656_v54 = vld [vmem:[%s13111_s1 + $0x1130] ss:$12 sps:$4 sm:$0xff]   ;;  %v9659_v58 = vld [vmem:[%s13111_s1 + $0xf00] ss:$12 sps:$4 sm:$0xff]  }
 0x1c9   :  { %5665 = vmatprep.subr.bf16.mxu0 %v9587_v57  ;;  %v9662_v57 = vld [vmem:[%s13111_s1 + $0x12c8] ss:$12 sps:$4 sm:$0xff]  }
 0x1cb   :  { %8665 = vmatpush3.bf16.msra.mxu1 %v9589_v60  ;;  %v9663_v60 = vld [vmem:[%s13111_s1 + $0x1208] ss:$12 sps:$4 sm:$0xff]  }
 0x1cc   :  { %5666 = vmatpush1.bf16.msra.mxu0 %v9585_v59  ;;  %8666 = vmatprep.subr.bf16.mxu1 %v9593_v6  ;;  %v11908_v59 = vcombine.low %v11802_v19, %v11802_v19  ;;  %v1069_v6 = vlaneseq  ;;  %v9674_v19 = vld [vmem:[%s13111_s1 + $0xf48] ss:$12 sps:$4 sm:$0xff]  }
 0x1cd   :  { %5667 = vmatprep.subr.bf16.mxu0 %v9592_v61  ;;  %v11916_v61 = vld [vmem:[%s13112_s0 + $0x60] sm:$0xff] }
 0x1cf   :  { %8667 = vmatpush3.bf16.msra.mxu1 %v9594_v63  ;;  %v9667_v63 = vld [vmem:[%s13111_s1 + $0x12e0] ss:$12 sps:$4 sm:$0xff]  }
 0x1d0   :  { %5668 = vmatpush1.bf16.msra.mxu0 %v9590_v62  ;;  %8668 = vmatprep.subr.bf16.mxu1 %v9598_v1  ;;  %v9666_v62 = vld [vmem:[%s13111_s1 + $0xf1c] ss:$12 sps:$4 sm:$0xff]   ;;  %v9668_v1 = vld [vmem:[%s13111_s1 + $0x1220] ss:$12 sps:$4 sm:$0xff]  }
 0x1d1   :  { %5669 = vmatprep.subr.bf16.mxu0 %v9597_v0  ;;  %v9664_v0 = vld [vmem:[%s13111_s1 + $0xf18] ss:$12 sps:$4 sm:$0xff]  }
 0x1d3   :  { %8669 = vmatpush3.bf16.msra.mxu1 %v9599_v2  ;;  %v8456_v2 = vpop.f32.mrb[4].mxu1 }
 0x1d4   :  { %5670 = vmatpush1.bf16.msra.mxu0 %v9595_v36  ;;  %8670 = vmatprep.subr.bf16.mxu1 %v9603_v3  ;;  %v11932_v36 = vcombine.high %v11916_v61, %v11916_v61  ;;  %v9671_v3 = vld [vmem:[%s13111_s1 + $0xf34] ss:$12 sps:$4 sm:$0xff]  }
 0x1d5   :  { %5671 = vmatprep.subr.bf16.mxu0 %v9602_v7  ;;  %v11936_v7 = vshrl.u32 %v1069_v6, 7 }
 0x1d7   :  { %8671 = vmatpush3.bf16.msra.mxu1 %v9604_v5  ;;  %v1079_v5 = vsub.s32 2, %v11936_v7 }
 0x1d8   :  { %5672 = vmatpush1.bf16.msra.mxu0 %v9600_v4  ;;  %8672 = vmatprep.subr.bf16.mxu1 %v9608_v8  ;;  %v9672_v4 = vld [vmem:[%s13111_s1 + $0x12f8] ss:$12 sps:$4 sm:$0xff]  }
 0x1d9   :  { %5673 = vmatprep.subr.bf16.mxu0 %v9607_v37  ;;  %v8457_v37 = vpop.f32.mrb[5].mxu1 }
 0x1da   :  { %v8458_v8 = vadd.f32 %v8457_v37, %v8456_v2 }
 0x1db   :  { %8673 = vmatpush3.bf16.msra.mxu1 %v9609_v9  ;;  %v9669_v9 = vld [vmem:[%s13111_s1 + $0xf30] ss:$12 sps:$4 sm:$0xff]  }
 0x1dc   :  { %5674 = vmatpush1.bf16.msra.mxu0 %v9605_v25  ;;  %8674 = vmatprep.subr.bf16.mxu1 %v9613_v31  ;;  %v8459_v25 = vpop.f32.mrb[6].mxu1 }
 0x1dd   :  { %5675 = vmatprep.subr.bf16.mxu0 %v9612_v10  ;;  %v8460_v31 = vpop.f32.mrb[7].mxu1  ;;  %v9703_v25 = vld [vmem:[%s13111_s1 + $0xfc4] ss:$12 sps:$4 sm:$0xff]  }
 0x1de   :  { %v12029_v31 = vld [vmem:[%s13112_s0 + $0x68] sm:$0xff] }
 0x1df   :  { %8675 = vmatpush3.bf16.msra.mxu1 %v9614_v12  ;;  %v8478_v12 = vpop.f32.mrb[8].mxu1 }
 0x1e0   :  { %5676 = vmatpush1.bf16.msra.mxu0 %v9610_v11  ;;  %8682 = vmatprep.subr.bf16.mxu1 %v9620_v14  ;;  %v9673_v11 = vld [vmem:[%s13111_s1 + $0x1238] ss:$12 sps:$4 sm:$0xff]  }
 0x1e1   :  { %5677 = vmatprep.subr.bf16.mxu0 %v9619_v13  ;;  %v9677_v13 = vld [vmem:[%s13111_s1 + $0x1310] ss:$12 sps:$4 sm:$0xff]  }
 0x1e2   :  { %6381 = vmatmul.mubr.bf16.vlgmr.msra.gmra.mrb[44].mxu1 %v11797_v18 }
 0x1e3   :  { %8683 = vmatpush3.bf16.msra.mxu1 %v9621_v20  ;;  %6420 = vmatprep.mubr.bf16.mxu1 %v11815_v23  ;;  %v9678_v20 = vld [vmem:[%s13111_s1 + $0x1250] ss:$12 sps:$4 sm:$0xff]  }
 0x1e4   :  { %5678 = vmatpush1.bf16.msra.mxu0 %v9617_v15  ;;  %8684 = vmatprep.subr.bf16.mxu1 %v9625_v22  ;;  %v8479_v15 = vpop.f32.mrb[9].mxu1 }
 0x1e5   :  { %5679 = vmatprep.subr.bf16.mxu0 %v9624_v21  ;;  %v8480_v21 = vadd.f32 %v8479_v15, %v8478_v12  ;;  %v8481_v22 = vpop.f32.mrb[10].mxu1  ;;  %v9705_v12 = vld [vmem:[%s13111_s1 + $0x1388] ss:$12 sps:$4 sm:$0xff]   ;;  %v9706_v15 = vld [vmem:[%s13111_s1 + $0xfd8] ss:$12 sps:$4 sm:$0xff]  }
 0x1e6   :  { %v9711_v22 = vld [vmem:[%s13111_s1 + $0xff0] ss:$12 sps:$4 sm:$0xff]  }
 0x1e7   :  { %8685 = vmatpush3.bf16.msra.mxu1 %v9626_v26  ;;  %v9681_v26 = vld [vmem:[%s13111_s1 + $0xf64] ss:$12 sps:$4 sm:$0xff]  }
 0x1e8   :  { %5680 = vmatpush1.bf16.msra.mxu0 %v9622_v24  ;;  %8686 = vmatprep.subr.bf16.mxu1 %v9630_v28  ;;  %v8482_v24 = vpop.f32.mrb[11].mxu1 }
 0x1e9   :  { %5681 = vmatprep.subr.bf16.mxu0 %v9629_v27  ;;  %v9682_v27 = vld [vmem:[%s13111_s1 + $0x1328] ss:$12 sps:$4 sm:$0xff]   ;;  %v9715_v24 = vld [vmem:[%s13111_s1 + $0x13b8] ss:$12 sps:$4 sm:$0xff]  }
 0x1eb   :  { %8687 = vmatpush3.bf16.msra.mxu1 %v9631_v32 }
 0x1ec   :  { %5682 = vmatpush1.bf16.msra.mxu0 %v9627_v30  ;;  %8688 = vmatprep.subr.bf16.mxu1 %v9635_v38  ;;  %v8500_v30 = vpop.f32.mrb[12].mxu1  ;;  %v9683_v38 = vld [vmem:[%s13111_s1 + $0x1268] ss:$12 sps:$4 sm:$0xff]  }
 0x1ed   :  { %5683 = vmatprep.subr.bf16.mxu0 %v9634_v35  ;;  %v8501_v32 = vpop.f32.mrb[13].mxu1  ;;  %v9679_v35 = vld [vmem:[%s13111_s1 + $0xf60] ss:$12 sps:$4 sm:$0xff]  }
 0x1ef   :  { %8689 = vmatpush3.bf16.msra.mxu1 %v9636_v40  ;;  %v8503_v40 = vpop.f32.mrb[14].mxu1 }
 0x1f0   :  { %5684 = vmatpush1.bf16.msra.mxu0 %v9632_v39  ;;  %8690 = vmatprep.subr.bf16.mxu1 %v9640_v17  ;;  %v8502_v39 = vadd.f32 %v8501_v32, %v8500_v30  ;;  %v9686_v17 = vld [vmem:[%s13111_s1 + $0xf7c] ss:$12 sps:$4 sm:$0xff]   ;;  %v9723_v32 = vld [vmem:[%s13111_s1 + $0x1024] ss:$12 sps:$4 sm:$0xff]  }
 0x1f1   :  { %5685 = vmatprep.subr.bf16.mxu0 %v9639_v42  ;;  %v8504_v42 = vpop.f32.mrb[15].mxu1  ;;  %v9720_v30 = vld [vmem:[%s13111_s1 + $0x13d0] ss:$12 sps:$4 sm:$0xff]  }
 0x1f2   :  { %v9728_v40 = vld [vmem:[%s13111_s1 + $0x103c] ss:$12 sps:$4 sm:$0xff]   ;;  %v9729_v42 = vld [vmem:[%s13111_s1 + $0x14c0] ss:$12 sps:$4 sm:$0xff]  }
 0x1f3   :  { %8691 = vmatpush3.bf16.msra.mxu1 %v9641_v43 }
 0x1f4   :  { %5686 = vmatpush1.bf16.msra.mxu0 %v9637_v16  ;;  %8692 = vmatprep.subr.bf16.mxu1 %v9645_v41  ;;  %v9687_v16 = vld [vmem:[%s13111_s1 + $0x1340] ss:$12 sps:$4 sm:$0xff]  }
 0x1f5   :  { %5687 = vmatprep.subr.bf16.mxu0 %v9644_v44  ;;  %v8522_v44 = vpop.f32.mrb[16].mxu1 }
 0x1f6   :  { %v8523_v41 = vpop.f32.mrb[17].mxu1 }
 0x1f7   :  { %8693 = vmatpush3.bf16.msra.mxu1 %v9646_v33  ;;  %v9688_v33 = vld [vmem:[%s13111_s1 + $0x1280] ss:$12 sps:$4 sm:$0xff]  }
 0x1f8   :  { %5688 = vmatpush1.bf16.msra.mxu0 %v9642_v34  ;;  %8694 = vmatprep.subr.bf16.mxu1 %v9650_v46  ;;  %v9684_v34 = vld [vmem:[%s13111_s1 + $0xf78] ss:$12 sps:$4 sm:$0xff]   ;;  %v8525_v46 = vpop.f32.mrb[18].mxu1 }
 0x1f9   :  { %5689 = vmatprep.subr.bf16.mxu0 %v9649_v45  ;;  %v8524_v45 = vadd.f32 %v8523_v41, %v8522_v44  ;;  %v9734_v44 = vld [vmem:[%s13111_s1 + $0x14d8] ss:$12 sps:$4 sm:$0xff]   ;;  %v9731_v41 = vld [vmem:[%s13111_s1 + $0x1050] ss:$12 sps:$4 sm:$0xff]  }
 0x1fb   :  { %8695 = vmatpush3.bf16.msra.mxu1 %v9651_v49  ;;  %v9691_v49 = vld [vmem:[%s13111_s1 + $0xf94] ss:$12 sps:$4 sm:$0xff]  }
 0x1fc   :  { %5690 = vmatpush1.bf16.msra.mxu0 %v9647_v47  ;;  %8696 = vmatprep.subr.bf16.mxu1 %v9655_v51  ;;  %v8526_v47 = vpop.f32.mrb[19].mxu1 }
 0x1fd   :  { %5691 = vmatprep.subr.bf16.mxu0 %v9654_v50  ;;  %v9692_v50 = vld [vmem:[%s13111_s1 + $0x1358] ss:$12 sps:$4 sm:$0xff]  }
 0x1ff   :  { %8697 = vmatpush3.bf16.msra.mxu1 %v9656_v54 }
 0x200   :  { %5692 = vmatpush1.bf16.msra.mxu0 %v9652_v52  ;;  %8704 = vmatprep.subr.bf16.mxu1 %v9662_v57  ;;  %v8544_v52 = vpop.f32.mrb[20].mxu1  ;;  %v9693_v57 = vld [vmem:[%s13111_s1 + $0x1298] ss:$12 sps:$4 sm:$0xff]  }
 0x201   :  { %5702 = vmatprep.subr.bf16.mxu0 %v9661_v56  ;;  %v8545_v54 = vpop.f32.mrb[21].mxu1  ;;  %v9689_v56 = vld [vmem:[%s13111_s1 + $0xf90] ss:$12 sps:$4 sm:$0xff]  }
 0x202   :  { %6421 = vmatmul.mubr.bf16.vlgmr.msra.gmra.mrb[48].mxu1 %v11908_v59 }
 0x203   :  { %5694 = vmatmul.mubr.bf16.vlgmr.msra.gmra.mrb[0].mxu0 %v11684_v53  ;;  %8705 = vmatpush3.bf16.msra.mxu1 %v9663_v60  ;;  %v1067_v53 = vld [vmem:[%s13113_s2] sm:$0x7]  ;;  %v8547_v60 = vpop.f32.mrb[22].mxu1 }
 0x204   :  { %5703 = vmatpush1.bf16.msra.mxu0 %v9659_v58  ;;  %8706 = vmatprep.subr.bf16.mxu1 %v9667_v63  ;;  %v1080_v10 = vrot.slane %v1067_v53, %v1079_v5  ;;  %v8546_v58 = vadd.f32 %v8545_v54, %v8544_v52  ;;  %v8548_v6 = vpop.f32.mrb[23].mxu1  ;;  %v9697_v63 = vld [vmem:[%s13111_s1 + $0x1370] ss:$12 sps:$4 sm:$0xff]   ;;  %v9736_v54 = vld [vmem:[%s13111_s1 + $0x1068] ss:$12 sps:$4 sm:$0xff]   ;;  %v12142_v60 = vcombine.low %v12029_v31, %v12029_v31 }
 0x205   :  { %5704 = vmatprep.subr.bf16.mxu0 %v9666_v62  ;;  %6460 = vmatprep.mubr.bf16.mxu1 %v11932_v36  ;;  %v9696_v62 = vld [vmem:[%s13111_s1 + $0xfac] ss:$12 sps:$4 sm:$0xff]   ;;  %v12147_v6 = vld [vmem:[%s13112_s0 + $0x70] sm:$0xff] }
 0x206   :  { %5734 = vmatprep.mubr.bf16.mxu0 %v11705_v55  ;;  %v9676_v55 = vld [vmem:[%s13111_s1 + $0xf4c] ss:$12 sps:$4 sm:$0xff]   ;;  %v5983_v14 = vadd.f32 %v8458_v8, %v1080_v10 }
 0x207   :  { %8707 = vmatpush3.bf16.msra.mxu1 %v9668_v1 }
 0x208   :  { %5705 = vmatpush1.bf16.msra.mxu0 %v9664_v0  ;;  %8708 = vmatprep.subr.bf16.mxu1 %v9672_v4  ;;  %v6023_v28 = vadd.f32 %v8480_v21, %v5983_v14  ;;  %v9698_v4 = vld [vmem:[%s13111_s1 + $0x12b0] ss:$12 sps:$4 sm:$0xff]   ;;  %v9709_v14 = vld [vmem:[%s13111_s1 + $0x1460] ss:$12 sps:$4 sm:$0xff]   ;;  %v9714_v21 = vld [vmem:[%s13111_s1 + $0x1478] ss:$12 sps:$4 sm:$0xff]  }
 0x209   :  { %5706 = vmatprep.subr.bf16.mxu0 %v9671_v3  ;;  %v9694_v3 = vld [vmem:[%s13111_s1 + $0xfa8] ss:$12 sps:$4 sm:$0xff]  }
 0x20a   :  { %v6063_v43 = vadd.f32 %v8502_v39, %v6023_v28  ;;  %v9716_v28 = vld [vmem:[%s13111_s1 + $0x1008] ss:$12 sps:$4 sm:$0xff]  }
 0x20b   :  { %8709 = vmatpush3.bf16.msra.mxu1 %v9673_v11  ;;  %v9701_v11 = vld [vmem:[%s13111_s1 + $0xfc0] ss:$12 sps:$4 sm:$0xff]   ;;  %v9725_v39 = vld [vmem:[%s13111_s1 + $0x13e8] ss:$12 sps:$4 sm:$0xff]  }
 0x20c   :  { %5707 = vmatpush1.bf16.msra.mxu0 %v9669_v9  ;;  %8710 = vmatprep.subr.bf16.mxu1 %v9677_v13  ;;  %v6103_v51 = vadd.f32 %v8524_v45, %v6063_v43  ;;  %v9704_v9 = vld [vmem:[%s13111_s1 + $0x1448] ss:$12 sps:$4 sm:$0xff]   ;;  %v9738_v45 = vld [vmem:[%s13111_s1 + $0x106c] ss:$12 sps:$4 sm:$0xff]  }
 0x20d   :  { %5708 = vmatprep.subr.bf16.mxu0 %v9676_v55  ;;  %v12039_v55 = vcombine.low %v11916_v61, %v11916_v61  ;;  %v9708_v13 = vld [vmem:[%s13111_s1 + $0xfdc] ss:$12 sps:$4 sm:$0xff]   ;;  %v9710_v61 = vld [vmem:[%s13111_s1 + $0x13a0] ss:$12 sps:$4 sm:$0xff]  }
 0x20e   :  { %v6143_v0 = vadd.f32 %v8546_v58, %v6103_v51  ;;  %v9733_v43 = vld [vmem:[%s13111_s1 + $0x1054] ss:$12 sps:$4 sm:$0xff]  }
 0x20f   :  { %8711 = vmatpush3.bf16.msra.mxu1 %v9678_v20  ;;  %v9713_v20 = vld [vmem:[%s13111_s1 + $0xff4] ss:$12 sps:$4 sm:$0xff]  }
 0x210   :  { %5709 = vmatpush1.bf16.msra.mxu0 %v9674_v19  ;;  %8712 = vmatprep.subr.bf16.mxu1 %v9682_v27  ;;  %v12055_v19 = vcombine.high %v12029_v31, %v12029_v31  ;;  %v9719_v27 = vld [vmem:[%s13111_s1 + $0x1490] ss:$12 sps:$4 sm:$0xff]   ;;  %v9746_v58 = vld [vmem:[%s13111_s1 + $0x15c8] ss:$12 sps:$4 sm:$0xff]  }
 0x211   :  { %5710 = vmatprep.subr.bf16.mxu0 %v9681_v26  ;;  %v9718_v26 = vld [vmem:[%s13111_s1 + $0x100c] ss:$12 sps:$4 sm:$0xff]   ;;  %v9765_v31 = vld [vmem:[%s13111_s1 + $0x10e4] ss:$12 sps:$4 sm:$0xff]  }
 0x213   :  { %8713 = vmatpush3.bf16.msra.mxu1 %v9683_v38  ;;  %v9721_v38 = vld [vmem:[%s13111_s1 + $0x1020] ss:$12 sps:$4 sm:$0xff]  }
 0x214   :  { %5711 = vmatpush1.bf16.msra.mxu0 %v9679_v35  ;;  %8714 = vmatprep.subr.bf16.mxu1 %v9687_v16  ;;  %v9724_v35 = vld [vmem:[%s13111_s1 + $0x14a8] ss:$12 sps:$4 sm:$0xff]   ;;  %v9730_v16 = vld [vmem:[%s13111_s1 + $0x1400] ss:$12 sps:$4 sm:$0xff]  }
 0x215   :  { %5712 = vmatprep.subr.bf16.mxu0 %v9686_v17  ;;  %v8566_v1 = vpop.f32.mrb[24].mxu1  ;;  %v9726_v17 = vld [vmem:[%s13111_s1 + $0x1038] ss:$12 sps:$4 sm:$0xff]  }
 0x216   :  { %v8567_v2 = vpop.f32.mrb[25].mxu1 }
 0x217   :  { %8715 = vmatpush3.bf16.msra.mxu1 %v9688_v33  ;;  %v8568_v37 = vadd.f32 %v8567_v2, %v8566_v1  ;;  %v8569_v53 = vpop.f32.mrb[26].mxu1  ;;  %v9751_v1 = vld [vmem:[%s13111_s1 + $0x15e0] ss:$12 sps:$4 sm:$0xff]   ;;  %v12163_v2 = vcombine.high %v12147_v6, %v12147_v6 }
 0x218   :  { %5713 = vmatpush1.bf16.msra.mxu0 %v9684_v34  ;;  %8716 = vmatprep.subr.bf16.mxu1 %v9692_v50  ;;  %v8570_v8 = vpop.f32.mrb[27].mxu1  ;;  %v9735_v34 = vld [vmem:[%s13111_s1 + $0x1418] ss:$12 sps:$4 sm:$0xff]   ;;  %v9739_v50 = vld [vmem:[%s13111_s1 + $0x14f0] ss:$12 sps:$4 sm:$0xff]  }
 0x219   :  { %5714 = vmatprep.subr.bf16.mxu0 %v9691_v49  ;;  %v12024_v10 = vadd.f32 %v8568_v37, %v6143_v0  ;;  %v9750_v0 = vld [vmem:[%s13111_s1 + $0x109c] ss:$12 sps:$4 sm:$0xff]   ;;  %v9755_v37 = vld [vmem:[%s13111_s1 + $0x10b4] ss:$12 sps:$4 sm:$0xff]   ;;  %v9757_v8 = vld [vmem:[%s13111_s1 + $0x1538] ss:$12 sps:$4 sm:$0xff]  }
 0x21a   :  { %v9753_v53 = vld [vmem:[%s13111_s1 + $0x10b0] ss:$12 sps:$4 sm:$0xff]  }
 0x21b   :  { %8717 = vmatpush3.bf16.msra.mxu1 %v9693_v57  ;;  %v9745_v57 = vld [vmem:[%s13111_s1 + $0x1084] ss:$12 sps:$4 sm:$0xff]  }
 0x21c   :  { %5715 = vmatpush1.bf16.msra.mxu0 %v9689_v56  ;;  %8718 = vmatprep.subr.bf16.mxu1 %v9697_v63  ;;  %v9740_v56 = vld [vmem:[%s13111_s1 + $0x1430] ss:$12 sps:$4 sm:$0xff]   ;;  %v9747_v63 = vld [vmem:[%s13111_s1 + $0x1508] ss:$12 sps:$4 sm:$0xff]  }
 0x21d   :  { %5716 = vmatprep.subr.bf16.mxu0 %v9696_v62  ;;  %v9743_v62 = vld [vmem:[%s13111_s1 + $0x1080] ss:$12 sps:$4 sm:$0xff]  }
 0x21f   :  { %8719 = vmatpush3.bf16.msra.mxu1 %v9698_v4  ;;  %v9752_v4 = vld [vmem:[%s13111_s1 + $0x1520] ss:$12 sps:$4 sm:$0xff]  }
 0x220   :  { %5717 = vmatpush1.bf16.msra.mxu0 %v9694_v3  ;;  %8726 = vmatprep.subr.bf16.mxu1 %v9704_v9  ;;  %v9748_v3 = vld [vmem:[%s13111_s1 + $0x1098] ss:$12 sps:$4 sm:$0xff]   ;;  %v9758_v9 = vld [vmem:[%s13111_s1 + $0x10c8] ss:$12 sps:$4 sm:$0xff]  }
 0x221   :  { %5718 = vmatprep.subr.bf16.mxu0 %v9703_v25  ;;  %v9760_v25 = vld [vmem:[%s13111_s1 + $0x10cc] ss:$12 sps:$4 sm:$0xff]  }
 0x222   :  { %6461 = vmatmul.mubr.bf16.vlgmr.msra.gmra.mrb[52].mxu1 %v12039_v55 }
 0x223   :  { %8727 = vmatpush3.bf16.msra.mxu1 %v9705_v12  ;;  %6500 = vmatprep.mubr.bf16.mxu1 %v12055_v19  ;;  %v9763_v12 = vld [vmem:[%s13111_s1 + $0x10e0] ss:$12 sps:$4 sm:$0xff]  }
 0x224   :  { %5719 = vmatpush1.bf16.msra.mxu0 %v9701_v11  ;;  %8728 = vmatprep.subr.bf16.mxu1 %v9709_v14  ;;  %v9766_v11 = vld [vmem:[%s13111_s1 + $0x1628] ss:$12 sps:$4 sm:$0xff]  }
 0x225   :  { %5720 = vmatprep.subr.bf16.mxu0 %v9708_v13  ;;  %v9767_v13 = vld [vmem:[%s13111_s1 + $0x1568] ss:$12 sps:$4 sm:$0xff]  }
 0x226   :  { %v9770_v14 = vld [vmem:[%s13111_s1 + $0x10fc] ss:$12 sps:$4 sm:$0xff]  }
 0x227   :  { %8729 = vmatpush3.bf16.msra.mxu1 %v9710_v61  ;;  %v9768_v61 = vld [vmem:[%s13111_s1 + $0x10f8] ss:$12 sps:$4 sm:$0xff]  }
 0x228   :  { %5721 = vmatpush1.bf16.msra.mxu0 %v9706_v15  ;;  %8730 = vmatprep.subr.bf16.mxu1 %v9714_v21  ;;  %v9771_v15 = vld [vmem:[%s13111_s1 + $0x1640] ss:$12 sps:$4 sm:$0xff]  }
 0x229   :  { %5722 = vmatprep.subr.bf16.mxu0 %v9713_v20  ;;  %v9772_v20 = vld [vmem:[%s13111_s1 + $0x1580] ss:$12 sps:$4 sm:$0xff]  }
 0x22a   :  { %v9775_v21 = vld [vmem:[%s13111_s1 + $0x1114] ss:$12 sps:$4 sm:$0xff]  }
 0x22b   :  { %8731 = vmatpush3.bf16.msra.mxu1 %v9715_v24 }
 0x22c   :  { %5723 = vmatpush1.bf16.msra.mxu0 %v9711_v22  ;;  %8732 = vmatprep.subr.bf16.mxu1 %v9719_v27  ;;  %v9776_v22 = vld [vmem:[%s13111_s1 + $0x1658] ss:$12 sps:$4 sm:$0xff]   ;;  %v9773_v27 = vld [vmem:[%s13111_s1 + $0x1110] ss:$12 sps:$4 sm:$0xff]  }
 0x22d   :  { %5724 = vmatprep.subr.bf16.mxu0 %v9718_v26 }
 0x22f   :  { %8733 = vmatpush3.bf16.msra.mxu1 %v9720_v30 }
 0x230   :  { %5725 = vmatpush1.bf16.msra.mxu0 %v9716_v28  ;;  %8734 = vmatprep.subr.bf16.mxu1 %v9724_v35  ;;  %v9777_v28 = vld [vmem:[%s13111_s1 + $0x1598] ss:$12 sps:$4 sm:$0xff]  }
 0x231   :  { %5726 = vmatprep.subr.bf16.mxu0 %v9723_v32  ;;  %v9780_v35 = vld [vmem:[%s13111_s1 + $0x112c] ss:$12 sps:$4 sm:$0xff]  }
 0x233   :  { %8735 = vmatpush3.bf16.msra.mxu1 %v9725_v39 }
 0x234   :  { %5727 = vmatpush1.bf16.msra.mxu0 %v9721_v38  ;;  %8736 = vmatprep.subr.bf16.mxu1 %v9729_v42  ;;  %v9781_v38 = vld [vmem:[%s13111_s1 + $0x1670] ss:$12 sps:$4 sm:$0xff]   ;;  %v9778_v42 = vld [vmem:[%s13111_s1 + $0x1128] ss:$12 sps:$4 sm:$0xff]  }
 0x235   :  { %5728 = vmatprep.subr.bf16.mxu0 %v9728_v40  ;;  %v8588_v33 = vpop.f32.mrb[28].mxu1 }
 0x236   :  { %v8589_v46 = vpop.f32.mrb[29].mxu1 }
 0x237   :  { %8737 = vmatpush3.bf16.msra.mxu1 %v9730_v16  ;;  %v8590_v47 = vadd.f32 %v8589_v46, %v8588_v33  ;;  %v8591_v49 = vpop.f32.mrb[30].mxu1  ;;  %v9787_v16 = vld [vmem:[%s13111_s1 + $0x1144] ss:$12 sps:$4 sm:$0xff]   ;;  %v9789_v33 = vld [vmem:[%s13111_s1 + $0x1688] ss:$12 sps:$4 sm:$0xff]  }
 0x238   :  { %5729 = vmatpush1.bf16.msra.mxu0 %v9726_v17  ;;  %8738 = vmatprep.subr.bf16.mxu1 %v9734_v44  ;;  %v8592_v51 = vpop.f32.mrb[31].mxu1  ;;  %v9782_v17 = vld [vmem:[%s13111_s1 + $0x15b0] ss:$12 sps:$4 sm:$0xff]   ;;  %v12258_v44 = vcombine.low %v12147_v6, %v12147_v6  ;;  %v9793_v46 = vld [vmem:[%s13111_s1 + $0x1760] ss:$12 sps:$4 sm:$0xff]  }
 0x239   :  { %5730 = vmatprep.subr.bf16.mxu0 %v9733_v43  ;;  %v12126_v52 = vadd.f32 %v8590_v47, %v12024_v10  ;;  %v9762_v10 = vld [vmem:[%s13111_s1 + $0x1550] ss:$12 sps:$4 sm:$0xff]   ;;  %v9788_v43 = vld [vmem:[%s13111_s1 + $0x1748] ss:$12 sps:$4 sm:$0xff]   ;;  %v9790_v49 = vld [vmem:[%s13111_s1 + $0x1158] ss:$12 sps:$4 sm:$0xff]  }
 0x23a   :  { %v9797_v51 = vld [vmem:[%s13111_s1 + $0x1174] ss:$12 sps:$4 sm:$0xff]  }
 0x23b   :  { %8739 = vmatpush3.bf16.msra.mxu1 %v9735_v34  ;;  %v9785_v34 = vld [vmem:[%s13111_s1 + $0x1140] ss:$12 sps:$4 sm:$0xff]   ;;  %v9800_v6 = vld [vmem:[%s13111_s1 + $0x1188] ss:$12 sps:$4 sm:$0xff]  }
 0x23c   :  { %5731 = vmatpush1.bf16.msra.mxu0 %v9731_v41  ;;  %8740 = vmatprep.subr.bf16.mxu1 %v9739_v50  ;;  %v12263_v41 = vld [vmem:[%s13112_s0 + $0x78] sm:$0xff]  ;;  %v9794_v50 = vld [vmem:[%s13111_s1 + $0x16a0] ss:$12 sps:$4 sm:$0xff]  }
 0x23d   :  { %5732 = vmatprep.subr.bf16.mxu0 %v9738_v45  ;;  %v9792_v45 = vld [vmem:[%s13111_s1 + $0x115c] ss:$12 sps:$4 sm:$0xff]   ;;  %v12279_v47 = vcombine.high %v12263_v41, %v12263_v41 }
 0x23f   :  { %8741 = vmatpush3.bf16.msra.mxu1 %v9740_v56  ;;  %v9799_v56 = vld [vmem:[%s13111_s1 + $0x16b8] ss:$12 sps:$4 sm:$0xff]  }
 0x240   :  { %5733 = vmatpush1.bf16.msra.mxu0 %v9736_v54  ;;  %8748 = vmatprep.subr.bf16.mxu1 %v9746_v58  ;;  %v9795_v54 = vld [vmem:[%s13111_s1 + $0x1170] ss:$12 sps:$4 sm:$0xff]  }
 0x241   :  { %5743 = vmatprep.subr.bf16.mxu0 %v9745_v57  ;;  %v9802_v57 = vld [vmem:[%s13111_s1 + $0x118c] ss:$12 sps:$4 sm:$0xff]   ;;  %v9803_v58 = vld [vmem:[%s13111_s1 + $0x1790] ss:$12 sps:$4 sm:$0xff]  }
 0x242   :  { %6501 = vmatmul.mubr.bf16.vlgmr.msra.gmra.mrb[56].mxu1 %v12142_v60 }
 0x243   :  { %5735 = vmatmul.mubr.bf16.vlgmr.msra.gmra.mrb[0].mxu0 %v11797_v18  ;;  %8749 = vmatpush3.bf16.msra.mxu1 %v9747_v63  ;;  %v9756_v18 = vld [vmem:[%s13111_s1 + $0x15f8] ss:$12 sps:$4 sm:$0xff]  }
 0x244   :  { %5744 = vmatpush1.bf16.msra.mxu0 %v9743_v62  ;;  %8750 = vmatprep.subr.bf16.mxu1 %v9751_v1  ;;  %v9804_v62 = vld [vmem:[%s13111_s1 + $0x16d0] ss:$12 sps:$4 sm:$0xff]   ;;  %v9805_v1 = vld [vmem:[%s13111_s1 + $0x11a0] ss:$12 sps:$4 sm:$0xff]  }
 0x245   :  { %5745 = vmatprep.subr.bf16.mxu0 %v9750_v0  ;;  %6540 = vmatprep.mubr.bf16.mxu1 %v12163_v2  ;;  %v9807_v63 = vld [vmem:[%s13111_s1 + $0x11a4] ss:$12 sps:$4 sm:$0xff]   ;;  %v9808_v0 = vld [vmem:[%s13111_s1 + $0x17a8] ss:$12 sps:$4 sm:$0xff]  }
 0x246   :  { %5775 = vmatprep.mubr.bf16.mxu0 %v11815_v23  ;;  %v9761_v23 = vld [vmem:[%s13111_s1 + $0x1610] ss:$12 sps:$4 sm:$0xff]  }
 0x247   :  { %8751 = vmatpush3.bf16.msra.mxu1 %v9752_v4  ;;  %v9812_v4 = vld [vmem:[%s13111_s1 + $0x11bc] ss:$12 sps:$4 sm:$0xff]  }
 0x248   :  { %5746 = vmatpush1.bf16.msra.mxu0 %v9748_v3  ;;  %8752 = vmatprep.subr.bf16.mxu1 %v9756_v18  ;;  %v9809_v3 = vld [vmem:[%s13111_s1 + $0x16e8] ss:$12 sps:$4 sm:$0xff]   ;;  %v9810_v18 = vld [vmem:[%s13111_s1 + $0x11b8] ss:$12 sps:$4 sm:$0xff]  }
 0x249   :  { %5747 = vmatprep.subr.bf16.mxu0 %v9755_v37  ;;  %v9813_v37 = vld [vmem:[%s13111_s1 + $0x17c0] ss:$12 sps:$4 sm:$0xff]  }
 0x24b   :  { %8753 = vmatpush3.bf16.msra.mxu1 %v9757_v8  ;;  %v9817_v8 = vld [vmem:[%s13111_s1 + $0x11d4] ss:$12 sps:$4 sm:$0xff]  }
 0x24c   :  { %5748 = vmatpush1.bf16.msra.mxu0 %v9753_v53  ;;  %8754 = vmatprep.subr.bf16.mxu1 %v9761_v23  ;;  %v9814_v53 = vld [vmem:[%s13111_s1 + $0x1700] ss:$12 sps:$4 sm:$0xff]  }
 0x24d   :  { %5749 = vmatprep.subr.bf16.mxu0 %v9760_v25  ;;  %v9818_v25 = vld [vmem:[%s13111_s1 + $0x17d8] ss:$12 sps:$4 sm:$0xff]  }
 0x24f   :  { %8755 = vmatpush3.bf16.msra.mxu1 %v9762_v10  ;;  %v9815_v10 = vld [vmem:[%s13111_s1 + $0x11d0] ss:$12 sps:$4 sm:$0xff]  }
 0x250   :  { %5750 = vmatpush1.bf16.msra.mxu0 %v9758_v9  ;;  %8756 = vmatprep.subr.bf16.mxu1 %v9766_v11 }
 0x251   :  { %5751 = vmatprep.subr.bf16.mxu0 %v9765_v31  ;;  %v9819_v31 = vld [vmem:[%s13111_s1 + $0x1718] ss:$12 sps:$4 sm:$0xff]  }
 0x253   :  { %8757 = vmatpush3.bf16.msra.mxu1 %v9767_v13  ;;  %v9822_v13 = vld [vmem:[%s13111_s1 + $0x11ec] ss:$12 sps:$4 sm:$0xff]  }
 0x254   :  { %5752 = vmatpush1.bf16.msra.mxu0 %v9763_v12  ;;  %8758 = vmatprep.subr.bf16.mxu1 %v9771_v15 }
 0x255   :  { %5753 = vmatprep.subr.bf16.mxu0 %v9770_v14  ;;  %v8610_v24 = vpop.f32.mrb[32].mxu1  ;;  %v9823_v14 = vld [vmem:[%s13111_s1 + $0x17f0] ss:$12 sps:$4 sm:$0xff]  }
 0x256   :  { %v8611_v26 = vpop.f32.mrb[33].mxu1 }
 0x257   :  { %8759 = vmatpush3.bf16.msra.mxu1 %v9772_v20  ;;  %v8612_v30 = vadd.f32 %v8611_v26, %v8610_v24  ;;  %v8613_v32 = vpop.f32.mrb[34].mxu1  ;;  %v9820_v20 = vld [vmem:[%s13111_s1 + $0x11e8] ss:$12 sps:$4 sm:$0xff]   ;;  %v12367_v24 = vcombine.low %v12263_v41, %v12263_v41  ;;  %v9827_v26 = vld [vmem:[%s13111_s1 + $0x1200] ss:$12 sps:$4 sm:$0xff]  }
 0x258   :  { %5754 = vmatpush1.bf16.msra.mxu0 %v9768_v61  ;;  %8760 = vmatprep.subr.bf16.mxu1 %v9776_v22  ;;  %v8614_v39 = vpop.f32.mrb[35].mxu1  ;;  %v9829_v22 = vld [vmem:[%s13111_s1 + $0x1204] ss:$12 sps:$4 sm:$0xff]  }
 0x259   :  { %5755 = vmatprep.subr.bf16.mxu0 %v9775_v21  ;;  %v12242_v40 = vadd.f32 %v8612_v30, %v12126_v52  ;;  %v9798_v52 = vld [vmem:[%s13111_s1 + $0x1778] ss:$12 sps:$4 sm:$0xff]   ;;  %v9824_v21 = vld [vmem:[%s13111_s1 + $0x1730] ss:$12 sps:$4 sm:$0xff]   ;;  %v9835_v30 = vld [vmem:[%s13111_s1 + $0x1234] ss:$12 sps:$4 sm:$0xff]  }
 0x25a   :  { %v9833_v32 = vld [vmem:[%s13111_s1 + $0x1230] ss:$12 sps:$4 sm:$0xff]  }
 0x25b   :  { %8761 = vmatpush3.bf16.msra.mxu1 %v9777_v28  ;;  %v9830_v28 = vld [vmem:[%s13111_s1 + $0x1218] ss:$12 sps:$4 sm:$0xff]   ;;  %v9844_v39 = vld [vmem:[%s13111_s1 + $0x127c] ss:$12 sps:$4 sm:$0xff]  }
 0x25c   :  { %5756 = vmatpush1.bf16.msra.mxu0 %v9773_v27  ;;  %8762 = vmatprep.subr.bf16.mxu1 %v9781_v38  ;;  %v9832_v27 = vld [vmem:[%s13111_s1 + $0x121c] ss:$12 sps:$4 sm:$0xff]   ;;  %v9839_v38 = vld [vmem:[%s13111_s1 + $0x1260] ss:$12 sps:$4 sm:$0xff]  }
 0x25d   :  { %5757 = vmatprep.subr.bf16.mxu0 %v9780_v35  ;;  %v9841_v35 = vld [vmem:[%s13111_s1 + $0x1264] ss:$12 sps:$4 sm:$0xff]  }
 0x25f   :  { %8763 = vmatpush3.bf16.msra.mxu1 %v9782_v17 }
 0x260   :  { %5758 = vmatpush1.bf16.msra.mxu0 %v9778_v42  ;;  %8770 = vmatprep.subr.bf16.mxu1 %v9788_v43  ;;  %v9847_v42 = vld [vmem:[%s13111_s1 + $0x1294] ss:$12 sps:$4 sm:$0xff]   ;;  %v9845_v43 = vld [vmem:[%s13111_s1 + $0x1290] ss:$12 sps:$4 sm:$0xff]  }
 0x261   :  { %5759 = vmatprep.subr.bf16.mxu0 %v9787_v16 }
 0x262   :  { %6541 = vmatmul.mubr.bf16.vlgmr.msra.gmra.mrb[60].mxu1 %v12258_v44 }
 0x263   :  { %8771 = vmatpush3.bf16.msra.mxu1 %v9789_v33  ;;  %6580 = vmatprep.mubr.bf16.mxu1 %v12279_v47  ;;  %v9850_v33 = vld [vmem:[%s13111_s1 + $0x12ac] ss:$12 sps:$4 sm:$0xff]  }
 0x264   :  { %5760 = vmatpush1.bf16.msra.mxu0 %v9785_v34  ;;  %8772 = vmatprep.subr.bf16.mxu1 %v9793_v46 }
 0x265   :  { %5761 = vmatprep.subr.bf16.mxu0 %v9792_v45 }
 0x267   :  { %8773 = vmatpush3.bf16.msra.mxu1 %v9794_v50  ;;  %v9853_v50 = vld [vmem:[%s13111_s1 + $0x12c4] ss:$12 sps:$4 sm:$0xff]  }
 0x268   :  { %5762 = vmatpush1.bf16.msra.mxu0 %v9790_v49  ;;  %8774 = vmatprep.subr.bf16.mxu1 %v9798_v52  ;;  %v9848_v49 = vld [vmem:[%s13111_s1 + $0x12a8] ss:$12 sps:$4 sm:$0xff]  }
 0x269   :  { %5763 = vmatprep.subr.bf16.mxu0 %v9797_v51  ;;  %v9851_v51 = vld [vmem:[%s13111_s1 + $0x12c0] ss:$12 sps:$4 sm:$0xff]   ;;  %v9856_v52 = vld [vmem:[%s13111_s1 + $0x12dc] ss:$12 sps:$4 sm:$0xff]  }
 0x26b   :  { %8775 = vmatpush3.bf16.msra.mxu1 %v9799_v56  ;;  %v9859_v56 = vld [vmem:[%s13111_s1 + $0x12f4] ss:$12 sps:$4 sm:$0xff]  }
 0x26c   :  { %5764 = vmatpush1.bf16.msra.mxu0 %v9795_v54  ;;  %8776 = vmatprep.subr.bf16.mxu1 %v9803_v58  ;;  %v9854_v54 = vld [vmem:[%s13111_s1 + $0x12d8] ss:$12 sps:$4 sm:$0xff]  }
 0x26d   :  { %5765 = vmatprep.subr.bf16.mxu0 %v9802_v57  ;;  %v9857_v57 = vld [vmem:[%s13111_s1 + $0x12f0] ss:$12 sps:$4 sm:$0xff]   ;;  %v9862_v58 = vld [vmem:[%s13111_s1 + $0x130c] ss:$12 sps:$4 sm:$0xff]  }
 0x26f   :  { %8777 = vmatpush3.bf16.msra.mxu1 %v9804_v62  ;;  %v9865_v62 = vld [vmem:[%s13111_s1 + $0x1324] ss:$12 sps:$4 sm:$0xff]  }
 0x270   :  { %5766 = vmatpush1.bf16.msra.mxu0 %v9800_v6  ;;  %8778 = vmatprep.subr.bf16.mxu1 %v9808_v0  ;;  %v9860_v6 = vld [vmem:[%s13111_s1 + $0x1308] ss:$12 sps:$4 sm:$0xff]  }
 0x271   :  { %5767 = vmatprep.subr.bf16.mxu0 %v9807_v63  ;;  %v9863_v63 = vld [vmem:[%s13111_s1 + $0x1320] ss:$12 sps:$4 sm:$0xff]   ;;  %v9868_v0 = vld [vmem:[%s13111_s1 + $0x133c] ss:$12 sps:$4 sm:$0xff]  }
 0x273   :  { %8779 = vmatpush3.bf16.msra.mxu1 %v9809_v3  ;;  %v9871_v3 = vld [vmem:[%s13111_s1 + $0x1354] ss:$12 sps:$4 sm:$0xff]  }
 0x274   :  { %5768 = vmatpush1.bf16.msra.mxu0 %v9805_v1  ;;  %8780 = vmatprep.subr.bf16.mxu1 %v9813_v37  ;;  %v9866_v1 = vld [vmem:[%s13111_s1 + $0x1338] ss:$12 sps:$4 sm:$0xff]  }
 0x275   :  { %5769 = vmatprep.subr.bf16.mxu0 %v9812_v4  ;;  %v8632_v23 = vpop.f32.mrb[36].mxu1 }
 0x276   :  { %v8633_v9 = vpop.f32.mrb[37].mxu1 }
 0x277   :  { %8781 = vmatpush3.bf16.msra.mxu1 %v9814_v53  ;;  %v8634_v11 = vadd.f32 %v8633_v9, %v8632_v23  ;;  %v8635_v12 = vpop.f32.mrb[38].mxu1  ;;  %v9869_v53 = vld [vmem:[%s13111_s1 + $0x1350] ss:$12 sps:$4 sm:$0xff]  }
 0x278   :  { %5770 = vmatpush1.bf16.msra.mxu0 %v9810_v18  ;;  %8782 = vmatprep.subr.bf16.mxu1 %v9818_v25  ;;  %v8636_v15 = vpop.f32.mrb[39].mxu1  ;;  %v9874_v25 = vld [vmem:[%s13111_s1 + $0x136c] ss:$12 sps:$4 sm:$0xff]   ;;  %v9880_v12 = vld [vmem:[%s13111_s1 + $0x139c] ss:$12 sps:$4 sm:$0xff]  }
 0x279   :  { %5771 = vmatprep.subr.bf16.mxu0 %v9817_v8  ;;  %v6303_v61 = vadd.f32 %v8634_v11, %v12242_v40  ;;  %v9842_v40 = vld [vmem:[%s13111_s1 + $0x1278] ss:$12 sps:$4 sm:$0xff]   ;;  %v9875_v11 = vld [vmem:[%s13111_s1 + $0x1380] ss:$12 sps:$4 sm:$0xff]   ;;  %v9881_v15 = vld [vmem:[%s13111_s1 + $0x13b0] ss:$12 sps:$4 sm:$0xff]  }
 0x27b   :  { %8783 = vmatpush3.bf16.msra.mxu1 %v9819_v31  ;;  %v9877_v31 = vld [vmem:[%s13111_s1 + $0x1384] ss:$12 sps:$4 sm:$0xff]  }
 0x27c   :  { %5772 = vmatpush1.bf16.msra.mxu0 %v9815_v10  ;;  %8784 = vmatprep.subr.bf16.mxu1 %v9823_v14  ;;  %v9872_v10 = vld [vmem:[%s13111_s1 + $0x1368] ss:$12 sps:$4 sm:$0xff]  }
 0x27d   :  { %5773 = vmatprep.subr.bf16.mxu0 %v9822_v13  ;;  %v9878_v13 = vld [vmem:[%s13111_s1 + $0x1398] ss:$12 sps:$4 sm:$0xff]   ;;  %v9883_v14 = vld [vmem:[%s13111_s1 + $0x13b4] ss:$12 sps:$4 sm:$0xff]  }
 0x27f   :  { %8785 = vmatpush3.bf16.msra.mxu1 %v9824_v21  ;;  %v9892_v21 = vld [vmem:[%s13111_s1 + $0x13fc] ss:$12 sps:$4 sm:$0xff]  }
 0x280   :  { %5774 = vmatpush1.bf16.msra.mxu0 %v9820_v20  ;;  %v9887_v20 = vld [vmem:[%s13111_s1 + $0x13e0] ss:$12 sps:$4 sm:$0xff]  }
 0x281   :  { %5784 = vmatprep.subr.bf16.mxu0 %v9829_v22  ;;  %v9890_v22 = vld [vmem:[%s13111_s1 + $0x13f8] ss:$12 sps:$4 sm:$0xff]  }
 0x282   :  { %6581 = vmatmul.mubr.bf16.vlgmr.msra.gmra.mrb[64].mxu1 %v12367_v24 }
 0x283   :  { %5776 = vmatmul.mubr.bf16.vlgmr.msra.gmra.mrb[0].mxu0 %v11908_v59  ;;  %v9838_v59 = vld [vmem:[%s13111_s1 + $0x124c] ss:$12 sps:$4 sm:$0xff]  }
 0x284   :  { %5785 = vmatpush1.bf16.msra.mxu0 %v9827_v26  ;;  %5816 = vmatprep.mubr.bf16.mxu0 %v11932_v36  ;;  %v9836_v36 = vld [vmem:[%s13111_s1 + $0x1248] ss:$12 sps:$4 sm:$0xff]  }
 0x285   :  { %5786 = vmatprep.subr.bf16.mxu0 %v9832_v27  ;;  %v9895_v26 = vld [vmem:[%s13111_s1 + $0x1414] ss:$12 sps:$4 sm:$0xff]  }
 0x288   :  { %5787 = vmatpush1.bf16.msra.mxu0 %v9830_v28 }
 0x289   :  { %5788 = vmatprep.subr.bf16.mxu0 %v9835_v30 }
 0x28c   :  { %5789 = vmatpush1.bf16.msra.mxu0 %v9833_v32  ;;  %v9893_v32 = vld [vmem:[%s13111_s1 + $0x1410] ss:$12 sps:$4 sm:$0xff]  }
 0x28d   :  { %5790 = vmatprep.subr.bf16.mxu0 %v9838_v59 }
 0x290   :  { %5791 = vmatpush1.bf16.msra.mxu0 %v9836_v36  ;;  %v9898_v36 = vld [vmem:[%s13111_s1 + $0x142c] ss:$12 sps:$4 sm:$0xff]  }
 0x291   :  { %5792 = vmatprep.subr.bf16.mxu0 %v9841_v35 }
 0x294   :  { %5793 = vmatpush1.bf16.msra.mxu0 %v9839_v38 }
 0x295   :  { %5794 = vmatprep.subr.bf16.mxu0 %v9844_v39  ;;  %v8654_v17 = vpop.f32.mrb[40].mxu1  ;;  %v9896_v39 = vld [vmem:[%s13111_s1 + $0x1428] ss:$12 sps:$4 sm:$0xff]  }
 0x296   :  { %v8655_v16 = vpop.f32.mrb[41].mxu1 }
 0x297   :  { %v8656_v41 = vadd.f32 %v8655_v16, %v8654_v17  ;;  %v8657_v34 = vpop.f32.mrb[42].mxu1  ;;  %v9904_v17 = vld [vmem:[%s13111_s1 + $0x145c] ss:$12 sps:$4 sm:$0xff]   ;;  %v9902_v16 = vld [vmem:[%s13111_s1 + $0x1458] ss:$12 sps:$4 sm:$0xff]  }
 0x298   :  { %5795 = vmatpush1.bf16.msra.mxu0 %v9842_v40  ;;  %v8658_v45 = vpop.f32.mrb[43].mxu1  ;;  %v9901_v40 = vld [vmem:[%s13111_s1 + $0x1444] ss:$12 sps:$4 sm:$0xff]   ;;  %v9910_v34 = vld [vmem:[%s13111_s1 + $0x148c] ss:$12 sps:$4 sm:$0xff]  }
 0x299   :  { %5796 = vmatprep.subr.bf16.mxu0 %v9847_v42  ;;  %v6343_v46 = vadd.f32 %v8656_v41, %v6303_v61  ;;  %v9889_v61 = vld [vmem:[%s13111_s1 + $0x13e4] ss:$12 sps:$4 sm:$0xff]   ;;  %v9899_v42 = vld [vmem:[%s13111_s1 + $0x1440] ss:$12 sps:$4 sm:$0xff]  }
 0x29a   :  { %v9905_v41 = vld [vmem:[%s13111_s1 + $0x1470] ss:$12 sps:$4 sm:$0xff]  }
 0x29b   :  { %v9913_v45 = vld [vmem:[%s13111_s1 + $0x14a4] ss:$12 sps:$4 sm:$0xff]  }
 0x29c   :  { %5797 = vmatpush1.bf16.msra.mxu0 %v9845_v43  ;;  %v9907_v43 = vld [vmem:[%s13111_s1 + $0x1474] ss:$12 sps:$4 sm:$0xff]  }
 0x29d   :  { %5798 = vmatprep.subr.bf16.mxu0 %v9850_v33  ;;  %v9908_v33 = vld [vmem:[%s13111_s1 + $0x1488] ss:$12 sps:$4 sm:$0xff]  }
 0x2a0   :  { %5799 = vmatpush1.bf16.msra.mxu0 %v9848_v49  ;;  %v9916_v49 = vld [vmem:[%s13111_s1 + $0x14bc] ss:$12 sps:$4 sm:$0xff]  }
 0x2a1   :  { %5800 = vmatprep.subr.bf16.mxu0 %v9853_v50  ;;  %v9914_v50 = vld [vmem:[%s13111_s1 + $0x14b8] ss:$12 sps:$4 sm:$0xff]  }
 0x2a4   :  { %5801 = vmatpush1.bf16.msra.mxu0 %v9851_v51  ;;  %v9919_v51 = vld [vmem:[%s13111_s1 + $0x14d4] ss:$12 sps:$4 sm:$0xff]  }
 0x2a5   :  { %5802 = vmatprep.subr.bf16.mxu0 %v9856_v52 }
 0x2a8   :  { %5803 = vmatpush1.bf16.msra.mxu0 %v9854_v54 }
 0x2a9   :  { %5804 = vmatprep.subr.bf16.mxu0 %v9859_v56 }
 0x2ac   :  { %5805 = vmatpush1.bf16.msra.mxu0 %v9857_v57  ;;  %v9917_v57 = vld [vmem:[%s13111_s1 + $0x14d0] ss:$12 sps:$4 sm:$0xff]  }
 0x2ad   :  { %5806 = vmatprep.subr.bf16.mxu0 %v9862_v58 }
 0x2b0   :  { %5807 = vmatpush1.bf16.msra.mxu0 %v9860_v6  ;;  %v9922_v6 = vld [vmem:[%s13111_s1 + $0x14ec] ss:$12 sps:$4 sm:$0xff]  }
 0x2b1   :  { %5808 = vmatprep.subr.bf16.mxu0 %v9865_v62 }
 0x2b4   :  { %5809 = vmatpush1.bf16.msra.mxu0 %v9863_v63 }
 0x2b5   :  { %5810 = vmatprep.subr.bf16.mxu0 %v9868_v0  ;;  %v8676_v4 = vpop.f32.mrb[44].mxu1  ;;  %v9920_v0 = vld [vmem:[%s13111_s1 + $0x14e8] ss:$12 sps:$4 sm:$0xff]  }
 0x2b6   :  { %v8677_v37 = vpop.f32.mrb[45].mxu1 }
 0x2b7   :  { %v8678_v18 = vadd.f32 %v8677_v37, %v8676_v4  ;;  %v8679_v8 = vpop.f32.mrb[46].mxu1  ;;  %v9928_v4 = vld [vmem:[%s13111_s1 + $0x151c] ss:$12 sps:$4 sm:$0xff]   ;;  %v9926_v37 = vld [vmem:[%s13111_s1 + $0x1518] ss:$12 sps:$4 sm:$0xff]  }
 0x2b8   :  { %5811 = vmatpush1.bf16.msra.mxu0 %v9866_v1  ;;  %v8680_v23 = vpop.f32.mrb[47].mxu1  ;;  %v9925_v1 = vld [vmem:[%s13111_s1 + $0x1504] ss:$12 sps:$4 sm:$0xff]   ;;  %v10024_v8 = vld [vmem:[%s13114_s3 + $0x1c] ss:$12 sps:$4 sm:$0xff]  }
 0x2b9   :  { %5812 = vmatprep.subr.bf16.mxu0 %v9871_v3  ;;  %v6383_v9 = vadd.f32 %v8678_v18, %v6343_v46  ;;  %v9911_v46 = vld [vmem:[%s13111_s1 + $0x14a0] ss:$12 sps:$4 sm:$0xff]   ;;  %v10022_v23 = vld [vmem:[%s13114_s3 + $0x18] ss:$12 sps:$4 sm:$0xff]  }
 0x2ba   :  { %v9923_v3 = vld [vmem:[%s13111_s1 + $0x1500] ss:$12 sps:$4 sm:$0xff]  }
 0x2bb   :  { %v9931_v18 = vld [vmem:[%s13111_s1 + $0x1534] ss:$12 sps:$4 sm:$0xff]  }
 0x2bc   :  { %5813 = vmatpush1.bf16.msra.mxu0 %v9869_v53  ;;  %v10019_v53 = vld [vmem:[%s13114_s3] ss:$12 sps:$4 sm:$0xff]  }
 0x2bd   :  { %5814 = vmatprep.subr.bf16.mxu0 %v9874_v25  ;;  %v9929_v25 = vld [vmem:[%s13111_s1 + $0x1530] ss:$12 sps:$4 sm:$0xff]  }
 0x2c0   :  { %5815 = vmatpush1.bf16.msra.mxu0 %v9872_v10  ;;  %v9932_v10 = vld [vmem:[%s13111_s1 + $0x1548] ss:$12 sps:$4 sm:$0xff]  }
 0x2c1   :  { %5825 = vmatprep.subr.bf16.mxu0 %v9877_v31  ;;  %v9937_v31 = vld [vmem:[%s13111_s1 + $0x1564] ss:$12 sps:$4 sm:$0xff]  }
 0x2c3   :  { %5817 = vmatmul.mubr.bf16.vlgmr.msra.gmra.mrb[0].mxu0 %v12039_v55  ;;  %v9886_v55 = vld [vmem:[%s13111_s1 + $0x13cc] ss:$12 sps:$4 sm:$0xff]  }
 0x2c4   :  { %5826 = vmatpush1.bf16.msra.mxu0 %v9875_v11  ;;  %5857 = vmatprep.mubr.bf16.mxu0 %v12055_v19  ;;  %v9884_v19 = vld [vmem:[%s13111_s1 + $0x13c8] ss:$12 sps:$4 sm:$0xff]   ;;  %v10025_v11 = vld [vmem:[%s13114_s3 + $0x30] ss:$12 sps:$4 sm:$0xff]  }
 0x2c5   :  { %5827 = vmatprep.subr.bf16.mxu0 %v9880_v12  ;;  %v10030_v12 = vld [vmem:[%s13114_s3 + $0x4c] ss:$12 sps:$4 sm:$0xff]  }
 0x2c8   :  { %5828 = vmatpush1.bf16.msra.mxu0 %v9878_v13  ;;  %v9935_v13 = vld [vmem:[%s13111_s1 + $0x1560] ss:$12 sps:$4 sm:$0xff]  }
 0x2c9   :  { %5829 = vmatprep.subr.bf16.mxu0 %v9883_v14  ;;  %v9940_v14 = vld [vmem:[%s13111_s1 + $0x157c] ss:$12 sps:$4 sm:$0xff]  }
 0x2cc   :  { %5830 = vmatpush1.bf16.msra.mxu0 %v9881_v15  ;;  %v10028_v15 = vld [vmem:[%s13114_s3 + $0x48] ss:$12 sps:$4 sm:$0xff]  }
 0x2cd   :  { %5831 = vmatprep.subr.bf16.mxu0 %v9886_v55  ;;  %v10033_v55 = vld [vmem:[%s13114_s3 + $0x64] ss:$12 sps:$4 sm:$0xff]  }
 0x2d0   :  { %5832 = vmatpush1.bf16.msra.mxu0 %v9884_v19  ;;  %v9938_v19 = vld [vmem:[%s13111_s1 + $0x1578] ss:$12 sps:$4 sm:$0xff]  }
 0x2d1   :  { %5833 = vmatprep.subr.bf16.mxu0 %v9889_v61  ;;  %v9943_v61 = vld [vmem:[%s13111_s1 + $0x1594] ss:$12 sps:$4 sm:$0xff]  }
 0x2d4   :  { %5834 = vmatpush1.bf16.msra.mxu0 %v9887_v20  ;;  %v10031_v20 = vld [vmem:[%s13114_s3 + $0x60] ss:$12 sps:$4 sm:$0xff]  }
 0x2d5   :  { %5835 = vmatprep.subr.bf16.mxu0 %v9892_v21  ;;  %v8698_v27 = vpop.f32.mrb[48].mxu1  ;;  %v10036_v21 = vld [vmem:[%s13114_s3 + $0x7c] ss:$12 sps:$4 sm:$0xff]  }
 0x2d6   :  { %v8699_v28 = vpop.f32.mrb[49].mxu1 }
 0x2d7   :  { %v8700_v30 = vadd.f32 %v8699_v28, %v8698_v27  ;;  %v8701_v59 = vpop.f32.mrb[50].mxu1  ;;  %v10034_v27 = vld [vmem:[%s13114_s3 + $0x78] ss:$12 sps:$4 sm:$0xff]  }
 0x2d8   :  { %5836 = vmatpush1.bf16.msra.mxu0 %v9890_v22  ;;  %v8702_v35 = vpop.f32.mrb[51].mxu1 }
 0x2d9   :  { %5837 = vmatprep.subr.bf16.mxu0 %v9895_v26  ;;  %v6423_v38 = vadd.f32 %v8700_v30, %v6383_v9  ;;  %v10027_v9 = vld [vmem:[%s13114_s3 + $0x34] ss:$12 sps:$4 sm:$0xff]   ;;  %v9941_v26 = vld [vmem:[%s13111_s1 + $0x1590] ss:$12 sps:$4 sm:$0xff]   ;;  %v9946_v30 = vld [vmem:[%s13111_s1 + $0x15ac] ss:$12 sps:$4 sm:$0xff]  }
 0x2dc   :  { %5838 = vmatpush1.bf16.msra.mxu0 %v9893_v32  ;;  %v10039_v32 = vld [vmem:[%s13114_s3 + $0x94] ss:$12 sps:$4 sm:$0xff]  }
 0x2dd   :  { %5839 = vmatprep.subr.bf16.mxu0 %v9898_v36 }
 0x2e0   :  { %5840 = vmatpush1.bf16.msra.mxu0 %v9896_v39  ;;  %v9944_v39 = vld [vmem:[%s13111_s1 + $0x15a8] ss:$12 sps:$4 sm:$0xff]  }
 0x2e1   :  { %5841 = vmatprep.subr.bf16.mxu0 %v9901_v40  ;;  %v10037_v40 = vld [vmem:[%s13114_s3 + $0x90] ss:$12 sps:$4 sm:$0xff]  }
 0x2e4   :  { %5842 = vmatpush1.bf16.msra.mxu0 %v9899_v42  ;;  %v9949_v42 = vld [vmem:[%s13111_s1 + $0x15c4] ss:$12 sps:$4 sm:$0xff]  }
 0x2e5   :  { %5843 = vmatprep.subr.bf16.mxu0 %v9904_v17  ;;  %v10042_v17 = vld [vmem:[%s13114_s3 + $0xac] ss:$12 sps:$4 sm:$0xff]  }
 0x2e8   :  { %5844 = vmatpush1.bf16.msra.mxu0 %v9902_v16  ;;  %v9947_v16 = vld [vmem:[%s13111_s1 + $0x15c0] ss:$12 sps:$4 sm:$0xff]  }
 0x2e9   :  { %5845 = vmatprep.subr.bf16.mxu0 %v9907_v43  ;;  %v10040_v43 = vld [vmem:[%s13114_s3 + $0xa8] ss:$12 sps:$4 sm:$0xff]  }
 0x2ec   :  { %5846 = vmatpush1.bf16.msra.mxu0 %v9905_v41  ;;  %v9952_v41 = vld [vmem:[%s13111_s1 + $0x15dc] ss:$12 sps:$4 sm:$0xff]  }
 0x2ed   :  { %5847 = vmatprep.subr.bf16.mxu0 %v9910_v34  ;;  %v10045_v34 = vld [vmem:[%s13114_s3 + $0xc4] ss:$12 sps:$4 sm:$0xff]  }
 0x2f0   :  { %5848 = vmatpush1.bf16.msra.mxu0 %v9908_v33  ;;  %v9950_v33 = vld [vmem:[%s13111_s1 + $0x15d8] ss:$12 sps:$4 sm:$0xff]  }
 0x2f1   :  { %5849 = vmatprep.subr.bf16.mxu0 %v9913_v45  ;;  %v10043_v45 = vld [vmem:[%s13114_s3 + $0xc0] ss:$12 sps:$4 sm:$0xff]  }
 0x2f4   :  { %5850 = vmatpush1.bf16.msra.mxu0 %v9911_v46  ;;  %v9955_v46 = vld [vmem:[%s13111_s1 + $0x15f4] ss:$12 sps:$4 sm:$0xff]  }
 0x2f5   :  { %5851 = vmatprep.subr.bf16.mxu0 %v9916_v49  ;;  %v8720_v52 = vpop.f32.mrb[52].mxu1  ;;  %v10048_v49 = vld [vmem:[%s13114_s3 + $0xdc] ss:$12 sps:$4 sm:$0xff]  }
 0x2f6   :  { %v8721_v54 = vpop.f32.mrb[53].mxu1 }
 0x2f7   :  { %v8722_v56 = vadd.f32 %v8721_v54, %v8720_v52  ;;  %v8723_v58 = vpop.f32.mrb[54].mxu1  ;;  %v9958_v52 = vld [vmem:[%s13111_s1 + $0x160c] ss:$12 sps:$4 sm:$0xff]   ;;  %v10051_v54 = vld [vmem:[%s13114_s3 + $0xf4] ss:$12 sps:$4 sm:$0xff]  }
 0x2f8   :  { %5852 = vmatpush1.bf16.msra.mxu0 %v9914_v50  ;;  %v8724_v62 = vpop.f32.mrb[55].mxu1  ;;  %v9953_v50 = vld [vmem:[%s13111_s1 + $0x15f0] ss:$12 sps:$4 sm:$0xff]  }
 0x2f9   :  { %5853 = vmatprep.subr.bf16.mxu0 %v9919_v51  ;;  %v12560_v63 = vadd.f32 %v8722_v56, %v6423_v38  ;;  %v10046_v51 = vld [vmem:[%s13114_s3 + $0xd8] ss:$12 sps:$4 sm:$0xff]   ;;  %v9956_v56 = vld [vmem:[%s13111_s1 + $0x1608] ss:$12 sps:$4 sm:$0xff]   ;;  %v9959_v62 = vld [vmem:[%s13111_s1 + $0x1620] ss:$12 sps:$4 sm:$0xff]  }
 0x2fa   :  { %v9961_v58 = vld [vmem:[%s13111_s1 + $0x1624] ss:$12 sps:$4 sm:$0xff]  }
 0x2fc   :  { %5854 = vmatpush1.bf16.msra.mxu0 %v9917_v57  ;;  %v10049_v57 = vld [vmem:[%s13114_s3 + $0xf0] ss:$12 sps:$4 sm:$0xff]  }
 0x2fd   :  { %5855 = vmatprep.subr.bf16.mxu0 %v9922_v6  ;;  %v10054_v6 = vld [vmem:[%s13114_s3 + $0x10c] ss:$12 sps:$4 sm:$0xff]  }
 0x300   :  { %5856 = vmatpush1.bf16.msra.mxu0 %v9920_v0  ;;  %v9964_v0 = vld [vmem:[%s13111_s1 + $0x163c] ss:$12 sps:$4 sm:$0xff]  }
 0x301   :  { %5866 = vmatprep.subr.bf16.mxu0 %v9925_v1  ;;  %v10057_v1 = vld [vmem:[%s13114_s3 + $0x124] ss:$12 sps:$4 sm:$0xff]  }
 0x303   :  { %5858 = vmatmul.mubr.bf16.vlgmr.msra.gmra.mrb[0].mxu0 %v12142_v60  ;;  %v10021_v60 = vld [vmem:[%s13114_s3 + $0x4] ss:$12 sps:$4 sm:$0xff]  }
 0x304   :  { %5867 = vmatpush1.bf16.msra.mxu0 %v9923_v3  ;;  %5898 = vmatprep.mubr.bf16.mxu0 %v12163_v2  ;;  %v9934_v2 = vld [vmem:[%s13111_s1 + $0x154c] ss:$12 sps:$4 sm:$0xff]  }
 0x305   :  { %5868 = vmatprep.subr.bf16.mxu0 %v9928_v4  ;;  %7091 = vmatprep.subr.bf16.mxu1 %v10021_v60  ;;  %v9962_v3 = vld [vmem:[%s13111_s1 + $0x1638] ss:$12 sps:$4 sm:$0xff]   ;;  %v10055_v4 = vld [vmem:[%s13114_s3 + $0x120] ss:$12 sps:$4 sm:$0xff]  }
 0x306   :  { %7092 = vmatpush1.bf16.msra.mxu1 %v10019_v53 }
 0x307   :  { %7093 = vmatprep.subr.bf16.mxu1 %v10024_v8 }
 0x308   :  { %5869 = vmatpush1.bf16.msra.mxu0 %v9926_v37  ;;  %v9967_v37 = vld [vmem:[%s13111_s1 + $0x1654] ss:$12 sps:$4 sm:$0xff]  }
 0x309   :  { %5870 = vmatprep.subr.bf16.mxu0 %v9931_v18  ;;  %v10060_v18 = vld [vmem:[%s13114_s3 + $0x13c] ss:$12 sps:$4 sm:$0xff]  }
 0x30a   :  { %7094 = vmatpush1.bf16.msra.mxu1 %v10022_v23  ;;  %v10058_v23 = vld [vmem:[%s13114_s3 + $0x138] ss:$12 sps:$4 sm:$0xff]  }
 0x30b   :  { %7095 = vmatprep.subr.bf16.mxu1 %v10027_v9  ;;  %v9970_v9 = vld [vmem:[%s13111_s1 + $0x166c] ss:$12 sps:$4 sm:$0xff]  }
 0x30c   :  { %5871 = vmatpush1.bf16.msra.mxu0 %v9929_v25  ;;  %v9965_v25 = vld [vmem:[%s13111_s1 + $0x1650] ss:$12 sps:$4 sm:$0xff]  }
 0x30d   :  { %5872 = vmatprep.subr.bf16.mxu0 %v9934_v2 }
 0x30e   :  { %7096 = vmatpush1.bf16.msra.mxu1 %v10025_v11  ;;  %v9968_v11 = vld [vmem:[%s13111_s1 + $0x1668] ss:$12 sps:$4 sm:$0xff]  }
 0x30f   :  { %7097 = vmatprep.subr.bf16.mxu1 %v10030_v12  ;;  %v9973_v12 = vld [vmem:[%s13111_s1 + $0x1684] ss:$12 sps:$4 sm:$0xff]  }
 0x310   :  { %5873 = vmatpush1.bf16.msra.mxu0 %v9932_v10 }
 0x311   :  { %5874 = vmatprep.subr.bf16.mxu0 %v9937_v31 }
 0x312   :  { %7098 = vmatpush1.bf16.msra.mxu1 %v10028_v15  ;;  %v9974_v15 = vld [vmem:[%s13111_s1 + $0x1698] ss:$12 sps:$4 sm:$0xff]  }
 0x313   :  { %7099 = vmatprep.subr.bf16.mxu1 %v10033_v55  ;;  %v9979_v55 = vld [vmem:[%s13111_s1 + $0x16b4] ss:$12 sps:$4 sm:$0xff]  }
 0x314   :  { %5875 = vmatpush1.bf16.msra.mxu0 %v9935_v13  ;;  %v9971_v13 = vld [vmem:[%s13111_s1 + $0x1680] ss:$12 sps:$4 sm:$0xff]  }
 0x315   :  { %5876 = vmatprep.subr.bf16.mxu0 %v9940_v14  ;;  %v8742_v22 = vpop.f32.mrb[56].mxu1  ;;  %v9976_v14 = vld [vmem:[%s13111_s1 + $0x169c] ss:$12 sps:$4 sm:$0xff]  }
 0x316   :  { %v8743_v28 = vpop.f32.mrb[57].mxu1  ;;  %7100 = vmatpush1.bf16.msra.mxu1 %v10031_v20  ;;  %v9983_v20 = vld [vmem:[%s13111_s1 + $0x16e0] ss:$12 sps:$4 sm:$0xff]  }
 0x317   :  { %v8744_v59 = vadd.f32 %v8743_v28, %v8742_v22  ;;  %v8745_v36 = vpop.f32.mrb[58].mxu1  ;;  %7101 = vmatprep.subr.bf16.mxu1 %v10036_v21  ;;  %v9988_v21 = vld [vmem:[%s13111_s1 + $0x16fc] ss:$12 sps:$4 sm:$0xff]   ;;  %v9986_v22 = vld [vmem:[%s13111_s1 + $0x16f8] ss:$12 sps:$4 sm:$0xff]  }
 0x318   :  { %5877 = vmatpush1.bf16.msra.mxu0 %v9938_v19  ;;  %v8746_v35 = vpop.f32.mrb[59].mxu1  ;;  %v9977_v19 = vld [vmem:[%s13111_s1 + $0x16b0] ss:$12 sps:$4 sm:$0xff]   ;;  %v9994_v36 = vld [vmem:[%s13111_s1 + $0x172c] ss:$12 sps:$4 sm:$0xff]  }
 0x319   :  { %5878 = vmatprep.subr.bf16.mxu0 %v9943_v61  ;;  %v12652_v38 = vadd.f32 %v8744_v59, %v12560_v63  ;;  %v10052_v63 = vld [vmem:[%s13114_s3 + $0x108] ss:$12 sps:$4 sm:$0xff]   ;;  %v9985_v61 = vld [vmem:[%s13111_s1 + $0x16e4] ss:$12 sps:$4 sm:$0xff]  }
 0x31a   :  { %7102 = vmatpush1.bf16.msra.mxu1 %v10034_v27 }
 0x31b   :  { %7103 = vmatprep.subr.bf16.mxu1 %v10039_v32  ;;  %v9989_v32 = vld [vmem:[%s13111_s1 + $0x1710] ss:$12 sps:$4 sm:$0xff]  }
 0x31c   :  { %5879 = vmatpush1.bf16.msra.mxu0 %v9941_v26  ;;  %v9991_v26 = vld [vmem:[%s13111_s1 + $0x1714] ss:$12 sps:$4 sm:$0xff]  }
 0x31d   :  { %5880 = vmatprep.subr.bf16.mxu0 %v9946_v30 }
 0x31e   :  { %7104 = vmatpush1.bf16.msra.mxu1 %v10037_v40  ;;  %v9997_v40 = vld [vmem:[%s13111_s1 + $0x1744] ss:$12 sps:$4 sm:$0xff]  }
 0x31f   :  { %7105 = vmatprep.subr.bf16.mxu1 %v10042_v17  ;;  %v10000_v17 = vld [vmem:[%s13111_s1 + $0x175c] ss:$12 sps:$4 sm:$0xff]  }
 0x320   :  { %5881 = vmatpush1.bf16.msra.mxu0 %v9944_v39  ;;  %v9992_v39 = vld [vmem:[%s13111_s1 + $0x1728] ss:$12 sps:$4 sm:$0xff]  }
 0x321   :  { %5882 = vmatprep.subr.bf16.mxu0 %v9949_v42  ;;  %v9995_v42 = vld [vmem:[%s13111_s1 + $0x1740] ss:$12 sps:$4 sm:$0xff]  }
 0x322   :  { %7106 = vmatpush1.bf16.msra.mxu1 %v10040_v43  ;;  %v10003_v43 = vld [vmem:[%s13111_s1 + $0x1774] ss:$12 sps:$4 sm:$0xff]  }
 0x323   :  { %7107 = vmatprep.subr.bf16.mxu1 %v10045_v34  ;;  %v10006_v34 = vld [vmem:[%s13111_s1 + $0x178c] ss:$12 sps:$4 sm:$0xff]  }
 0x324   :  { %5883 = vmatpush1.bf16.msra.mxu0 %v9947_v16  ;;  %v9998_v16 = vld [vmem:[%s13111_s1 + $0x1758] ss:$12 sps:$4 sm:$0xff]  }
 0x325   :  { %5884 = vmatprep.subr.bf16.mxu0 %v9952_v41  ;;  %v10001_v41 = vld [vmem:[%s13111_s1 + $0x1770] ss:$12 sps:$4 sm:$0xff]  }
 0x326   :  { %7108 = vmatpush1.bf16.msra.mxu1 %v10043_v45  ;;  %v10009_v45 = vld [vmem:[%s13111_s1 + $0x17a4] ss:$12 sps:$4 sm:$0xff]  }
 0x327   :  { %7109 = vmatprep.subr.bf16.mxu1 %v10048_v49  ;;  %v10012_v49 = vld [vmem:[%s13111_s1 + $0x17bc] ss:$12 sps:$4 sm:$0xff]  }
 0x328   :  { %5885 = vmatpush1.bf16.msra.mxu0 %v9950_v33  ;;  %v10004_v33 = vld [vmem:[%s13111_s1 + $0x1788] ss:$12 sps:$4 sm:$0xff]  }
 0x329   :  { %5886 = vmatprep.subr.bf16.mxu0 %v9955_v46  ;;  %v10007_v46 = vld [vmem:[%s13111_s1 + $0x17a0] ss:$12 sps:$4 sm:$0xff]  }
 0x32a   :  { %7110 = vmatpush1.bf16.msra.mxu1 %v10046_v51  ;;  %v10015_v51 = vld [vmem:[%s13111_s1 + $0x17d4] ss:$12 sps:$4 sm:$0xff]  }
 0x32b   :  { %7111 = vmatprep.subr.bf16.mxu1 %v10051_v54  ;;  %v10018_v54 = vld [vmem:[%s13111_s1 + $0x17ec] ss:$12 sps:$4 sm:$0xff]  }
 0x32c   :  { %5887 = vmatpush1.bf16.msra.mxu0 %v9953_v50  ;;  %v10010_v50 = vld [vmem:[%s13111_s1 + $0x17b8] ss:$12 sps:$4 sm:$0xff]  }
 0x32d   :  { %5888 = vmatprep.subr.bf16.mxu0 %v9958_v52  ;;  %v10013_v52 = vld [vmem:[%s13111_s1 + $0x17d0] ss:$12 sps:$4 sm:$0xff]  }
 0x32e   :  { %7112 = vmatpush1.bf16.msra.mxu1 %v10049_v57  ;;  %v10063_v57 = vld [vmem:[%s13114_s3 + $0x154] ss:$12 sps:$4 sm:$0xff]  }
 0x32f   :  { %7113 = vmatprep.subr.bf16.mxu1 %v10054_v6  ;;  %v10066_v6 = vld [vmem:[%s13114_s3 + $0x16c] ss:$12 sps:$4 sm:$0xff]  }
 0x330   :  { %5889 = vmatpush1.bf16.msra.mxu0 %v9956_v56  ;;  %v10016_v56 = vld [vmem:[%s13111_s1 + $0x17e8] ss:$12 sps:$4 sm:$0xff]  }
 0x331   :  { %5890 = vmatprep.subr.bf16.mxu0 %v9961_v58  ;;  %v10061_v58 = vld [vmem:[%s13114_s3 + $0x150] ss:$12 sps:$4 sm:$0xff]  }
 0x332   :  { %7114 = vmatpush1.bf16.msra.mxu1 %v10052_v63  ;;  %v1071_v63 = vsub.s32 0, %v11936_v7 }
 0x333   :  { %7115 = vmatprep.subr.bf16.mxu1 %v10057_v1  ;;  %v10139_v1 = vld [vmem:[%s13113_s2] sm:$0x7] }
 0x334   :  { %5891 = vmatpush1.bf16.msra.mxu0 %v9959_v62  ;;  %v10064_v62 = vld [vmem:[%s13114_s3 + $0x168] ss:$12 sps:$4 sm:$0xff]  }
 0x335   :  { %5892 = vmatprep.subr.bf16.mxu0 %v9964_v0  ;;  %v8764_v53 = vpop.f32.mrb[60].mxu1  ;;  %v1075_v0 = vsub.s32 1, %v11936_v7 }
 0x336   :  { %v8765_v60 = vpop.f32.mrb[61].mxu1  ;;  %7116 = vmatpush1.bf16.msra.mxu1 %v10055_v4 }
 0x337   :  { %v8766_v8 = vadd.f32 %v8765_v60, %v8764_v53  ;;  %v8767_v2 = vpop.f32.mrb[62].mxu1  ;;  %7117 = vmatprep.subr.bf16.mxu1 %v10060_v18  ;;  %v1076_v4 = vrot.slane %v10139_v1, %v1075_v0 }
 0x338   :  { %5893 = vmatpush1.bf16.msra.mxu0 %v9962_v3  ;;  %v8768_v10 = vpop.f32.mrb[63].mxu1  ;;  %v1072_v3 = vrot.slane %v10139_v1, %v1071_v63  ;;  %v10117_v1 = vld [vmem:[%s13115_s5 + $0x48] sm:$0xff]  }
 0x339   :  { %5894 = vmatprep.subr.bf16.mxu0 %v9967_v37  ;;  %v6543_v31 = vadd.f32 %v8766_v8, %v12652_v38  ;;  %v8896_v18 = vadd.f32 %v11647_v29, %v1076_v4  ;;  %v10070_v29 = vld [vmem:[%s13114_s3 + $0x198] ss:$12 sps:$4 sm:$0xff]   ;;  %v10119_v4 = vld [vmem:[%s13115_s5 + $0x50] sm:$0xff]  }
 0x33a   :  { %7118 = vmatpush1.bf16.msra.mxu1 %v10058_v23  ;;  %v8894_v37 = vadd.f32 %v11633_v48, %v1072_v3  ;;  %v10072_v48 = vld [vmem:[%s13114_s3 + $0x19c] ss:$12 sps:$4 sm:$0xff]  }
 0x33b   :  { %7119 = vmatprep.subr.bf16.mxu1 %v10063_v57  ;;  %v10112_v57 = vld [vmem:[%s13114_s3 + $0x200] ss:$12 sps:$4 sm:$0xff]  }
 0x33c   :  { %5895 = vmatpush1.bf16.msra.mxu0 %v9965_v25  ;;  %v10118_v3 = vld [vmem:[%s13115_s5 + $0x8] sm:$0xff]  }
 0x33d   :  { %5896 = vmatprep.subr.bf16.mxu0 %v9970_v9 }
 0x33e   :  { %7120 = vmatpush1.bf16.msra.mxu1 %v10061_v58  ;;  %v10113_v58 = vld [vmem:[%s13114_s3 + $0x218] ss:$12 sps:$4 sm:$0xff]  }
 0x33f   :  { %7121 = vmatprep.subr.bf16.mxu1 %v10066_v6  ;;  %v10114_v6 = vld [vmem:[%s13114_s3 + $0x230] ss:$12 sps:$4 sm:$0xff]  }
 0x340   :  { %5897 = vmatpush1.bf16.msra.mxu0 %v9968_v11  ;;  %v10067_v11 = vld [vmem:[%s13114_s3 + $0x180] ss:$12 sps:$4 sm:$0xff]  }
 0x341   :  { %5907 = vmatprep.subr.bf16.mxu0 %v9973_v12 }
 0x342   :  { %7122 = vmatpush1.bf16.msra.mxu1 %v10064_v62  ;;  %v10115_v62 = vld [vmem:[%s13115_s5 + $0x40] sm:$0xff]  }
 0x343   :  { %5899 = vmatmul.mubr.bf16.vlgmr.msra.gmra.mrb[0].mxu0 %v12258_v44  ;;  %v9982_v44 = vld [vmem:[%s13111_s1 + $0x16cc] ss:$12 sps:$4 sm:$0xff]  }
 0x344   :  { %5908 = vmatpush1.bf16.msra.mxu0 %v9971_v13  ;;  %5939 = vmatprep.mubr.bf16.mxu0 %v12279_v47  ;;  %v9980_v47 = vld [vmem:[%s13111_s1 + $0x16c8] ss:$12 sps:$4 sm:$0xff]   ;;  %v10140_v13 = vmov 0  }
 0x345   :  { %5909 = vmatprep.subr.bf16.mxu0 %v9976_v14  ;;  %v10075_v14 = vld [vmem:[%s13114_s3 + $0x1b4] ss:$12 sps:$4 sm:$0xff]  }
 0x348   :  { %5910 = vmatpush1.bf16.msra.mxu0 %v9974_v15  ;;  %v10073_v15 = vld [vmem:[%s13114_s3 + $0x1b0] ss:$12 sps:$4 sm:$0xff]  }
 0x349   :  { %5911 = vmatprep.subr.bf16.mxu0 %v9979_v55  ;;  %v10078_v55 = vld [vmem:[%s13114_s3 + $0x1cc] ss:$12 sps:$4 sm:$0xff]  }
 0x34c   :  { %5912 = vmatpush1.bf16.msra.mxu0 %v9977_v19  ;;  %v10076_v19 = vld [vmem:[%s13114_s3 + $0x1c8] ss:$12 sps:$4 sm:$0xff]  }
 0x34d   :  { %5913 = vmatprep.subr.bf16.mxu0 %v9982_v44  ;;  %v10081_v44 = vld [vmem:[%s13114_s3 + $0x1e4] ss:$12 sps:$4 sm:$0xff]  }
 0x350   :  { %5914 = vmatpush1.bf16.msra.mxu0 %v9980_v47  ;;  %v10079_v47 = vld [vmem:[%s13114_s3 + $0x1e0] ss:$12 sps:$4 sm:$0xff]  }
 0x351   :  { %5915 = vmatprep.subr.bf16.mxu0 %v9985_v61  ;;  %v10084_v61 = vld [vmem:[%s13114_s3 + $0x1fc] ss:$12 sps:$4 sm:$0xff]  }
 0x354   :  { %5916 = vmatpush1.bf16.msra.mxu0 %v9983_v20  ;;  %v10082_v20 = vld [vmem:[%s13114_s3 + $0x1f8] ss:$12 sps:$4 sm:$0xff]  }
 0x355   :  { %5917 = vmatprep.subr.bf16.mxu0 %v9988_v21  ;;  %v8786_v27 = vpop.f32.mrb[64].mxu1  ;;  %v10087_v21 = vld [vmem:[%s13114_s3 + $0x214] ss:$12 sps:$4 sm:$0xff]  }
 0x356   :  { %v8787_v28 = vpop.f32.mrb[65].mxu1 }
 0x357   :  { %v8788_v30 = vadd.f32 %v8787_v28, %v8786_v27  ;;  %v8789_v59 = vpop.f32.mrb[66].mxu1  ;;  %v10088_v27 = vld [vmem:[%s13114_s3 + $0x228] ss:$12 sps:$4 sm:$0xff]  }
 0x358   :  { %5918 = vmatpush1.bf16.msra.mxu0 %v9986_v22  ;;  %v8790_v35 = vpop.f32.mrb[67].mxu1  ;;  %v10085_v22 = vld [vmem:[%s13114_s3 + $0x210] ss:$12 sps:$4 sm:$0xff]  }
 0x359   :  { %5919 = vmatprep.subr.bf16.mxu0 %v9991_v26  ;;  %v12798_v38 = vadd.f32 %v8788_v30, %v6543_v31  ;;  %v10090_v26 = vld [vmem:[%s13114_s3 + $0x22c] ss:$12 sps:$4 sm:$0xff]   ;;  %v10091_v30 = vld [vmem:[%s13114_s3 + $0xc8] ss:$12 sps:$4 sm:$0xff]  }
 0x35a   :  { %v10094_v35 = vld [vmem:[%s13114_s3 + $0x20] ss:$12 sps:$4 sm:$0xff]  }
 0x35b   :  { %v6590_v28 = vmax.f32 %v12798_v38, 0.0  ;;  %v10095_v38 = vld [vmem:[%s13114_s3 + $0xf8] ss:$12 sps:$4 sm:$0xff]  }
 0x35c   :  { %5920 = vmatpush1.bf16.msra.mxu0 %v9989_v32  ;;  %v10092_v32 = vld [vmem:[%s13114_s3 + $0x8] ss:$12 sps:$4 sm:$0xff]  }
 0x35d   :  { %5921 = vmatprep.subr.bf16.mxu0 %v9994_v36  ;;  %v12933_v59 = vpack.c.bf16 %v6590_v28, %v6590_v28  ;;  %v10093_v36 = vld [vmem:[%s13114_s3 + $0xe0] ss:$12 sps:$4 sm:$0xff]   ;;  %v10137_v28 = vld [vmem:[%s13115_s5 + $0xb0] sm:$0xff]  }
 0x360   :  { %5922 = vmatpush1.bf16.msra.mxu0 %v9992_v39  ;;  %v10096_v39 = vld [vmem:[%s13114_s3 + $0x38] ss:$12 sps:$4 sm:$0xff]  }
 0x361   :  { %5923 = vmatprep.subr.bf16.mxu0 %v9997_v40  ;;  %v10097_v40 = vld [vmem:[%s13114_s3 + $0x110] ss:$12 sps:$4 sm:$0xff]  }
 0x364   :  { %5924 = vmatpush1.bf16.msra.mxu0 %v9995_v42  ;;  %v10098_v42 = vld [vmem:[%s13114_s3 + $0x50] ss:$12 sps:$4 sm:$0xff]  }
 0x365   :  { %5925 = vmatprep.subr.bf16.mxu0 %v10000_v17  ;;  %v10099_v17 = vld [vmem:[%s13114_s3 + $0x128] ss:$12 sps:$4 sm:$0xff]  }
 0x368   :  { %5926 = vmatpush1.bf16.msra.mxu0 %v9998_v16  ;;  %v10100_v16 = vld [vmem:[%s13114_s3 + $0x68] ss:$12 sps:$4 sm:$0xff]  }
 0x369   :  { %5927 = vmatprep.subr.bf16.mxu0 %v10003_v43  ;;  %v10101_v43 = vld [vmem:[%s13114_s3 + $0x140] ss:$12 sps:$4 sm:$0xff]  }
 0x36c   :  { %5928 = vmatpush1.bf16.msra.mxu0 %v10001_v41  ;;  %v10102_v41 = vld [vmem:[%s13114_s3 + $0x80] ss:$12 sps:$4 sm:$0xff]  }
 0x36d   :  { %5929 = vmatprep.subr.bf16.mxu0 %v10006_v34  ;;  %v10103_v34 = vld [vmem:[%s13114_s3 + $0x158] ss:$12 sps:$4 sm:$0xff]  }
 0x370   :  { %5930 = vmatpush1.bf16.msra.mxu0 %v10004_v33  ;;  %v10104_v33 = vld [vmem:[%s13114_s3 + $0x98] ss:$12 sps:$4 sm:$0xff]  }
 0x371   :  { %5931 = vmatprep.subr.bf16.mxu0 %v10009_v45  ;;  %v10105_v45 = vld [vmem:[%s13114_s3 + $0x170] ss:$12 sps:$4 sm:$0xff]  }
 0x374   :  { %5932 = vmatpush1.bf16.msra.mxu0 %v10007_v46  ;;  %v10106_v46 = vld [vmem:[%s13114_s3 + $0xb0] ss:$12 sps:$4 sm:$0xff]  }
 0x375   :  { %5933 = vmatprep.subr.bf16.mxu0 %v10012_v49  ;;  %v10107_v49 = vld [vmem:[%s13114_s3 + $0x188] ss:$12 sps:$4 sm:$0xff]  }
 0x378   :  { %5934 = vmatpush1.bf16.msra.mxu0 %v10010_v50  ;;  %v10141_v50 = vmov 0.0  }
 0x379   :  { %5935 = vmatprep.subr.bf16.mxu0 %v10015_v51  ;;  %v10108_v51 = vld [vmem:[%s13114_s3 + $0x1a0] ss:$12 sps:$4 sm:$0xff]  }
 0x37c   :  { %5936 = vmatpush1.bf16.msra.mxu0 %v10013_v52  ;;  %v10109_v52 = vld [vmem:[%s13114_s3 + $0x1b8] ss:$12 sps:$4 sm:$0xff]  }
 0x37d   :  { %5937 = vmatprep.subr.bf16.mxu0 %v10018_v54  ;;  %v10110_v54 = vld [vmem:[%s13114_s3 + $0x1d0] ss:$12 sps:$4 sm:$0xff]  }
 0x380   :  { %5938 = vmatpush1.bf16.msra.mxu0 %v10016_v56  ;;  %v10111_v56 = vld [vmem:[%s13114_s3 + $0x1e8] ss:$12 sps:$4 sm:$0xff]  }
 0x383   :  { %5940 = vmatmul.mubr.bf16.vlgmr.msra.gmra.mrb[0].mxu0 %v12367_v24  ;;  %v10069_v24 = vld [vmem:[%s13114_s3 + $0x184] ss:$12 sps:$4 sm:$0xff]  }
 0x384   :  { %7132 = vmatprep.subr.bf16.mxu1 %v10069_v24  ;;  %v10116_v24 = vld [vmem:[%s13115_s5] sm:$0xff]  }
 0x456   :  { %v5941_v53 = vpop.f32.mrb[0].mxu0 }
 0x457   :  { %v8895_v60 = vadd.f32 %v8894_v37, %v5941_v53  ;;  %v5943_v8 = vpop.f32.mrb[1].mxu0  ;;  %v10120_v37 = vld [vmem:[%s13115_s5 + $0x10] sm:$0xff]   ;;  %v10122_v53 = vld [vmem:[%s13115_s5 + $0x18] sm:$0xff]  }
 0x458   :  { %v8897_v25 = vadd.f32 %v8896_v18, %v5943_v8  ;;  %v5945_v2 = vpop.f32.mrb[2].mxu0  ;;  %v10121_v18 = vld [vmem:[%s13115_s5 + $0x58] sm:$0xff]   ;;  %v10124_v8 = vld [vmem:[%s13115_s5 + $0x20] sm:$0xff]  }
 0x459   :  { %v6588_v23 = vmax.f32 %v8895_v60, 0.0  ;;  %v5946_v9 = vpop.f32.mrb[3].mxu0  ;;  %v10123_v60 = vld [vmem:[%s13115_s5 + $0x60] sm:$0xff]   ;;  %v10126_v2 = vld [vmem:[%s13115_s5 + $0x28] sm:$0xff]  }
 0x45a   :  { %v6589_v10 = vmax.f32 %v8897_v25, 0.0  ;;  %v10125_v25 = vld [vmem:[%s13115_s5 + $0x68] sm:$0xff]   ;;  %v10128_v9 = vld [vmem:[%s13115_s5 + $0x30] sm:$0xff]  }
 0x45b   :  { %v12881_v12 = vpack.c.bf16 %v6588_v23, %v6588_v23  ;;  %v10127_v23 = vld [vmem:[%s13115_s5 + $0x70] sm:$0xff]  }
 0x45c   :  { %v6592_v31 = vpack.c.bf16 %v6589_v10, %v6589_v10  ;;  %v10129_v10 = vld [vmem:[%s13115_s5 + $0x78] sm:$0xff]  }
 0x45e   :  { %7123 = vmatprep.mubr.bf16.mxu1 %v6592_v31 }
 0x45f   :  { %7124 = vmatmul.mubr.bf16.vlgmr.msra.gmra.mrb[68].mxu1 %v12881_v12 }
 0x460   :  { %7133 = vmatpush1.bf16.msra.mxu1 %v10067_v11  ;;  %7164 = vmatprep.mubr.bf16.mxu1 %v10140_v13  ;;  %v6690_v11 = vld [vmem:[%s13116_s4] sm:$0x7] }
 0x461   :  { %7134 = vmatprep.subr.bf16.mxu1 %v10072_v48  ;;  %v6699_v48 = vrot.slane %v6690_v11, %v1075_v0  ;;  %v10133_v0 = vld [vmem:[%s13115_s5 + $0x90] sm:$0xff]  }
 0x464   :  { %7135 = vmatpush1.bf16.msra.mxu1 %v10070_v29 }
 0x465   :  { %7136 = vmatprep.subr.bf16.mxu1 %v10075_v14 }
 0x468   :  { %7137 = vmatpush1.bf16.msra.mxu1 %v10073_v15 }
 0x469   :  { %7138 = vmatprep.subr.bf16.mxu1 %v10078_v55 }
 0x46c   :  { %7139 = vmatpush1.bf16.msra.mxu1 %v10076_v19 }
 0x46d   :  { %7140 = vmatprep.subr.bf16.mxu1 %v10081_v44 }
 0x470   :  { %7141 = vmatpush1.bf16.msra.mxu1 %v10079_v47 }
 0x471   :  { %7142 = vmatprep.subr.bf16.mxu1 %v10084_v61 }
 0x474   :  { %7143 = vmatpush1.bf16.msra.mxu1 %v10082_v20  ;;  %v10131_v20 = vld [vmem:[%s13115_s5 + $0x80] sm:$0xff]  }
 0x475   :  { %7144 = vmatprep.subr.bf16.mxu1 %v10087_v21 }
 0x478   :  { %7145 = vmatpush1.bf16.msra.mxu1 %v10085_v22  ;;  %v10134_v22 = vld [vmem:[%s13115_s5 + $0x98] sm:$0xff]  }
 0x479   :  { %7146 = vmatprep.subr.bf16.mxu1 %v10090_v26  ;;  %v10135_v26 = vld [vmem:[%s13115_s5 + $0xa0] sm:$0xff]  }
 0x47c   :  { %7147 = vmatpush1.bf16.msra.mxu1 %v10088_v27  ;;  %v10136_v27 = vld [vmem:[%s13115_s5 + $0xa8] sm:$0xff]  }
 0x47d   :  { %8792 = vmatprep.subr.bf16.mxu1 %v10091_v30 }
 0x47f   :  { %7165 = vmatmul.mubr.bf16.vlgmr.msra.gmra.mrb[68].mxu1 %v12933_v59 }
 0x480   :  { %8793 = vmatpush3.bf16.msra.mxu1 %v10092_v32  ;;  %7205 = vmatprep.mubr.bf16.mxu1 %v6592_v31  ;;  %v10130_v31 = vld [vmem:[%s13115_s5 + $0x38] sm:$0xff]  }
 0x481   :  { %8794 = vmatprep.subr.bf16.mxu1 %v10093_v36 }
 0x484   :  { %8795 = vmatpush3.bf16.msra.mxu1 %v10094_v35  ;;  %v10138_v35 = vld [vmem:[%s13115_s5 + $0xb8] sm:$0xff]  }
 0x485   :  { %8796 = vmatprep.subr.bf16.mxu1 %v10095_v38 }
 0x488   :  { %8797 = vmatpush3.bf16.msra.mxu1 %v10096_v39  ;;  %v6703_v39 = vrot.slane %v6690_v11, %v1079_v5 }
 0x489   :  { %8798 = vmatprep.subr.bf16.mxu1 %v10097_v40 }
 0x48c   :  { %8799 = vmatpush3.bf16.msra.mxu1 %v10098_v42 }
 0x48d   :  { %8800 = vmatprep.subr.bf16.mxu1 %v10099_v17 }
 0x490   :  { %8801 = vmatpush3.bf16.msra.mxu1 %v10100_v16 }
 0x491   :  { %8802 = vmatprep.subr.bf16.mxu1 %v10101_v43 }
 0x494   :  { %8803 = vmatpush3.bf16.msra.mxu1 %v10102_v41 }
 0x495   :  { %8804 = vmatprep.subr.bf16.mxu1 %v10103_v34 }
 0x498   :  { %8805 = vmatpush3.bf16.msra.mxu1 %v10104_v33 }
 0x499   :  { %8806 = vmatprep.subr.bf16.mxu1 %v10105_v45 }
 0x49c   :  { %8807 = vmatpush3.bf16.msra.mxu1 %v10106_v46 }
 0x49d   :  { %8854 = vmatprep.subr.bf16.mxu1 %v10141_v50 }
 0x49f   :  { %7206 = vmatmul.mubr.bf16.vlgmr.msra.gmra.mrb[72].mxu1 %v12881_v12  ;;  %v6695_v12 = vrot.slane %v6690_v11, %v1071_v63  ;;  %v10132_v63 = vld [vmem:[%s13115_s5 + $0x88] sm:$0xff]  }
 0x4a0   :  { %8855 = vmatpush3.bf16.msra.mxu1 %v10107_v49  ;;  %8870 = vmatprep.mubr.msk.bf16.mxu1 %vm10142_vm0, %v10141_v50 }
 0x4a1   :  { %8856 = vmatprep.subr.bf16.mxu1 %v10141_v50 }
 0x4a4   :  { %8857 = vmatpush3.bf16.msra.mxu1 %v10108_v51 }
 0x4a5   :  { %8858 = vmatprep.subr.bf16.mxu1 %v10141_v50 }
 0x4a8   :  { %8859 = vmatpush3.bf16.msra.mxu1 %v10109_v52 }
 0x4a9   :  { %8860 = vmatprep.subr.bf16.mxu1 %v10141_v50 }
 0x4ac   :  { %8861 = vmatpush3.bf16.msra.mxu1 %v10110_v54 }
 0x4ad   :  { %8862 = vmatprep.subr.bf16.mxu1 %v10141_v50 }
 0x4b0   :  { %8863 = vmatpush3.bf16.msra.mxu1 %v10111_v56 }
 0x4b1   :  { %8864 = vmatprep.subr.bf16.mxu1 %v10141_v50 }
 0x4b4   :  { %8865 = vmatpush3.bf16.msra.mxu1 %v10112_v57 }
 0x4b5   :  { %8866 = vmatprep.subr.bf16.mxu1 %v10141_v50 }
 0x4b8   :  { %8867 = vmatpush3.bf16.msra.mxu1 %v10113_v58 }
 0x4b9   :  { %8868 = vmatprep.subr.bf16.mxu1 %v10141_v50 }
 0x4bc   :  { %8869 = vmatpush3.bf16.msra.mxu1 %v10114_v6 }
 0x4bd   :  { %8823 = vmatprep.subr.bf16.mxu1 %v10115_v62 }
 0x4bf   :  { %8871 = vmatmul.mubr.bf16.vlgmr.msra.gmra.mrb[76].mxu1 %v12933_v59 }
 0x4c0   :  { %8824 = vmatpush3.bf16.msra.mxu1 %v10116_v24 }
 0x4c1   :  { %8825 = vmatprep.subr.bf16.mxu1 %v10117_v1 }
 0x4c4   :  { %8826 = vmatpush3.bf16.msra.mxu1 %v10118_v3 }
 0x4c5   :  { %8827 = vmatprep.subr.bf16.mxu1 %v10119_v4 }
 0x4c8   :  { %8828 = vmatpush3.bf16.msra.mxu1 %v10120_v37 }
 0x4c9   :  { %8829 = vmatprep.subr.bf16.mxu1 %v10121_v18 }
 0x4cc   :  { %8830 = vmatpush3.bf16.msra.mxu1 %v10122_v53 }
 0x4cd   :  { %8831 = vmatprep.subr.bf16.mxu1 %v10123_v60 }
 0x4d0   :  { %8832 = vmatpush3.bf16.msra.mxu1 %v10124_v8 }
 0x4d1   :  { %8833 = vmatprep.subr.bf16.mxu1 %v10125_v25 }
 0x4d4   :  { %8834 = vmatpush3.bf16.msra.mxu1 %v10126_v2 }
 0x4d5   :  { %8835 = vmatprep.subr.bf16.mxu1 %v10127_v23 }
 0x4d8   :  { %8836 = vmatpush3.bf16.msra.mxu1 %v10128_v9 }
 0x4d9   :  { %8837 = vmatprep.subr.bf16.mxu1 %v10129_v10 }
 0x4dc   :  { %8838 = vmatpush3.bf16.msra.mxu1 %v10130_v31 }
 0x4dd   :  { %8874 = vmatprep.subr.bf16.mxu1 %v10141_v50 }
 0x552   :  { %v7166_v29 = vpop.f32.mrb[68].mxu1 }
 0x553   :  { %v8898_v13 = vadd.f32 %v7166_v29, %v6695_v12  ;;  %v7168_v14 = vpop.f32.mrb[69].mxu1 }
 0x554   :  { %v8899_v15 = vadd.f32 %v7168_v14, %v6699_v48  ;;  %v7170_v55 = vpop.f32.mrb[70].mxu1 }
 0x555   :  { %v7253_v19 = vmax.f32 %v8898_v13, 0.0  ;;  %v7171_v44 = vpop.f32.mrb[71].mxu1 }
 0x556   :  { %v7254_v47 = vmax.f32 %v8899_v15, 0.0 }
 0x557   :  { %v7256_v21 = vpack.c.bf16 %v7253_v19, %v7253_v19 }
 0x558   :  { %v7257_v61 = vpack.c.bf16 %v7254_v47, %v7254_v47 }
 0x55a   :  { %7490 = vmatprep.mubr.bf16.mxu1 %v7257_v61 }
 0x55b   :  { %7491 = vmatmul.mubr.bf16.vlgmr.msra.gmra.mrb[80].mxu1 %v7256_v21 }
 0x55c   :  { %8875 = vmatpush3.bf16.msra.mxu1 %v10131_v20  ;;  %8890 = vmatprep.mubr.msk.bf16.mxu1 %vm10142_vm0, %v10141_v50 }
 0x55d   :  { %8876 = vmatprep.subr.bf16.mxu1 %v10141_v50 }
 0x560   :  { %8877 = vmatpush3.bf16.msra.mxu1 %v10132_v63 }
 0x561   :  { %8878 = vmatprep.subr.bf16.mxu1 %v10141_v50 }
 0x564   :  { %8879 = vmatpush3.bf16.msra.mxu1 %v10133_v0 }
 0x565   :  { %8880 = vmatprep.subr.bf16.mxu1 %v10141_v50 }
 0x568   :  { %8881 = vmatpush3.bf16.msra.mxu1 %v10134_v22 }
 0x569   :  { %8882 = vmatprep.subr.bf16.mxu1 %v10141_v50 }
 0x56c   :  { %8883 = vmatpush3.bf16.msra.mxu1 %v10135_v26 }
 0x56d   :  { %8884 = vmatprep.subr.bf16.mxu1 %v10141_v50 }
 0x570   :  { %8885 = vmatpush3.bf16.msra.mxu1 %v10136_v27 }
 0x571   :  { %8886 = vmatprep.subr.bf16.mxu1 %v10141_v50 }
 0x572   :  { %v8808_v30 = vpop.f32.mrb[72].mxu1 }
 0x573   :  { %v8809_v32 = vpop.f32.mrb[73].mxu1 }
 0x574   :  { %v8810_v59 = vadd.f32 %v8809_v32, %v8808_v30  ;;  %v8811_v36 = vpop.f32.mrb[74].mxu1  ;;  %8887 = vmatpush3.bf16.msra.mxu1 %v10137_v28 }
 0x575   :  { %v8812_v38 = vpop.f32.mrb[75].mxu1  ;;  %8888 = vmatprep.subr.bf16.mxu1 %v10141_v50  ;;  %v8415_v50 = vld [vmem:[%s13117_s6] ss:$0 sm:$0xff] }
 0x576   :  { %v7208_v40 = vadd.f32 %v8810_v59, %v6703_v39 }
 0x578   :  { %8889 = vmatpush3.bf16.msra.mxu1 %v10138_v35 }
 0x592   :  { %v7247_v42 = vpop.f32.mrb[76].mxu1 }
 0x593   :  { %v7248_v17 = vadd.f32 %v7247_v42, %v7208_v40  ;;  %v8872_v16 = vpop.f32.mrb[77].mxu1 }
 0x594   :  { %v7250_v43 = vpop.f32.mrb[78].mxu1 }
 0x595   :  { %v7255_v41 = vmax.f32 %v7248_v17, 0.0  ;;  %v8873_v34 = vpop.f32.mrb[79].mxu1 }
 0x597   :  { %v7258_v33 = vpack.c.bf16 %v7255_v41, %v7255_v41 }
 0x599   :  { %8891 = vmatmul.mubr.bf16.vlgmr.msra.gmra.mrb[84].mxu1 %v7258_v33 }
 0x62e   :  { %v8839_v45 = vpop.f32.mrb[80].mxu1 }
 0x62f   :  { %v8840_v46 = vpop.f32.mrb[81].mxu1 }
 0x630   :  { %v8841_v49 = vadd.f32 %v8840_v46, %v8839_v45  ;;  %v8842_v51 = vpop.f32.mrb[82].mxu1 }
 0x631   :  { %v8843_v52 = vpop.f32.mrb[83].mxu1 }
 0x632   :  { %v7493_v7 = vadd.f32 %v8841_v49, %v8415_v50 }
 0x66c   :  { %v7532_v5 = vpop.f32.mrb[84].mxu1 }
 0x66d   :  { %v7533_v54 = vadd.f32 %v7532_v5, %v7493_v7  ;;  %v8892_v56 = vpop.f32.mrb[85].mxu1 }
 0x66e   :  { %v7535_v57 = vpop.f32.mrb[86].mxu1 }
 0x66f   :  { %7538 = vst [vmem:[%s13118_s7] sm:$0xff] %v7533_v54  ;;  %v8893_v58 = vpop.f32.mrb[87].mxu1 }

</bundles_post_ra>
